<compile_context>
chip_gen: v7x
topology: tpu7x:2x2x1
jax: 0.10.0
libtpu: 0.0.40
codegen_flags: <defaults>
</compile_context>

<pallas_src>
import functools

import numpy as np

import jax
import jax.numpy as jnp
from jax.experimental import pallas as pl
from jax.experimental.pallas import tpu as pltpu

BN_EPS = 1e-5


# ------------------------------- Pallas kernel ------------------------------ #

def net_kernel(xq_ref, w1_ref, e1_ref, g1_ref, be1_ref,
               w2c_ref, w2r_ref, w2e_ref, e2_ref, e2b_ref, g2_ref, be2_ref,
               fw1_ref, fb1_ref, fw2_ref, fb2_ref, o_ref, *, batch):
    """Whole Net forward for a small batch, single block, no grid.

    xq_ref : (4, B, 7, 28) f32  input rows split by (row mod 4) phase
    w1_ref : (84, 832)  bf16    banded conv1 weight; lanes = (pool-col-parity
                                b', pooled col q, out-chan c)
    e1_ref : (832, 32)  f32     lane -> channel selection (sum) matrix
    w2c_ref: (1248, 640) bf16   banded conv2 weight for the 4 pool candidates;
                                lanes = (b2, pooled col s, out-chan c)
    w2r_ref: (1248, 704) bf16   conv2 weight producing row i=10 (BN stats only)
    w2e_ref: (1248, 64)  bf16   conv2 weight producing col j=10 (BN stats only)
    e2_ref : (640, 64) f32; e2b_ref : (704, 64) f32  selection matrices
    fw1_ref: (1600, 512) bf16 (rows in (r, s, c) order); fb1: (1, 512) f32
    fw2_ref: (512, 128) bf16 zero-padded from (512,10); fb2: (1, 128) f32
    o_ref  : (B, 128) f32       logits in the first 10 lanes
    """
    f32 = jnp.float32
    B = batch

    # ---------------- conv1 + BN1 + ReLU + maxpool(2,2), fused -------------- #
    # One matmul: rows = (image b, pool row parity a, p-parity pi, t),
    # K = (tap row di, input col jq), lanes = (pool col parity b', q, c).
    blocks = []
    for b in range(B):
        for a in range(2):
            for pi in range(2):
                nt = 7 if pi == 0 else 6            # pooled rows p = 2t + pi
                taps = []
                for di in range(3):
                    u = 2 * pi + a + di             # input row = 4t + u
                    taps.append(xq_ref[u % 4, b, u // 4: u // 4 + nt, :])
                blocks.append(jnp.concatenate(taps, axis=1))     # (nt, 84)
    lhs1 = jnp.concatenate(blocks, axis=0).astype(jnp.bfloat16)  # (26B, 84)
    y1 = jnp.dot(lhs1, w1_ref[...], preferred_element_type=f32)  # (26B, 832)

    # train-mode BN1 statistics over all N*26*26 positions (one pass, f32).
    inv_cnt1 = 1.0 / (B * 676)
    rs1 = jnp.sum(y1, axis=0, keepdims=True)                     # (1, 832)
    rq1 = jnp.sum(y1 * y1, axis=0, keepdims=True)
    s1 = jnp.dot(rs1, e1_ref[...], preferred_element_type=f32)   # (1, 32)
    q1 = jnp.dot(rq1, e1_ref[...], preferred_element_type=f32)
    mean1 = s1 * inv_cnt1
    var1 = q1 * inv_cnt1 - mean1 * mean1
    scale1 = g1_ref[...] * jax.lax.rsqrt(var1 + BN_EPS)
    shift1 = be1_ref[...] - mean1 * scale1
    scale1w = jnp.concatenate([scale1] * 26, axis=1)             # (1, 832)
    shift1w = jnp.concatenate([shift1] * 26, axis=1)
    z1 = jnp.maximum(y1 * scale1w + shift1w, 0.0)                # (26B, 832)

    # maxpool(2,2): max over the 4 candidates (row blocks a, lane halves b').
    # pe[b]: pooled rows p = 0,2,..,12 (7 rows); po[b]: p = 1,3,..,11 (6 rows);
    # lanes = (q, c), 13*32 = 416.
    pe, po = [], []
    for b in range(B):
        r0 = b * 26
        for pi, nt, out in ((0, 7, pe), (1, 6, po)):
            off = 0 if pi == 0 else 7
            cands = [z1[r0 + a * 13 + off: r0 + a * 13 + off + nt,
                        bp * 416:(bp + 1) * 416]
                     for a in range(2) for bp in range(2)]
            out.append(jnp.maximum(jnp.maximum(cands[0], cands[1]),
                                   jnp.maximum(cands[2], cands[3])))

    # ---------------- conv2 + BN2 + ReLU + maxpool(2,2), fused -------------- #
    # Pool candidates: rows = (b, row parity a2, pooled row r), lanes =
    # (col parity b2, pooled col s, c).
    blocks2 = []
    for b in range(B):
        for a2 in range(2):
            taps = []
            for di in range(3):
                v = a2 + di                                     # p1 row = 2r + v
                src = pe[b] if v % 2 == 0 else po[b]
                taps.append(src[v // 2: v // 2 + 5, :])          # (5, 416)
            blocks2.append(jnp.concatenate(taps, axis=1))        # (5, 1248)
    lhs2 = jnp.concatenate(blocks2, axis=0).astype(jnp.bfloat16)  # (10B, 1248)
    y2 = jnp.dot(lhs2, w2c_ref[...], preferred_element_type=f32)  # (10B, 640)

    # Edge positions the pool discards (conv row i=10, conv col j=10) - they
    # only feed BN2 statistics, exactly like nn.BatchNorm2d over N*11*11.
    rows_er = []
    for b in range(B):
        taps = [pe[b][5:6, :], po[b][5:6, :], pe[b][6:7, :]]     # p1 rows 10,11,12
        rows_er.append(jnp.concatenate(taps, axis=1))            # (1, 1248)
    lhs_er = jnp.concatenate(rows_er, axis=0).astype(jnp.bfloat16)   # (B, 1248)
    y_er = jnp.dot(lhs_er, w2r_ref[...], preferred_element_type=f32)  # (B, 704)

    blocks_ec = []
    for b in range(B):
        for off in range(2):                                     # i = 2k + off
            taps = []
            for di in range(3):
                v = off + di
                src = pe[b] if v % 2 == 0 else po[b]
                taps.append(src[v // 2: v // 2 + 5, :])
            blocks_ec.append(jnp.concatenate(taps, axis=1))
    lhs_ec = jnp.concatenate(blocks_ec, axis=0).astype(jnp.bfloat16)  # (10B, 1248)
    y_ec = jnp.dot(lhs_ec, w2e_ref[...], preferred_element_type=f32)  # (10B, 64)

    inv_cnt2 = 1.0 / (B * 121)
    rs2 = jnp.sum(y2, axis=0, keepdims=True)
    rq2 = jnp.sum(y2 * y2, axis=0, keepdims=True)
    rs_er = jnp.sum(y_er, axis=0, keepdims=True)
    rq_er = jnp.sum(y_er * y_er, axis=0, keepdims=True)
    rs_ec = jnp.sum(y_ec, axis=0, keepdims=True)
    rq_ec = jnp.sum(y_ec * y_ec, axis=0, keepdims=True)
    s2 = (jnp.dot(rs2, e2_ref[...], preferred_element_type=f32)
          + jnp.dot(rs_er, e2b_ref[...], preferred_element_type=f32) + rs_ec)
    q2 = (jnp.dot(rq2, e2_ref[...], preferred_element_type=f32)
          + jnp.dot(rq_er, e2b_ref[...], preferred_element_type=f32) + rq_ec)
    mean2 = s2 * inv_cnt2
    var2 = q2 * inv_cnt2 - mean2 * mean2
    scale2 = g2_ref[...] * jax.lax.rsqrt(var2 + BN_EPS)          # (1, 64)
    shift2 = be2_ref[...] - mean2 * scale2
    scale2w = jnp.concatenate([scale2] * 10, axis=1)             # (1, 640)
    shift2w = jnp.concatenate([shift2] * 10, axis=1)
    z2 = jnp.maximum(y2 * scale2w + shift2w, 0.0)                # (10B, 640)

    # pool2 + flatten (feature order (r, s, c), matching fw1's row permutation)
    flats = []
    for b in range(B):
        cands = [z2[(2 * b + a2) * 5:(2 * b + a2) * 5 + 5,
                    b2 * 320:(b2 + 1) * 320]
                 for a2 in range(2) for b2 in range(2)]
        p2 = jnp.maximum(jnp.maximum(cands[0], cands[1]),
                         jnp.maximum(cands[2], cands[3]))        # (5, 320)
        flats.append(jnp.concatenate([p2[r:r + 1, :] for r in range(5)],
                                     axis=1))                    # (1, 1600)
    flat = jnp.concatenate(flats, axis=0).astype(jnp.bfloat16)   # (B, 1600)

    # ------------------------------ FC head --------------------------------- #
    h = jnp.dot(flat, fw1_ref[...], preferred_element_type=f32) + fb1_ref[...]
    h = jnp.maximum(h, 0.0).astype(jnp.bfloat16)                 # (B, 512)
    o_ref[...] = (jnp.dot(h, fw2_ref[...], preferred_element_type=f32)
                  + fb2_ref[...])


# --------------------------- banded weight builders -------------------------- #

def _build_conv1_weight(w1):
    """w1: (3,3,32).  K = (di, input col jq) = 84; N = (b', q, c) = 832."""
    W = np.zeros((84, 832), np.float32)
    for di in range(3):
        for bp in range(2):
            for q in range(13):
                for dj in range(3):
                    jq = 2 * q + bp + dj
                    W[di * 28 + jq, bp * 416 + q * 32: bp * 416 + (q + 1) * 32] = w1[di, dj]
    return W


def _build_conv2_cand_weight(w2):
    """w2: (3,3,32,64).  K = (di, jq, cin) = 1248; N = (b2, s, cout) = 640."""
    W = np.zeros((1248, 640), np.float32)
    for di in range(3):
        for b2 in range(2):
            for s in range(5):
                for dj in range(3):
                    jq = 2 * s + b2 + dj
                    W[di * 416 + jq * 32: di * 416 + (jq + 1) * 32,
                      b2 * 320 + s * 64: b2 * 320 + (s + 1) * 64] = w2[di, dj]
    return W


def _build_conv2_row_weight(w2):
    """Produces the full conv2 row (all j = 0..10); used for edge row i=10."""
    W = np.zeros((1248, 704), np.float32)
    for di in range(3):
        for j in range(11):
            for dj in range(3):
                jq = j + dj
                W[di * 416 + jq * 32: di * 416 + (jq + 1) * 32,
                  j * 64:(j + 1) * 64] = w2[di, dj]
    return W


def _build_conv2_col_weight(w2):
    """Produces only conv2 column j=10; used for edge positions (i<10, j=10)."""
    W = np.zeros((1248, 64), np.float32)
    for di in range(3):
        for dj in range(3):
            jq = 10 + dj
            W[di * 416 + jq * 32: di * 416 + (jq + 1) * 32, :] = w2[di, dj]
    return W


def _chan_sum_matrix(lanes, chans):
    E = np.zeros((lanes, chans), np.float32)
    E[np.arange(lanes), np.arange(lanes) % chans] = 1.0
    return E


# --------------------------------- parameters -------------------------------- #

def init_params(key):
    ks = jax.random.split(key, 6)

    def rnd(k, shape, fan_in):
        return np.asarray(jax.random.normal(k, shape, jnp.float32)) / np.sqrt(fan_in)

    # torch-layout raw weights (conv biases dropped: a per-channel constant
    # before train-mode BN is cancelled exactly by the mean subtraction).
    w1_t = rnd(ks[0], (32, 1, 3, 3), 9.0)       # Conv2d(1,32,3).weight
    w2_t = rnd(ks[1], (64, 32, 3, 3), 288.0)    # Conv2d(32,64,3).weight
    fw1_t = rnd(ks[2], (512, 1600), 1600.0)     # Linear(1600,512).weight
    fb1_t = rnd(ks[3], (512,), 1600.0)
    fw2_t = rnd(ks[4], (10, 512), 512.0)        # Linear(512,10).weight
    fb2_t = rnd(ks[5], (10,), 512.0)

    w1 = np.transpose(w1_t, (2, 3, 1, 0))[:, :, 0, :]   # (3,3,32)
    w2 = np.transpose(w2_t, (2, 3, 1, 0))                # (3,3,32,64)

    p = {}
    p["w1cat"] = jnp.asarray(_build_conv1_weight(w1), jnp.bfloat16)
    p["w2cat"] = jnp.asarray(_build_conv2_cand_weight(w2), jnp.bfloat16)
    p["w2row"] = jnp.asarray(_build_conv2_row_weight(w2), jnp.bfloat16)
    p["w2col"] = jnp.asarray(_build_conv2_col_weight(w2), jnp.bfloat16)
    p["e1"] = jnp.asarray(_chan_sum_matrix(832, 32), jnp.float32)
    p["e2"] = jnp.asarray(_chan_sum_matrix(640, 64), jnp.float32)
    p["e2b"] = jnp.asarray(_chan_sum_matrix(704, 64), jnp.float32)
    # BatchNorm affine params: PyTorch default init (gamma=1, beta=0).
    p["g1"] = jnp.ones((1, 32), jnp.float32)
    p["be1"] = jnp.zeros((1, 32), jnp.float32)
    p["g2"] = jnp.ones((1, 64), jnp.float32)
    p["be2"] = jnp.zeros((1, 64), jnp.float32)
    # fc1: permute the 1600 input features from torch flatten order (c, r, s)
    # to the kernel's flatten order (r, s, c) - no runtime transpose needed.
    fw1 = fw1_t.T.reshape(64, 5, 5, 512).transpose(1, 2, 0, 3).reshape(1600, 512)
    p["fw1"] = jnp.asarray(fw1, jnp.bfloat16)
    p["fb1"] = jnp.asarray(fb1_t.reshape(1, 512), jnp.float32)
    # fc2: zero-padded to 128 output lanes (lane-dense final store).
    fw2 = np.zeros((512, 128), np.float32)
    fw2[:, :10] = fw2_t.T
    fb2 = np.zeros((1, 128), np.float32)
    fb2[0, :10] = fb2_t
    p["fw2"] = jnp.asarray(fw2, jnp.bfloat16)
    p["fb2"] = jnp.asarray(fb2, jnp.float32)
    return p


# ----------------------------------- forward --------------------------------- #

def _vmem():
    return pl.BlockSpec(memory_space=pltpu.MemorySpace.VMEM)


def _nbytes(*arrs):
    return int(sum(a.size * a.dtype.itemsize for a in arrs))


def net_forward(x_nchw, p):
    batch = x_nchw.shape[0]
    x = x_nchw.reshape(batch, 28, 28).astype(jnp.float32)
    # space-to-depth on rows: xq[m, b, t, col] = x[b, 4*t + m, col]
    xq = x.reshape(batch, 7, 4, 28).transpose(2, 0, 1, 3)        # (4, B, 7, 28)

    flops = 2 * batch * (26 * 84 * 832 + 10 * 1248 * 640 + 1248 * 704
                         + 10 * 1248 * 64 + 1600 * 512 + 512 * 128)
    bytes_accessed = _nbytes(xq, p["w1cat"], p["w2cat"], p["w2row"], p["w2col"],
                             p["e1"], p["e2"], p["e2b"], p["g1"], p["be1"],
                             p["g2"], p["be2"], p["fw1"], p["fb1"], p["fw2"],
                             p["fb2"]) + batch * 128 * 4

    logits = pl.pallas_call(
        functools.partial(net_kernel, batch=batch),
        out_shape=jax.ShapeDtypeStruct((batch, 128), jnp.float32),
        in_specs=[_vmem()] * 16,
        out_specs=_vmem(),
        compiler_params=pltpu.CompilerParams(
            vmem_limit_bytes=32 * 1024 * 1024),
        cost_estimate=pl.CostEstimate(
            flops=flops, transcendentals=96, bytes_accessed=bytes_accessed),
    )(xq, p["w1cat"], p["e1"], p["g1"], p["be1"],
      p["w2cat"], p["w2row"], p["w2col"], p["e2"], p["e2b"], p["g2"], p["be2"],
      p["fw1"], p["fb1"], p["fw2"], p["fb2"])
    return logits[:, :10]


if __name__ == "__main__":
    key = jax.random.PRNGKey(0)
    pkey, xkey = jax.random.split(key)
    params = init_params(pkey)
    x = jax.random.normal(xkey, (2, 1, 28, 28), jnp.float32)     # NCHW, batch=2

    out = jax.jit(net_forward)(x, params)
    out = jax.block_until_ready(out)

    assert out.shape == (2, 10), out.shape
    assert out.dtype == jnp.float32
    print("KERNEL_OK")
</pallas_src>

<mosaic_0001>
module attributes {stable_mosaic.version = 11 : i64} {
  func.func @net_kernel(%arg0: memref<4x2x7x28xf32, #tpu.memory_space<vmem>>, %arg1: memref<84x832xbf16, #tpu.memory_space<vmem>>, %arg2: memref<832x32xf32, #tpu.memory_space<vmem>>, %arg3: memref<1x32xf32, #tpu.memory_space<vmem>>, %arg4: memref<1x32xf32, #tpu.memory_space<vmem>>, %arg5: memref<1248x640xbf16, #tpu.memory_space<vmem>>, %arg6: memref<1248x704xbf16, #tpu.memory_space<vmem>>, %arg7: memref<1248x64xbf16, #tpu.memory_space<vmem>>, %arg8: memref<640x64xf32, #tpu.memory_space<vmem>>, %arg9: memref<704x64xf32, #tpu.memory_space<vmem>>, %arg10: memref<1x64xf32, #tpu.memory_space<vmem>>, %arg11: memref<1x64xf32, #tpu.memory_space<vmem>>, %arg12: memref<1600x512xbf16, #tpu.memory_space<vmem>>, %arg13: memref<1x512xf32, #tpu.memory_space<vmem>>, %arg14: memref<512x128xbf16, #tpu.memory_space<vmem>>, %arg15: memref<1x128xf32, #tpu.memory_space<vmem>>, %arg16: memref<2x128xf32, #tpu.memory_space<vmem>>) attributes {dimension_semantics = [], scalar_prefetch = 0 : i64, scratch_operands = 0 : i64, tpu.core_type = #tpu.core_type<tc>} {
    %c0 = arith.constant 0 : index
    %c0_0 = arith.constant 0 : index
    %c0_1 = arith.constant 0 : index
    %c0_2 = arith.constant 0 : index
    %0 = vector.load %arg0[%c0, %c0_0, %c0_1, %c0_2] : memref<4x2x7x28xf32, #tpu.memory_space<vmem>>, vector<1x1x7x28xf32>
    %1 = vector.shape_cast %0 : vector<1x1x7x28xf32> to vector<7x28xf32>
    %c1 = arith.constant 1 : index
    %c0_3 = arith.constant 0 : index
    %c0_4 = arith.constant 0 : index
    %c0_5 = arith.constant 0 : index
    %2 = vector.load %arg0[%c1, %c0_3, %c0_4, %c0_5] : memref<4x2x7x28xf32, #tpu.memory_space<vmem>>, vector<1x1x7x28xf32>
    %3 = vector.shape_cast %2 : vector<1x1x7x28xf32> to vector<7x28xf32>
    %c2 = arith.constant 2 : index
    %c0_6 = arith.constant 0 : index
    %c0_7 = arith.constant 0 : index
    %c0_8 = arith.constant 0 : index
    %4 = vector.load %arg0[%c2, %c0_6, %c0_7, %c0_8] : memref<4x2x7x28xf32, #tpu.memory_space<vmem>>, vector<1x1x7x28xf32>
    %5 = vector.shape_cast %4 : vector<1x1x7x28xf32> to vector<7x28xf32>
    %6 = tpu.concatenate %1, %3, %5 in 1 : vector<7x28xf32>, vector<7x28xf32>, vector<7x28xf32> -> vector<7x84xf32>
    %c2_9 = arith.constant 2 : index
    %c0_10 = arith.constant 0 : index
    %c0_11 = arith.constant 0 : index
    %c0_12 = arith.constant 0 : index
    %7 = vector.load %arg0[%c2_9, %c0_10, %c0_11, %c0_12] : memref<4x2x7x28xf32, #tpu.memory_space<vmem>>, vector<1x1x6x28xf32>
    %8 = vector.shape_cast %7 : vector<1x1x6x28xf32> to vector<6x28xf32>
    %c3 = arith.constant 3 : index
    %c0_13 = arith.constant 0 : index
    %c0_14 = arith.constant 0 : index
    %c0_15 = arith.constant 0 : index
    %9 = vector.load %arg0[%c3, %c0_13, %c0_14, %c0_15] : memref<4x2x7x28xf32, #tpu.memory_space<vmem>>, vector<1x1x6x28xf32>
    %10 = vector.shape_cast %9 : vector<1x1x6x28xf32> to vector<6x28xf32>
    %c0_16 = arith.constant 0 : index
    %c0_17 = arith.constant 0 : index
    %c1_18 = arith.constant 1 : index
    %c0_19 = arith.constant 0 : index
    %11 = vector.load %arg0[%c0_16, %c0_17, %c1_18, %c0_19] : memref<4x2x7x28xf32, #tpu.memory_space<vmem>>, vector<1x1x6x28xf32>
    %12 = vector.shape_cast %11 : vector<1x1x6x28xf32> to vector<6x28xf32>
    %13 = tpu.concatenate %8, %10, %12 in 1 : vector<6x28xf32>, vector<6x28xf32>, vector<6x28xf32> -> vector<6x84xf32>
    %c1_20 = arith.constant 1 : index
    %c0_21 = arith.constant 0 : index
    %c0_22 = arith.constant 0 : index
    %c0_23 = arith.constant 0 : index
    %14 = vector.load %arg0[%c1_20, %c0_21, %c0_22, %c0_23] : memref<4x2x7x28xf32, #tpu.memory_space<vmem>>, vector<1x1x7x28xf32>
    %15 = vector.shape_cast %14 : vector<1x1x7x28xf32> to vector<7x28xf32>
    %c2_24 = arith.constant 2 : index
    %c0_25 = arith.constant 0 : index
    %c0_26 = arith.constant 0 : index
    %c0_27 = arith.constant 0 : index
    %16 = vector.load %arg0[%c2_24, %c0_25, %c0_26, %c0_27] : memref<4x2x7x28xf32, #tpu.memory_space<vmem>>, vector<1x1x7x28xf32>
    %17 = vector.shape_cast %16 : vector<1x1x7x28xf32> to vector<7x28xf32>
    %c3_28 = arith.constant 3 : index
    %c0_29 = arith.constant 0 : index
    %c0_30 = arith.constant 0 : index
    %c0_31 = arith.constant 0 : index
    %18 = vector.load %arg0[%c3_28, %c0_29, %c0_30, %c0_31] : memref<4x2x7x28xf32, #tpu.memory_space<vmem>>, vector<1x1x7x28xf32>
    %19 = vector.shape_cast %18 : vector<1x1x7x28xf32> to vector<7x28xf32>
    %20 = tpu.concatenate %15, %17, %19 in 1 : vector<7x28xf32>, vector<7x28xf32>, vector<7x28xf32> -> vector<7x84xf32>
    %c3_32 = arith.constant 3 : index
    %c0_33 = arith.constant 0 : index
    %c0_34 = arith.constant 0 : index
    %c0_35 = arith.constant 0 : index
    %21 = vector.load %arg0[%c3_32, %c0_33, %c0_34, %c0_35] : memref<4x2x7x28xf32, #tpu.memory_space<vmem>>, vector<1x1x6x28xf32>
    %22 = vector.shape_cast %21 : vector<1x1x6x28xf32> to vector<6x28xf32>
    %c0_36 = arith.constant 0 : index
    %c0_37 = arith.constant 0 : index
    %c1_38 = arith.constant 1 : index
    %c0_39 = arith.constant 0 : index
    %23 = vector.load %arg0[%c0_36, %c0_37, %c1_38, %c0_39] : memref<4x2x7x28xf32, #tpu.memory_space<vmem>>, vector<1x1x6x28xf32>
    %24 = vector.shape_cast %23 : vector<1x1x6x28xf32> to vector<6x28xf32>
    %c1_40 = arith.constant 1 : index
    %c0_41 = arith.constant 0 : index
    %c1_42 = arith.constant 1 : index
    %c0_43 = arith.constant 0 : index
    %25 = vector.load %arg0[%c1_40, %c0_41, %c1_42, %c0_43] : memref<4x2x7x28xf32, #tpu.memory_space<vmem>>, vector<1x1x6x28xf32>
    %26 = vector.shape_cast %25 : vector<1x1x6x28xf32> to vector<6x28xf32>
    %27 = tpu.concatenate %22, %24, %26 in 1 : vector<6x28xf32>, vector<6x28xf32>, vector<6x28xf32> -> vector<6x84xf32>
    %c0_44 = arith.constant 0 : index
    %c1_45 = arith.constant 1 : index
    %c0_46 = arith.constant 0 : index
    %c0_47 = arith.constant 0 : index
    %28 = vector.load %arg0[%c0_44, %c1_45, %c0_46, %c0_47] : memref<4x2x7x28xf32, #tpu.memory_space<vmem>>, vector<1x1x7x28xf32>
    %29 = vector.shape_cast %28 : vector<1x1x7x28xf32> to vector<7x28xf32>
    %c1_48 = arith.constant 1 : index
    %c1_49 = arith.constant 1 : index
    %c0_50 = arith.constant 0 : index
    %c0_51 = arith.constant 0 : index
    %30 = vector.load %arg0[%c1_48, %c1_49, %c0_50, %c0_51] : memref<4x2x7x28xf32, #tpu.memory_space<vmem>>, vector<1x1x7x28xf32>
    %31 = vector.shape_cast %30 : vector<1x1x7x28xf32> to vector<7x28xf32>
    %c2_52 = arith.constant 2 : index
    %c1_53 = arith.constant 1 : index
    %c0_54 = arith.constant 0 : index
    %c0_55 = arith.constant 0 : index
    %32 = vector.load %arg0[%c2_52, %c1_53, %c0_54, %c0_55] : memref<4x2x7x28xf32, #tpu.memory_space<vmem>>, vector<1x1x7x28xf32>
    %33 = vector.shape_cast %32 : vector<1x1x7x28xf32> to vector<7x28xf32>
    %34 = tpu.concatenate %29, %31, %33 in 1 : vector<7x28xf32>, vector<7x28xf32>, vector<7x28xf32> -> vector<7x84xf32>
    %c2_56 = arith.constant 2 : index
    %c1_57 = arith.constant 1 : index
    %c0_58 = arith.constant 0 : index
    %c0_59 = arith.constant 0 : index
    %35 = vector.load %arg0[%c2_56, %c1_57, %c0_58, %c0_59] : memref<4x2x7x28xf32, #tpu.memory_space<vmem>>, vector<1x1x6x28xf32>
    %36 = vector.shape_cast %35 : vector<1x1x6x28xf32> to vector<6x28xf32>
    %c3_60 = arith.constant 3 : index
    %c1_61 = arith.constant 1 : index
    %c0_62 = arith.constant 0 : index
    %c0_63 = arith.constant 0 : index
    %37 = vector.load %arg0[%c3_60, %c1_61, %c0_62, %c0_63] : memref<4x2x7x28xf32, #tpu.memory_space<vmem>>, vector<1x1x6x28xf32>
    %38 = vector.shape_cast %37 : vector<1x1x6x28xf32> to vector<6x28xf32>
    %c0_64 = arith.constant 0 : index
    %c1_65 = arith.constant 1 : index
    %c1_66 = arith.constant 1 : index
    %c0_67 = arith.constant 0 : index
    %39 = vector.load %arg0[%c0_64, %c1_65, %c1_66, %c0_67] : memref<4x2x7x28xf32, #tpu.memory_space<vmem>>, vector<1x1x6x28xf32>
    %40 = vector.shape_cast %39 : vector<1x1x6x28xf32> to vector<6x28xf32>
    %41 = tpu.concatenate %36, %38, %40 in 1 : vector<6x28xf32>, vector<6x28xf32>, vector<6x28xf32> -> vector<6x84xf32>
    %c1_68 = arith.constant 1 : index
    %c1_69 = arith.constant 1 : index
    %c0_70 = arith.constant 0 : index
    %c0_71 = arith.constant 0 : index
    %42 = vector.load %arg0[%c1_68, %c1_69, %c0_70, %c0_71] : memref<4x2x7x28xf32, #tpu.memory_space<vmem>>, vector<1x1x7x28xf32>
    %43 = vector.shape_cast %42 : vector<1x1x7x28xf32> to vector<7x28xf32>
    %c2_72 = arith.constant 2 : index
    %c1_73 = arith.constant 1 : index
    %c0_74 = arith.constant 0 : index
    %c0_75 = arith.constant 0 : index
    %44 = vector.load %arg0[%c2_72, %c1_73, %c0_74, %c0_75] : memref<4x2x7x28xf32, #tpu.memory_space<vmem>>, vector<1x1x7x28xf32>
    %45 = vector.shape_cast %44 : vector<1x1x7x28xf32> to vector<7x28xf32>
    %c3_76 = arith.constant 3 : index
    %c1_77 = arith.constant 1 : index
    %c0_78 = arith.constant 0 : index
    %c0_79 = arith.constant 0 : index
    %46 = vector.load %arg0[%c3_76, %c1_77, %c0_78, %c0_79] : memref<4x2x7x28xf32, #tpu.memory_space<vmem>>, vector<1x1x7x28xf32>
    %47 = vector.shape_cast %46 : vector<1x1x7x28xf32> to vector<7x28xf32>
    %48 = tpu.concatenate %43, %45, %47 in 1 : vector<7x28xf32>, vector<7x28xf32>, vector<7x28xf32> -> vector<7x84xf32>
    %c3_80 = arith.constant 3 : index
    %c1_81 = arith.constant 1 : index
    %c0_82 = arith.constant 0 : index
    %c0_83 = arith.constant 0 : index
    %49 = vector.load %arg0[%c3_80, %c1_81, %c0_82, %c0_83] : memref<4x2x7x28xf32, #tpu.memory_space<vmem>>, vector<1x1x6x28xf32>
    %50 = vector.shape_cast %49 : vector<1x1x6x28xf32> to vector<6x28xf32>
    %c0_84 = arith.constant 0 : index
    %c1_85 = arith.constant 1 : index
    %c1_86 = arith.constant 1 : index
    %c0_87 = arith.constant 0 : index
    %51 = vector.load %arg0[%c0_84, %c1_85, %c1_86, %c0_87] : memref<4x2x7x28xf32, #tpu.memory_space<vmem>>, vector<1x1x6x28xf32>
    %52 = vector.shape_cast %51 : vector<1x1x6x28xf32> to vector<6x28xf32>
    %c1_88 = arith.constant 1 : index
    %c1_89 = arith.constant 1 : index
    %c1_90 = arith.constant 1 : index
    %c0_91 = arith.constant 0 : index
    %53 = vector.load %arg0[%c1_88, %c1_89, %c1_90, %c0_91] : memref<4x2x7x28xf32, #tpu.memory_space<vmem>>, vector<1x1x6x28xf32>
    %54 = vector.shape_cast %53 : vector<1x1x6x28xf32> to vector<6x28xf32>
    %55 = tpu.concatenate %50, %52, %54 in 1 : vector<6x28xf32>, vector<6x28xf32>, vector<6x28xf32> -> vector<6x84xf32>
    %56 = tpu.concatenate %6, %13, %20, %27, %34, %41, %48, %55 in 0 : vector<7x84xf32>, vector<6x84xf32>, vector<7x84xf32>, vector<6x84xf32>, vector<7x84xf32>, vector<6x84xf32>, vector<7x84xf32>, vector<6x84xf32> -> vector<52x84xf32>
    %57 = arith.truncf %56 : vector<52x84xf32> to vector<52x84xbf16>
    %c0_92 = arith.constant 0 : index
    %c0_93 = arith.constant 0 : index
    %58 = vector.load %arg1[%c0_92, %c0_93] : memref<84x832xbf16, #tpu.memory_space<vmem>>, vector<84x832xbf16>
    %cst = arith.constant dense<0.000000e+00> : vector<52x832xf32>
    %59 = tpu.matmul %57, %58, %cst {dimension_numbers = #tpu.dot_dimension_numbers<[1], [0], [0], [1], [0, 0, 1, 1], [], []>} : vector<52x84xbf16>, vector<84x832xbf16>, vector<52x832xf32> -> vector<52x832xf32>
    %cst_94 = arith.constant dense<0.000000e+00> : vector<832xf32>
    %60 = vector.multi_reduction <add>, %59, %cst_94 [0] : vector<52x832xf32> to vector<832xf32>
    %61 = vector.shape_cast %60 : vector<832xf32> to vector<1x832xf32>
    %62 = arith.mulf %59, %59 : vector<52x832xf32>
    %cst_95 = arith.constant dense<0.000000e+00> : vector<832xf32>
    %63 = vector.multi_reduction <add>, %62, %cst_95 [0] : vector<52x832xf32> to vector<832xf32>
    %64 = vector.shape_cast %63 : vector<832xf32> to vector<1x832xf32>
    %c0_96 = arith.constant 0 : index
    %c0_97 = arith.constant 0 : index
    %65 = vector.load %arg2[%c0_96, %c0_97] : memref<832x32xf32, #tpu.memory_space<vmem>>, vector<832x32xf32>
    %cst_98 = arith.constant dense<0.000000e+00> : vector<1x32xf32>
    %66 = tpu.matmul %61, %65, %cst_98 {dimension_numbers = #tpu.dot_dimension_numbers<[1], [0], [0], [1], [0, 0, 1, 1], [], []>} : vector<1x832xf32>, vector<832x32xf32>, vector<1x32xf32> -> vector<1x32xf32>
    %c0_99 = arith.constant 0 : index
    %c0_100 = arith.constant 0 : index
    %67 = vector.load %arg2[%c0_99, %c0_100] : memref<832x32xf32, #tpu.memory_space<vmem>>, vector<832x32xf32>
    %cst_101 = arith.constant dense<0.000000e+00> : vector<1x32xf32>
    %68 = tpu.matmul %64, %67, %cst_101 {dimension_numbers = #tpu.dot_dimension_numbers<[1], [0], [0], [1], [0, 0, 1, 1], [], []>} : vector<1x832xf32>, vector<832x32xf32>, vector<1x32xf32> -> vector<1x32xf32>
    %cst_102 = arith.constant 7.396450e-04 : f32
    %69 = vector.broadcast %cst_102 : f32 to vector<1x32xf32>
    %70 = arith.mulf %66, %69 : vector<1x32xf32>
    %cst_103 = arith.constant 7.396450e-04 : f32
    %71 = vector.broadcast %cst_103 : f32 to vector<1x32xf32>
    %72 = arith.mulf %68, %71 : vector<1x32xf32>
    %73 = arith.mulf %70, %70 : vector<1x32xf32>
    %74 = arith.subf %72, %73 : vector<1x32xf32>
    %c0_104 = arith.constant 0 : index
    %c0_105 = arith.constant 0 : index
    %75 = vector.load %arg3[%c0_104, %c0_105] : memref<1x32xf32, #tpu.memory_space<vmem>>, vector<1x32xf32>
    %cst_106 = arith.constant 9.99999974E-6 : f32
    %76 = vector.broadcast %cst_106 : f32 to vector<1x32xf32>
    %77 = arith.addf %74, %76 : vector<1x32xf32>
    %78 = math.rsqrt %77 : vector<1x32xf32>
    %79 = arith.mulf %75, %78 : vector<1x32xf32>
    %c0_107 = arith.constant 0 : index
    %c0_108 = arith.constant 0 : index
    %80 = vector.load %arg4[%c0_107, %c0_108] : memref<1x32xf32, #tpu.memory_space<vmem>>, vector<1x32xf32>
    %81 = arith.mulf %70, %79 : vector<1x32xf32>
    %82 = arith.subf %80, %81 : vector<1x32xf32>
    %83 = tpu.concatenate %79, %79, %79, %79, %79, %79, %79, %79, %79, %79, %79, %79, %79, %79, %79, %79 in 1 : vector<1x32xf32>, vector<1x32xf32>, vector<1x32xf32>, vector<1x32xf32>, vector<1x32xf32>, vector<1x32xf32>, vector<1x32xf32>, vector<1x32xf32>, vector<1x32xf32>, vector<1x32xf32>, vector<1x32xf32>, vector<1x32xf32>, vector<1x32xf32>, vector<1x32xf32>, vector<1x32xf32>, vector<1x32xf32> -> vector<1x512xf32>
    %84 = tpu.concatenate %79, %79, %79, %79, %79, %79, %79, %79, %79, %79 in 1 : vector<1x32xf32>, vector<1x32xf32>, vector<1x32xf32>, vector<1x32xf32>, vector<1x32xf32>, vector<1x32xf32>, vector<1x32xf32>, vector<1x32xf32>, vector<1x32xf32>, vector<1x32xf32> -> vector<1x320xf32>
    %85 = tpu.concatenate %83, %84 in 1 : vector<1x512xf32>, vector<1x320xf32> -> vector<1x832xf32>
    %86 = tpu.concatenate %82, %82, %82, %82, %82, %82, %82, %82, %82, %82, %82, %82, %82, %82, %82, %82 in 1 : vector<1x32xf32>, vector<1x32xf32>, vector<1x32xf32>, vector<1x32xf32>, vector<1x32xf32>, vector<1x32xf32>, vector<1x32xf32>, vector<1x32xf32>, vector<1x32xf32>, vector<1x32xf32>, vector<1x32xf32>, vector<1x32xf32>, vector<1x32xf32>, vector<1x32xf32>, vector<1x32xf32>, vector<1x32xf32> -> vector<1x512xf32>
    %87 = tpu.concatenate %82, %82, %82, %82, %82, %82, %82, %82, %82, %82 in 1 : vector<1x32xf32>, vector<1x32xf32>, vector<1x32xf32>, vector<1x32xf32>, vector<1x32xf32>, vector<1x32xf32>, vector<1x32xf32>, vector<1x32xf32>, vector<1x32xf32>, vector<1x32xf32> -> vector<1x320xf32>
    %88 = tpu.concatenate %86, %87 in 1 : vector<1x512xf32>, vector<1x320xf32> -> vector<1x832xf32>
    %89 = vector.broadcast %85 : vector<1x832xf32> to vector<52x832xf32>
    %90 = arith.mulf %59, %89 : vector<52x832xf32>
    %91 = vector.broadcast %88 : vector<1x832xf32> to vector<52x832xf32>
    %92 = arith.addf %90, %91 : vector<52x832xf32>
    %cst_109 = arith.constant 0.000000e+00 : f32
    %93 = vector.broadcast %cst_109 : f32 to vector<52x832xf32>
    %94 = arith.maximumf %92, %93 : vector<52x832xf32>
    %95 = vector.extract_strided_slice %94 {offsets = [0, 0], sizes = [7, 416], strides = [1, 1]} : vector<52x832xf32> to vector<7x416xf32>
    %96 = vector.extract_strided_slice %94 {offsets = [0, 416], sizes = [7, 416], strides = [1, 1]} : vector<52x832xf32> to vector<7x416xf32>
    %97 = vector.extract_strided_slice %94 {offsets = [13, 0], sizes = [7, 416], strides = [1, 1]} : vector<52x832xf32> to vector<7x416xf32>
    %98 = vector.extract_strided_slice %94 {offsets = [13, 416], sizes = [7, 416], strides = [1, 1]} : vector<52x832xf32> to vector<7x416xf32>
    %99 = arith.maximumf %95, %96 : vector<7x416xf32>
    %100 = arith.maximumf %97, %98 : vector<7x416xf32>
    %101 = arith.maximumf %99, %100 : vector<7x416xf32>
    %102 = vector.extract_strided_slice %94 {offsets = [7, 0], sizes = [6, 416], strides = [1, 1]} : vector<52x832xf32> to vector<6x416xf32>
    %103 = vector.extract_strided_slice %94 {offsets = [7, 416], sizes = [6, 416], strides = [1, 1]} : vector<52x832xf32> to vector<6x416xf32>
    %104 = vector.extract_strided_slice %94 {offsets = [20, 0], sizes = [6, 416], strides = [1, 1]} : vector<52x832xf32> to vector<6x416xf32>
    %105 = vector.extract_strided_slice %94 {offsets = [20, 416], sizes = [6, 416], strides = [1, 1]} : vector<52x832xf32> to vector<6x416xf32>
    %106 = arith.maximumf %102, %103 : vector<6x416xf32>
    %107 = arith.maximumf %104, %105 : vector<6x416xf32>
    %108 = arith.maximumf %106, %107 : vector<6x416xf32>
    %109 = vector.extract_strided_slice %94 {offsets = [26, 0], sizes = [7, 416], strides = [1, 1]} : vector<52x832xf32> to vector<7x416xf32>
    %110 = vector.extract_strided_slice %94 {offsets = [26, 416], sizes = [7, 416], strides = [1, 1]} : vector<52x832xf32> to vector<7x416xf32>
    %111 = vector.extract_strided_slice %94 {offsets = [39, 0], sizes = [7, 416], strides = [1, 1]} : vector<52x832xf32> to vector<7x416xf32>
    %112 = vector.extract_strided_slice %94 {offsets = [39, 416], sizes = [7, 416], strides = [1, 1]} : vector<52x832xf32> to vector<7x416xf32>
    %113 = arith.maximumf %109, %110 : vector<7x416xf32>
    %114 = arith.maximumf %111, %112 : vector<7x416xf32>
    %115 = arith.maximumf %113, %114 : vector<7x416xf32>
    %116 = vector.extract_strided_slice %94 {offsets = [33, 0], sizes = [6, 416], strides = [1, 1]} : vector<52x832xf32> to vector<6x416xf32>
    %117 = vector.extract_strided_slice %94 {offsets = [33, 416], sizes = [6, 416], strides = [1, 1]} : vector<52x832xf32> to vector<6x416xf32>
    %118 = vector.extract_strided_slice %94 {offsets = [46, 0], sizes = [6, 416], strides = [1, 1]} : vector<52x832xf32> to vector<6x416xf32>
    %119 = vector.extract_strided_slice %94 {offsets = [46, 416], sizes = [6, 416], strides = [1, 1]} : vector<52x832xf32> to vector<6x416xf32>
    %120 = arith.maximumf %116, %117 : vector<6x416xf32>
    %121 = arith.maximumf %118, %119 : vector<6x416xf32>
    %122 = arith.maximumf %120, %121 : vector<6x416xf32>
    %123 = vector.extract_strided_slice %101 {offsets = [0, 0], sizes = [5, 416], strides = [1, 1]} : vector<7x416xf32> to vector<5x416xf32>
    %124 = vector.extract_strided_slice %108 {offsets = [0, 0], sizes = [5, 416], strides = [1, 1]} : vector<6x416xf32> to vector<5x416xf32>
    %125 = vector.extract_strided_slice %101 {offsets = [1, 0], sizes = [5, 416], strides = [1, 1]} : vector<7x416xf32> to vector<5x416xf32>
    %126 = tpu.concatenate %123, %124, %125 in 1 : vector<5x416xf32>, vector<5x416xf32>, vector<5x416xf32> -> vector<5x1248xf32>
    %127 = vector.extract_strided_slice %108 {offsets = [0, 0], sizes = [5, 416], strides = [1, 1]} : vector<6x416xf32> to vector<5x416xf32>
    %128 = vector.extract_strided_slice %101 {offsets = [1, 0], sizes = [5, 416], strides = [1, 1]} : vector<7x416xf32> to vector<5x416xf32>
    %129 = vector.extract_strided_slice %108 {offsets = [1, 0], sizes = [5, 416], strides = [1, 1]} : vector<6x416xf32> to vector<5x416xf32>
    %130 = tpu.concatenate %127, %128, %129 in 1 : vector<5x416xf32>, vector<5x416xf32>, vector<5x416xf32> -> vector<5x1248xf32>
    %131 = vector.extract_strided_slice %115 {offsets = [0, 0], sizes = [5, 416], strides = [1, 1]} : vector<7x416xf32> to vector<5x416xf32>
    %132 = vector.extract_strided_slice %122 {offsets = [0, 0], sizes = [5, 416], strides = [1, 1]} : vector<6x416xf32> to vector<5x416xf32>
    %133 = vector.extract_strided_slice %115 {offsets = [1, 0], sizes = [5, 416], strides = [1, 1]} : vector<7x416xf32> to vector<5x416xf32>
    %134 = tpu.concatenate %131, %132, %133 in 1 : vector<5x416xf32>, vector<5x416xf32>, vector<5x416xf32> -> vector<5x1248xf32>
    %135 = vector.extract_strided_slice %122 {offsets = [0, 0], sizes = [5, 416], strides = [1, 1]} : vector<6x416xf32> to vector<5x416xf32>
    %136 = vector.extract_strided_slice %115 {offsets = [1, 0], sizes = [5, 416], strides = [1, 1]} : vector<7x416xf32> to vector<5x416xf32>
    %137 = vector.extract_strided_slice %122 {offsets = [1, 0], sizes = [5, 416], strides = [1, 1]} : vector<6x416xf32> to vector<5x416xf32>
    %138 = tpu.concatenate %135, %136, %137 in 1 : vector<5x416xf32>, vector<5x416xf32>, vector<5x416xf32> -> vector<5x1248xf32>
    %139 = tpu.concatenate %126, %130, %134, %138 in 0 : vector<5x1248xf32>, vector<5x1248xf32>, vector<5x1248xf32>, vector<5x1248xf32> -> vector<20x1248xf32>
    %140 = arith.truncf %139 : vector<20x1248xf32> to vector<20x1248xbf16>
    %c0_110 = arith.constant 0 : index
    %c0_111 = arith.constant 0 : index
    %141 = vector.load %arg5[%c0_110, %c0_111] : memref<1248x640xbf16, #tpu.memory_space<vmem>>, vector<1248x640xbf16>
    %cst_112 = arith.constant dense<0.000000e+00> : vector<20x640xf32>
    %142 = tpu.matmul %140, %141, %cst_112 {dimension_numbers = #tpu.dot_dimension_numbers<[1], [0], [0], [1], [0, 0, 1, 1], [], []>} : vector<20x1248xbf16>, vector<1248x640xbf16>, vector<20x640xf32> -> vector<20x640xf32>
    %143 = vector.extract_strided_slice %101 {offsets = [5, 0], sizes = [1, 416], strides = [1, 1]} : vector<7x416xf32> to vector<1x416xf32>
    %144 = vector.extract_strided_slice %108 {offsets = [5, 0], sizes = [1, 416], strides = [1, 1]} : vector<6x416xf32> to vector<1x416xf32>
    %145 = vector.extract_strided_slice %101 {offsets = [6, 0], sizes = [1, 416], strides = [1, 1]} : vector<7x416xf32> to vector<1x416xf32>
    %146 = tpu.concatenate %143, %144, %145 in 1 : vector<1x416xf32>, vector<1x416xf32>, vector<1x416xf32> -> vector<1x1248xf32>
    %147 = vector.extract_strided_slice %115 {offsets = [5, 0], sizes = [1, 416], strides = [1, 1]} : vector<7x416xf32> to vector<1x416xf32>
    %148 = vector.extract_strided_slice %122 {offsets = [5, 0], sizes = [1, 416], strides = [1, 1]} : vector<6x416xf32> to vector<1x416xf32>
    %149 = vector.extract_strided_slice %115 {offsets = [6, 0], sizes = [1, 416], strides = [1, 1]} : vector<7x416xf32> to vector<1x416xf32>
    %150 = tpu.concatenate %147, %148, %149 in 1 : vector<1x416xf32>, vector<1x416xf32>, vector<1x416xf32> -> vector<1x1248xf32>
    %151 = tpu.concatenate %146, %150 in 0 : vector<1x1248xf32>, vector<1x1248xf32> -> vector<2x1248xf32>
    %152 = arith.truncf %151 : vector<2x1248xf32> to vector<2x1248xbf16>
    %c0_113 = arith.constant 0 : index
    %c0_114 = arith.constant 0 : index
    %153 = vector.load %arg6[%c0_113, %c0_114] : memref<1248x704xbf16, #tpu.memory_space<vmem>>, vector<1248x704xbf16>
    %cst_115 = arith.constant dense<0.000000e+00> : vector<2x704xf32>
    %154 = tpu.matmul %152, %153, %cst_115 {dimension_numbers = #tpu.dot_dimension_numbers<[1], [0], [0], [1], [0, 0, 1, 1], [], []>} : vector<2x1248xbf16>, vector<1248x704xbf16>, vector<2x704xf32> -> vector<2x704xf32>
    %155 = vector.extract_strided_slice %101 {offsets = [0, 0], sizes = [5, 416], strides = [1, 1]} : vector<7x416xf32> to vector<5x416xf32>
    %156 = vector.extract_strided_slice %108 {offsets = [0, 0], sizes = [5, 416], strides = [1, 1]} : vector<6x416xf32> to vector<5x416xf32>
    %157 = vector.extract_strided_slice %101 {offsets = [1, 0], sizes = [5, 416], strides = [1, 1]} : vector<7x416xf32> to vector<5x416xf32>
    %158 = tpu.concatenate %155, %156, %157 in 1 : vector<5x416xf32>, vector<5x416xf32>, vector<5x416xf32> -> vector<5x1248xf32>
    %159 = vector.extract_strided_slice %108 {offsets = [0, 0], sizes = [5, 416], strides = [1, 1]} : vector<6x416xf32> to vector<5x416xf32>
    %160 = vector.extract_strided_slice %101 {offsets = [1, 0], sizes = [5, 416], strides = [1, 1]} : vector<7x416xf32> to vector<5x416xf32>
    %161 = vector.extract_strided_slice %108 {offsets = [1, 0], sizes = [5, 416], strides = [1, 1]} : vector<6x416xf32> to vector<5x416xf32>
    %162 = tpu.concatenate %159, %160, %161 in 1 : vector<5x416xf32>, vector<5x416xf32>, vector<5x416xf32> -> vector<5x1248xf32>
    %163 = vector.extract_strided_slice %115 {offsets = [0, 0], sizes = [5, 416], strides = [1, 1]} : vector<7x416xf32> to vector<5x416xf32>
    %164 = vector.extract_strided_slice %122 {offsets = [0, 0], sizes = [5, 416], strides = [1, 1]} : vector<6x416xf32> to vector<5x416xf32>
    %165 = vector.extract_strided_slice %115 {offsets = [1, 0], sizes = [5, 416], strides = [1, 1]} : vector<7x416xf32> to vector<5x416xf32>
    %166 = tpu.concatenate %163, %164, %165 in 1 : vector<5x416xf32>, vector<5x416xf32>, vector<5x416xf32> -> vector<5x1248xf32>
    %167 = vector.extract_strided_slice %122 {offsets = [0, 0], sizes = [5, 416], strides = [1, 1]} : vector<6x416xf32> to vector<5x416xf32>
    %168 = vector.extract_strided_slice %115 {offsets = [1, 0], sizes = [5, 416], strides = [1, 1]} : vector<7x416xf32> to vector<5x416xf32>
    %169 = vector.extract_strided_slice %122 {offsets = [1, 0], sizes = [5, 416], strides = [1, 1]} : vector<6x416xf32> to vector<5x416xf32>
    %170 = tpu.concatenate %167, %168, %169 in 1 : vector<5x416xf32>, vector<5x416xf32>, vector<5x416xf32> -> vector<5x1248xf32>
    %171 = tpu.concatenate %158, %162, %166, %170 in 0 : vector<5x1248xf32>, vector<5x1248xf32>, vector<5x1248xf32>, vector<5x1248xf32> -> vector<20x1248xf32>
    %172 = arith.truncf %171 : vector<20x1248xf32> to vector<20x1248xbf16>
    %c0_116 = arith.constant 0 : index
    %c0_117 = arith.constant 0 : index
    %173 = vector.load %arg7[%c0_116, %c0_117] : memref<1248x64xbf16, #tpu.memory_space<vmem>>, vector<1248x64xbf16>
    %cst_118 = arith.constant dense<0.000000e+00> : vector<20x64xf32>
    %174 = tpu.matmul %172, %173, %cst_118 {dimension_numbers = #tpu.dot_dimension_numbers<[1], [0], [0], [1], [0, 0, 1, 1], [], []>} : vector<20x1248xbf16>, vector<1248x64xbf16>, vector<20x64xf32> -> vector<20x64xf32>
    %cst_119 = arith.constant dense<0.000000e+00> : vector<640xf32>
    %175 = vector.multi_reduction <add>, %142, %cst_119 [0] : vector<20x640xf32> to vector<640xf32>
    %176 = vector.shape_cast %175 : vector<640xf32> to vector<1x640xf32>
    %177 = arith.mulf %142, %142 : vector<20x640xf32>
    %cst_120 = arith.constant dense<0.000000e+00> : vector<640xf32>
    %178 = vector.multi_reduction <add>, %177, %cst_120 [0] : vector<20x640xf32> to vector<640xf32>
    %179 = vector.shape_cast %178 : vector<640xf32> to vector<1x640xf32>
    %cst_121 = arith.constant dense<0.000000e+00> : vector<704xf32>
    %180 = vector.multi_reduction <add>, %154, %cst_121 [0] : vector<2x704xf32> to vector<704xf32>
    %181 = vector.shape_cast %180 : vector<704xf32> to vector<1x704xf32>
    %182 = arith.mulf %154, %154 : vector<2x704xf32>
    %cst_122 = arith.constant dense<0.000000e+00> : vector<704xf32>
    %183 = vector.multi_reduction <add>, %182, %cst_122 [0] : vector<2x704xf32> to vector<704xf32>
    %184 = vector.shape_cast %183 : vector<704xf32> to vector<1x704xf32>
    %cst_123 = arith.constant dense<0.000000e+00> : vector<64xf32>
    %185 = vector.multi_reduction <add>, %174, %cst_123 [0] : vector<20x64xf32> to vector<64xf32>
    %186 = vector.shape_cast %185 : vector<64xf32> to vector<1x64xf32>
    %187 = arith.mulf %174, %174 : vector<20x64xf32>
    %cst_124 = arith.constant dense<0.000000e+00> : vector<64xf32>
    %188 = vector.multi_reduction <add>, %187, %cst_124 [0] : vector<20x64xf32> to vector<64xf32>
    %189 = vector.shape_cast %188 : vector<64xf32> to vector<1x64xf32>
    %c0_125 = arith.constant 0 : index
    %c0_126 = arith.constant 0 : index
    %190 = vector.load %arg8[%c0_125, %c0_126] : memref<640x64xf32, #tpu.memory_space<vmem>>, vector<640x64xf32>
    %cst_127 = arith.constant dense<0.000000e+00> : vector<1x64xf32>
    %191 = tpu.matmul %176, %190, %cst_127 {dimension_numbers = #tpu.dot_dimension_numbers<[1], [0], [0], [1], [0, 0, 1, 1], [], []>} : vector<1x640xf32>, vector<640x64xf32>, vector<1x64xf32> -> vector<1x64xf32>
    %c0_128 = arith.constant 0 : index
    %c0_129 = arith.constant 0 : index
    %192 = vector.load %arg9[%c0_128, %c0_129] : memref<704x64xf32, #tpu.memory_space<vmem>>, vector<704x64xf32>
    %cst_130 = arith.constant dense<0.000000e+00> : vector<1x64xf32>
    %193 = tpu.matmul %181, %192, %cst_130 {dimension_numbers = #tpu.dot_dimension_numbers<[1], [0], [0], [1], [0, 0, 1, 1], [], []>} : vector<1x704xf32>, vector<704x64xf32>, vector<1x64xf32> -> vector<1x64xf32>
    %194 = arith.addf %191, %193 : vector<1x64xf32>
    %195 = arith.addf %194, %186 : vector<1x64xf32>
    %c0_131 = arith.constant 0 : index
    %c0_132 = arith.constant 0 : index
    %196 = vector.load %arg8[%c0_131, %c0_132] : memref<640x64xf32, #tpu.memory_space<vmem>>, vector<640x64xf32>
    %cst_133 = arith.constant dense<0.000000e+00> : vector<1x64xf32>
    %197 = tpu.matmul %179, %196, %cst_133 {dimension_numbers = #tpu.dot_dimension_numbers<[1], [0], [0], [1], [0, 0, 1, 1], [], []>} : vector<1x640xf32>, vector<640x64xf32>, vector<1x64xf32> -> vector<1x64xf32>
    %c0_134 = arith.constant 0 : index
    %c0_135 = arith.constant 0 : index
    %198 = vector.load %arg9[%c0_134, %c0_135] : memref<704x64xf32, #tpu.memory_space<vmem>>, vector<704x64xf32>
    %cst_136 = arith.constant dense<0.000000e+00> : vector<1x64xf32>
    %199 = tpu.matmul %184, %198, %cst_136 {dimension_numbers = #tpu.dot_dimension_numbers<[1], [0], [0], [1], [0, 0, 1, 1], [], []>} : vector<1x704xf32>, vector<704x64xf32>, vector<1x64xf32> -> vector<1x64xf32>
    %200 = arith.addf %197, %199 : vector<1x64xf32>
    %201 = arith.addf %200, %189 : vector<1x64xf32>
    %cst_137 = arith.constant 0.00413223123 : f32
    %202 = vector.broadcast %cst_137 : f32 to vector<1x64xf32>
    %203 = arith.mulf %195, %202 : vector<1x64xf32>
    %cst_138 = arith.constant 0.00413223123 : f32
    %204 = vector.broadcast %cst_138 : f32 to vector<1x64xf32>
    %205 = arith.mulf %201, %204 : vector<1x64xf32>
    %206 = arith.mulf %203, %203 : vector<1x64xf32>
    %207 = arith.subf %205, %206 : vector<1x64xf32>
    %c0_139 = arith.constant 0 : index
    %c0_140 = arith.constant 0 : index
    %208 = vector.load %arg10[%c0_139, %c0_140] : memref<1x64xf32, #tpu.memory_space<vmem>>, vector<1x64xf32>
    %cst_141 = arith.constant 9.99999974E-6 : f32
    %209 = vector.broadcast %cst_141 : f32 to vector<1x64xf32>
    %210 = arith.addf %207, %209 : vector<1x64xf32>
    %211 = math.rsqrt %210 : vector<1x64xf32>
    %212 = arith.mulf %208, %211 : vector<1x64xf32>
    %c0_142 = arith.constant 0 : index
    %c0_143 = arith.constant 0 : index
    %213 = vector.load %arg11[%c0_142, %c0_143] : memref<1x64xf32, #tpu.memory_space<vmem>>, vector<1x64xf32>
    %214 = arith.mulf %203, %212 : vector<1x64xf32>
    %215 = arith.subf %213, %214 : vector<1x64xf32>
    %216 = tpu.concatenate %212, %212, %212, %212, %212, %212, %212, %212, %212, %212 in 1 : vector<1x64xf32>, vector<1x64xf32>, vector<1x64xf32>, vector<1x64xf32>, vector<1x64xf32>, vector<1x64xf32>, vector<1x64xf32>, vector<1x64xf32>, vector<1x64xf32>, vector<1x64xf32> -> vector<1x640xf32>
    %217 = tpu.concatenate %215, %215, %215, %215, %215, %215, %215, %215, %215, %215 in 1 : vector<1x64xf32>, vector<1x64xf32>, vector<1x64xf32>, vector<1x64xf32>, vector<1x64xf32>, vector<1x64xf32>, vector<1x64xf32>, vector<1x64xf32>, vector<1x64xf32>, vector<1x64xf32> -> vector<1x640xf32>
    %218 = vector.broadcast %216 : vector<1x640xf32> to vector<20x640xf32>
    %219 = arith.mulf %142, %218 : vector<20x640xf32>
    %220 = vector.broadcast %217 : vector<1x640xf32> to vector<20x640xf32>
    %221 = arith.addf %219, %220 : vector<20x640xf32>
    %cst_144 = arith.constant 0.000000e+00 : f32
    %222 = vector.broadcast %cst_144 : f32 to vector<20x640xf32>
    %223 = arith.maximumf %221, %222 : vector<20x640xf32>
    %224 = vector.extract_strided_slice %223 {offsets = [0, 0], sizes = [5, 320], strides = [1, 1]} : vector<20x640xf32> to vector<5x320xf32>
    %225 = vector.extract_strided_slice %223 {offsets = [0, 320], sizes = [5, 320], strides = [1, 1]} : vector<20x640xf32> to vector<5x320xf32>
    %226 = vector.extract_strided_slice %223 {offsets = [5, 0], sizes = [5, 320], strides = [1, 1]} : vector<20x640xf32> to vector<5x320xf32>
    %227 = vector.extract_strided_slice %223 {offsets = [5, 320], sizes = [5, 320], strides = [1, 1]} : vector<20x640xf32> to vector<5x320xf32>
    %228 = arith.maximumf %224, %225 : vector<5x320xf32>
    %229 = arith.maximumf %226, %227 : vector<5x320xf32>
    %230 = arith.maximumf %228, %229 : vector<5x320xf32>
    %231 = vector.extract_strided_slice %230 {offsets = [0, 0], sizes = [1, 320], strides = [1, 1]} : vector<5x320xf32> to vector<1x320xf32>
    %232 = vector.extract_strided_slice %230 {offsets = [1, 0], sizes = [1, 320], strides = [1, 1]} : vector<5x320xf32> to vector<1x320xf32>
    %233 = vector.extract_strided_slice %230 {offsets = [2, 0], sizes = [1, 320], strides = [1, 1]} : vector<5x320xf32> to vector<1x320xf32>
    %234 = vector.extract_strided_slice %230 {offsets = [3, 0], sizes = [1, 320], strides = [1, 1]} : vector<5x320xf32> to vector<1x320xf32>
    %235 = vector.extract_strided_slice %230 {offsets = [4, 0], sizes = [1, 320], strides = [1, 1]} : vector<5x320xf32> to vector<1x320xf32>
    %236 = tpu.concatenate %231, %232, %233, %234, %235 in 1 : vector<1x320xf32>, vector<1x320xf32>, vector<1x320xf32>, vector<1x320xf32>, vector<1x320xf32> -> vector<1x1600xf32>
    %237 = vector.extract_strided_slice %223 {offsets = [10, 0], sizes = [5, 320], strides = [1, 1]} : vector<20x640xf32> to vector<5x320xf32>
    %238 = vector.extract_strided_slice %223 {offsets = [10, 320], sizes = [5, 320], strides = [1, 1]} : vector<20x640xf32> to vector<5x320xf32>
    %239 = vector.extract_strided_slice %223 {offsets = [15, 0], sizes = [5, 320], strides = [1, 1]} : vector<20x640xf32> to vector<5x320xf32>
    %240 = vector.extract_strided_slice %223 {offsets = [15, 320], sizes = [5, 320], strides = [1, 1]} : vector<20x640xf32> to vector<5x320xf32>
    %241 = arith.maximumf %237, %238 : vector<5x320xf32>
    %242 = arith.maximumf %239, %240 : vector<5x320xf32>
    %243 = arith.maximumf %241, %242 : vector<5x320xf32>
    %244 = vector.extract_strided_slice %243 {offsets = [0, 0], sizes = [1, 320], strides = [1, 1]} : vector<5x320xf32> to vector<1x320xf32>
    %245 = vector.extract_strided_slice %243 {offsets = [1, 0], sizes = [1, 320], strides = [1, 1]} : vector<5x320xf32> to vector<1x320xf32>
    %246 = vector.extract_strided_slice %243 {offsets = [2, 0], sizes = [1, 320], strides = [1, 1]} : vector<5x320xf32> to vector<1x320xf32>
    %247 = vector.extract_strided_slice %243 {offsets = [3, 0], sizes = [1, 320], strides = [1, 1]} : vector<5x320xf32> to vector<1x320xf32>
    %248 = vector.extract_strided_slice %243 {offsets = [4, 0], sizes = [1, 320], strides = [1, 1]} : vector<5x320xf32> to vector<1x320xf32>
    %249 = tpu.concatenate %244, %245, %246, %247, %248 in 1 : vector<1x320xf32>, vector<1x320xf32>, vector<1x320xf32>, vector<1x320xf32>, vector<1x320xf32> -> vector<1x1600xf32>
    %250 = tpu.concatenate %236, %249 in 0 : vector<1x1600xf32>, vector<1x1600xf32> -> vector<2x1600xf32>
    %251 = arith.truncf %250 : vector<2x1600xf32> to vector<2x1600xbf16>
    %c0_145 = arith.constant 0 : index
    %c0_146 = arith.constant 0 : index
    %252 = vector.load %arg12[%c0_145, %c0_146] : memref<1600x512xbf16, #tpu.memory_space<vmem>>, vector<1600x512xbf16>
    %cst_147 = arith.constant dense<0.000000e+00> : vector<2x512xf32>
    %253 = tpu.matmul %251, %252, %cst_147 {dimension_numbers = #tpu.dot_dimension_numbers<[1], [0], [0], [1], [0, 0, 1, 1], [], []>} : vector<2x1600xbf16>, vector<1600x512xbf16>, vector<2x512xf32> -> vector<2x512xf32>
    %c0_148 = arith.constant 0 : index
    %c0_149 = arith.constant 0 : index
    %254 = vector.load %arg13[%c0_148, %c0_149] : memref<1x512xf32, #tpu.memory_space<vmem>>, vector<1x512xf32>
    %255 = vector.broadcast %254 : vector<1x512xf32> to vector<2x512xf32>
    %256 = arith.addf %253, %255 : vector<2x512xf32>
    %cst_150 = arith.constant 0.000000e+00 : f32
    %257 = vector.broadcast %cst_150 : f32 to vector<2x512xf32>
    %258 = arith.maximumf %256, %257 : vector<2x512xf32>
    %259 = arith.truncf %258 : vector<2x512xf32> to vector<2x512xbf16>
    %c0_151 = arith.constant 0 : index
    %c0_152 = arith.constant 0 : index
    %260 = vector.load %arg14[%c0_151, %c0_152] : memref<512x128xbf16, #tpu.memory_space<vmem>>, vector<512x128xbf16>
    %cst_153 = arith.constant dense<0.000000e+00> : vector<2x128xf32>
    %261 = tpu.matmul %259, %260, %cst_153 {dimension_numbers = #tpu.dot_dimension_numbers<[1], [0], [0], [1], [0, 0, 1, 1], [], []>} : vector<2x512xbf16>, vector<512x128xbf16>, vector<2x128xf32> -> vector<2x128xf32>
    %c0_154 = arith.constant 0 : index
    %c0_155 = arith.constant 0 : index
    %262 = vector.load %arg15[%c0_154, %c0_155] : memref<1x128xf32, #tpu.memory_space<vmem>>, vector<1x128xf32>
    %263 = vector.broadcast %262 : vector<1x128xf32> to vector<2x128xf32>
    %264 = arith.addf %261, %263 : vector<2x128xf32>
    %c0_156 = arith.constant 0 : index
    %c0_157 = arith.constant 0 : index
    %265 = vector.load %arg16[%c0_156, %c0_157] : memref<2x128xf32, #tpu.memory_space<vmem>>, vector<2x128xf32>
    tpu.vector_store %arg16[%c0_156, %c0_157], %264 {strides = array<i32>} : memref<2x128xf32, #tpu.memory_space<vmem>>, vector<2x128xf32>,
    return
  }
}

</mosaic_0001>

<bundles_post_ra>
// kernel: net_forward.1
= control target key start
LH: loop header
LB: loop body
LE: loop exit
PB: predicated region body
PF: predicated region fallthrough
CT: control target
= control target key end

     0   :  { %s28250_s0 = inlined_call_operand.vmem [shape: f32[4,2,7,28], index: 0, kind: input, shape index: {}]   ;;  %s28251_s1 = inlined_call_operand.vmem [shape: bf16[84,832], index: 1, kind: input, shape index: {}]   ;;  %s28252_s2 = inlined_call_operand.vmem [shape: f32[832,32], index: 2, kind: input, shape index: {}]   ;;  %s28253_s3 = inlined_call_operand.vmem [shape: f32[1,32], index: 3, kind: input, shape index: {}]   ;;  %s28254_s4 = inlined_call_operand.vmem [shape: f32[1,32], index: 4, kind: input, shape index: {}]   ;;  %s28255_s5 = inlined_call_operand.vmem [shape: bf16[1248,640], index: 5, kind: input, shape index: {}]   ;;  %s28256_s6 = inlined_call_operand.vmem [shape: bf16[1248,704], index: 6, kind: input, shape index: {}]   ;;  %s28257_s7 = inlined_call_operand.vmem [shape: bf16[1248,64], index: 7, kind: input, shape index: {}]   ;;  %s28258_s8 = inlined_call_operand.vmem [shape: f32[640,64], index: 8, kind: input, shape index: {}]   ;;  %s28259_s9 = inlined_call_operand.vmem [shape: f32[704,64], index: 9, kind: input, shape index: {}]   ;;  %s28260_s10 = inlined_call_operand.vmem [shape: f32[1,64], index: 10, kind: input, shape index: {}]   ;;  %s28261_s11 = inlined_call_operand.vmem [shape: f32[1,64], index: 11, kind: input, shape index: {}]   ;;  %s28262_s12 = inlined_call_operand.vmem [shape: bf16[1600,512], index: 12, kind: input, shape index: {}]   ;;  %s28263_s13 = inlined_call_operand.vmem [shape: f32[1,512], index: 13, kind: input, shape index: {}]   ;;  %s28264_s14 = inlined_call_operand.vmem [shape: bf16[512,128], index: 14, kind: input, shape index: {}]   ;;  %s28265_s15 = inlined_call_operand.vmem [shape: f32[1,128], index: 15, kind: input, shape index: {}]   ;;  %s28266_s16 = inlined_call_operand.hbm [shape: f32[2,128], index: 16, kind: output, shape index: {}]  }
   0x1   :  { %28405 = sst [smem:[#allocation64_spill]] %s28250_s0 }
   0x2   :  { %s28406_s23 = sld [smem:[#allocation64_spill]]  ;;  %s20454_s19 = smov 28   ;;  %v18411_v14 = vld [vmem:[%s28251_s1 + $0xc] ss:$28 sps:$4 sm:$0xff]   ;;  %v18413_v15 = vld [vmem:[%s28251_s1 + $0x4] ss:$28 sps:$4 sm:$0xff]  }
   0x3   :  { %v18415_v16 = vld [vmem:[%s28251_s1 + $0x8] ss:$28 sps:$4 sm:$0xff]   ;;  %v18416_v17 = vld [vmem:[%s28251_s1] ss:$28 sps:$4 sm:$0xff]   ;;  %v28268_v18 = vmov 0   ;;  %s20456_s24 = smov 56   ;;  %541 = vmatprep.subr.bf16.mxu1 %v18411_v14  ;;  %470 = vmatprep.subr.bf16.mxu0 %v18413_v15 }
   0x4   :  { %502 = vmatprep.mubr.bf16.mxu0 %v28268_v18  ;;  %573 = vmatprep.mubr.bf16.mxu1 %v28268_v18  ;;  %v18417_v20 = vld [vmem:[%s28251_s1 + $0x44] ss:$28 sps:$4 sm:$0xff]   ;;  %v18419_v23 = vld [vmem:[%s28251_s1 + $0x3c] ss:$28 sps:$4 sm:$0xff]   ;;  %v18425_v28 = vld [vmem:[%s28251_s1 + $0x74] ss:$28 sps:$4 sm:$0xff]  }
   0x5   :  { %542 = vmatpush1.bf16.msra.mxu1 %v18415_v16  ;;  %471 = vmatpush1.bf16.msra.mxu0 %v18416_v17  ;;  %v18421_v25 = vld [vmem:[%s28251_s1 + $0x40] ss:$28 sps:$4 sm:$0xff]   ;;  %v18422_v26 = vld [vmem:[%s28251_s1 + $0x38] ss:$28 sps:$4 sm:$0xff]   ;;  %v18428_v31 = vld [vmem:[%s28251_s1 + $0x70] ss:$28 sps:$4 sm:$0xff]  }
   0x6   :  { %543 = vmatprep.subr.bf16.mxu1 %v18417_v20  ;;  %472 = vmatprep.subr.bf16.mxu0 %v18419_v23  ;;  %v18423_v27 = vld [vmem:[%s28251_s1 + $0x7c] ss:$28 sps:$4 sm:$0xff]   ;;  %v18429_v32 = vld [vmem:[%s28251_s1 + $0xb4] ss:$28 sps:$4 sm:$0xff]   ;;  %v18431_v33 = vld [vmem:[%s28251_s1 + $0xac] ss:$28 sps:$4 sm:$0xff]  }
   0x7   :  { %v18427_v29 = vld [vmem:[%s28251_s1 + $0x78] ss:$28 sps:$4 sm:$0xff]   ;;  %v18433_v34 = vld [vmem:[%s28251_s1 + $0xb0] ss:$28 sps:$4 sm:$0xff]   ;;  %v18434_v35 = vld [vmem:[%s28251_s1 + $0xa8] ss:$28 sps:$4 sm:$0xff]  }
   0x8   :  { %v14991_v0 = vld [vmem:[%s28406_s23 + $0x20] sm:$0x7f]  ;;  %v20555_v1 = vld [vmem:[%s28406_s23 + $0x30] sm:$0x3f]  ;;  %v20577_v9 = vld [vmem:[%s28406_s23 + $0x18] sm:$0x7f] }
   0x9   :  { %v18171_v2 = vpack.i.bf16 %v14991_v0, %v20555_v1  ;;  %v75_v3 = vld [vmem:[%s28406_s23 + $0x1] sm:$0x3f]  ;;  %v14994_v4 = vld [vmem:[%s28406_s23 + $0x30] sm:$0x7f]  ;;  %v20582_v10 = vld [vmem:[%s28406_s23 + $0x38] sm:$0x3f]  ;;  %544 = vmatpush1.bf16.msra.mxu1 %v18421_v25  ;;  %473 = vmatpush1.bf16.msra.mxu0 %v18422_v26 }
   0xa   :  { %v14995_v5 = vld [vmem:[%s28406_s23 + $0x11] sm:$0x3f]  ;;  %v18176_v7 = vpack.i.bf16 %v14994_v4, %v75_v3  ;;  %v14998_v11 = vld [vmem:[%s28406_s23 + $0x28] sm:$0x7f]  ;;  %v18191_v19 = vpack.i.bf16 %v20582_v10, %v20577_v9  ;;  %v15002_v21 = vld [vmem:[%s28406_s23 + $0x38] sm:$0x7f]  ;;  %545 = vmatprep.subr.bf16.mxu1 %v18423_v27  ;;  %474 = vmatprep.subr.bf16.mxu0 %v18425_v28 }
   0xb   :  { %v20570_v6 = vld [vmem:[%s28406_s23 + $0x10] sm:$0x7f]  ;;  %18172 = vrot.lane.b32.xlu0 %v18171_v2, %s20454_s19  ;;  %v15001_v12 = vld [vmem:[%s28406_s23 + $0x9] sm:$0x3f]  ;;  %v18186_v13 = vpack.i.bf16 %v14995_v5, %v14991_v0  ;;  %v15003_v22 = vld [vmem:[%s28406_s23 + $0x19] sm:$0x3f] }
   0xc   :  { %v18181_v8 = vpack.i.bf16 %v75_v3, %v20570_v6  ;;  %v18196_v24 = vpack.i.bf16 %v15001_v12, %v14998_v11  ;;  %v18206_v30 = vpack.i.bf16 %v15003_v22, %v15002_v21  ;;  %v18435_v36 = vld [vmem:[%s28251_s1 + $0xec] ss:$28 sps:$4 sm:$0xff]   ;;  %v18437_v37 = vld [vmem:[%s28251_s1 + $0xe4] ss:$28 sps:$4 sm:$0xff]   ;;  %v234_v39 = vld [vmem:[%s28251_s1 + $0x118] sm:$0x33] }
   0xd   :  { %546 = vmatpush1.bf16.msra.mxu1 %v18427_v29  ;;  %475 = vmatpush1.bf16.msra.mxu0 %v18428_v31  ;;  %v235_v38 = vld [vmem:[%s28251_s1 + $0x120] sm:$0x33]  ;;  %vm183_vm0 = vcmask 1041408   ;;  %v15040_v44 = vcombine.high %v234_v39, %v234_v39  ;;  %v15039_v45 = vcombine.low %v234_v39, %v234_v39  ;;  %v20676_v46 = vld [vmem:[%s28251_s1 + $0x18] ss:$28 sps:$4 sm:$0xff]   ;;  %vm68_vm1 = vcmask 228352  }
   0xe   :  { %18182 = vrot.lane.b32.xlu1 %v18181_v8, %s20454_s19  ;;  %547 = vmatprep.subr.bf16.mxu1 %v18429_v32  ;;  %v18439_v40 = vld [vmem:[%s28251_s1 + $0xe8] ss:$28 sps:$4 sm:$0xff]   ;;  %v18440_v41 = vld [vmem:[%s28251_s1 + $0xe0] ss:$28 sps:$4 sm:$0xff]   ;;  %v15042_v42 = vcombine.high %v235_v38, %v235_v38  ;;  %v15041_v43 = vcombine.low %v235_v38, %v235_v38  ;;  %v18449_v49 = vld [vmem:[%s28251_s1 + $0x14] ss:$28 sps:$4 sm:$0xff]  }
   0xf   :  { %18177 = vrot.lane.b32.xlu0 %v18176_v7, %s20456_s24  ;;  %476 = vmatprep.subr.bf16.mxu0 %v18431_v33  ;;  %v450_v48 = vsel %vm183_vm0, %v15039_v45, 0  ;;  %v14992_v51 = vld [vmem:[%s28406_s23 + $0x20] sm:$0x3f]  ;;  %vm70_vm2 = vcmask 457728   ;;  %vm177_vm3 = vcmask 1046528   ;;  %vm179_vm4 = vcmask 1044480  }
  0x10   :  { %v456_v47 = vsel %vm183_vm0, %v15041_v43, 0  ;;  %v55_v52 = vld [vmem:[%s28406_s23] sm:$0x7f]  ;;  %v14996_v3 = vld [vmem:[%s28406_s23 + $0x8] sm:$0x7f]  ;;  %vm436_vm5 = vcmask 687104  }
  0x11   :  { %548 = vmatpush1.bf16.msra.mxu1 %v18433_v34  ;;  %477 = vmatpush1.bf16.msra.mxu0 %v18434_v35  ;;  %v14999_v4 = vld [vmem:[%s28406_s23 + $0x28] sm:$0x3f]  ;;  %v20726_v28 = vld [vmem:[%s28251_s1 + $0x130] ss:$0 sps:$4 sm:$0x33]   ;;  %vm181_vm6 = vcmask 1043456  }
  0x12   :  { %18187 = vrot.lane.b32.xlu1 %v18186_v13, %s20456_s24  ;;  %549 = vmatprep.subr.bf16.mxu1 %v18435_v36  ;;  %v20710_v16 = vld [vmem:[%s28251_s1 + $0x128] sm:$0x33]  ;;  %vm185_vm7 = vcmask 1040384   ;;  %vm188_vm8 = vcmask 1045504   ;;  %vm825_vm9 = vcmask 523264   ;;  %vm837_vm10 = vcmask 519168  }
  0x13   :  { %18192 = vrot.lane.b32.xlu0 %v18191_v19, %s20454_s19  ;;  %478 = vmatprep.subr.bf16.mxu0 %v18437_v37  ;;  %v18446_v22 = vld [vmem:[%s28251_s1 + $0x50] ss:$28 sps:$4 sm:$0xff]   ;;  %v18450_v39 = vld [vmem:[%s28251_s1 + $0x88] ss:$28 sps:$4 sm:$0xff]   ;;  %vm20458_vm11 = vmmov 0  }
  0x14   :  { %v18447_v27 = vld [vmem:[%s28251_s1 + $0x10] ss:$28 sps:$4 sm:$0xff]   ;;  %v18451_v45 = vld [vmem:[%s28251_s1 + $0x48] ss:$28 sps:$4 sm:$0xff]  }
  0x15   :  { %550 = vmatpush1.bf16.msra.mxu1 %v18439_v40  ;;  %479 = vmatpush1.bf16.msra.mxu0 %v18440_v41  ;;  %v18453_v31 = vld [vmem:[%s28251_s1 + $0x4c] ss:$28 sps:$4 sm:$0xff]   ;;  %v15043_v40 = vcombine.low %v20710_v16, %v20710_v16 }
  0x16   :  { %18197 = vrot.lane.b32.xlu1 %v18196_v24, %s20456_s24  ;;  %15051 = vmatprep.subr.msk.bf16.mxu1 %vm183_vm0, %v15042_v42 }
  0x17   :  { %18202 = vrot.lane.b32.xlu0 %v18196_v24, %s20454_s19  ;;  %15046 = vmatprep.subr.msk.bf16.mxu0 %vm183_vm0, %v15040_v44 }
  0x19   :  { %552 = vmatpush1.bf16.msra.mxu1 %v456_v47  ;;  %481 = vmatpush1.bf16.msra.mxu0 %v450_v48 }
  0x1a   :  { %18207 = vrot.lane.b32.xlu1 %v18206_v30, %s20456_s24  ;;  %17276 = vmatprep.subr.bf16.mxu1 %v20676_v46 }
  0x1b   :  { %612 = vmatprep.subr.bf16.mxu0 %v18449_v49 }
  0x7d   :  { %v18173_v50 = vpop.permute.xlu0 %18172 }
  0x7e   :  { %v18175_v53 = vunpack.i.h.bf16 %v18173_v50  ;;  %v18174_v54 = vunpack.i.l.bf16 %v18173_v50  ;;  %v18454_v50 = vld [vmem:[%s28251_s1 + $0xc0] ss:$28 sps:$4 sm:$0xff]  }
  0x80   :  { %v18183_v55 = vpop.permute.xlu1 %18182  ;;  %v84_v61 = vsel %vm68_vm1, %v14992_v51, %v18174_v54  ;;  %v94_v62 = vsel %vm68_vm1, %v20570_v6, %v18175_v53  ;;  %v462_v51 = vsel %vm183_vm0, %v15043_v40, 0  ;;  %v18457_v54 = vld [vmem:[%s28251_s1 + $0x84] ss:$28 sps:$4 sm:$0xff]   ;;  %v1029_v40 = vld [vmem:[%s28252_s2 + $0x128] sm:$0xff] }
  0x81   :  { %v18185_v56 = vunpack.i.h.bf16 %v18183_v55  ;;  %v18184_v57 = vunpack.i.l.bf16 %v18183_v55  ;;  %v18178_v58 = vpop.permute.xlu0 %18177 }
  0x82   :  { %v18180_v59 = vunpack.i.h.bf16 %v18178_v58  ;;  %v18179_v60 = vunpack.i.l.bf16 %v18178_v58 }
  0x83   :  { %v104_v63 = vsel %vm68_vm1, %v20555_v1, %v18185_v56  ;;  %v69_v0 = vsel %vm68_vm1, %v55_v52, %v18184_v57  ;;  %v18455_v56 = vld [vmem:[%s28251_s1 + $0x80] ss:$28 sps:$4 sm:$0xff]  }
  0x84   :  { %v18188_v2 = vpop.permute.xlu1 %18187  ;;  %v85_v5 = vsel %vm70_vm2, %v84_v61, %v18179_v60  ;;  %v95_v7 = vsel %vm70_vm2, %v94_v62, %v18180_v59  ;;  %v18460_v57 = vld [vmem:[%s28251_s1 + $0xbc] ss:$28 sps:$4 sm:$0xff]  }
  0x85   :  { %v18190_v8 = vunpack.i.h.bf16 %v18188_v2  ;;  %v18189_v6 = vunpack.i.l.bf16 %v18188_v2  ;;  %v157_v11 = vrot.slane %v85_v5, 1  ;;  %v160_v12 = vrot.slane %v95_v7, 3  ;;  %v18193_v1 = vpop.permute.xlu0 %18192  ;;  %v18461_v59 = vld [vmem:[%s28251_s1 + $0xf8] ss:$28 sps:$4 sm:$0xff]   ;;  %v18462_v2 = vld [vmem:[%s28251_s1 + $0xf0] ss:$28 sps:$4 sm:$0xff]  }
  0x86   :  { %v18195_v14 = vunpack.i.h.bf16 %v18193_v1  ;;  %v18194_v15 = vunpack.i.l.bf16 %v18193_v1  ;;  %v18458_v62 = vld [vmem:[%s28251_s1 + $0xb8] ss:$28 sps:$4 sm:$0xff]   ;;  %v1008_v5 = vld [vmem:[%s28252_s2 + $0x80] sm:$0xff]  ;;  %v1009_v7 = vld [vmem:[%s28252_s2 + $0x88] sm:$0xff] }
  0x87   :  { %v71_v13 = vsel %vm70_vm2, %v69_v0, %v18189_v6  ;;  %v105_v17 = vsel %vm70_vm2, %v104_v63, %v18190_v8  ;;  %v180_v21 = vsel %vm179_vm4, %v157_v11, %v160_v12  ;;  %v18464_v63 = vld [vmem:[%s28251_s1 + $0xf4] ss:$28 sps:$4 sm:$0xff]   ;;  %v20823_v8 = vpack.c.bf16 %v1009_v7, %v1008_v5  ;;  %v992_v6 = vld [vmem:[%s28252_s2] sm:$0xff]  ;;  %v1003_v7 = vld [vmem:[%s28252_s2 + $0x58] sm:$0xff] }
  0x88   :  { %v18198_v19 = vpop.permute.xlu1 %18197  ;;  %v178_v20 = vsel %vm177_vm3, %v71_v13, %v157_v11  ;;  %v134_v23 = vsel %vm68_vm1, %v14999_v4, %v18195_v14  ;;  %v120_v24 = vsel %vm68_vm1, %v14996_v3, %v18194_v15  ;;  %v163_v35 = vrot.slane %v105_v17, 4  ;;  %v993_v11 = vld [vmem:[%s28252_s2 + $0x8] sm:$0xff]  ;;  %v1024_v15 = vld [vmem:[%s28252_s2 + $0x100] sm:$0xff]  ;;  %v1002_v5 = vld [vmem:[%s28252_s2 + $0x50] sm:$0xff] }
  0x89   :  { %v18200_v25 = vunpack.i.h.bf16 %v18198_v19  ;;  %v18199_v26 = vunpack.i.l.bf16 %v18198_v19  ;;  %v18203_v29 = vpop.permute.xlu0 %18202  ;;  %v20728_v30 = vpack.c.bf16 %v180_v21, %v178_v20  ;;  %v15044_v3 = vcombine.high %v20710_v16, %v20710_v16  ;;  %v1041_v13 = vld [vmem:[%s28252_s2 + $0x188] sm:$0xff]  ;;  %v1010_v19 = vld [vmem:[%s28252_s2 + $0x90] sm:$0xff]  ;;  %v1011_v20 = vld [vmem:[%s28252_s2 + $0x98] sm:$0xff] }
  0x8a   :  { %v18205_v33 = vunpack.i.h.bf16 %v18203_v29  ;;  %v18204_v34 = vunpack.i.l.bf16 %v18203_v29  ;;  %v182_v53 = vsel %vm181_vm6, %v160_v12, %v163_v35  ;;  %v1040_v12 = vld [vmem:[%s28252_s2 + $0x180] sm:$0xff]  ;;  %v20834_v1 = vpack.c.bf16 %v993_v11, %v992_v6  ;;  %v1025_v16 = vld [vmem:[%s28252_s2 + $0x108] sm:$0xff]  ;;  %v1050_v6 = vld [vmem:[%s28252_s2 + $0x1d0] sm:$0xff] }
  0x8b   :  { %v121_v32 = vsel %vm70_vm2, %v120_v24, %v18199_v26  ;;  %v135_v36 = vsel %vm70_vm2, %v134_v23, %v18200_v25  ;;  %15047 = vmatmul.mubr.msk.bf16.vlgmr.msra.gmra.mrb[0].mxu0 %vm436_vm5, %v20728_v30  ;;  %15052 = vmatmul.mubr.msk.bf16.vlgmr.msra.gmra.mrb[0].mxu1 %vm436_vm5, %v20728_v30  ;;  %v20840_v14 = vpack.c.bf16 %v1041_v13, %v1040_v12  ;;  %v995_v23 = vld [vmem:[%s28252_s2 + $0x18] sm:$0xff]  ;;  %v1042_v24 = vld [vmem:[%s28252_s2 + $0x190] sm:$0xff] }
  0x8c   :  { %v166_v37 = vrot.slane %v121_v32, 6  ;;  %v18208_v38 = vpop.permute.xlu1 %18207  ;;  %v154_v41 = vsel %vm68_vm1, %v20582_v10, %v18205_v33  ;;  %v144_v42 = vsel %vm68_vm1, %v20577_v9, %v18204_v34  ;;  %17277 = vmatpush3.bf16.msra.mxu1 %v20676_v46  ;;  %512 = vmatprep.mubr.bf16.mxu0 %v28268_v18  ;;  %v468_v46 = vsel %vm183_vm0, %v20726_v28, 0  ;;  %v1043_v26 = vld [vmem:[%s28252_s2 + $0x198] sm:$0xff]  ;;  %v1013_v32 = vld [vmem:[%s28252_s2 + $0xa8] sm:$0xff]  ;;  %v996_v34 = vld [vmem:[%s28252_s2 + $0x20] sm:$0xff] }
  0x8d   :  { %v18210_v43 = vunpack.i.h.bf16 %v18208_v38  ;;  %v18209_v44 = vunpack.i.l.bf16 %v18208_v38  ;;  %17278 = vmatprep.subr.bf16.mxu1 %v18446_v22  ;;  %583 = vmatprep.mubr.bf16.mxu1 %v28268_v18  ;;  %v169_v48 = vrot.slane %v135_v36, 7  ;;  %v20849_v17 = vpack.c.bf16 %v1025_v16, %v1024_v15  ;;  %v1044_v36 = vld [vmem:[%s28252_s2 + $0x1a0] sm:$0xff]  ;;  %v1045_v38 = vld [vmem:[%s28252_s2 + $0x1a8] sm:$0xff]  ;;  %v1051_v12 = vld [vmem:[%s28252_s2 + $0x1d8] sm:$0xff] }
  0x8e   :  { %v184_v47 = vsel %vm183_vm0, %v163_v35, %v166_v37  ;;  %613 = vmatpush1.bf16.msra.mxu0 %v18447_v27  ;;  %v20859_v21 = vpack.c.bf16 %v1011_v20, %v1010_v19  ;;  %v1026_v27 = vld [vmem:[%s28252_s2 + $0x110] sm:$0xff]  ;;  %v20882_v29 = vpack.c.bf16 %v1043_v26, %v1042_v24  ;;  %v997_v35 = vld [vmem:[%s28252_s2 + $0x28] sm:$0xff]  ;;  %v21014_v11 = vpack.c.bf16 %v1003_v7, %v1002_v5  ;;  %v1035_v15 = vld [vmem:[%s28252_s2 + $0x158] sm:$0xff] }
  0x8f   :  { %v155_v10 = vsel %vm70_vm2, %v154_v41, %v18210_v43  ;;  %v145_v9 = vsel %vm70_vm2, %v144_v42, %v18209_v44  ;;  %614 = vmatprep.subr.bf16.mxu0 %v18453_v31  ;;  %v191_v55 = vpack.c.bf16 %v184_v47, %v182_v53  ;;  %v186_v58 = vsel %vm185_vm7, %v166_v37, %v169_v48  ;;  %v1012_v31 = vld [vmem:[%s28252_s2 + $0xa0] sm:$0xff]  ;;  %v1014_v43 = vld [vmem:[%s28252_s2 + $0xb0] sm:$0xff]  ;;  %v1015_v44 = vld [vmem:[%s28252_s2 + $0xb8] sm:$0xff] }
  0x90   :  { %v175_v49 = vrot.slane %v155_v10, 2  ;;  %v172_v52 = vrot.slane %v145_v9, 1  ;;  %17279 = vmatpush3.bf16.msra.mxu1 %v18446_v22  ;;  %v994_v22 = vld [vmem:[%s28252_s2 + $0x10] sm:$0xff]  ;;  %v20894_v33 = vpack.c.bf16 %v1013_v32, %v1012_v31  ;;  %v20906_v37 = vpack.c.bf16 %v997_v35, %v996_v34  ;;  %v999_v9 = vld [vmem:[%s28252_s2 + $0x38] sm:$0xff]  ;;  %v1016_v53 = vld [vmem:[%s28252_s2 + $0xc0] sm:$0xff] }
  0x91   :  { %17280 = vmatprep.subr.bf16.mxu1 %v18450_v39  ;;  %v20870_v25 = vpack.c.bf16 %v995_v23, %v994_v22  ;;  %v20918_v41 = vpack.c.bf16 %v1045_v38, %v1044_v36  ;;  %v998_v10 = vld [vmem:[%s28252_s2 + $0x30] sm:$0xff]  ;;  %v1047_v48 = vld [vmem:[%s28252_s2 + $0x1b8] sm:$0xff]  ;;  %v21026_v16 = vpack.c.bf16 %v1051_v12, %v1050_v6  ;;  %v1020_v20 = vld [vmem:[%s28252_s2 + $0xe0] sm:$0xff] }
  0x92   :  { %615 = vmatpush1.bf16.msra.mxu0 %v18451_v45  ;;  %v187_v60 = vsel %vm177_vm3, %v186_v58, %v172_v52  ;;  %v189_v61 = vsel %vm188_vm8, %v172_v52, %v175_v49  ;;  %v193_v4 = vpack.c.bf16 %v175_v49, %v175_v49  ;;  %v20930_v45 = vpack.c.bf16 %v1015_v44, %v1014_v43  ;;  %v1046_v47 = vld [vmem:[%s28252_s2 + $0x1b0] sm:$0xff]  ;;  %v1048_v58 = vld [vmem:[%s28252_s2 + $0x1c0] sm:$0xff]  ;;  %v1021_v22 = vld [vmem:[%s28252_s2 + $0xe8] sm:$0xff] }
  0x93   :  { %15048 = vmatmul.mubr.msk.bf16.gmra.mrb[4].mxu0 %vm436_vm5, %v191_v55  ;;  %15053 = vmatmul.mubr.msk.bf16.gmra.mrb[4].mxu1 %vm436_vm5, %v191_v55  ;;  %v192_v0 = vpack.c.bf16 %v189_v61, %v187_v60  ;;  %v1030_v49 = vld [vmem:[%s28252_s2 + $0x130] sm:$0xff]  ;;  %v1049_v60 = vld [vmem:[%s28252_s2 + $0x1c8] sm:$0xff]  ;;  %v1032_v61 = vld [vmem:[%s28252_s2 + $0x140] sm:$0xff]  ;;  %28411 = vst [vmem:[#allocation9_spill] sm:$0xff] %v21026_v16  ;;  %v21038_v23 = vpack.c.bf16 %v1021_v22, %v1020_v20 }
  0x94   :  { %17281 = vmatpush3.bf16.msra.mxu1 %v18450_v39  ;;  %522 = vmatprep.mubr.bf16.mxu0 %v28268_v18  ;;  %v1028_v39 = vld [vmem:[%s28252_s2 + $0x120] sm:$0xff]  ;;  %v1034_v13 = vld [vmem:[%s28252_s2 + $0x150] sm:$0xff]  ;;  %v1005_v26 = vld [vmem:[%s28252_s2 + $0x68] sm:$0xff] }
  0x95   :  { %593 = vmatprep.mubr.bf16.mxu1 %v28268_v18  ;;  %17282 = vmatprep.subr.bf16.mxu1 %v18454_v50  ;;  %v20920_v42 = vpack.c.bf16 %v1029_v40, %v1028_v39  ;;  %v21028_v19 = vpack.c.bf16 %v1035_v15, %v1034_v13  ;;  %v1004_v24 = vld [vmem:[%s28252_s2 + $0x60] sm:$0xff]  ;;  %v1053_v31 = vld [vmem:[%s28252_s2 + $0x1e8] sm:$0xff]  ;;  %v1022_v38 = vld [vmem:[%s28252_s2 + $0xf0] sm:$0xff] }
  0x96   :  { %616 = vmatprep.subr.bf16.mxu0 %v18457_v54  ;;  %v1017_v54 = vld [vmem:[%s28252_s2 + $0xc8] sm:$0xff]  ;;  %v1036_v32 = vld [vmem:[%s28252_s2 + $0x160] sm:$0xff]  ;;  %v1023_v39 = vld [vmem:[%s28252_s2 + $0xf8] sm:$0xff] }
  0x97   :  { %617 = vmatpush1.bf16.msra.mxu0 %v18455_v56  ;;  %v1000_v56 = vld [vmem:[%s28252_s2 + $0x40] sm:$0xff]  ;;  %28412 = vst [vmem:[#allocation10_spill] sm:$0xff] %v21028_v19  ;;  %v1037_v34 = vld [vmem:[%s28252_s2 + $0x168] sm:$0xff]  ;;  %v21074_v40 = vpack.c.bf16 %v1023_v39, %v1022_v38  ;;  %v1006_v43 = vld [vmem:[%s28252_s2 + $0x70] sm:$0xff] }
  0x98   :  { %17283 = vmatpush3.bf16.msra.mxu1 %v18454_v50  ;;  %618 = vmatprep.subr.bf16.mxu0 %v18460_v57  ;;  %v1031_v50 = vld [vmem:[%s28252_s2 + $0x138] sm:$0xff]  ;;  %v1001_v57 = vld [vmem:[%s28252_s2 + $0x48] sm:$0xff]  ;;  %v21064_v36 = vpack.c.bf16 %v1037_v34, %v1036_v32 }
  0x99   :  { %17284 = vmatprep.subr.bf16.mxu1 %v18461_v59  ;;  %v20956_v52 = vpack.c.bf16 %v1031_v50, %v1030_v49  ;;  %28416 = vst [vmem:[#allocation14_spill] sm:$0xff] %v21074_v40  ;;  %v1007_v44 = vld [vmem:[%s28252_s2 + $0x78] sm:$0xff] }
  0x9a   :  { %28415 = vst [vmem:[#allocation13_spill] sm:$0xff] %v21064_v36  ;;  %v1039_v49 = vld [vmem:[%s28252_s2 + $0x178] sm:$0xff] }
  0x9b   :  { %15049 = vmatmul.mubr.msk.bf16.gmra.mrb[8].mxu0 %vm436_vm5, %v192_v0  ;;  %15054 = vmatmul.mubr.msk.bf16.gmra.mrb[8].mxu1 %vm436_vm5, %v192_v0  ;;  %28408 = vst [vmem:[#allocation6_spill] sm:$0xff] %v20956_v52 }
  0x9c   :  { %619 = vmatpush1.bf16.msra.mxu0 %v18458_v62  ;;  %17285 = vmatpush3.bf16.msra.mxu1 %v18461_v59  ;;  %v20978_v59 = vpack.c.bf16 %v1001_v57, %v1000_v56  ;;  %v1033_v62 = vld [vmem:[%s28252_s2 + $0x148] sm:$0xff] }
  0x9d   :  { %532 = vmatprep.mubr.bf16.mxu0 %v28268_v18  ;;  %603 = vmatprep.mubr.bf16.mxu1 %v28268_v18  ;;  %v1073_v56 = vld [vmem:[%s28252_s2 + $0x288] sm:$0xff] }
  0x9e   :  { %620 = vmatprep.subr.bf16.mxu0 %v18464_v63  ;;  %18160 = vmatprep.subr.msk.bf16.mxu1 %vm183_vm0, %v20726_v28  ;;  %v1027_v28 = vld [vmem:[%s28252_s2 + $0x118] sm:$0xff]  ;;  %v20990_v63 = vpack.c.bf16 %v1049_v60, %v1048_v58  ;;  %v28270_v58 = vmov 0.0|0.0  }
  0xa0   :  { %621 = vmatpush1.bf16.msra.mxu0 %v18462_v2  ;;  %17287 = vmatpush3.bf16.msra.mxu1 %v468_v46  ;;  %v20942_v46 = vpack.c.bf16 %v999_v9, %v998_v10  ;;  %28409 = vst [vmem:[#allocation7_spill] sm:$0xff] %v20990_v63  ;;  %v1018_v2 = vld [vmem:[%s28252_s2 + $0xd0] sm:$0xff]  ;;  %v21086_v9 = vpack.c.bf16 %v1007_v44, %v1006_v43 }
  0xa1   :  { %15056 = vmatprep.subr.msk.bf16.mxu0 %vm183_vm0, %v15044_v3  ;;  %17437 = vmatprep.subr.bf16.mxu1 %v20840_v14  ;;  %v1019_v3 = vld [vmem:[%s28252_s2 + $0xd8] sm:$0xff]  ;;  %v1054_v10 = vld [vmem:[%s28252_s2 + $0x1f0] sm:$0xff] }
  0xa2   :  { %28417 = vst [vmem:[#allocation15_spill] sm:$0xff] %v21086_v9 }
  0xa3   :  { %15050 = vmatmul.mubr.msk.bf16.gmra.mrb[12].mxu0 %vm436_vm5, %v193_v4  ;;  %15055 = vmatmul.mubr.msk.bf16.gmra.mrb[12].mxu1 %vm436_vm5, %v193_v4 }
  0xa4   :  { %17288 = vmatprep.mubr.msk.bf16.mxu1 %vm436_vm5, %v20728_v30  ;;  %623 = vmatpush1.bf16.msra.mxu0 %v462_v51  ;;  %v20954_v51 = vpack.c.bf16 %v1047_v48, %v1046_v47  ;;  %v1055_v47 = vld [vmem:[%s28252_s2 + $0x1f8] sm:$0xff]  ;;  %v1038_v48 = vld [vmem:[%s28252_s2 + $0x170] sm:$0xff] }
  0xa5   :  { %644 = vmatprep.mubr.bf16.mxu0 %v28268_v18  ;;  %17405 = vmatprep.subr.bf16.mxu0 %v20823_v8  ;;  %v21098_v50 = vpack.c.bf16 %v1055_v47, %v1054_v10 }
  0xa6   :  { %28407 = vst [vmem:[#allocation5_spill] sm:$0xff] %v20954_v51 }
  0xa7   :  { %28418 = vst [vmem:[#allocation16_spill] sm:$0xff] %v21098_v50 }
  0xab   :  { %15057 = vmatmul.mubr.msk.bf16.vlgmr.msra.gmra.mrb[16].mxu0 %vm436_vm5, %v20728_v30  ;;  %17289 = vmatmul.mubr.msk.bf16.vlgmr.msra.gmra.mrb[16].mxu1 %vm436_vm5, %v191_v55  ;;  %v20884_v30 = vpack.c.bf16 %v1027_v28, %v1026_v27  ;;  %v1052_v27 = vld [vmem:[%s28252_s2 + $0x1e0] sm:$0xff]  ;;  %v21050_v28 = vpack.c.bf16 %v1005_v26, %v1004_v24 }
  0xac   :  { %17292 = vmatprep.mubr.msk.bf16.mxu1 %vm436_vm5, %v192_v0  ;;  %654 = vmatprep.mubr.bf16.mxu0 %v28268_v18  ;;  %v21062_v35 = vpack.c.bf16 %v1053_v31, %v1052_v27 }
  0xad   :  { %17407 = vmatpush3.bf16.msra.mxu0 %v20834_v1  ;;  %17439 = vmatpush3.bf16.msra.mxu1 %v20849_v17  ;;  %28413 = vst [vmem:[#allocation11_spill] sm:$0xff] %v21050_v28 }
  0xae   :  { %17409 = vmatprep.subr.bf16.mxu0 %v20859_v21  ;;  %17441 = vmatprep.subr.bf16.mxu1 %v20882_v29  ;;  %28414 = vst [vmem:[#allocation12_spill] sm:$0xff] %v21062_v35 }
  0xb1   :  { %17411 = vmatpush3.bf16.msra.mxu0 %v20870_v25  ;;  %17443 = vmatpush3.bf16.msra.mxu1 %v20884_v30 }
  0xb2   :  { %17413 = vmatprep.subr.bf16.mxu0 %v20894_v33  ;;  %17445 = vmatprep.subr.bf16.mxu1 %v20918_v41 }
  0xb3   :  { %15058 = vmatmul.mubr.msk.bf16.gmra.mrb[20].mxu0 %vm436_vm5, %v191_v55  ;;  %17293 = vmatmul.mubr.msk.bf16.gmra.mrb[20].mxu1 %vm436_vm5, %v193_v4  ;;  %v20967_v55 = vpack.c.bf16 %v1017_v54, %v1016_v53  ;;  %v21100_v53 = vpack.c.bf16 %v1039_v49, %v1038_v48  ;;  %v1072_v54 = vld [vmem:[%s28252_s2 + $0x280] sm:$0xff] }
  0xb4   :  { %664 = vmatprep.mubr.bf16.mxu0 %v28268_v18  ;;  %v21111_v57 = vpack.c.bf16 %v1073_v56, %v1072_v54 }
  0xb5   :  { %17415 = vmatpush3.bf16.msra.mxu0 %v20906_v37  ;;  %17447 = vmatpush3.bf16.msra.mxu1 %v20920_v42  ;;  %28419 = vst [vmem:[#allocation17_spill] sm:$0xff] %v21100_v53 }
  0xb6   :  { %17417 = vmatprep.subr.bf16.mxu0 %v20930_v45  ;;  %17449 = vmatprep.subr.bf16.mxu1 %v20954_v51  ;;  %28420 = vst [vmem:[#allocation18_spill] sm:$0xff] %v21111_v57 }
  0xb9   :  { %17419 = vmatpush3.bf16.msra.mxu0 %v20942_v46  ;;  %17451 = vmatpush3.bf16.msra.mxu1 %v20956_v52 }
  0xba   :  { %17421 = vmatprep.subr.bf16.mxu0 %v20967_v55  ;;  %17453 = vmatprep.subr.bf16.mxu1 %v20990_v63 }
  0xbb   :  { %15059 = vmatmul.mubr.msk.bf16.gmra.mrb[24].mxu0 %vm436_vm5, %v192_v0  ;;  %v20992_v0 = vpack.c.bf16 %v1033_v62, %v1032_v61 }
  0xbc   :  { %674 = vmatprep.mubr.bf16.mxu0 %v28268_v18 }
  0xbd   :  { %28410 = vst [vmem:[#allocation8_spill] sm:$0xff] %v20992_v0  ;;  %17423 = vmatpush3.bf16.msra.mxu0 %v20978_v59  ;;  %17455 = vmatpush3.bf16.msra.mxu1 %v20992_v0 }
  0xbe   :  { %17457 = vmatprep.subr.bf16.mxu1 %v21026_v16 }
  0xc1   :  { %17459 = vmatpush3.bf16.msra.mxu1 %v21028_v19 }
  0xc2   :  { %17461 = vmatprep.subr.bf16.mxu1 %v21062_v35 }
  0xc3   :  { %15060 = vmatmul.mubr.msk.bf16.gmra.mrb[28].mxu0 %vm436_vm5, %v193_v4  ;;  %v21002_v4 = vpack.c.bf16 %v1019_v3, %v1018_v2 }
  0xc5   :  { %17425 = vmatprep.subr.bf16.mxu0 %v21002_v4  ;;  %17463 = vmatpush3.bf16.msra.mxu1 %v21064_v36 }
  0xc6   :  { %17427 = vmatpush3.bf16.msra.mxu0 %v21014_v11  ;;  %17465 = vmatprep.subr.bf16.mxu1 %v21098_v50 }
  0xc7   :  { %17429 = vmatprep.subr.bf16.mxu0 %v21038_v23 }
  0xc9   :  { %17467 = vmatpush3.bf16.msra.mxu1 %v21100_v53 }
  0xca   :  { %17431 = vmatpush3.bf16.msra.mxu0 %v21050_v28  ;;  %17500 = vmatprep.subr.bf16.mxu1 %v28270_v58 }
  0xcb   :  { %17433 = vmatprep.subr.bf16.mxu0 %v21074_v40 }
  0xce   :  { %17435 = vmatpush3.bf16.msra.mxu0 %v21086_v9 }
  0xcf   :  { %17469 = vmatprep.subr.bf16.mxu0 %v21111_v57 }
 0x15e   :  { %v21115_v60 = vpop.f32.mrb[0].mxu0  ;;  %v21117_v61 = vpop.f32.mrb[0].mxu1 }
 0x15f   :  { %28421 = vst [vmem:[#allocation19_spill] sm:$0xff] %v21115_v60  ;;  %28422 = vst [vmem:[#allocation20_spill] sm:$0xff] %v21117_v61  ;;  %v21119_v62 = vpop.f32.mrb[1].mxu0  ;;  %v21121_v2 = vpop.f32.mrb[1].mxu1  ;;  %v846_v3 = vmul.f32 %v21115_v60, %v21115_v60  ;;  %v848_v5 = vmul.f32 %v21117_v61, %v21117_v61 }
 0x160   :  { %28423 = vst [vmem:[#allocation21_spill] sm:$0xff] %v21119_v62  ;;  %28424 = vst [vmem:[#allocation22_spill] sm:$0xff] %v21121_v2  ;;  %v847_v7 = vmul.f32 %v21119_v62, %v21119_v62  ;;  %v849_v6 = vmul.f32 %v21121_v2, %v21121_v2  ;;  %v21131_v12 = vpop.f32.mrb[2].mxu0  ;;  %v21133_v13 = vpop.f32.mrb[2].mxu1 }
 0x161   :  { %28425 = vst [vmem:[#allocation23_spill] sm:$0xff] %v21131_v12  ;;  %28426 = vst [vmem:[#allocation24_spill] sm:$0xff] %v21133_v13  ;;  %v747_v15 = vadd.f32 %v21131_v12, %v21115_v60  ;;  %v853_v20 = vmul.f32 %v21131_v12, %v21131_v12  ;;  %v773_v22 = vadd.f32 %v21133_v13, %v21117_v61  ;;  %v21143_v26 = vpop.f32.mrb[3].mxu0  ;;  %v21145_v27 = vpop.f32.mrb[3].mxu1 }
 0x162   :  { %v855_v24 = vmul.f32 %v21133_v13, %v21133_v13  ;;  %28427 = vst [vmem:[#allocation25_spill] sm:$0xff] %v21143_v26  ;;  %28428 = vst [vmem:[#allocation26_spill] sm:$0xff] %v21145_v27  ;;  %v760_v31 = vadd.f32 %v21143_v26, %v21119_v62  ;;  %v854_v32 = vmul.f32 %v21143_v26, %v21143_v26  ;;  %v1076_v13 = vld [vmem:[%s28252_s2 + $0x2a0] sm:$0xff] }
 0x163   :  { %v786_v34 = vadd.f32 %v21145_v27, %v21121_v2  ;;  %v856_v38 = vmul.f32 %v21145_v27, %v21145_v27  ;;  %v895_v39 = vadd.f32 %v853_v20, %v846_v3 }
 0x164   :  { %v921_v43 = vadd.f32 %v855_v24, %v848_v5  ;;  %v908_v44 = vadd.f32 %v854_v32, %v847_v7 }
 0x165   :  { %v934_v10 = vadd.f32 %v856_v38, %v849_v6 }
 0x166   :  { %v21155_v47 = vpop.f32.mrb[4].mxu0  ;;  %v21157_v48 = vpop.f32.mrb[4].mxu1 }
 0x167   :  { %28429 = vst [vmem:[#allocation27_spill] sm:$0xff] %v21155_v47  ;;  %28430 = vst [vmem:[#allocation28_spill] sm:$0xff] %v21157_v48  ;;  %v748_v49 = vadd.f32 %v747_v15, %v21155_v47  ;;  %v860_v54 = vmul.f32 %v21155_v47, %v21155_v47  ;;  %v774_v56 = vadd.f32 %v773_v22, %v21157_v48  ;;  %v21165_v58 = vpop.f32.mrb[5].mxu0  ;;  %v21167_v3 = vpop.f32.mrb[5].mxu1 }
 0x168   :  { %v862_v18 = vmul.f32 %v21157_v48, %v21157_v48  ;;  %28431 = vst [vmem:[#allocation29_spill] sm:$0xff] %v21165_v58  ;;  %28432 = vst [vmem:[#allocation30_spill] sm:$0xff] %v21167_v3  ;;  %v761_v5 = vadd.f32 %v760_v31, %v21165_v58  ;;  %v861_v7 = vmul.f32 %v21165_v58, %v21165_v58  ;;  %v21175_v20 = vpop.f32.mrb[6].mxu0  ;;  %v21177_v22 = vpop.f32.mrb[6].mxu1 }
 0x169   :  { %v787_v6 = vadd.f32 %v786_v34, %v21167_v3  ;;  %v863_v15 = vmul.f32 %v21167_v3, %v21167_v3  ;;  %28433 = vst [vmem:[#allocation31_spill] sm:$0xff] %v21175_v20  ;;  %28434 = vst [vmem:[#allocation32_spill] sm:$0xff] %v21177_v22  ;;  %v896_v24 = vadd.f32 %v895_v39, %v860_v54  ;;  %v21182_v31 = vpop.f32.mrb[7].mxu0  ;;  %v21184_v27 = vpop.f32.mrb[7].mxu1 }
 0x16a   :  { %v922_v32 = vadd.f32 %v921_v43, %v862_v18  ;;  %v749_v38 = vadd.f32 %v748_v49, %v21175_v20  ;;  %v867_v2 = vmul.f32 %v21175_v20, %v21175_v20  ;;  %28435 = vst [vmem:[#allocation33_spill] sm:$0xff] %v21182_v31  ;;  %28436 = vst [vmem:[#allocation34_spill] sm:$0xff] %v21184_v27 }
 0x16b   :  { %v909_v48 = vadd.f32 %v908_v44, %v861_v7  ;;  %v935_v34 = vadd.f32 %v934_v10, %v863_v15  ;;  %v775_v58 = vadd.f32 %v774_v56, %v21177_v22  ;;  %v869_v3 = vmul.f32 %v21177_v22, %v21177_v22 }
 0x16c   :  { %v897_v47 = vadd.f32 %v896_v24, %v867_v2  ;;  %v762_v39 = vadd.f32 %v761_v5, %v21182_v31  ;;  %v868_v18 = vmul.f32 %v21182_v31, %v21182_v31  ;;  %v788_v43 = vadd.f32 %v787_v6, %v21184_v27 }
 0x16d   :  { %v923_v49 = vadd.f32 %v922_v32, %v869_v3  ;;  %v870_v54 = vmul.f32 %v21184_v27, %v21184_v27 }
 0x16e   :  { %v910_v20 = vadd.f32 %v909_v48, %v868_v18  ;;  %v21195_v10 = vpop.f32.mrb[8].mxu0  ;;  %v21197_v56 = vpop.f32.mrb[8].mxu1 }
 0x16f   :  { %v936_v44 = vadd.f32 %v935_v34, %v870_v54  ;;  %28437 = vst [vmem:[#allocation35_spill] sm:$0xff] %v21195_v10  ;;  %28438 = vst [vmem:[#allocation36_spill] sm:$0xff] %v21197_v56  ;;  %v750_v7 = vadd.f32 %v749_v38, %v21195_v10  ;;  %v874_v2 = vmul.f32 %v21195_v10, %v21195_v10  ;;  %v21205_v3 = vpop.f32.mrb[9].mxu0  ;;  %v21207_v15 = vpop.f32.mrb[9].mxu1 }
 0x170   :  { %v776_v5 = vadd.f32 %v775_v58, %v21197_v56  ;;  %v876_v6 = vmul.f32 %v21197_v56, %v21197_v56  ;;  %28439 = vst [vmem:[#allocation37_spill] sm:$0xff] %v21205_v3  ;;  %28440 = vst [vmem:[#allocation38_spill] sm:$0xff] %v21207_v15  ;;  %v763_v48 = vadd.f32 %v762_v39, %v21205_v3  ;;  %v21215_v34 = vpop.f32.mrb[10].mxu0  ;;  %v21217_v58 = vpop.f32.mrb[10].mxu1 }
 0x171   :  { %v875_v24 = vmul.f32 %v21205_v3, %v21205_v3  ;;  %v789_v32 = vadd.f32 %v788_v43, %v21207_v15  ;;  %v877_v38 = vmul.f32 %v21207_v15, %v21207_v15  ;;  %28441 = vst [vmem:[#allocation39_spill] sm:$0xff] %v21215_v34  ;;  %28442 = vst [vmem:[#allocation40_spill] sm:$0xff] %v21217_v58  ;;  %v21222_v39 = vpop.f32.mrb[11].mxu0  ;;  %v21224_v10 = vpop.f32.mrb[11].mxu1 }
 0x172   :  { %v898_v18 = vadd.f32 %v897_v47, %v874_v2  ;;  %v924_v54 = vadd.f32 %v923_v49, %v876_v6  ;;  %v751_v27 = vadd.f32 %v750_v7, %v21215_v34  ;;  %v881_v56 = vmul.f32 %v21215_v34, %v21215_v34  ;;  %28443 = vst [vmem:[#allocation41_spill] sm:$0xff] %v21222_v39 }
 0x173   :  { %28444 = vst [vmem:[#allocation42_spill] sm:$0xff] %v21224_v10  ;;  %v911_v3 = vadd.f32 %v910_v20, %v875_v24  ;;  %v937_v43 = vadd.f32 %v936_v44, %v877_v38  ;;  %v777_v22 = vadd.f32 %v776_v5, %v21217_v58  ;;  %v883_v15 = vmul.f32 %v21217_v58, %v21217_v58  ;;  %v1056_v38 = vld [vmem:[%s28252_s2 + $0x200] sm:$0xff]  ;;  %v1075_v58 = vld [vmem:[%s28252_s2 + $0x298] sm:$0xff] }
 0x174   :  { %v899_v31 = vadd.f32 %v898_v18, %v881_v56  ;;  %v764_v47 = vadd.f32 %v763_v48, %v21222_v39  ;;  %v882_v49 = vmul.f32 %v21222_v39, %v21222_v39  ;;  %v790_v7 = vadd.f32 %v789_v32, %v21224_v10  ;;  %v1057_v18 = vld [vmem:[%s28252_s2 + $0x208] sm:$0xff] }
 0x175   :  { %v925_v2 = vadd.f32 %v924_v54, %v883_v15  ;;  %v884_v6 = vmul.f32 %v21224_v10, %v21224_v10  ;;  %v21293_v50 = vpack.c.bf16 %v1057_v18, %v1056_v38 }
 0x176   :  { %v912_v34 = vadd.f32 %v911_v3, %v882_v49  ;;  %v21235_v44 = vpop.f32.mrb[12].mxu0  ;;  %v21237_v5 = vpop.f32.mrb[12].mxu1 }
 0x177   :  { %v938_v20 = vadd.f32 %v937_v43, %v884_v6  ;;  %28445 = vst [vmem:[#allocation43_spill] sm:$0xff] %v21235_v44  ;;  %28446 = vst [vmem:[#allocation44_spill] sm:$0xff] %v21237_v5  ;;  %v752_v56 = vsel %vm181_vm6, %v21235_v44, 0.0  ;;  %v888_v48 = vmul.f32 %v21235_v44, %v21235_v44  ;;  %v778_v24 = vsel %vm181_vm6, %v21237_v5, 0.0  ;;  %v21247_v32 = vpop.f32.mrb[13].mxu0  ;;  %v21249_v3 = vpop.f32.mrb[13].mxu1 }
 0x178   :  { %v890_v15 = vmul.f32 %v21237_v5, %v21237_v5  ;;  %28447 = vst [vmem:[#allocation45_spill] sm:$0xff] %v21247_v32  ;;  %28448 = vst [vmem:[#allocation46_spill] sm:$0xff] %v21249_v3  ;;  %v753_v54 = vadd.f32 %v752_v56, %v751_v27  ;;  %v779_v43 = vadd.f32 %v778_v24, %v777_v22  ;;  %v765_v49 = vsel %vm181_vm6, %v21247_v32, 0.0  ;;  %v538_v10 = vpop.f32.mrb[14].mxu0  ;;  %v609_v5 = vpop.f32.mrb[14].mxu1  ;;  %v1074_v44 = vld [vmem:[%s28252_s2 + $0x290] sm:$0xff] }
 0x179   :  { %v889_v6 = vmul.f32 %v21247_v32, %v21247_v32  ;;  %v900_v39 = vsel %vm181_vm6, %v888_v48, 0.0  ;;  %v766_v22 = vadd.f32 %v765_v49, %v764_v47  ;;  %v791_v56 = vsel %vm181_vm6, %v21249_v3, 0.0  ;;  %v539_v24 = vpop.f32.mrb[15].mxu0  ;;  %v610_v32 = vpop.f32.mrb[15].mxu1  ;;  %v1088_v10 = vld [vmem:[%s28252_s2 + $0x300] sm:$0xff]  ;;  %v1089_v5 = vld [vmem:[%s28252_s2 + $0x308] sm:$0xff] }
 0x17a   :  { %v926_v27 = vsel %vm181_vm6, %v890_v15, 0.0  ;;  %v1058_v48 = vld [vmem:[%s28252_s2 + $0x210] sm:$0xff]  ;;  %v1059_v47 = vld [vmem:[%s28252_s2 + $0x218] sm:$0xff]  ;;  %v754_v15 = vrot.slane %v753_v54, 4  ;;  %v21283_v49 = vadd.f32 %v900_v39, %v899_v31  ;;  %v780_v32 = vrot.slane %v779_v43, 4  ;;  %v1077_v31 = vld [vmem:[%s28252_s2 + $0x2a8] sm:$0xff] }
 0x17b   :  { %v21285_v24 = vadd.f32 %v926_v27, %v925_v2  ;;  %v767_v26 = vrot.slane %v766_v22, 4  ;;  %v913_v12 = vsel %vm181_vm6, %v889_v6, 0.0  ;;  %v792_v61 = vadd.f32 %v791_v56, %v790_v7 }
 0x17c   :  { %v891_v62 = vmul.f32 %v21249_v3, %v21249_v3  ;;  %v755_v60 = vadd.f32 %v754_v15, %v753_v54  ;;  %v781_v53 = vadd.f32 %v780_v32, %v779_v43  ;;  %v21298_v39 = vadd.f32 %v913_v12, %v912_v34 }
 0x17d   :  { %v793_v2 = vrot.slane %v792_v61, 4  ;;  %v21301_v36 = vpack.c.bf16 %v1075_v58, %v1074_v44  ;;  %v21307_v43 = vpack.c.bf16 %v1089_v5, %v1088_v10  ;;  %v21309_v38 = vpack.c.bf16 %v1059_v47, %v1058_v48 }
 0x17e   :  { %v939_v27 = vsel %vm181_vm6, %v891_v62, 0.0  ;;  %v756_v7 = vrot.slane %v755_v60, 2  ;;  %v782_v6 = vrot.slane %v781_v53, 2  ;;  %v21303_v56 = vpop.f32.mrb[16].mxu0  ;;  %v21305_v54 = vpop.f32.mrb[16].mxu1  ;;  %v768_v18 = vadd.f32 %v767_v26, %v766_v22 }
 0x17f   :  { %28449 = vst [vmem:[#allocation47_spill] sm:$0xff] %v21303_v56  ;;  %28450 = vst [vmem:[#allocation48_spill] sm:$0xff] %v21305_v54  ;;  %v21311_v15 = vadd.f32 %v939_v27, %v938_v20  ;;  %v21313_v12 = vpop.f32.mrb[17].mxu0  ;;  %v21315_v34 = vpop.f32.mrb[17].mxu1  ;;  %v21317_v62 = vpack.c.bf16 %v1077_v31, %v1076_v13  ;;  %v794_v3 = vadd.f32 %v793_v2, %v792_v61  ;;  %v829_v20 = vsel %vm825_vm9, %v21305_v54, 0.0 }
 0x180   :  { %28451 = vst [vmem:[#allocation49_spill] sm:$0xff] %v21313_v12  ;;  %28452 = vst [vmem:[#allocation50_spill] sm:$0xff] %v21315_v34  ;;  %v757_v58 = vadd.f32 %v756_v7, %v755_v60  ;;  %v783_v44 = vadd.f32 %v782_v6, %v781_v53  ;;  %v21320_v35 = vpop.f32.mrb[18].mxu0  ;;  %v21322_v10 = vpop.f32.mrb[18].mxu1  ;;  %v850_v26 = vmul.f32 %v21303_v56, %v21303_v56  ;;  %v826_v48 = vsel %vm825_vm9, %v21315_v34, 0.0 }
 0x181   :  { %28453 = vst [vmem:[#allocation51_spill] sm:$0xff] %v21320_v35  ;;  %28454 = vst [vmem:[#allocation52_spill] sm:$0xff] %v21322_v10  ;;  %v866_v22 = vmul.f32 %v21305_v54, %v21305_v54  ;;  %v851_v60 = vmul.f32 %v21313_v12, %v21313_v12  ;;  %v21332_v53 = vpop.f32.mrb[19].mxu0  ;;  %v21334_v13 = vpop.f32.mrb[19].mxu1  ;;  %v852_v47 = vmul.f32 %v21315_v34, %v21315_v34  ;;  %v831_v7 = vsel %vm825_vm9, %v21322_v10, 0.0 }
 0x182   :  { %28455 = vst [vmem:[#allocation53_spill] sm:$0xff] %v21332_v53  ;;  %28456 = vst [vmem:[#allocation54_spill] sm:$0xff] %v21334_v13  ;;  %v758_v61 = vrot.slane %v757_v58, 1  ;;  %v784_v5 = vrot.slane %v783_v44, 1  ;;  %v799_v2 = vadd.f32 %v21320_v35, %v21303_v56  ;;  %v857_v27 = vmul.f32 %v21320_v35, %v21320_v35 }
 0x183   :  { %v976_v31 = vsel %vm825_vm9, %v866_v22, 0.0  ;;  %v973_v54 = vsel %vm825_vm9, %v852_v47, 0.0  ;;  %v873_v34 = vmul.f32 %v21322_v10, %v21322_v10  ;;  %v812_v22 = vadd.f32 %v21332_v53, %v21313_v12 }
 0x184   :  { %v21347_v6 = vadd.f32 %v758_v61, %v757_v58  ;;  %v21349_v32 = vadd.f32 %v784_v5, %v783_v44  ;;  %v947_v19 = vadd.f32 %v857_v27, %v850_v26  ;;  %v858_v56 = vmul.f32 %v21332_v53, %v21332_v53 }
 0x185   :  { %v827_v35 = vsel %vm825_vm9, %v21334_v13, 0.0  ;;  %v978_v58 = vsel %vm825_vm9, %v873_v34, 0.0  ;;  %v859_v44 = vmul.f32 %v21334_v13, %v21334_v13  ;;  %v769_v26 = vrot.slane %v768_v18, 2 }
 0x186   :  { %v828_v61 = vadd.f32 %v827_v35, %v826_v48  ;;  %v21363_v5 = vpop.f32.mrb[20].mxu0  ;;  %v21365_v47 = vpop.f32.mrb[20].mxu1  ;;  %v960_v27 = vadd.f32 %v858_v56, %v851_v60 }
 0x187   :  { %28457 = vst [vmem:[#allocation55_spill] sm:$0xff] %v21363_v5  ;;  %28458 = vst [vmem:[#allocation56_spill] sm:$0xff] %v21365_v47  ;;  %v800_v12 = vadd.f32 %v799_v2, %v21363_v5  ;;  %v864_v53 = vmul.f32 %v21363_v5, %v21363_v5  ;;  %v838_v10 = vsel %vm837_vm10, %v21365_v47, 0.0  ;;  %v21372_v16 = vpop.f32.mrb[21].mxu0  ;;  %v21374_v35 = vpop.f32.mrb[21].mxu1  ;;  %v974_v48 = vsel %vm825_vm9, %v859_v44, 0.0 }
 0x188   :  { %28459 = vst [vmem:[#allocation57_spill] sm:$0xff] %v21372_v16  ;;  %v830_v34 = vadd.f32 %v829_v20, %v828_v61  ;;  %v894_v13 = vmul.f32 %v21365_v47, %v21365_v47  ;;  %v813_v56 = vadd.f32 %v812_v22, %v21372_v16  ;;  %v21380_v60 = vpop.f32.mrb[22].mxu0  ;;  %v17295_v2 = vpop.f32.mrb[22].mxu1  ;;  %v975_v57 = vadd.f32 %v974_v48, %v973_v54 }
 0x189   :  { %v948_v5 = vadd.f32 %v947_v19, %v864_v53  ;;  %v865_v0 = vmul.f32 %v21372_v16, %v21372_v16  ;;  %v833_v9 = vsel %vm825_vm9, %v21374_v35, 0.0  ;;  %v21386_v63 = vpop.f32.mrb[23].mxu0  ;;  %v21388_v20 = vpop.f32.mrb[23].mxu1  ;;  %v880_v22 = vmul.f32 %v21374_v35, %v21374_v35 }
 0x18a   :  { %v984_v61 = vsel %vm837_vm10, %v894_v13, 0.0  ;;  %v832_v44 = vadd.f32 %v831_v7, %v830_v34  ;;  %v770_v47 = vadd.f32 %v769_v26, %v768_v18  ;;  %v977_v2 = vadd.f32 %v976_v31, %v975_v57 }
 0x18b   :  { %v961_v54 = vadd.f32 %v960_v27, %v865_v0  ;;  %v795_v19 = vrot.slane %v794_v3, 2  ;;  %v801_v53 = vadd.f32 %v800_v12, %v21380_v60  ;;  %v980_v16 = vsel %vm825_vm9, %v880_v22, 0.0 }
 0x18c   :  { %v834_v48 = vadd.f32 %v833_v9, %v832_v44  ;;  %v771_v40 = vrot.slane %v770_v47, 1  ;;  %v871_v52 = vmul.f32 %v21380_v60, %v21380_v60  ;;  %v979_v28 = vadd.f32 %v978_v58, %v977_v2 }
 0x18d   :  { %v796_v51 = vadd.f32 %v795_v19, %v794_v3  ;;  %v814_v13 = vadd.f32 %v813_v56, %v21386_v63  ;;  %v872_v7 = vmul.f32 %v21386_v63, %v21386_v63  ;;  %v835_v0 = vsel %vm825_vm9, %v21388_v20, 0.0  ;;  %v1061_v19 = vld [vmem:[%s28252_s2 + $0x228] sm:$0xff] }
 0x18e   :  { %v772_v18 = vadd.f32 %v771_v40, %v770_v47  ;;  %v949_v57 = vadd.f32 %v948_v5, %v871_v52  ;;  %v887_v9 = vmul.f32 %v21388_v20, %v21388_v20  ;;  %v21404_v12 = vpop.f32.mrb[24].mxu0  ;;  %v981_v31 = vadd.f32 %v980_v16, %v979_v28  ;;  %v1090_v47 = vld [vmem:[%s28252_s2 + $0x310] sm:$0xff]  ;;  %v1091_v16 = vld [vmem:[%s28252_s2 + $0x318] sm:$0xff] }
 0x18f   :  { %28460 = vst [vmem:[#allocation58_spill] sm:$0xff] %v21404_v12  ;;  %v797_v26 = vrot.slane %v796_v51, 1  ;;  %v962_v27 = vadd.f32 %v961_v54, %v872_v7  ;;  %v836_v58 = vadd.f32 %v835_v0, %v834_v48  ;;  %v21406_v3 = vpop.f32.mrb[25].mxu0  ;;  %v802_v40 = vadd.f32 %v801_v53, %v21404_v12  ;;  %v1060_v54 = vld [vmem:[%s28252_s2 + $0x220] sm:$0xff]  ;;  %v1079_v7 = vld [vmem:[%s28252_s2 + $0x2b8] sm:$0xff] }
 0x190   :  { %28461 = vst [vmem:[#allocation59_spill] sm:$0xff] %v21406_v3  ;;  %1163 = vmatprep.mubr.f32.mxu0 %v772_v18  ;;  %v982_v34 = vsel %vm825_vm9, %v887_v9, 0.0  ;;  %v878_v52 = vmul.f32 %v21404_v12, %v21404_v12  ;;  %v815_v5 = vadd.f32 %v814_v13, %v21406_v3  ;;  %v21419_v28 = vpop.f32.mrb[26].mxu0  ;;  %v879_v2 = vmul.f32 %v21406_v3, %v21406_v3  ;;  %v1078_v13 = vld [vmem:[%s28252_s2 + $0x2b0] sm:$0xff]  ;;  %v1067_v3 = vld [vmem:[%s28252_s2 + $0x258] sm:$0xff] }
 0x191   :  { %28462 = vst [vmem:[#allocation60_spill] sm:$0xff] %v21419_v28  ;;  %v798_v56 = vadd.f32 %v797_v26, %v796_v51  ;;  %1164 = vmatmul.mubr.f32.vlgmr.msra.gmra.mrb[32].mxu0 %v21347_v6  ;;  %v839_v44 = vadd.f32 %v838_v10, %v836_v58  ;;  %v983_v22 = vadd.f32 %v982_v34, %v981_v31  ;;  %v21430_v53 = vpop.f32.mrb[27].mxu0  ;;  %v1092_v31 = vld [vmem:[%s28252_s2 + $0x320] sm:$0xff]  ;;  %v1093_v26 = vld [vmem:[%s28252_s2 + $0x328] sm:$0xff]  ;;  %v28464_v34 = vrot.slane %v21298_v39, 4 }
 0x192   :  { %28463 = vst [vmem:[#allocation61_spill] sm:$0xff] %v21430_v53  ;;  %17471 = vmatpush3.bf16.msra.mxu0 %v21293_v50  ;;  %v950_v51 = vadd.f32 %v949_v57, %v878_v52  ;;  %v803_v6 = vadd.f32 %v802_v40, %v21419_v28  ;;  %v885_v10 = vmul.f32 %v21419_v28, %v21419_v28 }
 0x193   :  { %v816_v48 = vadd.f32 %v815_v5, %v21430_v53  ;;  %1233 = vmatprep.mubr.f32.mxu1 %v798_v56  ;;  %v840_v18 = vrot.slane %v839_v44, 4  ;;  %v21443_v0 = vadd.f32 %v984_v61, %v983_v22  ;;  %17473 = vmatprep.subr.bf16.mxu0 %v21301_v36  ;;  %v963_v57 = vadd.f32 %v962_v27, %v879_v2  ;;  %v1062_v61 = vld [vmem:[%s28252_s2 + $0x230] sm:$0xff]  ;;  %v1063_v27 = vld [vmem:[%s28252_s2 + $0x238] sm:$0xff] }
 0x194   :  { %v886_v9 = vmul.f32 %v21430_v53, %v21430_v53  ;;  %1234 = vmatmul.mubr.f32.vlgmr.msra.gmra.mrb[24].mxu1 %v21349_v32  ;;  %v951_v58 = vadd.f32 %v950_v51, %v885_v10  ;;  %v916_v40 = vadd.f32 %v28464_v34, %v21298_v39  ;;  %v21465_v5 = vpack.c.bf16 %v1091_v16, %v1090_v47  ;;  %v1080_v39 = vld [vmem:[%s28252_s2 + $0x2c0] sm:$0xff]  ;;  %v1081_v47 = vld [vmem:[%s28252_s2 + $0x2c8] sm:$0xff] }
 0x195   :  { %v841_v52 = vadd.f32 %v840_v18, %v839_v44  ;;  %17502 = vmatpush3.bf16.msra.mxu1 %v21307_v43  ;;  %v28325_v32 = vmov 0.0   ;;  %v28465_v22 = vmov 0.0|0.0   ;;  %v21471_v2 = vpack.c.bf16 %v1061_v19, %v1060_v54 }
 0x196   :  { %v964_v56 = vadd.f32 %v963_v57, %v886_v9  ;;  %17312 = vmatprep.mubr.msk.f32.mxu1 %vm20458_vm11, %v28325_v32  ;;  %17475 = vmatpush3.bf16.msra.mxu0 %v21309_v38  ;;  %v21473_v51 = vpop.f32.mrb[28].mxu0  ;;  %v917_v16 = vrot.slane %v916_v40, 2  ;;  %v21482_v10 = vpack.c.bf16 %v1079_v7, %v1078_v13  ;;  %v21490_v57 = vpack.c.bf16 %v1093_v26, %v1092_v31  ;;  %v1094_v13 = vld [vmem:[%s28252_s2 + $0x330] sm:$0xff]  ;;  %v1095_v7 = vld [vmem:[%s28252_s2 + $0x338] sm:$0xff] }
 0x197   :  { %17503 = vmatprep.subr.bf16.mxu1 %v28465_v22  ;;  %28466 = vst [vmem:[#allocation62_spill] sm:$0xff] %v21473_v51  ;;  %v842_v44 = vrot.slane %v841_v52, 2  ;;  %17477 = vmatprep.subr.bf16.mxu0 %v21317_v62  ;;  %v804_v54 = vsel %vm181_vm6, %v21473_v51, 0.0  ;;  %v892_v19 = vmul.f32 %v21473_v51, %v21473_v51  ;;  %v21488_v18 = vpop.f32.mrb[29].mxu0  ;;  %v21503_v31 = vpack.c.bf16 %v1063_v27, %v1062_v61 }
 0x198   :  { %28467 = vst [vmem:[#allocation63_spill] sm:$0xff] %v21488_v18  ;;  %v805_v9 = vadd.f32 %v804_v54, %v803_v6  ;;  %v817_v34 = vsel %vm181_vm6, %v21488_v18, 0.0  ;;  %v893_v32 = vmul.f32 %v21488_v18, %v21488_v18  ;;  %v680_v51 = vpop.f32.mrb[30].mxu0  ;;  %v1064_v54 = vld [vmem:[%s28252_s2 + $0x240] sm:$0xff]  ;;  %v1065_v18 = vld [vmem:[%s28252_s2 + $0x248] sm:$0xff]  ;;  %v21517_v27 = vpack.c.bf16 %v1081_v47, %v1080_v39  ;;  %v1066_v47 = vld [vmem:[%s28252_s2 + $0x250] sm:$0xff] }
 0x199   :  { %v843_v53 = vadd.f32 %v842_v44, %v841_v52  ;;  %17505 = vmatpush3.bf16.msra.mxu1 %v21465_v5  ;;  %v952_v6 = vsel %vm181_vm6, %v892_v19, 0.0  ;;  %v818_v26 = vadd.f32 %v817_v34, %v816_v48  ;;  %v681_v28 = vpop.f32.mrb[31].mxu0  ;;  %v1082_v48 = vld [vmem:[%s28252_s2 + $0x2d0] sm:$0xff]  ;;  %v1083_v44 = vld [vmem:[%s28252_s2 + $0x2d8] sm:$0xff]  ;;  %v21530_v39 = vpack.c.bf16 %v1095_v7, %v1094_v13 }
 0x19a   :  { %17479 = vmatpush3.bf16.msra.mxu0 %v21471_v2  ;;  %17506 = vmatprep.subr.bf16.mxu1 %v28465_v22  ;;  %v806_v52 = vrot.slane %v805_v9, 4  ;;  %v21514_v51 = vadd.f32 %v952_v6, %v951_v58  ;;  %v965_v61 = vsel %vm181_vm6, %v893_v32, 0.0  ;;  %v941_v28 = vrot.slane %v21311_v15, 4 }
 0x19b   :  { %17481 = vmatprep.subr.bf16.mxu0 %v21482_v10  ;;  %v819_v19 = vrot.slane %v818_v26, 4  ;;  %v21527_v34 = vadd.f32 %v965_v61, %v964_v56  ;;  %v918_v58 = vadd.f32 %v917_v16, %v916_v40  ;;  %v844_v6 = vrot.slane %v843_v53, 1  ;;  %v1084_v56 = vld [vmem:[%s28252_s2 + $0x2e0] sm:$0xff]  ;;  %v1085_v16 = vld [vmem:[%s28252_s2 + $0x2e8] sm:$0xff] }
 0x19c   :  { %v807_v12 = vadd.f32 %v806_v52, %v805_v9  ;;  %v21540_v40 = vpack.c.bf16 %v1065_v18, %v1064_v54  ;;  %v21549_v13 = vpack.c.bf16 %v1083_v44, %v1082_v48  ;;  %v942_v9 = vadd.f32 %v941_v28, %v21311_v15  ;;  %v1068_v18 = vld [vmem:[%s28252_s2 + $0x260] sm:$0xff]  ;;  %v1069_v54 = vld [vmem:[%s28252_s2 + $0x268] sm:$0xff]  ;;  %v1086_v15 = vld [vmem:[%s28252_s2 + $0x2f0] sm:$0xff] }
 0x19d   :  { %17508 = vmatpush3.bf16.msra.mxu1 %v21490_v57  ;;  %v820_v32 = vadd.f32 %v819_v19, %v818_v26  ;;  %v919_v7 = vrot.slane %v918_v58, 1  ;;  %v845_v61 = vadd.f32 %v844_v6, %v843_v53  ;;  %v21561_v48 = vpack.c.bf16 %v1067_v3, %v1066_v47  ;;  %v1087_v53 = vld [vmem:[%s28252_s2 + $0x2f8] sm:$0xff] }
 0x19e   :  { %17483 = vmatpush3.bf16.msra.mxu0 %v21503_v31  ;;  %17509 = vmatprep.subr.bf16.mxu1 %v28465_v22  ;;  %v808_v19 = vrot.slane %v807_v12, 2  ;;  %v21570_v28 = vpack.c.bf16 %v1085_v16, %v1084_v56  ;;  %v1071_v3 = vld [vmem:[%s28252_s2 + $0x278] sm:$0xff] }
 0x19f   :  { %17485 = vmatprep.subr.bf16.mxu0 %v21517_v27  ;;  %v821_v26 = vrot.slane %v820_v32, 2  ;;  %v920_v44 = vadd.f32 %v919_v7, %v918_v58  ;;  %v21582_v58 = vpack.c.bf16 %v1069_v54, %v1068_v18  ;;  %v28475_v54 = vld [vmem:[#allocation18_spill] sm:$0xff] }
 0x1a0   :  { %v809_v56 = vadd.f32 %v808_v19, %v807_v12  ;;  %v902_v12 = vrot.slane %v21283_v49, 4  ;;  %v28476_v19 = vld [vmem:[#allocation9_spill] sm:$0xff] }
 0x1a1   :  { %17511 = vmatpush3.bf16.msra.mxu1 %v21530_v39  ;;  %v822_v52 = vadd.f32 %v821_v26, %v820_v32  ;;  %v943_v32 = vrot.slane %v942_v9, 2 }
 0x1a2   :  { %17487 = vmatpush3.bf16.msra.mxu0 %v21540_v40  ;;  %17513 = vmatprep.subr.bf16.mxu1 %v20823_v8  ;;  %v1070_v8 = vld [vmem:[%s28252_s2 + $0x270] sm:$0xff] }
 0x1a3   :  { %17489 = vmatprep.subr.bf16.mxu0 %v21549_v13  ;;  %v823_v6 = vrot.slane %v822_v52, 1  ;;  %v944_v16 = vadd.f32 %v943_v32, %v942_v9  ;;  %v21590_v7 = vpack.c.bf16 %v1071_v3, %v1070_v8  ;;  %v903_v9 = vadd.f32 %v902_v12, %v21283_v49  ;;  %v28480_v8 = vld [vmem:[#allocation16_spill] sm:$0xff] }
 0x1a4   :  { %17313 = vmatmul.mubr.msk.f32.vlgmr.msra.gmra.mrb[26].mxu1 %vm825_vm9, %v845_v61  ;;  %v986_v32 = vrot.slane %v21443_v0, 4 }
 0x1a5   :  { %17515 = vmatpush3.bf16.msra.mxu1 %v20834_v1  ;;  %1446 = vmatprep.mubr.f32.mxu1 %v920_v44  ;;  %v824_v47 = vadd.f32 %v823_v6, %v822_v52  ;;  %v21585_v1 = vpack.c.bf16 %v1087_v53, %v1086_v15  ;;  %v945_v26 = vrot.slane %v944_v16, 1  ;;  %v28477_v53 = vld [vmem:[#allocation10_spill] sm:$0xff]  ;;  %v28479_v6 = vld [vmem:[#allocation13_spill] sm:$0xff] }
 0x1a6   :  { %17491 = vmatpush3.bf16.msra.mxu0 %v21561_v48  ;;  %17517 = vmatprep.subr.bf16.mxu1 %v20859_v21  ;;  %v810_v21 = vrot.slane %v809_v56, 1 }
 0x1a7   :  { %17493 = vmatprep.subr.bf16.mxu0 %v21570_v28  ;;  %1303 = vmatprep.mubr.f32.mxu0 %v824_v47  ;;  %v28481_v47 = vld [vmem:[#allocation17_spill] sm:$0xff] }
 0x1a8   :  { %v811_v61 = vadd.f32 %v810_v21, %v809_v56  ;;  %v28482_v56 = vmov 0.0  }
 0x1a9   :  { %17519 = vmatpush3.bf16.msra.mxu1 %v20870_v25  ;;  %v967_v25 = vrot.slane %v21527_v34, 4 }
 0x1aa   :  { %17495 = vmatpush3.bf16.msra.mxu0 %v21582_v58  ;;  %17521 = vmatprep.subr.bf16.mxu1 %v20894_v33  ;;  %v946_v33 = vadd.f32 %v945_v26, %v944_v16 }
 0x1ab   :  { %17497 = vmatprep.subr.bf16.mxu0 %v21585_v1 }
 0x1ad   :  { %17523 = vmatpush3.bf16.msra.mxu1 %v20906_v37  ;;  %v968_v37 = vadd.f32 %v967_v25, %v21527_v34  ;;  %v28473_v34 = vld [vmem:[#allocation15_spill] sm:$0xff] }
 0x1ae   :  { %17499 = vmatpush3.bf16.msra.mxu0 %v21590_v7  ;;  %17525 = vmatprep.subr.bf16.mxu1 %v20930_v45  ;;  %v904_v45 = vrot.slane %v903_v9, 2 }
 0x1af   :  { %17545 = vmatprep.subr.bf16.mxu0 %v20840_v14  ;;  %v969_v14 = vrot.slane %v968_v37, 2 }
 0x1b1   :  { %17527 = vmatpush3.bf16.msra.mxu1 %v20942_v46  ;;  %1304 = vmatmul.mubr.f32.vlgmr.msra.gmra.mrb[34].mxu0 %v811_v61  ;;  %v28468_v46 = vld [vmem:[#allocation5_spill] sm:$0xff] }
 0x1b2   :  { %17547 = vmatpush3.bf16.msra.mxu0 %v20849_v17  ;;  %1516 = vmatprep.mubr.f32.mxu0 %v946_v33  ;;  %v905_v17 = vadd.f32 %v904_v45, %v903_v9 }
 0x1b3   :  { %17529 = vmatprep.subr.bf16.mxu1 %v20967_v55  ;;  %17549 = vmatprep.subr.bf16.mxu0 %v20882_v29  ;;  %v928_v29 = vrot.slane %v21285_v24, 4  ;;  %v970_v55 = vadd.f32 %v969_v14, %v968_v37 }
 0x1b5   :  { %17531 = vmatpush3.bf16.msra.mxu1 %v20978_v59  ;;  %v28469_v59 = vld [vmem:[#allocation11_spill] sm:$0xff]  ;;  %v929_v49 = vadd.f32 %v928_v29, %v21285_v24  ;;  %v28478_v24 = vld [vmem:[#allocation12_spill] sm:$0xff] }
 0x1b6   :  { %17551 = vmatpush3.bf16.msra.mxu0 %v20884_v30  ;;  %17533 = vmatprep.subr.bf16.mxu1 %v21002_v4  ;;  %v28470_v30 = vld [vmem:[#allocation6_spill] sm:$0xff] }
 0x1b7   :  { %17553 = vmatprep.subr.bf16.mxu0 %v20918_v41  ;;  %v28471_v4 = vld [vmem:[#allocation14_spill] sm:$0xff]  ;;  %v906_v41 = vrot.slane %v905_v17, 1  ;;  %v930_v52 = vrot.slane %v929_v49, 2 }
 0x1b9   :  { %17535 = vmatpush3.bf16.msra.mxu1 %v21014_v11  ;;  %v28472_v11 = vld [vmem:[#allocation7_spill] sm:$0xff]  ;;  %v907_v18 = vadd.f32 %v906_v41, %v905_v17  ;;  %v931_v44 = vadd.f32 %v930_v52, %v929_v49 }
 0x1ba   :  { %17555 = vmatpush3.bf16.msra.mxu0 %v20920_v42  ;;  %17537 = vmatprep.subr.bf16.mxu1 %v21038_v23  ;;  %v971_v42 = vrot.slane %v970_v55, 1  ;;  %v28474_v23 = vld [vmem:[#allocation8_spill] sm:$0xff] }
 0x1bb   :  { %17557 = vmatprep.subr.bf16.mxu0 %v28468_v46  ;;  %v932_v3 = vrot.slane %v931_v44, 1 }
 0x1bc   :  { %v972_v15 = vadd.f32 %v971_v42, %v970_v55 }
 0x1bd   :  { %17539 = vmatpush3.bf16.msra.mxu1 %v28469_v59 }
 0x1be   :  { %17559 = vmatpush3.bf16.msra.mxu0 %v28470_v30  ;;  %17541 = vmatprep.subr.bf16.mxu1 %v28471_v4 }
 0x1bf   :  { %17561 = vmatprep.subr.bf16.mxu0 %v28472_v11 }
 0x1c1   :  { %17543 = vmatpush3.bf16.msra.mxu1 %v28473_v34 }
 0x1c2   :  { %17563 = vmatpush3.bf16.msra.mxu0 %v28474_v23  ;;  %17577 = vmatprep.subr.bf16.mxu1 %v28475_v54 }
 0x1c3   :  { %17565 = vmatprep.subr.bf16.mxu0 %v28476_v19 }
 0x1c4   :  { %1447 = vmatmul.mubr.f32.vlgmr.msra.gmra.mrb[28].mxu1 %v907_v18 }
 0x1c5   :  { %17579 = vmatpush3.bf16.msra.mxu1 %v21293_v50  ;;  %1586 = vmatprep.mubr.f32.mxu1 %v972_v15  ;;  %v954_v50 = vrot.slane %v21514_v51, 4 }
 0x1c6   :  { %17567 = vmatpush3.bf16.msra.mxu0 %v28477_v53  ;;  %17581 = vmatprep.subr.bf16.mxu1 %v21301_v36  ;;  %v987_v36 = vadd.f32 %v986_v32, %v21443_v0 }
 0x1c7   :  { %17569 = vmatprep.subr.bf16.mxu0 %v28478_v24 }
 0x1c9   :  { %17583 = vmatpush3.bf16.msra.mxu1 %v21309_v38  ;;  %v933_v38 = vadd.f32 %v932_v3, %v931_v44 }
 0x1ca   :  { %17571 = vmatpush3.bf16.msra.mxu0 %v28479_v6  ;;  %17585 = vmatprep.subr.bf16.mxu1 %v21317_v62  ;;  %v955_v62 = vadd.f32 %v954_v50, %v21514_v51 }
 0x1cb   :  { %17573 = vmatprep.subr.bf16.mxu0 %v28480_v8 }
 0x1cc   :  { %v956_v0 = vrot.slane %v955_v62, 2 }
 0x1cd   :  { %17587 = vmatpush3.bf16.msra.mxu1 %v21471_v2  ;;  %v988_v2 = vrot.slane %v987_v36, 2 }
 0x1ce   :  { %17575 = vmatpush3.bf16.msra.mxu0 %v28481_v47  ;;  %17589 = vmatprep.subr.bf16.mxu1 %v21482_v10 }
 0x1cf   :  { %17608 = vmatprep.subr.bf16.mxu0 %v28465_v22  ;;  %v989_v10 = vadd.f32 %v988_v2, %v987_v36 }
 0x1d1   :  { %1517 = vmatmul.mubr.f32.vlgmr.msra.gmra.mrb[36].mxu0 %v933_v38  ;;  %17591 = vmatpush3.bf16.msra.mxu1 %v21503_v31  ;;  %v990_v31 = vrot.slane %v989_v10, 1 }
 0x1d2   :  { %17610 = vmatpush3.bf16.msra.mxu0 %v21307_v43  ;;  %17593 = vmatprep.subr.bf16.mxu1 %v21517_v27  ;;  %v957_v43 = vadd.f32 %v956_v0, %v955_v62 }
 0x1d3   :  { %17611 = vmatprep.subr.bf16.mxu0 %v28465_v22  ;;  %17331 = vmatprep.mubr.msk.f32.mxu0 %vm20458_vm11, %v28482_v56  ;;  %v991_v51 = vadd.f32 %v990_v31, %v989_v10 }
 0x1d5   :  { %17595 = vmatpush3.bf16.msra.mxu1 %v21540_v40 }
 0x1d6   :  { %17613 = vmatpush3.bf16.msra.mxu0 %v21465_v5  ;;  %17597 = vmatprep.subr.bf16.mxu1 %v21549_v13  ;;  %v958_v5 = vrot.slane %v957_v43, 1 }
 0x1d7   :  { %17614 = vmatprep.subr.bf16.mxu0 %v28465_v22 }
 0x1d8   :  { %v959_v27 = vadd.f32 %v958_v5, %v957_v43 }
 0x1d9   :  { %17599 = vmatpush3.bf16.msra.mxu1 %v21561_v48 }
 0x1da   :  { %17616 = vmatpush3.bf16.msra.mxu0 %v21490_v57  ;;  %17601 = vmatprep.subr.bf16.mxu1 %v21570_v28 }
 0x1db   :  { %17617 = vmatprep.subr.bf16.mxu0 %v28465_v22 }
 0x1dd   :  { %17603 = vmatpush3.bf16.msra.mxu1 %v21582_v58 }
 0x1de   :  { %17619 = vmatpush3.bf16.msra.mxu0 %v21530_v39  ;;  %17605 = vmatprep.subr.bf16.mxu1 %v21585_v1 }
 0x1e1   :  { %17607 = vmatpush3.bf16.msra.mxu1 %v21590_v7  ;;  %17332 = vmatmul.mubr.msk.f32.vlgmr.msra.gmra.mrb[38].mxu0 %vm825_vm9, %v991_v51 }
 0x1e4   :  { %1587 = vmatmul.mubr.f32.vlgmr.msra.gmra.mrb[30].mxu1 %v959_v27 }
 0x1e5   :  { %21 = vsyncpa [#allocation3], 0  ;;  %v1674_v18 = vlaneseq  ;;  %v1666_v52 = vld [vmem:[%s28253_s3] sm:$0x1]  ;;  %s20460_s23 = smov 64   ;;  %s20461_s27 = smov 32  }
 0x1e6   :  { %v1670_v24 = vld [vmem:[%s28254_s4] sm:$0x1]  ;;  %s20462_s3 = smov 96   ;;  %v18470_v50 = vld [vmem:[%s28255_s5 + $0x4] ss:$20 sps:$4 sm:$0xff]   ;;  %vm1687_vm12 = vcmask 261120  }
 0x1e7   :  { %v21658_v54 = vshrl.u32 %v1674_v18, 7  ;;  %v18468_v3 = vld [vmem:[%s28255_s5] ss:$20 sps:$4 sm:$0xff]   ;;  %v18471_v47 = vld [vmem:[%s28255_s5 + $0x8] ss:$20 sps:$4 sm:$0xff]   ;;  %4946 = vmatprep.subr.bf16.mxu0 %v18470_v50  ;;  %vm1690_vm13 = vcmask 785408  }
 0x1e8   :  { %v18473_v36 = vld [vmem:[%s28255_s5 + $0xc] ss:$20 sps:$4 sm:$0xff]   ;;  %v18479_v62 = vld [vmem:[%s28255_s5 + $0x34] ss:$20 sps:$4 sm:$0xff]   ;;  %4947 = vmatpush1.bf16.msra.mxu0 %v18468_v3  ;;  %v18477_v0 = vld [vmem:[%s28255_s5 + $0x30] ss:$20 sps:$4 sm:$0xff]  }
 0x1e9   :  { %28483 = vst [vmem:[#allocation5_spill] sm:$0xff] %v21658_v54  ;;  %v21664_v19 = vsub.s32 0, %v21658_v54  ;;  %v18476_v38 = vld [vmem:[%s28255_s5 + $0x2c] ss:$20 sps:$4 sm:$0xff]   ;;  %5201 = vmatprep.subr.bf16.mxu1 %v18473_v36  ;;  %v18474_v2 = vld [vmem:[%s28255_s5 + $0x28] ss:$20 sps:$4 sm:$0xff]  }
 0x1ea   :  { %5202 = vmatpush1.bf16.msra.mxu1 %v18471_v47  ;;  %4948 = vmatprep.subr.bf16.mxu0 %v18476_v38  ;;  %v18482_v10 = vld [vmem:[%s28255_s5 + $0x54] ss:$20 sps:$4 sm:$0xff]   ;;  %v18485_v43 = vld [vmem:[%s28255_s5 + $0x5c] ss:$20 sps:$4 sm:$0xff]   ;;  %v18483_v5 = vld [vmem:[%s28255_s5 + $0x58] ss:$20 sps:$4 sm:$0xff]  }
 0x1eb   :  { %28484 = vst [vmem:[#allocation11_spill] sm:$0xff] %v21664_v19  ;;  %5203 = vmatprep.subr.bf16.mxu1 %v18479_v62  ;;  %v18480_v31 = vld [vmem:[%s28255_s5 + $0x50] ss:$20 sps:$4 sm:$0xff]   ;;  %v28487_v18 = vld [vmem:[#allocation20_spill] sm:$0xff]  ;;  %vm1949_vm14 = vcmask 1042432   ;;  %vm10226_vm15 = vcmask 517120  }
 0x1ec   :  { %4949 = vmatpush1.bf16.msra.mxu0 %v18474_v2  ;;  %v18488_v51 = vld [vmem:[%s28255_s5 + $0x7c] ss:$20 sps:$4 sm:$0xff]   ;;  %v18491_v27 = vld [vmem:[%s28255_s5 + $0x84] ss:$20 sps:$4 sm:$0xff]  }
 0x1ed   :  { %4950 = vmatprep.subr.bf16.mxu0 %v18482_v10  ;;  %v28491_v50 = vld [vmem:[#allocation27_spill] sm:$0xff]  ;;  %v28492_v36 = vld [vmem:[#allocation29_spill] sm:$0xff]  ;;  %v28493_v62 = vld [vmem:[#allocation28_spill] sm:$0xff] }
 0x1ee   :  { %5204 = vmatpush1.bf16.msra.mxu1 %v18477_v0  ;;  %v28494_v0 = vld [vmem:[#allocation31_spill] sm:$0xff] }
 0x1ef   :  { %5205 = vmatprep.subr.bf16.mxu1 %v18485_v43  ;;  %v28495_v43 = vld [vmem:[#allocation33_spill] sm:$0xff] }
 0x1f0   :  { %4951 = vmatpush1.bf16.msra.mxu0 %v18480_v31 }
 0x1f1   :  { %4952 = vmatprep.subr.bf16.mxu0 %v18488_v51 }
 0x1f2   :  { %5206 = vmatpush1.bf16.msra.mxu1 %v18483_v5  ;;  %v28496_v5 = vld [vmem:[#allocation32_spill] sm:$0xff] }
 0x1f3   :  { %5207 = vmatprep.subr.bf16.mxu1 %v18491_v27  ;;  %v28497_v27 = vld [vmem:[#allocation35_spill] sm:$0xff] }
 0x264   :  { %v16498_v57 = vpop.f32.mrb[32].mxu0 }
 0x265   :  { %v16499_v40 = vpop.f32.mrb[33].mxu0 }
 0x266   :  { %v16500_v13 = vadd.f32 %v16499_v40, %v16498_v57  ;;  %v18486_v57 = vld [vmem:[%s28255_s5 + $0x78] ss:$20 sps:$4 sm:$0xff]   ;;  %v18489_v40 = vld [vmem:[%s28255_s5 + $0x80] ss:$20 sps:$4 sm:$0xff]  }
 0x267   :  { %v16533_v48 = vpop.f32.mrb[24].mxu1  ;;  %4953 = vmatpush1.bf16.msra.mxu0 %v18486_v57  ;;  %5208 = vmatpush1.bf16.msra.mxu1 %v18489_v40  ;;  %v28498_v40 = vld [vmem:[#allocation37_spill] sm:$0xff] }
 0x268   :  { %v16534_v28 = vpop.f32.mrb[25].mxu1 }
 0x269   :  { %v16535_v16 = vadd.f32 %v16534_v28, %v16533_v48  ;;  %v18497_v48 = vld [vmem:[%s28255_s5 + $0xac] ss:$20 sps:$4 sm:$0xff]  }
 0x26a   :  { %v18492_v28 = vld [vmem:[%s28255_s5 + $0xa0] ss:$20 sps:$4 sm:$0xff]   ;;  %5209 = vmatprep.subr.bf16.mxu1 %v18497_v48 }
 0x26b   :  { %v1236_v58 = vadd.f32 %v16535_v16, %v16500_v13  ;;  %v18494_v13 = vld [vmem:[%s28255_s5 + $0xa4] ss:$20 sps:$4 sm:$0xff]   ;;  %v18495_v16 = vld [vmem:[%s28255_s5 + $0xa8] ss:$20 sps:$4 sm:$0xff]  }
 0x26c   :  { %4954 = vmatprep.subr.bf16.mxu0 %v18494_v13  ;;  %5210 = vmatpush1.bf16.msra.mxu1 %v18495_v16  ;;  %v28499_v48 = vld [vmem:[#allocation36_spill] sm:$0xff]  ;;  %v28500_v16 = vld [vmem:[#allocation39_spill] sm:$0xff] }
 0x26d   :  { %4955 = vmatpush1.bf16.msra.mxu0 %v18492_v28 }
 0x277   :  { %v1375_v21 = vpop.f32.mrb[26].mxu1 }
 0x278   :  { %v17314_v39 = vpop.f32.mrb[27].mxu1 }
 0x279   :  { %v18498_v39 = vld [vmem:[%s28255_s5 + $0xc8] ss:$20 sps:$4 sm:$0xff]  }
 0x284   :  { %v16568_v26 = vpop.f32.mrb[34].mxu0 }
 0x285   :  { %v16569_v1 = vpop.f32.mrb[35].mxu0 }
 0x286   :  { %v16570_v12 = vadd.f32 %v16569_v1, %v16568_v26  ;;  %v18501_v26 = vld [vmem:[%s28255_s5 + $0xd0] ss:$20 sps:$4 sm:$0xff]   ;;  %v18506_v1 = vld [vmem:[%s28255_s5 + $0xf4] ss:$20 sps:$4 sm:$0xff]  }
 0x288   :  { %v1306_v25 = vadd.f32 %v16570_v12, %v1236_v58  ;;  %v18500_v58 = vld [vmem:[%s28255_s5 + $0xcc] ss:$20 sps:$4 sm:$0xff]   ;;  %v18509_v12 = vld [vmem:[%s28255_s5 + $0xfc] ss:$20 sps:$4 sm:$0xff]  }
 0x289   :  { %4956 = vmatprep.subr.bf16.mxu0 %v18500_v58 }
 0x28a   :  { %v1376_v61 = vadd.f32 %v1375_v21, %v1306_v25  ;;  %v18503_v21 = vld [vmem:[%s28255_s5 + $0xd4] ss:$20 sps:$4 sm:$0xff]   ;;  %4957 = vmatpush1.bf16.msra.mxu0 %v18498_v39  ;;  %v18504_v25 = vld [vmem:[%s28255_s5 + $0xf0] ss:$20 sps:$4 sm:$0xff]  }
 0x28b   :  { %5211 = vmatprep.subr.bf16.mxu1 %v18503_v21  ;;  %4958 = vmatprep.subr.bf16.mxu0 %v18506_v1  ;;  %v28501_v21 = vld [vmem:[#allocation41_spill] sm:$0xff] }
 0x28c   :  { %v1662_v4 = vmul.f32 0.000739645, %v1376_v61  ;;  %5212 = vmatpush1.bf16.msra.mxu1 %v18501_v26  ;;  %v18507_v61 = vld [vmem:[%s28255_s5 + $0xf8] ss:$20 sps:$4 sm:$0xff]  }
 0x28d   :  { %5213 = vmatprep.subr.bf16.mxu1 %v18509_v12  ;;  %v28502_v12 = vld [vmem:[#allocation40_spill] sm:$0xff] }
 0x28e   :  { %v1664_v11 = vmul.f32 %v1662_v4, %v1662_v4  ;;  %4959 = vmatpush1.bf16.msra.mxu0 %v18504_v25 }
 0x290   :  { %5214 = vmatpush1.bf16.msra.mxu1 %v18507_v61 }
 0x297   :  { %v16612_v7 = vpop.f32.mrb[28].mxu1 }
 0x298   :  { %v16613_v33 = vpop.f32.mrb[29].mxu1 }
 0x299   :  { %v16614_v9 = vadd.f32 %v16613_v33, %v16612_v7  ;;  %v18512_v7 = vld [vmem:[%s28255_s5 + $0x11c] ss:$20 sps:$4 sm:$0xff]   ;;  %v18515_v33 = vld [vmem:[%s28255_s5 + $0x124] ss:$20 sps:$4 sm:$0xff]  }
 0x29a   :  { %4960 = vmatprep.subr.bf16.mxu0 %v18512_v7  ;;  %5215 = vmatprep.subr.bf16.mxu1 %v18515_v33  ;;  %v28503_v7 = vld [vmem:[#allocation43_spill] sm:$0xff] }
 0x2a4   :  { %v16647_v37 = vpop.f32.mrb[36].mxu0 }
 0x2a5   :  { %v16648_v45 = vpop.f32.mrb[37].mxu0 }
 0x2a6   :  { %v16649_v14 = vadd.f32 %v16648_v45, %v16647_v37  ;;  %v18513_v37 = vld [vmem:[%s28255_s5 + $0x120] ss:$20 sps:$4 sm:$0xff]   ;;  %v18518_v45 = vld [vmem:[%s28255_s5 + $0x144] ss:$20 sps:$4 sm:$0xff]  }
 0x2a7   :  { %5216 = vmatpush1.bf16.msra.mxu1 %v18513_v37 }
 0x2a8   :  { %v1519_v17 = vadd.f32 %v16649_v14, %v16614_v9  ;;  %v18510_v9 = vld [vmem:[%s28255_s5 + $0x118] ss:$20 sps:$4 sm:$0xff]  }
 0x2a9   :  { %v18521_v14 = vld [vmem:[%s28255_s5 + $0x14c] ss:$20 sps:$4 sm:$0xff]   ;;  %4961 = vmatpush1.bf16.msra.mxu0 %v18510_v9 }
 0x2aa   :  { %4962 = vmatprep.subr.bf16.mxu0 %v18518_v45  ;;  %5217 = vmatprep.subr.bf16.mxu1 %v18521_v14  ;;  %v28504_v9 = vld [vmem:[#allocation45_spill] sm:$0xff]  ;;  %v28505_v45 = vld [vmem:[#allocation44_spill] sm:$0xff] }
 0x2b4   :  { %v1658_v29 = vpop.f32.mrb[38].mxu0 }
 0x2b5   :  { %v17333_v46 = vpop.f32.mrb[39].mxu0 }
 0x2b7   :  { %v16682_v55 = vpop.f32.mrb[30].mxu1 }
 0x2b8   :  { %v16683_v59 = vpop.f32.mrb[31].mxu1 }
 0x2b9   :  { %v16684_v30 = vadd.f32 %v16683_v59, %v16682_v55 }
 0x2bb   :  { %v1589_v41 = vadd.f32 %v16684_v30, %v1519_v17  ;;  %v18516_v17 = vld [vmem:[%s28255_s5 + $0x140] ss:$20 sps:$4 sm:$0xff]  }
 0x2bc   :  { %4963 = vmatpush1.bf16.msra.mxu0 %v18516_v17 }
 0x2bd   :  { %v1659_v49 = vadd.f32 %v1658_v29, %v1589_v41  ;;  %v18519_v29 = vld [vmem:[%s28255_s5 + $0x148] ss:$20 sps:$4 sm:$0xff]  }
 0x2be   :  { %5218 = vmatpush1.bf16.msra.mxu1 %v18519_v29 }
 0x2bf   :  { %v1663_v42 = vmul.f32 0.000739645, %v1659_v49 }
 0x2c1   :  { %v1665_v34 = vsub.f32 %v1663_v42, %v1664_v11  ;;  %v28485_v11 = vld [vmem:[#allocation19_spill] sm:$0xff] }
 0x2c3   :  { %v1667_v23 = vadd.f32 1e-05, %v1665_v34  ;;  %v28486_v34 = vld [vmem:[#allocation21_spill] sm:$0xff] }
 0x2c5   :  { %20426 = vrsqrt.f32 %v1667_v23 }
 0x2cf   :  { %v20427_v15 = vpop.eup %20426 }
 0x2d0   :  { %v21666_v53 = vmul.f32 %v20427_v15, %v1666_v52  ;;  %v28488_v15 = vld [vmem:[#allocation23_spill] sm:$0xff] }
 0x2d2   :  { %v1677_v44 = vrot.slane %v21666_v53, %v21664_v19  ;;  %v1671_v6 = vmul.f32 %v21666_v53, %v1662_v4 }
 0x2d4   :  { %1681 = vrot.lane.b32.xlu1 %v1677_v44, %s20460_s23  ;;  %1678 = vrot.lane.b32.xlu0 %v1677_v44, %s20461_s27  ;;  %v21676_v32 = vsub.f32 %v1670_v24, %v1671_v6  ;;  %v28489_v24 = vld [vmem:[#allocation25_spill] sm:$0xff]  ;;  %v28490_v6 = vld [vmem:[#allocation24_spill] sm:$0xff] }
 0x2d6   :  { %v1696_v8 = vrot.slane %v21676_v32, %v21664_v19 }
 0x2d8   :  { %1684 = vrot.lane.b32.xlu0 %v1677_v44, %s20462_s3  ;;  %1697 = vrot.lane.b32.xlu1 %v1696_v8, %s20461_s27 }
 0x2dc   :  { %1700 = vrot.lane.b32.xlu0 %v1696_v8, %s20460_s23  ;;  %1703 = vrot.lane.b32.xlu1 %v1696_v8, %s20462_s3 }
 0x346   :  { %v1679_v46 = vpop.permute.xlu0 %1678  ;;  %v1682_v55 = vpop.permute.xlu1 %1681 }
 0x347   :  { %v1688_v59 = vsel %vm1687_vm12, %v21666_v53, %v1679_v46 }
 0x348   :  { %v1689_v30 = vsel %vm825_vm9, %v1688_v59, %v1682_v55  ;;  %v21838_v1 = vrot.slane %v1688_v59, %v21664_v19  ;;  %v28506_v59 = vld [vmem:[#allocation48_spill] sm:$0xff] }
 0x34a   :  { %v1685_v4 = vpop.permute.xlu0 %1684  ;;  %v1698_v3 = vpop.permute.xlu1 %1697 }
 0x34b   :  { %v1691_v41 = vsel %vm1690_vm13, %v1689_v30, %v1685_v4  ;;  %v1706_v17 = vsel %vm1687_vm12, %v21676_v32, %v1698_v3  ;;  %v1737_v30 = vmul.f32 %v28506_v59, %v21838_v1  ;;  %v28507_v4 = vld [vmem:[#allocation52_spill] sm:$0xff]  ;;  %v21865_v32 = vmul.f32 %v21838_v1, %v21388_v20 }
 0x34c   :  { %v21797_v49 = vrot.slane %v1691_v41, %v21664_v19  ;;  %v1744_v41 = vmul.f32 %v28507_v4, %v21838_v1  ;;  %v28519_v4 = vld [vmem:[#allocation42_spill] sm:$0xff] }
 0x34e   :  { %v21801_v42 = vmul.f32 %v21797_v49, %v28485_v11  ;;  %v1718_v23 = vmul.f32 %v21797_v49, %v28486_v34  ;;  %v1719_v52 = vmul.f32 %v21797_v49, %v28487_v18  ;;  %v1724_v53 = vmul.f32 %v21797_v49, %v28488_v15  ;;  %v1701_v26 = vpop.permute.xlu0 %1700  ;;  %v1704_v61 = vpop.permute.xlu1 %1703  ;;  %v28508_v11 = vld [vmem:[#allocation50_spill] sm:$0xff]  ;;  %v28509_v15 = vld [vmem:[#allocation56_spill] sm:$0xff] }
 0x34f   :  { %v1725_v44 = vmul.f32 %v21797_v49, %v28489_v24  ;;  %v21813_v8 = vmul.f32 %v21797_v49, %v28490_v6  ;;  %v1731_v47 = vmul.f32 %v21797_v49, %v28491_v50  ;;  %v1732_v38 = vmul.f32 %v21797_v49, %v28492_v36  ;;  %v28510_v6 = vld [vmem:[#allocation47_spill] sm:$0xff] }
 0x350   :  { %v1733_v2 = vmul.f32 %v21797_v49, %v28493_v62  ;;  %v1738_v10 = vmul.f32 %v21797_v49, %v28494_v0  ;;  %v1739_v31 = vmul.f32 %v21797_v49, %v28495_v43  ;;  %v1740_v51 = vmul.f32 %v21797_v49, %v28496_v5  ;;  %v28512_v0 = vld [vmem:[#allocation53_spill] sm:$0xff] }
 0x351   :  { %v1745_v57 = vmul.f32 %v21797_v49, %v28497_v27  ;;  %v1746_v13 = vmul.f32 %v21797_v49, %v28498_v40  ;;  %v1747_v28 = vmul.f32 %v21797_v49, %v28499_v48  ;;  %v1752_v58 = vmul.f32 %v21797_v49, %v28500_v16  ;;  %v28513_v40 = vld [vmem:[#allocation30_spill] sm:$0xff] }
 0x352   :  { %v1753_v39 = vmul.f32 %v21797_v49, %v28501_v21  ;;  %v1754_v25 = vmul.f32 %v21797_v49, %v28502_v12  ;;  %v1759_v33 = vmul.f32 %v21797_v49, %v28503_v7  ;;  %v1760_v37 = vmul.f32 %v21797_v49, %v28504_v9  ;;  %v28514_v21 = vld [vmem:[#allocation55_spill] sm:$0xff] }
 0x353   :  { %v1761_v14 = vmul.f32 %v21797_v49, %v28505_v45  ;;  %v1707_v29 = vsel %vm825_vm9, %v1706_v17, %v1701_v26  ;;  %v1723_v34 = vmul.f32 %v21838_v1, %v28508_v11  ;;  %v1751_v18 = vmul.f32 %v21838_v1, %v21374_v35  ;;  %v28511_v35 = vld [vmem:[#allocation49_spill] sm:$0xff] }
 0x354   :  { %v1708_v46 = vsel %vm1690_vm13, %v1707_v29, %v1704_v61  ;;  %v21869_v24 = vmul.f32 %v28509_v15, %v21838_v1  ;;  %v1721_v3 = vmul.f32 %v21797_v49, %v28510_v6  ;;  %v21874_v50 = vrot.slane %v1706_v17, %v21664_v19  ;;  %v28517_v29 = vld [vmem:[#allocation58_spill] sm:$0xff]  ;;  %v28521_v6 = vld [vmem:[#allocation61_spill] sm:$0xff] }
 0x355   :  { %v21853_v55 = vrot.slane %v1708_v46, %v21664_v19  ;;  %v1722_v20 = vmul.f32 %v21797_v49, %v28511_v35  ;;  %v21886_v43 = vmul.f32 %v21797_v49, %v28512_v0  ;;  %v1735_v26 = vmul.f32 %v21797_v49, %v28514_v21  ;;  %v28518_v46 = vld [vmem:[#allocation59_spill] sm:$0xff]  ;;  %v28522_v21 = vld [vmem:[#allocation46_spill] sm:$0xff] }
 0x356   :  { %v1757_v35 = vmul.f32 %v21797_v49, %v28521_v6 }
 0x357   :  { %v21877_v36 = vadd.f32 %v21853_v55, %v1718_v23  ;;  %v21880_v62 = vadd.f32 %v21853_v55, %v1719_v52  ;;  %v21889_v5 = vadd.f32 %v21853_v55, %v1724_v53  ;;  %v21892_v27 = vadd.f32 %v21853_v55, %v1725_v44  ;;  %v28515_v53 = vld [vmem:[#allocation57_spill] sm:$0xff] }
 0x358   :  { %v1734_v23 = vmul.f32 %v21797_v49, %v28513_v40  ;;  %v21897_v48 = vadd.f32 %v21853_v55, %v1731_v47  ;;  %v21900_v52 = vadd.f32 %v21853_v55, %v1732_v38  ;;  %v21903_v16 = vadd.f32 %v21853_v55, %v1733_v2  ;;  %v28516_v47 = vld [vmem:[#allocation34_spill] sm:$0xff] }
 0x359   :  { %v1736_v12 = vmul.f32 %v21797_v49, %v28515_v53  ;;  %v1742_v44 = vmul.f32 %v21797_v49, %v21380_v60  ;;  %v21912_v61 = vadd.f32 %v21853_v55, %v1738_v10  ;;  %v1741_v7 = vmul.f32 %v21797_v49, %v28516_v47 }
 0x35a   :  { %v1743_v38 = vmul.f32 %v21797_v49, %v21386_v63  ;;  %v21919_v2 = vadd.f32 %v21853_v55, %v1739_v31  ;;  %v21922_v9 = vadd.f32 %v21853_v55, %v1740_v51  ;;  %v21926_v17 = vadd.f32 %v21853_v55, %v1745_v57 }
 0x35b   :  { %v1799_v45 = vadd.f32 %v21853_v55, %v1742_v44  ;;  %v21929_v60 = vadd.f32 %v21853_v55, %v1746_v13  ;;  %v21932_v10 = vadd.f32 %v21853_v55, %v1747_v28  ;;  %v1749_v63 = vmul.f32 %v21797_v49, %v28517_v29  ;;  %v28520_v13 = vld [vmem:[#allocation60_spill] sm:$0xff]  ;;  %v28524_v44 = vld [vmem:[#allocation63_spill] sm:$0xff] }
 0x35c   :  { %v1750_v31 = vmul.f32 %v21797_v49, %v28518_v46  ;;  %v1800_v51 = vadd.f32 %v21853_v55, %v1743_v38  ;;  %v21940_v59 = vadd.f32 %v21853_v55, %v1752_v58  ;;  %v21944_v57 = vmul.f32 %v21797_v49, %v28519_v4 }
 0x35d   :  { %v1756_v11 = vmul.f32 %v21797_v49, %v28520_v13  ;;  %v21949_v28 = vadd.f32 %v21853_v55, %v1753_v39  ;;  %v21952_v15 = vadd.f32 %v21853_v55, %v1754_v25  ;;  %v21957_v0 = vadd.f32 %v21853_v55, %v1759_v33  ;;  %v28523_v39 = vld [vmem:[#allocation62_spill] sm:$0xff] }
 0x35e   :  { %v21960_v58 = vadd.f32 %v21853_v55, %v1760_v37  ;;  %v21963_v40 = vadd.f32 %v21853_v55, %v1761_v14  ;;  %v21967_v53 = vmul.f32 %v21797_v49, %v28522_v21  ;;  %v1763_v25 = vmul.f32 %v21797_v49, %v28523_v39 }
 0x35f   :  { %v1764_v47 = vmul.f32 %v21797_v49, %v28524_v44  ;;  %v1848_v38 = vmax.f32 %v1799_v45, 0.0  ;;  %v1849_v29 = vmax.f32 %v1800_v51, 0.0  ;;  %v21974_v33 = vadd.f32 %v21874_v50, %v1737_v30  ;;  %v18522_v30 = vld [vmem:[%s28255_s5 + $0x168] ss:$20 sps:$4 sm:$0xff]  }
 0x360   :  { %v21977_v37 = vadd.f32 %v21874_v50, %v1744_v41  ;;  %v21980_v14 = vadd.f32 %v21874_v50, %v1723_v34  ;;  %v21983_v46 = vadd.f32 %v21853_v55, %v1734_v23  ;;  %v1792_v4 = vadd.f32 %v21853_v55, %v1735_v26  ;;  %v18524_v23 = vld [vmem:[%s28255_s5 + $0x16c] ss:$20 sps:$4 sm:$0xff]  }
 0x361   :  { %v1793_v13 = vadd.f32 %v21853_v55, %v1736_v12  ;;  %v1813_v6 = vadd.f32 %v21853_v55, %v1756_v11  ;;  %v21992_v45 = vadd.f32 %v21853_v55, %v1741_v7  ;;  %v1806_v41 = vadd.f32 %v21853_v55, %v1749_v63  ;;  %v18525_v7 = vld [vmem:[%s28255_s5 + $0x170] ss:$20 sps:$4 sm:$0xff]   ;;  %4964 = vmatprep.subr.bf16.mxu0 %v18524_v23 }
 0x362   :  { %v1814_v34 = vadd.f32 %v21853_v55, %v1757_v35  ;;  %v18216_v51 = vpack.i.bf16 %v1849_v29, %v1848_v38  ;;  %v1807_v26 = vadd.f32 %v21853_v55, %v1750_v31  ;;  %v1820_v12 = vadd.f32 %v21853_v55, %v1763_v25  ;;  %4965 = vmatpush1.bf16.msra.mxu0 %v18522_v30  ;;  %v18531_v30 = vld [vmem:[%s28255_s5 + $0x198] ss:$20 sps:$4 sm:$0xff]  }
 0x363   :  { %v1821_v11 = vadd.f32 %v21853_v55, %v1764_v47  ;;  %v1808_v21 = vadd.f32 %v21874_v50, %v1751_v18  ;;  %v1778_v63 = vadd.f32 %v21853_v55, %v1721_v3  ;;  %v1843_v35 = vmax.f32 %v21974_v33, 0.0  ;;  %v18527_v18 = vld [vmem:[%s28255_s5 + $0x174] ss:$20 sps:$4 sm:$0xff]   ;;  %v18528_v3 = vld [vmem:[%s28255_s5 + $0x190] ss:$20 sps:$4 sm:$0xff]  }
 0x364   :  { %18217 = vrot.lane.b32.xlu1 %v18216_v51, %s20462_s3  ;;  %v1850_v39 = vmax.f32 %v21977_v37, 0.0  ;;  %v1815_v31 = vadd.f32 %v21874_v50, %v21865_v32  ;;  %v1779_v25 = vadd.f32 %v21853_v55, %v1722_v20  ;;  %v1841_v44 = vmax.f32 %v1792_v4, 0.0  ;;  %5219 = vmatprep.subr.bf16.mxu1 %v18527_v18  ;;  %v18530_v51 = vld [vmem:[%s28255_s5 + $0x194] ss:$20 sps:$4 sm:$0xff]   ;;  %v18533_v18 = vld [vmem:[%s28255_s5 + $0x19c] ss:$20 sps:$4 sm:$0xff]  }
 0x365   :  { %v1842_v47 = vmax.f32 %v1793_v13, 0.0  ;;  %v1862_v38 = vmax.f32 %v1813_v6, 0.0  ;;  %v1863_v29 = vmax.f32 %v1814_v34, 0.0  ;;  %v28343_v32 = vmax.f32 %v21992_v45, 0.0  ;;  %5220 = vmatpush1.bf16.msra.mxu1 %v18525_v7  ;;  %4966 = vmatprep.subr.bf16.mxu0 %v18530_v51  ;;  %v18536_v51 = vld [vmem:[%s28255_s5 + $0x1bc] ss:$20 sps:$4 sm:$0xff]  }
 0x366   :  { %v1855_v37 = vmax.f32 %v1806_v41, 0.0  ;;  %v1856_v4 = vmax.f32 %v1807_v26, 0.0  ;;  %v1869_v13 = vmax.f32 %v1820_v12, 0.0  ;;  %v1870_v6 = vmax.f32 %v1821_v11, 0.0  ;;  %4967 = vmatpush1.bf16.msra.mxu0 %v18528_v3  ;;  %5221 = vmatprep.subr.bf16.mxu1 %v18533_v18 }
 0x367   :  { %v18211_v20 = vpack.i.bf16 %v1842_v47, %v1841_v44  ;;  %v18226_v34 = vpack.i.bf16 %v1863_v29, %v1862_v38  ;;  %v1829_v23 = vmax.f32 %v21980_v14, 0.0  ;;  %v1857_v33 = vmax.f32 %v1808_v21, 0.0  ;;  %v28525_v44 = vld [vmem:[#allocation38_spill] sm:$0xff]  ;;  %4968 = vmatprep.subr.bf16.mxu0 %v18536_v51 }
 0x368   :  { %v1822_v41 = vadd.f32 %v21874_v50, %v21869_v24  ;;  %v18236_v26 = vpack.i.bf16 %v1856_v4, %v1855_v37  ;;  %v18231_v12 = vpack.i.bf16 %v1870_v6, %v1869_v13  ;;  %v1827_v11 = vmax.f32 %v1778_v63, 0.0  ;;  %v18539_v13 = vld [vmem:[%s28255_s5 + $0x1c4] ss:$20 sps:$4 sm:$0xff]   ;;  %v18551_v51 = vld [vmem:[%s28255_s5 + $0x214] ss:$20 sps:$4 sm:$0xff]  }
 0x369   :  { %18212 = vrot.lane.b32.xlu0 %v18211_v20, %s20462_s3  ;;  %v1828_v7 = vmax.f32 %v1779_v25, 0.0  ;;  %v1748_v47 = vmul.f32 %v21797_v49, %v28525_v44  ;;  %v1786_v14 = vadd.f32 %v21853_v55, %v21886_v43  ;;  %v22040_v24 = vadd.f32 %v21853_v55, %v21944_v57  ;;  %18227 = vrot.lane.b32.xlu1 %v18226_v34, %s20462_s3  ;;  %v28527_v20 = vld [vmem:[#allocation26_spill] sm:$0xff]  ;;  %v18542_v6 = vld [vmem:[%s28255_s5 + $0x1e4] ss:$20 sps:$4 sm:$0xff]  }
 0x36a   :  { %v22045_v21 = vadd.f32 %v21853_v55, %v21967_v53  ;;  %v28526_v63 = vmax.f32 %v21983_v46, 0.0  ;;  %v18261_v3 = vpack.i.bf16 %v1850_v39, %v1843_v35  ;;  %5222 = vmatpush1.bf16.msra.mxu1 %v18531_v30  ;;  %v22054_v57 = vpack.i.bf16 %v1829_v23, %v1857_v33  ;;  %v18534_v53 = vld [vmem:[%s28255_s5 + $0x1b8] ss:$20 sps:$4 sm:$0xff]   ;;  %v18543_v44 = vld [vmem:[%s28255_s5 + $0x1e8] ss:$20 sps:$4 sm:$0xff]  }
 0x36b   :  { %v18246_v38 = vpack.i.bf16 %v1828_v7, %v1827_v11  ;;  %v22052_v43 = vadd.f32 %v21853_v55, %v1748_v47  ;;  %v1864_v29 = vmax.f32 %v1815_v31, 0.0  ;;  %v1871_v37 = vmax.f32 %v1822_v41, 0.0  ;;  %v28528_v35 = vld [vmem:[#allocation51_spill] sm:$0xff]  ;;  %4969 = vmatpush1.bf16.msra.mxu0 %v18534_v53  ;;  %5223 = vmatprep.subr.bf16.mxu1 %v18539_v13  ;;  %v28530_v13 = vld [vmem:[#allocation54_spill] sm:$0xff] }
 0x36c   :  { %v18221_v25 = vpack.i.bf16 %v28343_v32, %v28526_v63  ;;  %v1727_v4 = vmul.f32 %v21797_v49, %v28527_v20  ;;  %v1728_v39 = vmul.f32 %v21797_v49, %v28528_v35  ;;  %v18537_v31 = vld [vmem:[%s28255_s5 + $0x1c0] ss:$20 sps:$4 sm:$0xff]   ;;  %v22079_v30 = vadd.f32 %v21853_v55, %v21801_v42  ;;  %4970 = vmatprep.subr.bf16.mxu0 %v18542_v6  ;;  %v18549_v53 = vld [vmem:[%s28255_s5 + $0x210] ss:$20 sps:$4 sm:$0xff]  }
 0x36d   :  { %18237 = vrot.lane.b32.xlu1 %v18236_v26, %s20462_s3  ;;  %v18266_v33 = vpack.i.bf16 %v1871_v37, %v1864_v29  ;;  %v22083_v34 = vadd.f32 %v21853_v55, %v21813_v8  ;;  %v28333_v18 = vmax.f32 %v22040_v24, 0.0  ;;  %v28335_v26 = vmax.f32 %v22045_v21, 0.0  ;;  %v18540_v11 = vld [vmem:[%s28255_s5 + $0x1e0] ss:$20 sps:$4 sm:$0xff]   ;;  %v28529_v29 = vld [vmem:[#allocation22_spill] sm:$0xff] }
 0x36e   :  { %18222 = vrot.lane.b32.xlu0 %v18221_v25, %s20462_s3  ;;  %v22086_v23 = vadd.f32 %v21853_v55, %v1727_v4  ;;  %v1785_v41 = vadd.f32 %v21853_v55, %v1728_v39  ;;  %v18545_v42 = vld [vmem:[%s28255_s5 + $0x1ec] ss:$20 sps:$4 sm:$0xff]   ;;  %v1835_v8 = vmax.f32 %v1786_v14, 0.0  ;;  %v28337_v7 = vmax.f32 %v22052_v43, 0.0  ;;  %5224 = vmatpush1.bf16.msra.mxu1 %v18537_v31  ;;  %v18546_v25 = vld [vmem:[%s28255_s5 + $0x208] ss:$20 sps:$4 sm:$0xff]  }
 0x36f   :  { %5225 = vmatprep.subr.bf16.mxu1 %v18545_v42  ;;  %v18241_v47 = vpack.i.bf16 %v28335_v26, %v28333_v18  ;;  %4971 = vmatpush1.bf16.msra.mxu0 %v18540_v11  ;;  %v1720_v37 = vmul.f32 %v21797_v49, %v28529_v29  ;;  %v18552_v49 = vld [vmem:[%s28255_s5 + $0x230] ss:$20 sps:$4 sm:$0xff]   ;;  %v18554_v35 = vld [vmem:[%s28255_s5 + $0x234] ss:$20 sps:$4 sm:$0xff]   ;;  %v18555_v39 = vld [vmem:[%s28255_s5 + $0x238] ss:$20 sps:$4 sm:$0xff]   ;;  %v1730_v6 = vmul.f32 %v21838_v1, %v28530_v13 }
 0x370   :  { %v28334_v14 = vmax.f32 %v22086_v23, 0.0  ;;  %v1834_v63 = vmax.f32 %v1785_v41, 0.0  ;;  %v18558_v41 = vld [vmem:[%s28255_s5 + $0x258] ss:$20 sps:$4 sm:$0xff]   ;;  %v18560_v11 = vld [vmem:[%s28255_s5 + $0x25c] ss:$20 sps:$4 sm:$0xff]  }
 0x371   :  { %18247 = vrot.lane.b32.xlu1 %v18246_v38, %s20462_s3  ;;  %v18548_v38 = vld [vmem:[%s28255_s5 + $0x20c] ss:$20 sps:$4 sm:$0xff]   ;;  %v22129_v4 = vadd.f32 %v21853_v55, %v1720_v37  ;;  %v18557_v55 = vld [vmem:[%s28255_s5 + $0x23c] ss:$20 sps:$4 sm:$0xff]   ;;  %v1839_v26 = vmax.f32 %v21903_v16, 0.0 }
 0x372   :  { %18232 = vrot.lane.b32.xlu0 %v18231_v12, %s20462_s3  ;;  %v18256_v12 = vpack.i.bf16 %v28337_v7, %v1835_v8  ;;  %5226 = vmatpush1.bf16.msra.mxu1 %v18543_v44  ;;  %v18251_v20 = vpack.i.bf16 %v1834_v63, %v28334_v14  ;;  %v18561_v1 = vld [vmem:[%s28255_s5 + $0x260] ss:$20 sps:$4 sm:$0xff]   ;;  %v1845_v63 = vmax.f32 %v21919_v2, 0.0  ;;  %v1824_v2 = vmax.f32 %v21877_v36, 0.0 }
 0x373   :  { %4972 = vmatprep.subr.bf16.mxu0 %v18548_v38  ;;  %5227 = vmatprep.subr.bf16.mxu1 %v18551_v51  ;;  %v28338_v31 = vmax.f32 %v22129_v4, 0.0  ;;  %v1838_v51 = vmax.f32 %v21900_v52, 0.0  ;;  %v1831_v14 = vmax.f32 %v21892_v27, 0.0 }
 0x374   :  { %4973 = vmatpush1.bf16.msra.mxu0 %v18546_v25 }
 0x375   :  { %18257 = vrot.lane.b32.xlu1 %v18256_v12, %s20462_s3  ;;  %4974 = vmatprep.subr.bf16.mxu0 %v18554_v35  ;;  %v1859_v35 = vmax.f32 %v21949_v28, 0.0 }
 0x376   :  { %18242 = vrot.lane.b32.xlu0 %v18241_v47, %s20462_s3  ;;  %5228 = vmatpush1.bf16.msra.mxu1 %v18549_v53 }
 0x377   :  { %5229 = vmatprep.subr.bf16.mxu1 %v18557_v55  ;;  %v1837_v55 = vmax.f32 %v21897_v48, 0.0 }
 0x378   :  { %4975 = vmatpush1.bf16.msra.mxu0 %v18552_v49 }
 0x379   :  { %18262 = vrot.lane.b32.xlu1 %v18261_v3, %s20462_s3  ;;  %v1787_v3 = vadd.f32 %v21874_v50, %v1730_v6  ;;  %4976 = vmatprep.subr.bf16.mxu0 %v18560_v11  ;;  %v18566_v50 = vld [vmem:[%s28255_s5 + $0x284] ss:$20 sps:$4 sm:$0xff]  }
 0x37a   :  { %18252 = vrot.lane.b32.xlu0 %v18251_v20, %s20462_s3  ;;  %5230 = vmatpush1.bf16.msra.mxu1 %v18555_v39 }
 0x37b   :  { %v1836_v42 = vmax.f32 %v1787_v3, 0.0 }
 0x37c   :  { %4977 = vmatpush1.bf16.msra.mxu0 %v18558_v41 }
 0x37d   :  { %18272 = vrot.lane.b32.xlu1 %v22054_v57, %s20462_s3  ;;  %v18563_v57 = vld [vmem:[%s28255_s5 + $0x264] ss:$20 sps:$4 sm:$0xff]   ;;  %4997 = vmatprep.subr.bf16.mxu0 %v18566_v50  ;;  %v1852_v50 = vmax.f32 %v21929_v60, 0.0 }
 0x37e   :  { %1876 = vrot.lane.b32.xlu0 %v28338_v31, %s20462_s3  ;;  %5231 = vmatprep.subr.bf16.mxu1 %v18563_v57 }
 0x37f   :  { %5232 = vmatpush1.bf16.msra.mxu1 %v18561_v1  ;;  %v1844_v1 = vmax.f32 %v21912_v61, 0.0 }
 0x382   :  { %18267 = vrot.lane.b32.xlu0 %v18266_v33, %s20462_s3  ;;  %v18569_v33 = vld [vmem:[%s28255_s5 + $0x28c] ss:$20 sps:$4 sm:$0xff]  }
 0x383   :  { %5252 = vmatprep.subr.bf16.mxu1 %v18569_v33  ;;  %v1866_v33 = vmax.f32 %v21960_v58, 0.0 }
 0x386   :  { %1909 = vrot.lane.b32.xlu0 %v1836_v42, %s20462_s3 }
 0x3d6   :  { %v22174_v8 = vpop.permute.xlu1 %18217 }
 0x3d7   :  { %v18220_v44 = vunpack.i.h.bf16 %v22174_v8  ;;  %v18219_v47 = vunpack.i.l.bf16 %v22174_v8 }
 0x3d9   :  { %v1983_v12 = vsel %vm1690_vm13, %v18219_v47, %v18220_v44 }
 0x3da   :  { %v1990_v25 = vmax.f32 %v1845_v63, %v1983_v12 }
 0x3db   :  { %v22182_v38 = vpop.permute.xlu0 %18212  ;;  %v22186_v53 = vpop.permute.xlu1 %18227 }
 0x3dc   :  { %v18215_v29 = vunpack.i.h.bf16 %v22182_v38  ;;  %v18214_v37 = vunpack.i.l.bf16 %v22182_v38  ;;  %v28336_v20 = vunpack.i.h.bf16 %v22186_v53  ;;  %v18229_v49 = vunpack.i.l.bf16 %v22186_v53 }
 0x3dd   :  { %v1999_v13 = vrot.slane %v1990_v25, 5 }
 0x3de   :  { %v1923_v39 = vsel %vm1690_vm13, %v18214_v37, %v18215_v29  ;;  %v2057_v52 = vsel %vm1690_vm13, %v18229_v49, %v28336_v20 }
 0x3df   :  { %v1938_v6 = vmax.f32 %v1838_v51, %v1923_v39  ;;  %v2064_v41 = vmax.f32 %v1859_v35, %v2057_v52  ;;  %v22202_v28 = vpop.permute.xlu1 %18237 }
 0x3e0   :  { %v18223_v3 = vpop.permute.xlu0 %18222  ;;  %v28340_v48 = vunpack.i.h.bf16 %v22202_v28  ;;  %v28344_v42 = vunpack.i.l.bf16 %v22202_v28 }
 0x3e1   :  { %v18225_v11 = vunpack.i.h.bf16 %v18223_v3  ;;  %v18224_v36 = vunpack.i.l.bf16 %v18223_v3  ;;  %v22205_v57 = vrot.slane %v1938_v6, 5  ;;  %v22224_v6 = vrot.slane %v2064_v41, 5 }
 0x3e2   :  { %v2034_v61 = vsel %vm1690_vm13, %v28344_v42, %v28340_v48  ;;  %v1832_v42 = vmax.f32 %v22083_v34, 0.0 }
 0x3e3   :  { %v1982_v63 = vsel %vm1690_vm13, %v18225_v11, %v18219_v47  ;;  %v1922_v12 = vsel %vm1690_vm13, %v18224_v36, %v18214_v37  ;;  %v2000_v60 = vsel %vm1949_vm14, %v22205_v57, %v1999_v13  ;;  %v22226_v58 = vmax.f32 %v1852_v50, %v2034_v61 }
 0x3e4   :  { %v22213_v51 = vmax.f32 %v1844_v1, %v1982_v63  ;;  %v1937_v35 = vmax.f32 %v1837_v55, %v1922_v12  ;;  %v22220_v39 = vpop.permute.xlu0 %18232  ;;  %v22230_v55 = vpop.permute.xlu1 %18247  ;;  %v1830_v63 = vmax.f32 %v21889_v5, 0.0  ;;  %v1867_v13 = vmax.f32 %v21963_v40, 0.0 }
 0x3e5   :  { %v28339_v47 = vunpack.i.h.bf16 %v22220_v39  ;;  %v18234_v37 = vunpack.i.l.bf16 %v22220_v39  ;;  %v28341_v11 = vunpack.i.h.bf16 %v22230_v55  ;;  %v28342_v36 = vunpack.i.l.bf16 %v22230_v55 }
 0x3e6   :  { %v1997_v52 = vrot.slane %v22213_v51, 5  ;;  %v22233_v3 = vrot.slane %v1937_v35, 5  ;;  %v2078_v41 = vrot.slane %v22226_v58, 5 }
 0x3e7   :  { %v2116_v1 = vsel %vm1690_vm13, %v18234_v37, %v28339_v47  ;;  %v1885_v61 = vsel %vm1690_vm13, %v28342_v36, %v28341_v11  ;;  %v1851_v47 = vmax.f32 %v21926_v17, 0.0  ;;  %v1823_v11 = vmax.f32 %v22079_v30, 0.0 }
 0x3e8   :  { %v2123_v12 = vmax.f32 %v1866_v33, %v2116_v1  ;;  %v18243_v35 = vpop.permute.xlu0 %18242  ;;  %v1998_v18 = vsel %vm1949_vm14, %v22233_v3, %v1997_v52  ;;  %v2080_v50 = vsel %vm1949_vm14, %v2078_v41, %v22224_v6  ;;  %v1892_v20 = vmax.f32 %v1824_v2, %v1885_v61  ;;  %v22256_v5 = vpop.permute.xlu1 %18257 }
 0x3e9   :  { %v1846_v33 = vmax.f32 %v21922_v9, 0.0  ;;  %v22259_v1 = vmax.f32 %v1990_v25, %v2080_v50  ;;  %v18244_v31 = vunpack.i.l.bf16 %v18243_v35  ;;  %v1853_v52 = vmax.f32 %v21932_v10, 0.0 }
 0x3ea   :  { %v2132_v7 = vrot.slane %v2123_v12, 5  ;;  %v22264_v27 = vmax.f32 %v1892_v20, %v22205_v57  ;;  %v18259_v16 = vunpack.i.l.bf16 %v22256_v5  ;;  %v1858_v41 = vmax.f32 %v21940_v59, 0.0 }
 0x3eb   :  { %v18245_v25 = vunpack.i.h.bf16 %v18243_v35  ;;  %v1865_v12 = vmax.f32 %v21957_v0, 0.0  ;;  %v2056_v59 = vsel %vm1690_vm13, %v18244_v31, %v18229_v49  ;;  %v18260_v35 = vunpack.i.h.bf16 %v22256_v5 }
 0x3ec   :  { %v2133_v9 = vsel %vm1949_vm14, %v22224_v6, %v2132_v7  ;;  %v18253_v50 = vpop.permute.xlu0 %18252  ;;  %v18263_v48 = vpop.permute.xlu1 %18262  ;;  %v2063_v32 = vmax.f32 %v1858_v41, %v2056_v59 }
 0x3ed   :  { %v22273_v17 = vmax.f32 %v22226_v58, %v2133_v9  ;;  %v18255_v10 = vunpack.i.h.bf16 %v18253_v50  ;;  %v18254_v61 = vunpack.i.l.bf16 %v18253_v50  ;;  %v18265_v2 = vunpack.i.h.bf16 %v18263_v48 }
 0x3ee   :  { %v18264_v9 = vunpack.i.l.bf16 %v18263_v48  ;;  %v2115_v50 = vsel %vm1690_vm13, %v18245_v25, %v18234_v37 }
 0x3ef   :  { %v1919_v7 = vsel %vm1690_vm13, %v18254_v61, %v18255_v10  ;;  %v1920_v0 = vsel %vm1690_vm13, %v18255_v10, %v18259_v16  ;;  %v1984_v31 = vsel %vm1690_vm13, %v18220_v44, %v18265_v2  ;;  %v22299_v8 = vmax.f32 %v1865_v12, %v2115_v50 }
 0x3f0   :  { %v1933_v36 = vmax.f32 %v1830_v63, %v1919_v7  ;;  %v1934_v40 = vmax.f32 %v1831_v14, %v1920_v0  ;;  %v1877_v49 = vpop.permute.xlu0 %1876  ;;  %v22289_v30 = vmax.f32 %v1846_v33, %v1984_v31  ;;  %v1924_v61 = vsel %vm1690_vm13, %v18215_v29, %v18264_v9  ;;  %v18273_v14 = vpop.permute.xlu1 %18272 }
 0x3f1   :  { %v28531_v44 = vunpack.i.l.bf16 %v22202_v28  ;;  %v1939_v38 = vmax.f32 %v1839_v26, %v1924_v61  ;;  %v2331_v29 = vrot.slane %v22264_v27, 2  ;;  %v28533_v7 = vunpack.i.l.bf16 %v22230_v55 }
 0x3f2   :  { %v1950_v10 = vrot.slane %v1933_v36, 5  ;;  %v22295_v48 = vmax.f32 %v1933_v36, %v1998_v18  ;;  %v1953_v37 = vrot.slane %v1934_v40, 5  ;;  %v22297_v63 = vmax.f32 %v1934_v40, %v2000_v60 }
 0x3f3   :  { %v2033_v33 = vsel %vm1690_vm13, %v18260_v35, %v28531_v44  ;;  %v2001_v41 = vrot.slane %v22289_v30, 5  ;;  %v28532_v18 = vmax.f32 %v21992_v45, 0.0  ;;  %v1957_v59 = vrot.slane %v1939_v38, 5 }
 0x3f4   :  { %v1955_v34 = vsel %vm1949_vm14, %v1953_v37, %v22205_v57  ;;  %v1952_v60 = vsel %vm1949_vm14, %v1950_v10, %v22233_v3  ;;  %v18268_v25 = vpop.permute.xlu0 %18267  ;;  %v1884_v26 = vsel %vm1690_vm13, %v1877_v49, %v28533_v7  ;;  %v18275_v35 = vunpack.i.h.bf16 %v18273_v14 }
 0x3f5   :  { %v22310_v36 = vmax.f32 %v28532_v18, %v18265_v2  ;;  %v22314_v12 = vmax.f32 %v1892_v20, %v1955_v34  ;;  %v28534_v0 = vmax.f32 %v21983_v46, 0.0  ;;  %v1891_v57 = vmax.f32 %v1823_v11, %v1884_v26 }
 0x3f6   :  { %v18274_v40 = vunpack.i.l.bf16 %v18273_v14  ;;  %v18270_v45 = vunpack.i.h.bf16 %v18268_v25  ;;  %v22321_v2 = vmax.f32 %v1851_v47, %v2033_v33  ;;  %v28535_v31 = vunpack.i.h.bf16 %v22230_v55 }
 0x3f7   :  { %v1940_v50 = vmax.f32 %v28534_v0, %v18264_v9  ;;  %v18269_v20 = vunpack.i.l.bf16 %v18268_v25  ;;  %v2002_v10 = vsel %vm1949_vm14, %v1957_v59, %v2001_v41  ;;  %v22327_v37 = vmax.f32 %v1891_v57, %v1952_v60 }
 0x3f8   :  { %v1886_v61 = vsel %vm1690_vm13, %v28535_v31, %v18275_v35  ;;  %v2013_v49 = vmax.f32 %v1891_v57, %v22233_v3  ;;  %v28536_v44 = vmax.f32 %v21880_v62, 0.0  ;;  %v28537_v11 = vunpack.i.h.bf16 %v22202_v28  ;;  %v1910_v28 = vpop.permute.xlu0 %1909 }
 0x3f9   :  { %v22335_v47 = vrot.slane %v2063_v32, 5  ;;  %v2130_v55 = vrot.slane %v22299_v8, 5  ;;  %v28538_v33 = vunpack.i.h.bf16 %v22220_v39  ;;  %v2332_v38 = vrot.slane %v22297_v63, 2 }
 0x3fa   :  { %v1893_v46 = vmax.f32 %v28536_v44, %v1886_v61  ;;  %v2035_v9 = vsel %vm1690_vm13, %v28537_v11, %v18274_v40  ;;  %v2003_v3 = vrot.slane %v22310_v36, 5  ;;  %v22345_v62 = vrot.slane %v1940_v50, 5 }
 0x3fb   :  { %v22338_v14 = vmax.f32 %v1853_v52, %v2035_v9  ;;  %v2117_v41 = vsel %vm1690_vm13, %v28538_v33, %v18270_v45  ;;  %v2329_v32 = vrot.slane %v22295_v48, 2  ;;  %v2075_v18 = vrot.slane %v22321_v2, 5 }
 0x3fc   :  { %v22347_v34 = vmax.f32 %v1893_v46, %v1957_v59  ;;  %v28539_v52 = vmax.f32 %v22129_v4, 0.0  ;;  %v2375_v39 = vrot.slane %v22273_v17, 2  ;;  %v28540_v60 = vmax.f32 %v22052_v43, 0.0 }
 0x3fd   :  { %v2081_v7 = vrot.slane %v22338_v14, 5  ;;  %v22361_v26 = vmax.f32 %v1867_v13, %v2117_v41  ;;  %v28541_v0 = vunpack.i.h.bf16 %v22186_v53  ;;  %v28542_v57 = vmax.f32 %v22045_v21, 0.0 }
 0x3fe   :  { %v22353_v8 = vmax.f32 %v28539_v52, %v18275_v35  ;;  %v22358_v25 = vmax.f32 %v28540_v60, %v18274_v40  ;;  %v28543_v4 = vmax.f32 %v21952_v15, 0.0  ;;  %v1921_v43 = vsel %vm1690_vm13, %v18259_v16, %v1910_v28 }
 0x3ff   :  { %v2058_v50 = vsel %vm1690_vm13, %v28541_v0, %v18269_v20  ;;  %v22368_v31 = vmax.f32 %v28542_v57, %v18270_v45  ;;  %v28544_v40 = vmax.f32 %v22086_v23, 0.0  ;;  %v28545_v13 = vmax.f32 %v22040_v24, 0.0 }
 0x400   :  { %v2065_v35 = vmax.f32 %v28543_v4, %v2058_v50  ;;  %v2004_v53 = vsel %vm1949_vm14, %v22345_v62, %v2003_v3  ;;  %v1935_v11 = vmax.f32 %v1832_v42, %v1921_v43  ;;  %v2333_v21 = vsel %vm188_vm8, %v2331_v29, %v2332_v38 }
 0x401   :  { %v1936_v61 = vmax.f32 %v28544_v40, %v1910_v28  ;;  %v2066_v44 = vmax.f32 %v28545_v13, %v18269_v20  ;;  %v2154_v45 = vrot.slane %v2013_v49, 7  ;;  %v2395_v5 = vsel %vm179_vm4, %v22314_v12, %v2333_v21 }
 0x402   :  { %v22382_v9 = vrot.slane %v2065_v35, 5  ;;  %v2328_v16 = vrot.slane %v2013_v49, 2  ;;  %v2084_v23 = vrot.slane %v22358_v25, 5  ;;  %v1956_v33 = vrot.slane %v1935_v11, 5 }
 0x403   :  { %v1959_v15 = vrot.slane %v1936_v61, 5  ;;  %v22387_v41 = vmax.f32 %v1935_v11, %v2002_v10  ;;  %v2334_v24 = vrot.slane %v22347_v34, 2  ;;  %v2134_v20 = vrot.slane %v22361_v26, 5 }
 0x404   :  { %v2136_v42 = vrot.slane %v22368_v31, 5  ;;  %v2083_v29 = vsel %vm1949_vm14, %v2081_v7, %v22382_v9  ;;  %v22394_v3 = vrot.slane %v2066_v44, 5  ;;  %v1958_v49 = vsel %vm1949_vm14, %v1956_v33, %v1957_v59 }
 0x405   :  { %v22397_v28 = vmax.f32 %v22289_v30, %v2083_v29  ;;  %v22400_v52 = vmax.f32 %v1936_v61, %v2004_v53  ;;  %v1961_v10 = vsel %vm1949_vm14, %v1959_v15, %v22345_v62  ;;  %v22404_v60 = vmax.f32 %v1893_v46, %v1958_v49 }
 0x406   :  { %v2335_v26 = vrot.slane %v22387_v41, 2  ;;  %v2405_v0 = vsel %vm183_vm0, %v2332_v38, %v22259_v1  ;;  %v2131_v30 = vsel %vm1949_vm14, %v22335_v47, %v2130_v55  ;;  %v2155_v50 = vrot.slane %v22295_v48, 7 }
 0x407   :  { %v2415_v7 = vsel %vm177_vm3, %v2405_v0, %v2375_v39  ;;  %v2077_v59 = vsel %vm1949_vm14, %v2075_v18, %v22335_v47  ;;  %v22425_v38 = vmax.f32 %v22321_v2, %v2131_v30  ;;  %v2206_v18 = vrot.slane %v22327_v37, 2 }
 0x408   :  { %v22416_v57 = vsel %vm188_vm8, %v2334_v24, %v2335_v26  ;;  %v22420_v46 = vsel %vm183_vm0, %v2335_v26, %v22397_v28  ;;  %v22422_v31 = vpack.c.bf16 %v2415_v7, %v2395_v5  ;;  %v2156_v55 = vsel %vm185_vm7, %v2154_v45, %v2155_v50  ;;  %v18567_v7 = vld [vmem:[%s28255_s5 + $0x288] ss:$20 sps:$4 sm:$0xff]  }
 0x409   :  { %v22431_v4 = vmax.f32 %v22213_v51, %v2077_v59  ;;  %v2330_v35 = vsel %vm188_vm8, %v2328_v16, %v2329_v32  ;;  %v2161_v43 = vrot.slane %v22387_v41, 7  ;;  %v2246_v40 = vrot.slane %v22425_v38, 7 }
 0x40a   :  { %4978 = vmatprep.mubr.bf16.mxu0 %v22422_v31  ;;  %5233 = vmatprep.mubr.bf16.mxu1 %v22422_v31  ;;  %v2374_v61 = vrot.slane %v22425_v38, 2  ;;  %v2394_v13 = vsel %vm179_vm4, %v22327_v37, %v2330_v35  ;;  %v2291_v53 = vrot.slane %v22259_v1, 2  ;;  %v2292_v11 = vrot.slane %v22397_v28, 2 }
 0x40b   :  { %v2290_v51 = vrot.slane %v22431_v4, 2  ;;  %v2404_v44 = vsel %vm183_vm0, %v2329_v32, %v22431_v4  ;;  %v18281_v21 = vpack.i.bf16 %v2156_v55, %v2246_v40  ;;  %v22448_v15 = vpack.c.bf16 %v2375_v39, %v2375_v39  ;;  %v18564_v32 = vld [vmem:[%s28255_s5 + $0x280] ss:$20 sps:$4 sm:$0xff]  }
 0x40c   :  { %v2414_v45 = vsel %vm177_vm3, %v2404_v44, %v2374_v61  ;;  %v2207_v5 = vrot.slane %v22314_v12, 2  ;;  %v18291_v24 = vpack.i.bf16 %v2292_v11, %v2291_v53  ;;  %v2208_v29 = vrot.slane %v22404_v60, 2  ;;  %v18575_v40 = vld [vmem:[%s28255_s5 + $0x2b4] ss:$20 sps:$4 sm:$0xff]  }
 0x40d   :  { %v18276_v16 = vpack.i.bf16 %v2290_v51, %v2206_v18  ;;  %v22451_v33 = vpack.c.bf16 %v2414_v45, %v2394_v13  ;;  %18282 = vrot.lane.b32.xlu0 %v18281_v21, %s20461_s27  ;;  %v2157_v49 = vrot.slane %v22264_v27, 7  ;;  %v2158_v26 = vrot.slane %v22297_v63, 7  ;;  %v18570_v53 = vld [vmem:[%s28255_s5 + $0x2a8] ss:$20 sps:$4 sm:$0xff]   ;;  %v18573_v21 = vld [vmem:[%s28255_s5 + $0x2b0] ss:$20 sps:$4 sm:$0xff]  }
 0x40e   :  { %v2160_v39 = vrot.slane %v22347_v34, 7  ;;  %v2135_v0 = vsel %vm1949_vm14, %v22382_v9, %v2134_v20  ;;  %v2086_v30 = vsel %vm1949_vm14, %v2084_v23, %v22394_v3  ;;  %v18286_v59 = vpack.i.bf16 %v2208_v29, %v2207_v5  ;;  %v18572_v20 = vld [vmem:[%s28255_s5 + $0x2ac] ss:$20 sps:$4 sm:$0xff]  }
 0x40f   :  { %18277 = vrot.lane.b32.xlu1 %v18276_v16, %s20461_s27  ;;  %4979 = vmatmul.mubr.bf16.vlgmr.msra.gmra.mrb[40].mxu0 %v22451_v33  ;;  %v22471_v27 = vmax.f32 %v22338_v14, %v2135_v0  ;;  %v2223_v34 = vrot.slane %v22295_v48, 1  ;;  %v2137_v55 = vsel %vm1949_vm14, %v22394_v3, %v2136_v42  ;;  %v2159_v23 = vsel %vm185_vm7, %v2157_v49, %v2158_v26  ;;  %v18581_v0 = vld [vmem:[%s28255_s5 + $0x2dc] ss:$20 sps:$4 sm:$0xff]  }
 0x410   :  { %5234 = vmatmul.mubr.bf16.vlgmr.msra.gmra.mrb[32].mxu1 %v22451_v33  ;;  %4988 = vmatprep.mubr.bf16.mxu0 %v22448_v15  ;;  %v2162_v18 = vsel %vm185_vm7, %v2160_v39, %v2161_v43  ;;  %v2224_v35 = vrot.slane %v22297_v63, 1  ;;  %v22490_v13 = vmax.f32 %v22353_v8, %v1961_v10  ;;  %v2247_v51 = vrot.slane %v22273_v17, 7  ;;  %v18578_v39 = vld [vmem:[%s28255_s5 + $0x2d4] ss:$20 sps:$4 sm:$0xff]  }
 0x411   :  { %5243 = vmatprep.mubr.bf16.mxu1 %v22448_v15  ;;  %v18301_v42 = vpack.i.bf16 %v2162_v18, %v2159_v23  ;;  %v2248_v44 = vrot.slane %v22471_v27, 7  ;;  %4998 = vmatpush1.bf16.msra.mxu0 %v18564_v32  ;;  %v22500_v63 = vmax.f32 %v22353_v8, %v22345_v62  ;;  %v2307_v11 = vrot.slane %v22425_v38, 1 }
 0x412   :  { %18292 = vrot.lane.b32.xlu0 %v18291_v24, %s20461_s27  ;;  %v18311_v10 = vpack.i.bf16 %v2224_v35, %v2223_v34  ;;  %5253 = vmatpush1.bf16.msra.mxu1 %v18567_v7  ;;  %v22508_v45 = vmax.f32 %v22310_v36, %v2086_v30  ;;  %v2308_v16 = vrot.slane %v22273_v17, 1  ;;  %v2185_v62 = vrot.slane %v22327_v37, 1 }
 0x413   :  { %18287 = vrot.lane.b32.xlu1 %v18286_v59, %s20461_s27  ;;  %v18296_v5 = vpack.i.bf16 %v2248_v44, %v2247_v51  ;;  %4999 = vmatprep.subr.bf16.mxu0 %v18572_v20  ;;  %v22514_v8 = vmax.f32 %v22358_v25, %v2137_v55  ;;  %v2186_v38 = vrot.slane %v22314_v12, 1  ;;  %v2269_v24 = vrot.slane %v22431_v4, 1  ;;  %v18576_v59 = vld [vmem:[%s28255_s5 + $0x2d0] ss:$20 sps:$4 sm:$0xff]   ;;  %v18579_v55 = vld [vmem:[%s28255_s5 + $0x2d8] ss:$20 sps:$4 sm:$0xff]  }
 0x414   :  { %v2270_v29 = vrot.slane %v22259_v1, 1  ;;  %5254 = vmatprep.subr.bf16.mxu1 %v18575_v40  ;;  %v2164_v36 = vrot.slane %v22400_v52, 7  ;;  %v22520_v32 = vpack.c.bf16 %v2374_v61, %v2374_v61  ;;  %v2209_v49 = vrot.slane %v22490_v13, 2  ;;  %v18587_v51 = vld [vmem:[%s28255_s5 + $0x304] ss:$20 sps:$4 sm:$0xff]  }
 0x415   :  { %v18316_v17 = vpack.i.bf16 %v2308_v16, %v2307_v11  ;;  %5000 = vmatpush1.bf16.msra.mxu0 %v18570_v53  ;;  %v22531_v7 = vrot.slane %v22471_v27, 2  ;;  %v18331_v30 = vpack.i.bf16 %v2186_v38, %v2185_v62  ;;  %v2163_v34 = vrot.slane %v22500_v63, 7 }
 0x416   :  { %18302 = vrot.lane.b32.xlu0 %v18301_v42, %s20461_s27  ;;  %v18326_v61 = vpack.i.bf16 %v2270_v29, %v2269_v24  ;;  %5255 = vmatpush1.bf16.msra.mxu1 %v18573_v21  ;;  %v2293_v20 = vrot.slane %v22508_v45, 2  ;;  %v2249_v23 = vrot.slane %v22514_v8, 7  ;;  %v22547_v18 = vpack.i.bf16 %v2161_v43, %v2158_v26  ;;  %v18584_v42 = vld [vmem:[%s28255_s5 + $0x2fc] ss:$20 sps:$4 sm:$0xff]   ;;  %v18582_v21 = vld [vmem:[%s28255_s5 + $0x2f8] ss:$20 sps:$4 sm:$0xff]  }
 0x417   :  { %4989 = vmatmul.mubr.bf16.gmra.mrb[44].mxu0 %v22520_v32  ;;  %18297 = vrot.lane.b32.xlu1 %v18296_v5, %s20461_s27  ;;  %v2099_v35 = vmax.f32 %v22321_v2, %v22335_v47  ;;  %v2101_v40 = vmax.f32 %v22338_v14, %v22382_v9  ;;  %v2165_v43 = vsel %vm185_vm7, %v2163_v34, %v2164_v36  ;;  %v5735_v47 = vrot.slane %v22314_v12, 5  ;;  %v18585_v12 = vld [vmem:[%s28255_s5 + $0x300] ss:$20 sps:$4 sm:$0xff]   ;;  %v18621_v14 = vld [vmem:[%s28255_s5 + $0x3f0] ss:$20 sps:$4 sm:$0xff]  }
 0x418   :  { %5244 = vmatmul.mubr.bf16.gmra.mrb[36].mxu1 %v22520_v32  ;;  %v18306_v44 = vpack.i.bf16 %v2293_v20, %v2209_v49  ;;  %v28546_v26 = vmax.f32 %v22226_v58, %v22224_v6  ;;  %5001 = vmatprep.subr.bf16.mxu0 %v18578_v39  ;;  %v5734_v53 = vrot.slane %v22327_v37, 5  ;;  %v2396_v6 = vsel %vm179_vm4, %v22404_v60, %v22416_v57  ;;  %v18590_v57 = vld [vmem:[%s28255_s5 + $0x324] ss:$20 sps:$4 sm:$0xff]   ;;  %v18588_v29 = vld [vmem:[%s28255_s5 + $0x320] ss:$20 sps:$4 sm:$0xff]  }
 0x419   :  { %5256 = vmatprep.subr.bf16.mxu1 %v18581_v0  ;;  %v22570_v11 = vrot.slane %v2099_v35, 1  ;;  %5002 = vmatpush1.bf16.msra.mxu0 %v18576_v59  ;;  %v2416_v58 = vsel %vm177_vm3, %v22420_v46, %v22531_v7  ;;  %v18321_v5 = vpack.i.bf16 %v2165_v43, %v2249_v23  ;;  %v18593_v46 = vld [vmem:[%s28255_s5 + $0x32c] ss:$20 sps:$4 sm:$0xff]   ;;  %v5756_v62 = vrot.slane %v22431_v4, 6  ;;  %v18591_v4 = vld [vmem:[%s28255_s5 + $0x328] ss:$20 sps:$4 sm:$0xff]  }
 0x41a   :  { %v22565_v2 = vrot.slane %v28546_v26, 1  ;;  %18312 = vrot.lane.b32.xlu0 %v18311_v10, %s20460_s23  ;;  %5257 = vmatpush1.bf16.msra.mxu1 %v18579_v55  ;;  %v22585_v37 = vpack.c.bf16 %v2416_v58, %v2396_v6  ;;  %v5757_v10 = vrot.slane %v22259_v1, 6  ;;  %v5736_v38 = vrot.slane %v22404_v60, 5  ;;  %v18596_v34 = vld [vmem:[%s28255_s5 + $0x34c] ss:$20 sps:$4 sm:$0xff]  }
 0x41b   :  { %18307 = vrot.lane.b32.xlu1 %v18306_v44, %s20461_s27  ;;  %5003 = vmatprep.subr.bf16.mxu0 %v18584_v42  ;;  %v5758_v24 = vrot.slane %v22397_v28, 6  ;;  %v22607_v49 = vsel %vm185_vm7, %v5734_v53, %v5756_v62  ;;  %v2309_v0 = vrot.slane %v22471_v27, 1  ;;  %v2310_v59 = vrot.slane %v22514_v8, 1  ;;  %v18594_v27 = vld [vmem:[%s28255_s5 + $0x348] ss:$20 sps:$4 sm:$0xff]  }
 0x41c   :  { %v18361_v16 = vpack.i.bf16 %v22565_v2, %v22570_v11  ;;  %5258 = vmatprep.subr.bf16.mxu1 %v18587_v51  ;;  %v22599_v1 = vsel %vm185_vm7, %v5735_v47, %v5757_v10  ;;  %v2225_v20 = vrot.slane %v22387_v41, 1  ;;  %v2226_v55 = vrot.slane %v22400_v52, 1  ;;  %v18597_v23 = vld [vmem:[%s28255_s5 + $0x350] ss:$20 sps:$4 sm:$0xff]   ;;  %v18603_v26 = vld [vmem:[%s28255_s5 + $0x378] ss:$20 sps:$4 sm:$0xff]  }
 0x41d   :  { %5004 = vmatpush1.bf16.msra.mxu0 %v18582_v21  ;;  %v22614_v39 = vsel %vm185_vm7, %v5736_v38, %v5758_v24  ;;  %v18341_v35 = vpack.i.bf16 %v2310_v59, %v2309_v0  ;;  %v2187_v42 = vrot.slane %v22404_v60, 1  ;;  %v2188_v41 = vrot.slane %v22490_v13, 1  ;;  %v18600_v60 = vld [vmem:[%s28255_s5 + $0x370] ss:$20 sps:$4 sm:$0xff]   ;;  %v18606_v6 = vld [vmem:[%s28255_s5 + $0x398] ss:$20 sps:$4 sm:$0xff]  }
 0x41e   :  { %18322 = vrot.lane.b32.xlu0 %v18321_v5, %s20461_s27  ;;  %5259 = vmatpush1.bf16.msra.mxu1 %v18585_v12  ;;  %v18336_v51 = vpack.i.bf16 %v2226_v55, %v2225_v20  ;;  %v2271_v44 = vrot.slane %v22397_v28, 1  ;;  %v2272_v43 = vrot.slane %v22508_v45, 1  ;;  %v18608_v28 = vld [vmem:[%s28255_s5 + $0x39c] ss:$20 sps:$4 sm:$0xff]   ;;  %v18611_v53 = vld [vmem:[%s28255_s5 + $0x3a4] ss:$20 sps:$4 sm:$0xff]   ;;  %v2102_v5 = vmax.f32 %v22358_v25, %v22394_v3 }
 0x41f   :  { %18317 = vrot.lane.b32.xlu1 %v18316_v17, %s20460_s23  ;;  %5005 = vmatprep.subr.bf16.mxu0 %v18590_v57  ;;  %v18599_v17 = vld [vmem:[%s28255_s5 + $0x354] ss:$20 sps:$4 sm:$0xff]   ;;  %v18351_v47 = vpack.i.bf16 %v2188_v41, %v2187_v42  ;;  %v18614_v12 = vld [vmem:[%s28255_s5 + $0x3c4] ss:$20 sps:$4 sm:$0xff]   ;;  %v18617_v10 = vld [vmem:[%s28255_s5 + $0x3cc] ss:$20 sps:$4 sm:$0xff]  }
 0x420   :  { %5260 = vmatprep.subr.bf16.mxu1 %v18593_v46  ;;  %v18346_v21 = vpack.i.bf16 %v2272_v43, %v2271_v44  ;;  %v18609_v58 = vld [vmem:[%s28255_s5 + $0x3a0] ss:$20 sps:$4 sm:$0xff]   ;;  %v18615_v46 = vld [vmem:[%s28255_s5 + $0x3c8] ss:$20 sps:$4 sm:$0xff]   ;;  %v5717_v48 = vrot.slane %v2101_v40, 1 }
 0x421   :  { %5006 = vmatpush1.bf16.msra.mxu0 %v18588_v29  ;;  %v18612_v57 = vld [vmem:[%s28255_s5 + $0x3c0] ss:$20 sps:$4 sm:$0xff]   ;;  %v18629_v40 = vld [vmem:[%s28255_s5 + $0x41c] ss:$20 sps:$4 sm:$0xff]   ;;  %v18627_v11 = vld [vmem:[%s28255_s5 + $0x418] ss:$20 sps:$4 sm:$0xff]  }
 0x422   :  { %18332 = vrot.lane.b32.xlu0 %v18331_v30, %s20460_s23  ;;  %5261 = vmatpush1.bf16.msra.mxu1 %v18591_v4  ;;  %v18602_v30 = vld [vmem:[%s28255_s5 + $0x374] ss:$20 sps:$4 sm:$0xff]   ;;  %v18620_v25 = vld [vmem:[%s28255_s5 + $0x3ec] ss:$20 sps:$4 sm:$0xff]   ;;  %v18635_v62 = vld [vmem:[%s28255_s5 + $0x444] ss:$20 sps:$4 sm:$0xff]  }
 0x423   :  { %18327 = vrot.lane.b32.xlu1 %v18326_v61, %s20460_s23  ;;  %5007 = vmatprep.subr.bf16.mxu0 %v18596_v34  ;;  %v18605_v61 = vld [vmem:[%s28255_s5 + $0x37c] ss:$20 sps:$4 sm:$0xff]   ;;  %v18623_v3 = vld [vmem:[%s28255_s5 + $0x3f4] ss:$20 sps:$4 sm:$0xff]   ;;  %v18630_v38 = vld [vmem:[%s28255_s5 + $0x438] ss:$20 sps:$4 sm:$0xff]  }
 0x424   :  { %5262 = vmatprep.subr.bf16.mxu1 %v18599_v17  ;;  %v18626_v9 = vld [vmem:[%s28255_s5 + $0x414] ss:$20 sps:$4 sm:$0xff]   ;;  %v18638_v29 = vld [vmem:[%s28255_s5 + $0x464] ss:$20 sps:$4 sm:$0xff]   ;;  %v18641_v4 = vld [vmem:[%s28255_s5 + $0x46c] ss:$20 sps:$4 sm:$0xff]  }
 0x425   :  { %5008 = vmatpush1.bf16.msra.mxu0 %v18594_v27  ;;  %v18633_v24 = vld [vmem:[%s28255_s5 + $0x440] ss:$20 sps:$4 sm:$0xff]   ;;  %v18639_v59 = vld [vmem:[%s28255_s5 + $0x468] ss:$20 sps:$4 sm:$0xff]   ;;  %v18645_v55 = vld [vmem:[%s28255_s5 + $0x490] ss:$20 sps:$4 sm:$0xff]  }
 0x426   :  { %18342 = vrot.lane.b32.xlu0 %v18341_v35, %s20460_s23  ;;  %5263 = vmatpush1.bf16.msra.mxu1 %v18597_v23  ;;  %v18636_v0 = vld [vmem:[%s28255_s5 + $0x460] ss:$20 sps:$4 sm:$0xff]   ;;  %v18642_v20 = vld [vmem:[%s28255_s5 + $0x488] ss:$20 sps:$4 sm:$0xff]   ;;  %v18648_v35 = vld [vmem:[%s28255_s5 + $0x4b0] ss:$20 sps:$4 sm:$0xff]  }
 0x427   :  { %18337 = vrot.lane.b32.xlu1 %v18336_v51, %s20460_s23  ;;  %5009 = vmatprep.subr.bf16.mxu0 %v18602_v30  ;;  %v18644_v34 = vld [vmem:[%s28255_s5 + $0x48c] ss:$20 sps:$4 sm:$0xff]   ;;  %v18647_v17 = vld [vmem:[%s28255_s5 + $0x494] ss:$20 sps:$4 sm:$0xff]   ;;  %v18653_v23 = vld [vmem:[%s28255_s5 + $0x4bc] ss:$20 sps:$4 sm:$0xff]  }
 0x428   :  { %5264 = vmatprep.subr.bf16.mxu1 %v18605_v61  ;;  %v18650_v27 = vld [vmem:[%s28255_s5 + $0x4b4] ss:$20 sps:$4 sm:$0xff]   ;;  %v18651_v42 = vld [vmem:[%s28255_s5 + $0x4b8] ss:$20 sps:$4 sm:$0xff]   ;;  %v18656_v41 = vld [vmem:[%s28255_s5 + $0x4dc] ss:$20 sps:$4 sm:$0xff]  }
 0x429   :  { %5010 = vmatpush1.bf16.msra.mxu0 %v18600_v60  ;;  %v18659_v30 = vld [vmem:[%s28255_s5 + $0x4e4] ss:$20 sps:$4 sm:$0xff]   ;;  %v18657_v51 = vld [vmem:[%s28255_s5 + $0x4e0] ss:$20 sps:$4 sm:$0xff]  }
 0x42a   :  { %18352 = vrot.lane.b32.xlu0 %v18351_v47, %s20460_s23  ;;  %5265 = vmatpush1.bf16.msra.mxu1 %v18603_v26  ;;  %v18654_v61 = vld [vmem:[%s28255_s5 + $0x4d8] ss:$20 sps:$4 sm:$0xff]  }
 0x42b   :  { %18347 = vrot.lane.b32.xlu1 %v18346_v21, %s20460_s23  ;;  %5011 = vmatprep.subr.bf16.mxu0 %v18608_v28  ;;  %v18662_v44 = vld [vmem:[%s28255_s5 + $0x504] ss:$20 sps:$4 sm:$0xff]   ;;  %v18665_v43 = vld [vmem:[%s28255_s5 + $0x50c] ss:$20 sps:$4 sm:$0xff]  }
 0x42c   :  { %5266 = vmatprep.subr.bf16.mxu1 %v18611_v53 }
 0x42d   :  { %5012 = vmatpush1.bf16.msra.mxu0 %v18606_v6 }
 0x42e   :  { %18357 = vrot.lane.b32.xlu0 %v22547_v18, %s20461_s27  ;;  %5267 = vmatpush1.bf16.msra.mxu1 %v18609_v58  ;;  %v18618_v18 = vld [vmem:[%s28255_s5 + $0x3e8] ss:$20 sps:$4 sm:$0xff]  }
 0x42f   :  { %5696 = vrot.lane.b32.xlu1 %v2155_v50, %s20461_s27  ;;  %5013 = vmatprep.subr.bf16.mxu0 %v18614_v12  ;;  %v5718_v50 = vrot.slane %v2102_v5, 1 }
 0x430   :  { %5268 = vmatprep.subr.bf16.mxu1 %v18617_v10 }
 0x431   :  { %5014 = vmatpush1.bf16.msra.mxu0 %v18612_v57  ;;  %v18366_v2 = vpack.i.bf16 %v5718_v50, %v5717_v48 }
 0x432   :  { %18362 = vrot.lane.b32.xlu0 %v18361_v16, %s20460_s23  ;;  %5269 = vmatpush1.bf16.msra.mxu1 %v18615_v46  ;;  %v18632_v16 = vld [vmem:[%s28255_s5 + $0x43c] ss:$20 sps:$4 sm:$0xff]  }
 0x433   :  { %5702 = vrot.lane.b32.xlu1 %v2164_v36, %s20461_s27  ;;  %5015 = vmatprep.subr.bf16.mxu0 %v18620_v25  ;;  %v18624_v36 = vld [vmem:[%s28255_s5 + $0x410] ss:$20 sps:$4 sm:$0xff]  }
 0x434   :  { %5270 = vmatprep.subr.bf16.mxu1 %v18623_v3 }
 0x435   :  { %5016 = vmatpush1.bf16.msra.mxu0 %v18618_v18 }
 0x436   :  { %5271 = vmatpush1.bf16.msra.mxu1 %v18621_v14  ;;  %5017 = vmatprep.subr.bf16.mxu0 %v18626_v9 }
 0x437   :  { %18367 = vrot.lane.b32.xlu1 %v18366_v2, %s20460_s23  ;;  %5272 = vmatprep.subr.bf16.mxu1 %v18629_v40 }
 0x439   :  { %5018 = vmatpush1.bf16.msra.mxu0 %v18624_v36 }
 0x43a   :  { %5273 = vmatpush1.bf16.msra.mxu1 %v18627_v11  ;;  %5019 = vmatprep.subr.bf16.mxu0 %v18632_v16 }
 0x43b   :  { %5274 = vmatprep.subr.bf16.mxu1 %v18635_v62 }
 0x43d   :  { %5020 = vmatpush1.bf16.msra.mxu0 %v18630_v38 }
 0x43e   :  { %5275 = vmatpush1.bf16.msra.mxu1 %v18633_v24  ;;  %5021 = vmatprep.subr.bf16.mxu0 %v18638_v29  ;;  %v18660_v24 = vld [vmem:[%s28255_s5 + $0x500] ss:$20 sps:$4 sm:$0xff]   ;;  %v18663_v29 = vld [vmem:[%s28255_s5 + $0x508] ss:$20 sps:$4 sm:$0xff]  }
 0x43f   :  { %5276 = vmatprep.subr.bf16.mxu1 %v18641_v4 }
 0x441   :  { %5022 = vmatpush1.bf16.msra.mxu0 %v18636_v0 }
 0x442   :  { %5277 = vmatpush1.bf16.msra.mxu1 %v18639_v59  ;;  %5023 = vmatprep.subr.bf16.mxu0 %v18644_v34 }
 0x443   :  { %5278 = vmatprep.subr.bf16.mxu1 %v18647_v17 }
 0x445   :  { %5024 = vmatpush1.bf16.msra.mxu0 %v18642_v20 }
 0x446   :  { %5279 = vmatpush1.bf16.msra.mxu1 %v18645_v55  ;;  %5025 = vmatprep.subr.bf16.mxu0 %v18650_v27 }
 0x447   :  { %5280 = vmatprep.subr.bf16.mxu1 %v18653_v23 }
 0x449   :  { %5026 = vmatpush1.bf16.msra.mxu0 %v18648_v35 }
 0x44a   :  { %5281 = vmatpush1.bf16.msra.mxu1 %v18651_v42  ;;  %5027 = vmatprep.subr.bf16.mxu0 %v18656_v41 }
 0x44b   :  { %5282 = vmatprep.subr.bf16.mxu1 %v18659_v30  ;;  %v18668_v30 = vld [vmem:[%s28255_s5 + $0x52c] ss:$20 sps:$4 sm:$0xff]  }
 0x44d   :  { %5028 = vmatpush1.bf16.msra.mxu0 %v18654_v61  ;;  %v18671_v61 = vld [vmem:[%s28255_s5 + $0x534] ss:$20 sps:$4 sm:$0xff]  }
 0x44e   :  { %5283 = vmatpush1.bf16.msra.mxu1 %v18657_v51  ;;  %5048 = vmatprep.subr.bf16.mxu0 %v18662_v44 }
 0x44f   :  { %5303 = vmatprep.subr.bf16.mxu1 %v18665_v43 }
 0x47f   :  { %v18283_v60 = vpop.permute.xlu0 %18282 }
 0x480   :  { %v18284_v26 = vunpack.i.l.bf16 %v18283_v60  ;;  %v18285_v10 = vunpack.i.h.bf16 %v18283_v60 }
 0x481   :  { %v18278_v47 = vpop.permute.xlu1 %18277 }
 0x482   :  { %v18280_v28 = vunpack.i.h.bf16 %v18278_v47  ;;  %v18279_v53 = vunpack.i.l.bf16 %v18278_v47  ;;  %v22796_v5 = vsel %vm1687_vm12, %v22508_v45, %v18284_v26  ;;  %v2204_v45 = vsel %vm1687_vm12, %v22490_v13, %v18285_v10 }
 0x484   :  { %v2323_v21 = vsel %vm1687_vm12, %v22514_v8, %v18280_v28  ;;  %v2239_v6 = vsel %vm1687_vm12, %v22500_v63, %v18279_v53  ;;  %v2240_v58 = vsel %vm1687_vm12, %v22400_v52, %v18279_v53  ;;  %v22792_v12 = vpop.permute.xlu0 %18292 }
 0x485   :  { %v2337_v57 = vrot.slane %v2239_v6, 2  ;;  %v2338_v46 = vrot.slane %v2240_v58, 2  ;;  %v18288_v25 = vpop.permute.xlu1 %18287  ;;  %v2377_v3 = vrot.slane %v2323_v21, 2  ;;  %v18294_v48 = vunpack.i.l.bf16 %v22792_v12 }
 0x486   :  { %v18290_v8 = vunpack.i.h.bf16 %v18288_v25  ;;  %v18289_v50 = vunpack.i.l.bf16 %v18288_v25  ;;  %v18295_v18 = vunpack.i.h.bf16 %v22792_v12 }
 0x487   :  { %v2339_v63 = vsel %vm188_vm8, %v2337_v57, %v2338_v46  ;;  %v2407_v52 = vsel %vm183_vm0, %v2338_v46, %v22796_v5  ;;  %v2302_v11 = vsel %vm1687_vm12, %v18280_v28, %v18294_v48  ;;  %v22853_v44 = vpack.c.bf16 %v2377_v3, %v2377_v3  ;;  %v18666_v28 = vld [vmem:[%s28255_s5 + $0x528] ss:$20 sps:$4 sm:$0xff]  }
 0x488   :  { %v2218_v14 = vsel %vm1687_vm12, %v18279_v53, %v18289_v50  ;;  %v22804_v9 = vpop.permute.xlu0 %18302  ;;  %v2219_v40 = vsel %vm1687_vm12, %v18289_v50, %v18290_v8  ;;  %v2397_v16 = vsel %vm179_vm4, %v2204_v45, %v2339_v63  ;;  %v2417_v62 = vsel %vm177_vm3, %v2407_v52, %v2377_v3  ;;  %v18669_v53 = vld [vmem:[%s28255_s5 + $0x530] ss:$20 sps:$4 sm:$0xff]   ;;  %v18674_v57 = vld [vmem:[%s28255_s5 + $0x554] ss:$20 sps:$4 sm:$0xff]  }
 0x489   :  { %v2340_v2 = vrot.slane %v2218_v14, 2  ;;  %v22809_v36 = vpop.permute.xlu1 %18297  ;;  %v18304_v38 = vunpack.i.l.bf16 %v22804_v9  ;;  %v22821_v4 = vpack.c.bf16 %v2417_v62, %v2397_v16  ;;  %v2303_v34 = vsel %vm1687_vm12, %v18294_v48, %v18295_v18  ;;  %v18677_v46 = vld [vmem:[%s28255_s5 + $0x55c] ss:$20 sps:$4 sm:$0xff]  }
 0x48a   :  { %v18300_v0 = vunpack.i.h.bf16 %v22809_v36  ;;  %v18299_v59 = vunpack.i.l.bf16 %v22809_v36  ;;  %v2342_v17 = vrot.slane %v2219_v40, 2  ;;  %v18305_v20 = vunpack.i.h.bf16 %v22804_v9  ;;  %v18672_v9 = vld [vmem:[%s28255_s5 + $0x550] ss:$20 sps:$4 sm:$0xff]  }
 0x48b   :  { %v2174_v55 = vsel %vm1687_vm12, %v18285_v10, %v18304_v38  ;;  %v22832_v23 = vrot.slane %v2302_v11, 2  ;;  %5029 = vmatprep.mubr.bf16.mxu0 %v22821_v4  ;;  %5284 = vmatprep.mubr.bf16.mxu1 %v22821_v4  ;;  %v22902_v16 = vpack.c.bf16 %v22531_v7, %v22531_v7  ;;  %v18680_v62 = vld [vmem:[%s28255_s5 + $0x57c] ss:$20 sps:$4 sm:$0xff]  }
 0x48c   :  { %v22830_v27 = vpop.permute.xlu0 %18312  ;;  %v2398_v35 = vsel %vm179_vm4, %v2174_v55, %v2340_v2  ;;  %v22838_v42 = vsel %vm1687_vm12, %v18284_v26, %v18299_v59  ;;  %v22843_v41 = vsel %vm1687_vm12, %v18299_v59, %v18300_v0  ;;  %5030 = vmatmul.mubr.bf16.vlgmr.msra.gmra.mrb[40].mxu0 %v22585_v37  ;;  %5285 = vmatmul.mubr.bf16.vlgmr.msra.gmra.mrb[32].mxu1 %v22585_v37  ;;  %v22859_v26 = vrot.slane %v2303_v34, 2 }
 0x48d   :  { %v18308_v51 = vpop.permute.xlu1 %18307  ;;  %v2408_v43 = vsel %vm183_vm0, %v2340_v2, %v22838_v42  ;;  %v2409_v60 = vsel %vm183_vm0, %v2342_v17, %v22843_v41  ;;  %5049 = vmatpush1.bf16.msra.mxu0 %v18660_v24  ;;  %5304 = vmatpush1.bf16.msra.mxu1 %v18663_v29  ;;  %v2175_v6 = vsel %vm1687_vm12, %v18304_v38, %v18305_v20  ;;  %v18314_v3 = vunpack.i.l.bf16 %v22830_v27 }
 0x48e   :  { %v2418_v47 = vsel %vm177_vm3, %v2408_v43, %v22832_v23  ;;  %v18309_v21 = vunpack.i.l.bf16 %v18308_v51  ;;  %5039 = vmatprep.mubr.bf16.mxu0 %v22853_v44  ;;  %5294 = vmatprep.mubr.bf16.mxu1 %v22853_v44  ;;  %v18310_v10 = vunpack.i.h.bf16 %v18308_v51  ;;  %v2419_v63 = vsel %vm177_vm3, %v2409_v60, %v22859_v26  ;;  %v18686_v51 = vld [vmem:[%s28255_s5 + $0x5a4] ss:$20 sps:$4 sm:$0xff]   ;;  %v18689_v43 = vld [vmem:[%s28255_s5 + $0x5ac] ss:$20 sps:$4 sm:$0xff]  }
 0x48f   :  { %v22872_v58 = vpack.c.bf16 %v2418_v47, %v2398_v35  ;;  %5050 = vmatprep.subr.bf16.mxu0 %v18668_v30  ;;  %5305 = vmatprep.subr.bf16.mxu1 %v18671_v61  ;;  %v2399_v2 = vsel %vm179_vm4, %v2175_v6, %v2342_v17  ;;  %v18678_v35 = vld [vmem:[%s28255_s5 + $0x578] ss:$20 sps:$4 sm:$0xff]   ;;  %v18681_v30 = vld [vmem:[%s28255_s5 + $0x580] ss:$20 sps:$4 sm:$0xff]  }
 0x490   :  { %v18323_v25 = vpop.permute.xlu0 %18322  ;;  %v2220_v48 = vsel %vm1687_vm12, %v18290_v8, %v18309_v21  ;;  %v18675_v8 = vld [vmem:[%s28255_s5 + $0x558] ss:$20 sps:$4 sm:$0xff]   ;;  %v2304_v11 = vsel %vm1687_vm12, %v18295_v18, %v18310_v10  ;;  %v22907_v38 = vpack.c.bf16 %v2419_v63, %v2399_v2  ;;  %v18315_v21 = vunpack.i.h.bf16 %v22830_v27 }
 0x491   :  { %v22882_v50 = vpop.permute.xlu1 %18317  ;;  %v18325_v52 = vunpack.i.h.bf16 %v18323_v25  ;;  %5051 = vmatpush1.bf16.msra.mxu0 %v18666_v28  ;;  %5306 = vmatpush1.bf16.msra.mxu1 %v18669_v53  ;;  %v2241_v14 = vsel %vm825_vm9, %v2220_v48, %v18314_v3  ;;  %v18324_v45 = vunpack.i.l.bf16 %v18323_v25  ;;  %v18683_v18 = vld [vmem:[%s28255_s5 + $0x584] ss:$20 sps:$4 sm:$0xff]   ;;  %v18684_v25 = vld [vmem:[%s28255_s5 + $0x5a0] ss:$20 sps:$4 sm:$0xff]   ;;  %v18687_v48 = vld [vmem:[%s28255_s5 + $0x5a8] ss:$20 sps:$4 sm:$0xff]  }
 0x492   :  { %v18319_v40 = vunpack.i.l.bf16 %v22882_v50  ;;  %5052 = vmatprep.subr.bf16.mxu0 %v18674_v57  ;;  %5307 = vmatprep.subr.bf16.mxu1 %v18677_v46  ;;  %v2344_v59 = vrot.slane %v2241_v14, 2  ;;  %v18320_v57 = vunpack.i.h.bf16 %v22882_v50  ;;  %v18695_v14 = vld [vmem:[%s28255_s5 + $0x5d4] ss:$20 sps:$4 sm:$0xff]  }
 0x493   :  { %v2176_v34 = vsel %vm1687_vm12, %v18305_v20, %v18325_v52  ;;  %v22929_v55 = vsel %vm1687_vm12, %v18300_v0, %v18324_v45  ;;  %v18692_v52 = vld [vmem:[%s28255_s5 + $0x5cc] ss:$20 sps:$4 sm:$0xff]  }
 0x494   :  { %v22909_v24 = vpop.permute.xlu0 %18332  ;;  %v2324_v12 = vsel %vm825_vm9, %v2304_v11, %v18319_v40  ;;  %5040 = vmatmul.mubr.bf16.gmra.mrb[44].mxu0 %v22902_v16  ;;  %5295 = vmatmul.mubr.bf16.gmra.mrb[36].mxu1 %v22902_v16 }
 0x495   :  { %v22918_v29 = vunpack.i.l.bf16 %v22909_v24  ;;  %v22920_v7 = vpop.permute.xlu1 %18327  ;;  %5053 = vmatpush1.bf16.msra.mxu0 %v18672_v9  ;;  %5308 = vmatpush1.bf16.msra.mxu1 %v18675_v8  ;;  %v22939_v61 = vrot.slane %v2324_v12, 2  ;;  %v18335_v8 = vunpack.i.h.bf16 %v22909_v24  ;;  %v23255_v24 = vpack.c.bf16 %v22832_v23, %v22832_v23  ;;  %v18779_v23 = vld [vmem:[%s28255_s5 + $0x804] ss:$20 sps:$4 sm:$0xff]  }
 0x496   :  { %v18329_v17 = vunpack.i.l.bf16 %v22920_v7  ;;  %5054 = vmatprep.subr.bf16.mxu0 %v18680_v62  ;;  %5080 = vmatprep.mubr.bf16.mxu0 %v22907_v38  ;;  %v18330_v12 = vunpack.i.h.bf16 %v22920_v7  ;;  %v18764_v7 = vld [vmem:[%s28255_s5 + $0x7ac] ss:$20 sps:$4 sm:$0xff]  }
 0x497   :  { %v2205_v20 = vsel %vm825_vm9, %v2176_v34, %v22918_v29  ;;  %5309 = vmatprep.subr.bf16.mxu1 %v18683_v18  ;;  %5335 = vmatprep.mubr.bf16.mxu1 %v22907_v38  ;;  %v18693_v34 = vld [vmem:[%s28255_s5 + $0x5d0] ss:$20 sps:$4 sm:$0xff]  }
 0x498   :  { %v2400_v36 = vsel %vm179_vm4, %v2205_v20, %v2344_v59  ;;  %v2289_v0 = vsel %vm825_vm9, %v22929_v55, %v18329_v17  ;;  %v22953_v60 = vpop.permute.xlu0 %18342 }
 0x499   :  { %v2410_v47 = vsel %vm183_vm0, %v2344_v59, %v2289_v0  ;;  %v28348_v28 = vunpack.i.l.bf16 %v22953_v60  ;;  %v22958_v53 = vpop.permute.xlu1 %18337  ;;  %5055 = vmatpush1.bf16.msra.mxu0 %v18678_v35  ;;  %5310 = vmatpush1.bf16.msra.mxu1 %v18681_v30  ;;  %v18690_v59 = vld [vmem:[%s28255_s5 + $0x5c8] ss:$20 sps:$4 sm:$0xff]  }
 0x49a   :  { %v2420_v6 = vsel %vm177_vm3, %v2410_v47, %v22939_v61  ;;  %v18339_v10 = vunpack.i.l.bf16 %v22958_v53  ;;  %5056 = vmatprep.subr.bf16.mxu0 %v18686_v51  ;;  %5311 = vmatprep.subr.bf16.mxu1 %v18689_v43  ;;  %v18698_v0 = vld [vmem:[%s28255_s5 + $0x5f4] ss:$20 sps:$4 sm:$0xff]   ;;  %v18701_v51 = vld [vmem:[%s28255_s5 + $0x5fc] ss:$20 sps:$4 sm:$0xff]  }
 0x49b   :  { %v22965_v46 = vpack.c.bf16 %v2420_v6, %v2400_v36  ;;  %v2320_v45 = vsel %vm825_vm9, %v18320_v57, %v28348_v28 }
 0x49c   :  { %v2236_v63 = vsel %vm825_vm9, %v18315_v21, %v18339_v10  ;;  %v22984_v9 = vpop.permute.xlu0 %18352  ;;  %v23010_v30 = vrot.slane %v2320_v45, 2 }
 0x49d   :  { %v2348_v2 = vrot.slane %v2236_v63, 2  ;;  %v28347_v11 = vunpack.i.l.bf16 %v22984_v9  ;;  %v22993_v62 = vpop.permute.xlu1 %18347  ;;  %5057 = vmatpush1.bf16.msra.mxu0 %v18684_v25  ;;  %5312 = vmatpush1.bf16.msra.mxu1 %v18687_v48 }
 0x49e   :  { %v18349_v18 = vunpack.i.l.bf16 %v22993_v62  ;;  %5058 = vmatprep.subr.bf16.mxu0 %v18692_v52  ;;  %5313 = vmatprep.subr.bf16.mxu1 %v18695_v14  ;;  %v18696_v52 = vld [vmem:[%s28255_s5 + $0x5f0] ss:$20 sps:$4 sm:$0xff]   ;;  %v18699_v14 = vld [vmem:[%s28255_s5 + $0x5f8] ss:$20 sps:$4 sm:$0xff]  }
 0x49f   :  { %v23008_v35 = vsel %vm825_vm9, %v18335_v8, %v28347_v11 }
 0x4a0   :  { %v2402_v20 = vsel %vm179_vm4, %v23008_v35, %v2348_v2  ;;  %v2282_v36 = vsel %vm825_vm9, %v18330_v12, %v18349_v18  ;;  %v23025_v43 = vpop.permute.xlu0 %18357 }
 0x4a1   :  { %v2412_v47 = vsel %vm183_vm0, %v2348_v2, %v2282_v36  ;;  %v28345_v6 = vunpack.i.l.bf16 %v23025_v43  ;;  %v23029_v25 = vpop.permute.xlu1 %5696  ;;  %5059 = vmatpush1.bf16.msra.mxu0 %v18690_v59  ;;  %5314 = vmatpush1.bf16.msra.mxu1 %v18693_v34  ;;  %v5760_v2 = vrot.slane %v22838_v42, 6  ;;  %v28346_v59 = vunpack.i.h.bf16 %v23025_v43  ;;  %v18707_v36 = vld [vmem:[%s28255_s5 + $0x624] ss:$20 sps:$4 sm:$0xff]  }
 0x4a2   :  { %v2422_v48 = vsel %vm177_vm3, %v2412_v47, %v23010_v30  ;;  %5060 = vmatprep.subr.bf16.mxu0 %v18698_v0  ;;  %5315 = vmatprep.subr.bf16.mxu1 %v18701_v51  ;;  %v18702_v51 = vld [vmem:[%s28255_s5 + $0x618] ss:$20 sps:$4 sm:$0xff]  }
 0x4a3   :  { %v23033_v63 = vpack.c.bf16 %v2422_v48, %v2402_v20  ;;  %v5704_v45 = vsel %vm1687_vm12, %v23029_v25, %v28345_v6  ;;  %v18704_v20 = vld [vmem:[%s28255_s5 + $0x61c] ss:$20 sps:$4 sm:$0xff]  }
 0x4a4   :  { %v5738_v34 = vrot.slane %v5704_v45, 5  ;;  %v23053_v47 = vpop.permute.xlu0 %18362  ;;  %v18705_v45 = vld [vmem:[%s28255_s5 + $0x620] ss:$20 sps:$4 sm:$0xff]  }
 0x4a5   :  { %v28350_v48 = vunpack.i.l.bf16 %v23053_v47  ;;  %v5703_v6 = vpop.permute.xlu1 %5702  ;;  %5061 = vmatpush1.bf16.msra.mxu0 %v18696_v52  ;;  %5316 = vmatpush1.bf16.msra.mxu1 %v18699_v14  ;;  %v18710_v52 = vld [vmem:[%s28255_s5 + $0x644] ss:$20 sps:$4 sm:$0xff]   ;;  %v18713_v14 = vld [vmem:[%s28255_s5 + $0x64c] ss:$20 sps:$4 sm:$0xff]   ;;  %v28351_v28 = vunpack.i.h.bf16 %v23053_v47 }
 0x4a6   :  { %v23057_v42 = vsel %vm185_vm7, %v5738_v34, %v5760_v2  ;;  %v5706_v0 = vsel %vm1687_vm12, %v28346_v59, %v5703_v6  ;;  %5062 = vmatprep.subr.bf16.mxu0 %v18704_v20  ;;  %5317 = vmatprep.subr.bf16.mxu1 %v18707_v36  ;;  %v18708_v20 = vld [vmem:[%s28255_s5 + $0x640] ss:$20 sps:$4 sm:$0xff]   ;;  %v18711_v36 = vld [vmem:[%s28255_s5 + $0x648] ss:$20 sps:$4 sm:$0xff]  }
 0x4a7   :  { %v5731_v2 = vsel %vm825_vm9, %v22929_v55, %v28350_v48  ;;  %v5710_v6 = vsel %vm825_vm9, %v5706_v0, %v22918_v29  ;;  %v19203_v48 = vld [vmem:[%s28256_s6 + $0x488] ss:$24 sps:$4 sm:$0xff]  }
 0x4a8   :  { %v5762_v34 = vrot.slane %v5731_v2, 6  ;;  %v5740_v59 = vrot.slane %v5710_v6, 5  ;;  %v18719_v2 = vld [vmem:[%s28255_s5 + $0x674] ss:$20 sps:$4 sm:$0xff]   ;;  %v5742_v6 = vrot.slane %v23008_v35, 5 }
 0x4a9   :  { %v23080_v11 = vpop.permute.xlu1 %18367  ;;  %5063 = vmatpush1.bf16.msra.mxu0 %v18702_v51  ;;  %5318 = vmatpush1.bf16.msra.mxu1 %v18705_v45  ;;  %v18716_v45 = vld [vmem:[%s28255_s5 + $0x66c] ss:$20 sps:$4 sm:$0xff]   ;;  %v18722_v35 = vld [vmem:[%s28255_s5 + $0x694] ss:$20 sps:$4 sm:$0xff]  }
 0x4aa   :  { %v28349_v55 = vunpack.i.l.bf16 %v23080_v11  ;;  %v23091_v0 = vsel %vm185_vm7, %v5740_v59, %v5762_v34  ;;  %5064 = vmatprep.subr.bf16.mxu0 %v18710_v52  ;;  %5319 = vmatprep.subr.bf16.mxu1 %v18713_v14  ;;  %v18714_v34 = vld [vmem:[%s28255_s5 + $0x668] ss:$20 sps:$4 sm:$0xff]   ;;  %v18717_v52 = vld [vmem:[%s28255_s5 + $0x670] ss:$20 sps:$4 sm:$0xff]  }
 0x4ac   :  { %v5728_v51 = vsel %vm825_vm9, %v28351_v28, %v28349_v55 }
 0x4ad   :  { %v5764_v59 = vrot.slane %v5728_v51, 6  ;;  %5065 = vmatpush1.bf16.msra.mxu0 %v18708_v20  ;;  %5320 = vmatpush1.bf16.msra.mxu1 %v18711_v36  ;;  %v18725_v20 = vld [vmem:[%s28255_s5 + $0x69c] ss:$20 sps:$4 sm:$0xff]   ;;  %v18723_v51 = vld [vmem:[%s28255_s5 + $0x698] ss:$20 sps:$4 sm:$0xff]  }
 0x4ae   :  { %5066 = vmatprep.subr.bf16.mxu0 %v18716_v45  ;;  %5321 = vmatprep.subr.bf16.mxu1 %v18719_v2  ;;  %v18720_v36 = vld [vmem:[%s28255_s5 + $0x690] ss:$20 sps:$4 sm:$0xff]  }
 0x4af   :  { %v23112_v14 = vsel %vm185_vm7, %v5742_v6, %v5764_v59  ;;  %v18728_v45 = vld [vmem:[%s28255_s5 + $0x6bc] ss:$20 sps:$4 sm:$0xff]   ;;  %v18731_v2 = vld [vmem:[%s28255_s5 + $0x6c4] ss:$20 sps:$4 sm:$0xff]   ;;  %v18729_v59 = vld [vmem:[%s28255_s5 + $0x6c0] ss:$20 sps:$4 sm:$0xff]  }
 0x4b0   :  { %v18726_v6 = vld [vmem:[%s28255_s5 + $0x6b8] ss:$20 sps:$4 sm:$0xff]  }
 0x4b1   :  { %5067 = vmatpush1.bf16.msra.mxu0 %v18714_v34  ;;  %5322 = vmatpush1.bf16.msra.mxu1 %v18717_v52  ;;  %v18734_v34 = vld [vmem:[%s28255_s5 + $0x6e4] ss:$20 sps:$4 sm:$0xff]   ;;  %v18737_v52 = vld [vmem:[%s28255_s5 + $0x6ec] ss:$20 sps:$4 sm:$0xff]  }
 0x4b2   :  { %5068 = vmatprep.subr.bf16.mxu0 %v18722_v35  ;;  %5323 = vmatprep.subr.bf16.mxu1 %v18725_v20  ;;  %v18732_v35 = vld [vmem:[%s28255_s5 + $0x6e0] ss:$20 sps:$4 sm:$0xff]   ;;  %v18735_v20 = vld [vmem:[%s28255_s5 + $0x6e8] ss:$20 sps:$4 sm:$0xff]  }
 0x4b5   :  { %5069 = vmatpush1.bf16.msra.mxu0 %v18720_v36  ;;  %5324 = vmatpush1.bf16.msra.mxu1 %v18723_v51  ;;  %v18740_v36 = vld [vmem:[%s28255_s5 + $0x70c] ss:$20 sps:$4 sm:$0xff]   ;;  %v18743_v51 = vld [vmem:[%s28255_s5 + $0x714] ss:$20 sps:$4 sm:$0xff]  }
 0x4b6   :  { %5070 = vmatprep.subr.bf16.mxu0 %v18728_v45  ;;  %5325 = vmatprep.subr.bf16.mxu1 %v18731_v2  ;;  %v18738_v45 = vld [vmem:[%s28255_s5 + $0x708] ss:$20 sps:$4 sm:$0xff]   ;;  %v18741_v2 = vld [vmem:[%s28255_s5 + $0x710] ss:$20 sps:$4 sm:$0xff]  }
 0x4b9   :  { %5071 = vmatpush1.bf16.msra.mxu0 %v18726_v6  ;;  %5326 = vmatpush1.bf16.msra.mxu1 %v18729_v59  ;;  %v18746_v6 = vld [vmem:[%s28255_s5 + $0x734] ss:$20 sps:$4 sm:$0xff]   ;;  %v18749_v59 = vld [vmem:[%s28255_s5 + $0x73c] ss:$20 sps:$4 sm:$0xff]  }
 0x4ba   :  { %5072 = vmatprep.subr.bf16.mxu0 %v18734_v34  ;;  %5327 = vmatprep.subr.bf16.mxu1 %v18737_v52  ;;  %v18744_v34 = vld [vmem:[%s28255_s5 + $0x730] ss:$20 sps:$4 sm:$0xff]   ;;  %v18747_v52 = vld [vmem:[%s28255_s5 + $0x738] ss:$20 sps:$4 sm:$0xff]  }
 0x4bd   :  { %5073 = vmatpush1.bf16.msra.mxu0 %v18732_v35  ;;  %5328 = vmatpush1.bf16.msra.mxu1 %v18735_v20  ;;  %v18752_v35 = vld [vmem:[%s28255_s5 + $0x75c] ss:$20 sps:$4 sm:$0xff]   ;;  %v18755_v20 = vld [vmem:[%s28255_s5 + $0x764] ss:$20 sps:$4 sm:$0xff]  }
 0x4be   :  { %5074 = vmatprep.subr.bf16.mxu0 %v18740_v36  ;;  %5329 = vmatprep.subr.bf16.mxu1 %v18743_v51  ;;  %v18750_v36 = vld [vmem:[%s28255_s5 + $0x758] ss:$20 sps:$4 sm:$0xff]   ;;  %v18753_v51 = vld [vmem:[%s28255_s5 + $0x760] ss:$20 sps:$4 sm:$0xff]  }
 0x4c1   :  { %5075 = vmatpush1.bf16.msra.mxu0 %v18738_v45  ;;  %5330 = vmatpush1.bf16.msra.mxu1 %v18741_v2  ;;  %v18758_v45 = vld [vmem:[%s28255_s5 + $0x784] ss:$20 sps:$4 sm:$0xff]   ;;  %v18761_v2 = vld [vmem:[%s28255_s5 + $0x78c] ss:$20 sps:$4 sm:$0xff]  }
 0x4c2   :  { %5076 = vmatprep.subr.bf16.mxu0 %v18746_v6  ;;  %5331 = vmatprep.subr.bf16.mxu1 %v18749_v59  ;;  %v2235_v6 = vsel %vm825_vm9, %v18314_v3, %v18315_v21  ;;  %v18756_v59 = vld [vmem:[%s28255_s5 + $0x780] ss:$20 sps:$4 sm:$0xff]   ;;  %v2319_v3 = vsel %vm825_vm9, %v18319_v40, %v18320_v57  ;;  %v23215_v21 = vpack.c.bf16 %v22859_v26, %v22859_v26  ;;  %v18762_v26 = vld [vmem:[%s28255_s5 + $0x7a8] ss:$20 sps:$4 sm:$0xff]   ;;  %v18765_v57 = vld [vmem:[%s28255_s5 + $0x7b0] ss:$20 sps:$4 sm:$0xff]  }
 0x4c3   :  { %v2346_v27 = vrot.slane %v2235_v6, 2  ;;  %v23230_v40 = vrot.slane %v2319_v3, 2  ;;  %v18774_v6 = vld [vmem:[%s28255_s5 + $0x7f8] ss:$20 sps:$4 sm:$0xff]   ;;  %v18783_v3 = vld [vmem:[%s28255_s5 + $0x828] ss:$20 sps:$4 sm:$0xff]  }
 0x4c5   :  { %5077 = vmatpush1.bf16.msra.mxu0 %v18744_v34  ;;  %5332 = vmatpush1.bf16.msra.mxu1 %v18747_v52  ;;  %v2281_v34 = vsel %vm825_vm9, %v18329_v17, %v18330_v12  ;;  %v18759_v52 = vld [vmem:[%s28255_s5 + $0x788] ss:$20 sps:$4 sm:$0xff]  }
 0x4c6   :  { %5078 = vmatprep.subr.bf16.mxu0 %v18752_v35  ;;  %5333 = vmatprep.subr.bf16.mxu1 %v18755_v20  ;;  %v18767_v17 = vld [vmem:[%s28255_s5 + $0x7b4] ss:$20 sps:$4 sm:$0xff]   ;;  %v2411_v50 = vsel %vm183_vm0, %v2346_v27, %v2281_v34  ;;  %v23243_v35 = vsel %vm825_vm9, %v22918_v29, %v18335_v8  ;;  %v18773_v20 = vld [vmem:[%s28255_s5 + $0x7dc] ss:$20 sps:$4 sm:$0xff]   ;;  %v18771_v29 = vld [vmem:[%s28255_s5 + $0x7d8] ss:$20 sps:$4 sm:$0xff]  }
 0x4c7   :  { %v18770_v12 = vld [vmem:[%s28255_s5 + $0x7d4] ss:$20 sps:$4 sm:$0xff]   ;;  %v2401_v8 = vsel %vm179_vm4, %v23243_v35, %v2346_v27  ;;  %v18782_v34 = vld [vmem:[%s28255_s5 + $0x824] ss:$20 sps:$4 sm:$0xff]  }
 0x4c8   :  { %v18780_v27 = vld [vmem:[%s28255_s5 + $0x820] ss:$20 sps:$4 sm:$0xff]  }
 0x4c9   :  { %5079 = vmatpush1.bf16.msra.mxu0 %v18750_v36  ;;  %5334 = vmatpush1.bf16.msra.mxu1 %v18753_v51  ;;  %v2421_v36 = vsel %vm177_vm3, %v2411_v50, %v23230_v40  ;;  %v18768_v51 = vld [vmem:[%s28255_s5 + $0x7d0] ss:$20 sps:$4 sm:$0xff]   ;;  %v18786_v50 = vld [vmem:[%s28255_s5 + $0x848] ss:$20 sps:$4 sm:$0xff]  }
 0x4ca   :  { %5099 = vmatprep.subr.bf16.mxu0 %v18758_v45  ;;  %5354 = vmatprep.subr.bf16.mxu1 %v18761_v2  ;;  %v23262_v45 = vpack.c.bf16 %v2421_v36, %v2401_v8  ;;  %v18776_v2 = vld [vmem:[%s28255_s5 + $0x7fc] ss:$20 sps:$4 sm:$0xff]   ;;  %v18795_v36 = vld [vmem:[%s28255_s5 + $0x878] ss:$20 sps:$4 sm:$0xff]  }
 0x4cb   :  { %v18798_v8 = vld [vmem:[%s28255_s5 + $0x898] ss:$20 sps:$4 sm:$0xff]  }
 0x4cc   :  { %5081 = vmatmul.mubr.bf16.vlgmr.msra.gmra.mrb[40].mxu0 %v22872_v58  ;;  %5336 = vmatmul.mubr.bf16.vlgmr.msra.gmra.mrb[32].mxu1 %v22872_v58 }
 0x4cd   :  { %5090 = vmatprep.mubr.bf16.mxu0 %v23215_v21  ;;  %5100 = vmatpush1.bf16.msra.mxu0 %v18756_v59  ;;  %v18777_v59 = vld [vmem:[%s28255_s5 + $0x800] ss:$20 sps:$4 sm:$0xff]  }
 0x4ce   :  { %5345 = vmatprep.mubr.bf16.mxu1 %v23215_v21  ;;  %5355 = vmatpush1.bf16.msra.mxu1 %v18759_v52  ;;  %v18785_v52 = vld [vmem:[%s28255_s5 + $0x82c] ss:$20 sps:$4 sm:$0xff]  }
 0x4cf   :  { %5101 = vmatprep.subr.bf16.mxu0 %v18764_v7  ;;  %5356 = vmatprep.subr.bf16.mxu1 %v18767_v17  ;;  %v18788_v7 = vld [vmem:[%s28255_s5 + $0x84c] ss:$20 sps:$4 sm:$0xff]   ;;  %v18791_v17 = vld [vmem:[%s28255_s5 + $0x854] ss:$20 sps:$4 sm:$0xff]  }
 0x4d1   :  { %5102 = vmatpush1.bf16.msra.mxu0 %v18762_v26  ;;  %v18789_v26 = vld [vmem:[%s28255_s5 + $0x850] ss:$20 sps:$4 sm:$0xff]  }
 0x4d2   :  { %5357 = vmatpush1.bf16.msra.mxu1 %v18765_v57  ;;  %5103 = vmatprep.subr.bf16.mxu0 %v18770_v12  ;;  %v18794_v57 = vld [vmem:[%s28255_s5 + $0x874] ss:$20 sps:$4 sm:$0xff]   ;;  %v18797_v12 = vld [vmem:[%s28255_s5 + $0x87c] ss:$20 sps:$4 sm:$0xff]  }
 0x4d3   :  { %5358 = vmatprep.subr.bf16.mxu1 %v18773_v20  ;;  %v18792_v20 = vld [vmem:[%s28255_s5 + $0x870] ss:$20 sps:$4 sm:$0xff]  }
 0x4d4   :  { %5091 = vmatmul.mubr.bf16.gmra.mrb[44].mxu0 %v23255_v24  ;;  %5346 = vmatmul.mubr.bf16.gmra.mrb[36].mxu1 %v23255_v24 }
 0x4d5   :  { %5104 = vmatpush1.bf16.msra.mxu0 %v18768_v51  ;;  %5131 = vmatprep.mubr.bf16.mxu0 %v23262_v45  ;;  %v18800_v51 = vld [vmem:[%s28255_s5 + $0x89c] ss:$20 sps:$4 sm:$0xff]  }
 0x4d6   :  { %5359 = vmatpush1.bf16.msra.mxu1 %v18771_v29  ;;  %5386 = vmatprep.mubr.bf16.mxu1 %v23262_v45  ;;  %v18803_v29 = vld [vmem:[%s28255_s5 + $0x8a4] ss:$20 sps:$4 sm:$0xff]  }
 0x4d7   :  { %5105 = vmatprep.subr.bf16.mxu0 %v18776_v2  ;;  %5360 = vmatprep.subr.bf16.mxu1 %v18779_v23  ;;  %v18801_v2 = vld [vmem:[%s28255_s5 + $0x8a0] ss:$20 sps:$4 sm:$0xff]   ;;  %v18806_v23 = vld [vmem:[%s28255_s5 + $0x8c4] ss:$20 sps:$4 sm:$0xff]  }
 0x4d9   :  { %5106 = vmatpush1.bf16.msra.mxu0 %v18774_v6  ;;  %v18809_v6 = vld [vmem:[%s28255_s5 + $0x8cc] ss:$20 sps:$4 sm:$0xff]  }
 0x4da   :  { %5361 = vmatpush1.bf16.msra.mxu1 %v18777_v59  ;;  %5107 = vmatprep.subr.bf16.mxu0 %v18782_v34  ;;  %v18804_v59 = vld [vmem:[%s28255_s5 + $0x8c0] ss:$20 sps:$4 sm:$0xff]   ;;  %v18807_v34 = vld [vmem:[%s28255_s5 + $0x8c8] ss:$20 sps:$4 sm:$0xff]  }
 0x4db   :  { %5362 = vmatprep.subr.bf16.mxu1 %v18785_v52  ;;  %v18812_v52 = vld [vmem:[%s28255_s5 + $0x8ec] ss:$20 sps:$4 sm:$0xff]  }
 0x4dd   :  { %5108 = vmatpush1.bf16.msra.mxu0 %v18780_v27  ;;  %v18815_v27 = vld [vmem:[%s28255_s5 + $0x8f4] ss:$20 sps:$4 sm:$0xff]  }
 0x4de   :  { %5363 = vmatpush1.bf16.msra.mxu1 %v18783_v3  ;;  %5109 = vmatprep.subr.bf16.mxu0 %v18788_v7  ;;  %v18810_v3 = vld [vmem:[%s28255_s5 + $0x8e8] ss:$20 sps:$4 sm:$0xff]   ;;  %v18813_v7 = vld [vmem:[%s28255_s5 + $0x8f0] ss:$20 sps:$4 sm:$0xff]  }
 0x4df   :  { %5364 = vmatprep.subr.bf16.mxu1 %v18791_v17  ;;  %v18818_v17 = vld [vmem:[%s28255_s5 + $0x914] ss:$20 sps:$4 sm:$0xff]  }
 0x4e1   :  { %5110 = vmatpush1.bf16.msra.mxu0 %v18786_v50  ;;  %v18821_v50 = vld [vmem:[%s28255_s5 + $0x91c] ss:$20 sps:$4 sm:$0xff]  }
 0x4e2   :  { %5365 = vmatpush1.bf16.msra.mxu1 %v18789_v26  ;;  %5111 = vmatprep.subr.bf16.mxu0 %v18794_v57  ;;  %v18816_v26 = vld [vmem:[%s28255_s5 + $0x910] ss:$20 sps:$4 sm:$0xff]   ;;  %v18819_v57 = vld [vmem:[%s28255_s5 + $0x918] ss:$20 sps:$4 sm:$0xff]  }
 0x4e3   :  { %5366 = vmatprep.subr.bf16.mxu1 %v18797_v12  ;;  %v18824_v12 = vld [vmem:[%s28255_s5 + $0x93c] ss:$20 sps:$4 sm:$0xff]  }
 0x4e5   :  { %5112 = vmatpush1.bf16.msra.mxu0 %v18792_v20  ;;  %v18827_v20 = vld [vmem:[%s28255_s5 + $0x944] ss:$20 sps:$4 sm:$0xff]  }
 0x4e6   :  { %5367 = vmatpush1.bf16.msra.mxu1 %v18795_v36  ;;  %5113 = vmatprep.subr.bf16.mxu0 %v18800_v51  ;;  %v18822_v36 = vld [vmem:[%s28255_s5 + $0x938] ss:$20 sps:$4 sm:$0xff]   ;;  %v18825_v51 = vld [vmem:[%s28255_s5 + $0x940] ss:$20 sps:$4 sm:$0xff]  }
 0x4e7   :  { %5368 = vmatprep.subr.bf16.mxu1 %v18803_v29  ;;  %v18830_v29 = vld [vmem:[%s28255_s5 + $0x964] ss:$20 sps:$4 sm:$0xff]  }
 0x4e9   :  { %5114 = vmatpush1.bf16.msra.mxu0 %v18798_v8  ;;  %v18833_v8 = vld [vmem:[%s28255_s5 + $0x96c] ss:$20 sps:$4 sm:$0xff]  }
 0x4ea   :  { %5369 = vmatpush1.bf16.msra.mxu1 %v18801_v2  ;;  %5115 = vmatprep.subr.bf16.mxu0 %v18806_v23  ;;  %v18828_v2 = vld [vmem:[%s28255_s5 + $0x960] ss:$20 sps:$4 sm:$0xff]   ;;  %v18831_v23 = vld [vmem:[%s28255_s5 + $0x968] ss:$20 sps:$4 sm:$0xff]  }
 0x4eb   :  { %5370 = vmatprep.subr.bf16.mxu1 %v18809_v6  ;;  %v18836_v6 = vld [vmem:[%s28255_s5 + $0x98c] ss:$20 sps:$4 sm:$0xff]  }
 0x4ed   :  { %5116 = vmatpush1.bf16.msra.mxu0 %v18804_v59  ;;  %v18839_v59 = vld [vmem:[%s28255_s5 + $0x994] ss:$20 sps:$4 sm:$0xff]  }
 0x4ee   :  { %5371 = vmatpush1.bf16.msra.mxu1 %v18807_v34  ;;  %5117 = vmatprep.subr.bf16.mxu0 %v18812_v52  ;;  %v18834_v34 = vld [vmem:[%s28255_s5 + $0x988] ss:$20 sps:$4 sm:$0xff]   ;;  %v18837_v52 = vld [vmem:[%s28255_s5 + $0x990] ss:$20 sps:$4 sm:$0xff]  }
 0x4ef   :  { %5372 = vmatprep.subr.bf16.mxu1 %v18815_v27  ;;  %v18842_v27 = vld [vmem:[%s28255_s5 + $0x9b4] ss:$20 sps:$4 sm:$0xff]  }
 0x4f1   :  { %5118 = vmatpush1.bf16.msra.mxu0 %v18810_v3  ;;  %v18845_v3 = vld [vmem:[%s28255_s5 + $0x9bc] ss:$20 sps:$4 sm:$0xff]  }
 0x4f2   :  { %5373 = vmatpush1.bf16.msra.mxu1 %v18813_v7  ;;  %5119 = vmatprep.subr.bf16.mxu0 %v18818_v17  ;;  %v18840_v7 = vld [vmem:[%s28255_s5 + $0x9b0] ss:$20 sps:$4 sm:$0xff]   ;;  %v18843_v17 = vld [vmem:[%s28255_s5 + $0x9b8] ss:$20 sps:$4 sm:$0xff]  }
 0x4f3   :  { %5374 = vmatprep.subr.bf16.mxu1 %v18821_v50  ;;  %v18848_v50 = vld [vmem:[%s28255_s5 + $0x9dc] ss:$20 sps:$4 sm:$0xff]  }
 0x4f5   :  { %5120 = vmatpush1.bf16.msra.mxu0 %v18816_v26  ;;  %v18851_v26 = vld [vmem:[%s28255_s5 + $0x9e4] ss:$20 sps:$4 sm:$0xff]  }
 0x4f6   :  { %5375 = vmatpush1.bf16.msra.mxu1 %v18819_v57  ;;  %5121 = vmatprep.subr.bf16.mxu0 %v18824_v12  ;;  %v18340_v57 = vunpack.i.h.bf16 %v22958_v53  ;;  %v18846_v12 = vld [vmem:[%s28255_s5 + $0x9d8] ss:$20 sps:$4 sm:$0xff]   ;;  %v18355_v53 = vunpack.i.h.bf16 %v22984_v9 }
 0x4f7   :  { %5376 = vmatprep.subr.bf16.mxu1 %v18827_v20  ;;  %v18350_v20 = vunpack.i.h.bf16 %v22993_v62  ;;  %v23451_v62 = vpack.c.bf16 %v23230_v40, %v23230_v40  ;;  %v18858_v40 = vld [vmem:[%s28255_s5 + $0xa28] ss:$20 sps:$4 sm:$0xff]  }
 0x4f9   :  { %5122 = vmatpush1.bf16.msra.mxu0 %v18822_v36  ;;  %v18849_v36 = vld [vmem:[%s28255_s5 + $0x9e0] ss:$20 sps:$4 sm:$0xff]  }
 0x4fa   :  { %5377 = vmatpush1.bf16.msra.mxu1 %v18825_v51  ;;  %5123 = vmatprep.subr.bf16.mxu0 %v18830_v29  ;;  %v18854_v51 = vld [vmem:[%s28255_s5 + $0xa04] ss:$20 sps:$4 sm:$0xff]   ;;  %v18345_v29 = vunpack.i.h.bf16 %v22953_v60 }
 0x4fb   :  { %5378 = vmatprep.subr.bf16.mxu1 %v18833_v8  ;;  %v18857_v8 = vld [vmem:[%s28255_s5 + $0xa0c] ss:$20 sps:$4 sm:$0xff]  }
 0x4fd   :  { %5124 = vmatpush1.bf16.msra.mxu0 %v18828_v2  ;;  %v2237_v2 = vsel %vm825_vm9, %v18339_v10, %v18340_v57  ;;  %v18855_v10 = vld [vmem:[%s28255_s5 + $0xa08] ss:$20 sps:$4 sm:$0xff]  }
 0x4fe   :  { %5379 = vmatpush1.bf16.msra.mxu1 %v18831_v23  ;;  %5125 = vmatprep.subr.bf16.mxu0 %v18836_v6  ;;  %v2283_v23 = vsel %vm825_vm9, %v18349_v18, %v18350_v20  ;;  %v18852_v6 = vld [vmem:[%s28255_s5 + $0xa00] ss:$20 sps:$4 sm:$0xff]   ;;  %v18869_v57 = vld [vmem:[%s28255_s5 + $0xa5c] ss:$20 sps:$4 sm:$0xff]  }
 0x4ff   :  { %5380 = vmatprep.subr.bf16.mxu1 %v18839_v59  ;;  %v28547_v59 = vunpack.i.l.bf16 %v22953_v60  ;;  %v18860_v18 = vld [vmem:[%s28255_s5 + $0xa2c] ss:$20 sps:$4 sm:$0xff]   ;;  %v18863_v60 = vld [vmem:[%s28255_s5 + $0xa34] ss:$20 sps:$4 sm:$0xff]   ;;  %v18864_v20 = vld [vmem:[%s28255_s5 + $0xa50] ss:$20 sps:$4 sm:$0xff]  }
 0x501   :  { %5126 = vmatpush1.bf16.msra.mxu0 %v18834_v34  ;;  %v2321_v34 = vsel %vm825_vm9, %v28547_v59, %v18345_v29  ;;  %v18881_v59 = vld [vmem:[%s28255_s5 + $0xaac] ss:$20 sps:$4 sm:$0xff]  }
 0x502   :  { %5381 = vmatpush1.bf16.msra.mxu1 %v18837_v52  ;;  %5127 = vmatprep.subr.bf16.mxu0 %v18842_v27  ;;  %v2350_v52 = vrot.slane %v2237_v2, 2  ;;  %v18870_v2 = vld [vmem:[%s28255_s5 + $0xa78] ss:$20 sps:$4 sm:$0xff]  }
 0x503   :  { %5382 = vmatprep.subr.bf16.mxu1 %v18845_v3  ;;  %v23463_v3 = vrot.slane %v2321_v34, 2  ;;  %v18876_v34 = vld [vmem:[%s28255_s5 + $0xaa0] ss:$20 sps:$4 sm:$0xff]  }
 0x504   :  { %v2413_v27 = vsel %vm183_vm0, %v2350_v52, %v2283_v23  ;;  %v18873_v23 = vld [vmem:[%s28255_s5 + $0xa80] ss:$20 sps:$4 sm:$0xff]  }
 0x505   :  { %5128 = vmatpush1.bf16.msra.mxu0 %v18840_v7  ;;  %v28548_v7 = vunpack.i.l.bf16 %v22984_v9  ;;  %v2423_v9 = vsel %vm177_vm3, %v2413_v27, %v23463_v3  ;;  %v18890_v27 = vld [vmem:[%s28255_s5 + $0xaf4] ss:$20 sps:$4 sm:$0xff]  }
 0x506   :  { %5383 = vmatpush1.bf16.msra.mxu1 %v18843_v17  ;;  %5129 = vmatprep.subr.bf16.mxu0 %v18848_v50  ;;  %v18861_v50 = vld [vmem:[%s28255_s5 + $0xa30] ss:$20 sps:$4 sm:$0xff]  }
 0x507   :  { %5384 = vmatprep.subr.bf16.mxu1 %v18851_v26  ;;  %v23472_v17 = vsel %vm825_vm9, %v28548_v7, %v18355_v53  ;;  %v18866_v26 = vld [vmem:[%s28255_s5 + $0xa54] ss:$20 sps:$4 sm:$0xff]   ;;  %v18884_v53 = vld [vmem:[%s28255_s5 + $0xacc] ss:$20 sps:$4 sm:$0xff]   ;;  %v18888_v7 = vld [vmem:[%s28255_s5 + $0xaf0] ss:$20 sps:$4 sm:$0xff]  }
 0x509   :  { %5130 = vmatpush1.bf16.msra.mxu0 %v18846_v12  ;;  %v23487_v12 = vpack.c.bf16 %v22939_v61, %v22939_v61  ;;  %v18872_v61 = vld [vmem:[%s28255_s5 + $0xa7c] ss:$20 sps:$4 sm:$0xff]  }
 0x50a   :  { %5385 = vmatpush1.bf16.msra.mxu1 %v18849_v36  ;;  %5150 = vmatprep.subr.bf16.mxu0 %v18854_v51  ;;  %v2403_v36 = vsel %vm179_vm4, %v23472_v17, %v2350_v52  ;;  %v18867_v51 = vld [vmem:[%s28255_s5 + $0xa58] ss:$20 sps:$4 sm:$0xff]   ;;  %v18879_v52 = vld [vmem:[%s28255_s5 + $0xaa8] ss:$20 sps:$4 sm:$0xff]  }
 0x50b   :  { %5405 = vmatprep.subr.bf16.mxu1 %v18857_v8  ;;  %v23497_v29 = vpack.c.bf16 %v2423_v9, %v2403_v36  ;;  %v18875_v8 = vld [vmem:[%s28255_s5 + $0xa84] ss:$20 sps:$4 sm:$0xff]  }
 0x50c   :  { %5132 = vmatmul.mubr.bf16.vlgmr.msra.gmra.mrb[40].mxu0 %v22965_v46  ;;  %v18894_v9 = vld [vmem:[%s28255_s5 + $0xb18] ss:$20 sps:$4 sm:$0xff]  }
 0x50d   :  { %5387 = vmatmul.mubr.bf16.vlgmr.msra.gmra.mrb[32].mxu1 %v22965_v46  ;;  %5141 = vmatprep.mubr.bf16.mxu0 %v23451_v62  ;;  %v18902_v36 = vld [vmem:[%s28255_s5 + $0xb44] ss:$20 sps:$4 sm:$0xff]  }
 0x50e   :  { %5151 = vmatpush1.bf16.msra.mxu0 %v18852_v6  ;;  %5396 = vmatprep.mubr.bf16.mxu1 %v23451_v62  ;;  %v18878_v6 = vld [vmem:[%s28255_s5 + $0xaa4] ss:$20 sps:$4 sm:$0xff]  }
 0x50f   :  { %5406 = vmatpush1.bf16.msra.mxu1 %v18855_v10  ;;  %5152 = vmatprep.subr.bf16.mxu0 %v18860_v18  ;;  %v18887_v10 = vld [vmem:[%s28255_s5 + $0xad4] ss:$20 sps:$4 sm:$0xff]  }
 0x510   :  { %5407 = vmatprep.subr.bf16.mxu1 %v18863_v60  ;;  %v18882_v18 = vld [vmem:[%s28255_s5 + $0xac8] ss:$20 sps:$4 sm:$0xff]   ;;  %v18885_v60 = vld [vmem:[%s28255_s5 + $0xad0] ss:$20 sps:$4 sm:$0xff]  }
 0x512   :  { %5153 = vmatpush1.bf16.msra.mxu0 %v18858_v40  ;;  %v18893_v40 = vld [vmem:[%s28255_s5 + $0xafc] ss:$20 sps:$4 sm:$0xff]  }
 0x513   :  { %5408 = vmatpush1.bf16.msra.mxu1 %v18861_v50  ;;  %5154 = vmatprep.subr.bf16.mxu0 %v18866_v26  ;;  %v18891_v50 = vld [vmem:[%s28255_s5 + $0xaf8] ss:$20 sps:$4 sm:$0xff]   ;;  %v18896_v26 = vld [vmem:[%s28255_s5 + $0xb1c] ss:$20 sps:$4 sm:$0xff]  }
 0x514   :  { %5142 = vmatmul.mubr.bf16.gmra.mrb[44].mxu0 %v23487_v12  ;;  %5409 = vmatprep.subr.bf16.mxu1 %v18869_v57  ;;  %v18899_v57 = vld [vmem:[%s28255_s5 + $0xb24] ss:$20 sps:$4 sm:$0xff]  }
 0x515   :  { %5397 = vmatmul.mubr.bf16.gmra.mrb[36].mxu1 %v23487_v12  ;;  %15457 = vmatprep.mubr.msk.bf16.mxu0 %vm1690_vm13, %v23497_v29 }
 0x516   :  { %5155 = vmatpush1.bf16.msra.mxu0 %v18864_v20  ;;  %15459 = vmatprep.mubr.msk.bf16.mxu1 %vm1690_vm13, %v23497_v29  ;;  %v18897_v20 = vld [vmem:[%s28255_s5 + $0xb20] ss:$20 sps:$4 sm:$0xff]  }
 0x517   :  { %5410 = vmatpush1.bf16.msra.mxu1 %v18867_v51  ;;  %5156 = vmatprep.subr.bf16.mxu0 %v18872_v61  ;;  %v18905_v51 = vld [vmem:[%s28255_s5 + $0xb4c] ss:$20 sps:$4 sm:$0xff]  }
 0x518   :  { %5411 = vmatprep.subr.bf16.mxu1 %v18875_v8  ;;  %v18900_v61 = vld [vmem:[%s28255_s5 + $0xb40] ss:$20 sps:$4 sm:$0xff]   ;;  %v18903_v8 = vld [vmem:[%s28255_s5 + $0xb48] ss:$20 sps:$4 sm:$0xff]  }
 0x51a   :  { %5157 = vmatpush1.bf16.msra.mxu0 %v18870_v2  ;;  %v18908_v2 = vld [vmem:[%s28255_s5 + $0xb6c] ss:$20 sps:$4 sm:$0xff]  }
 0x51b   :  { %5412 = vmatpush1.bf16.msra.mxu1 %v18873_v23  ;;  %5158 = vmatprep.subr.bf16.mxu0 %v18878_v6  ;;  %v18911_v23 = vld [vmem:[%s28255_s5 + $0xb74] ss:$20 sps:$4 sm:$0xff]  }
 0x51c   :  { %5413 = vmatprep.subr.bf16.mxu1 %v18881_v59  ;;  %v18906_v6 = vld [vmem:[%s28255_s5 + $0xb68] ss:$20 sps:$4 sm:$0xff]   ;;  %v18909_v59 = vld [vmem:[%s28255_s5 + $0xb70] ss:$20 sps:$4 sm:$0xff]  }
 0x51e   :  { %5159 = vmatpush1.bf16.msra.mxu0 %v18876_v34  ;;  %v18914_v34 = vld [vmem:[%s28255_s5 + $0xb94] ss:$20 sps:$4 sm:$0xff]  }
 0x51f   :  { %5414 = vmatpush1.bf16.msra.mxu1 %v18879_v52  ;;  %5160 = vmatprep.subr.bf16.mxu0 %v18884_v53  ;;  %v18917_v52 = vld [vmem:[%s28255_s5 + $0xb9c] ss:$20 sps:$4 sm:$0xff]  }
 0x520   :  { %5415 = vmatprep.subr.bf16.mxu1 %v18887_v10  ;;  %v18912_v53 = vld [vmem:[%s28255_s5 + $0xb90] ss:$20 sps:$4 sm:$0xff]   ;;  %v18915_v10 = vld [vmem:[%s28255_s5 + $0xb98] ss:$20 sps:$4 sm:$0xff]  }
 0x522   :  { %5161 = vmatpush1.bf16.msra.mxu0 %v18882_v18  ;;  %v18920_v18 = vld [vmem:[%s28255_s5 + $0xbbc] ss:$20 sps:$4 sm:$0xff]  }
 0x523   :  { %5416 = vmatpush1.bf16.msra.mxu1 %v18885_v60  ;;  %5162 = vmatprep.subr.bf16.mxu0 %v18890_v27  ;;  %v18923_v60 = vld [vmem:[%s28255_s5 + $0xbc4] ss:$20 sps:$4 sm:$0xff]  }
 0x524   :  { %5417 = vmatprep.subr.bf16.mxu1 %v18893_v40  ;;  %v18918_v27 = vld [vmem:[%s28255_s5 + $0xbb8] ss:$20 sps:$4 sm:$0xff]   ;;  %v18921_v40 = vld [vmem:[%s28255_s5 + $0xbc0] ss:$20 sps:$4 sm:$0xff]  }
 0x526   :  { %5163 = vmatpush1.bf16.msra.mxu0 %v18888_v7  ;;  %v18926_v7 = vld [vmem:[%s28255_s5 + $0xbe4] ss:$20 sps:$4 sm:$0xff]  }
 0x527   :  { %5418 = vmatpush1.bf16.msra.mxu1 %v18891_v50  ;;  %5164 = vmatprep.subr.bf16.mxu0 %v18896_v26  ;;  %v18929_v50 = vld [vmem:[%s28255_s5 + $0xbec] ss:$20 sps:$4 sm:$0xff]  }
 0x528   :  { %5419 = vmatprep.subr.bf16.mxu1 %v18899_v57  ;;  %v18924_v26 = vld [vmem:[%s28255_s5 + $0xbe0] ss:$20 sps:$4 sm:$0xff]   ;;  %v18927_v57 = vld [vmem:[%s28255_s5 + $0xbe8] ss:$20 sps:$4 sm:$0xff]  }
 0x52a   :  { %5165 = vmatpush1.bf16.msra.mxu0 %v18894_v9  ;;  %v18932_v9 = vld [vmem:[%s28255_s5 + $0xc0c] ss:$20 sps:$4 sm:$0xff]  }
 0x52b   :  { %5420 = vmatpush1.bf16.msra.mxu1 %v18897_v20  ;;  %5166 = vmatprep.subr.bf16.mxu0 %v18902_v36  ;;  %v18935_v20 = vld [vmem:[%s28255_s5 + $0xc14] ss:$20 sps:$4 sm:$0xff]  }
 0x52c   :  { %5421 = vmatprep.subr.bf16.mxu1 %v18905_v51  ;;  %v18930_v36 = vld [vmem:[%s28255_s5 + $0xc08] ss:$20 sps:$4 sm:$0xff]   ;;  %v18933_v51 = vld [vmem:[%s28255_s5 + $0xc10] ss:$20 sps:$4 sm:$0xff]  }
 0x52e   :  { %5167 = vmatpush1.bf16.msra.mxu0 %v18900_v61  ;;  %v18936_v61 = vld [vmem:[%s28255_s5 + $0x150] ss:$20 sps:$4 sm:$0xff]  }
 0x52f   :  { %5422 = vmatpush1.bf16.msra.mxu1 %v18903_v8  ;;  %5168 = vmatprep.subr.bf16.mxu0 %v18908_v2  ;;  %v18937_v8 = vld [vmem:[%s28255_s5 + $0x3d0] ss:$20 sps:$4 sm:$0xff]  }
 0x530   :  { %5423 = vmatprep.subr.bf16.mxu1 %v18911_v23  ;;  %v18938_v2 = vld [vmem:[%s28255_s5 + $0x10] ss:$20 sps:$4 sm:$0xff]   ;;  %v23648_v23 = vpack.c.bf16 %v23463_v3, %v23463_v3  ;;  %v18942_v3 = vld [vmem:[%s28255_s5 + $0x38] ss:$20 sps:$4 sm:$0xff]  }
 0x532   :  { %5169 = vmatpush1.bf16.msra.mxu0 %v18906_v6  ;;  %v18939_v6 = vld [vmem:[%s28255_s5 + $0x290] ss:$20 sps:$4 sm:$0xff]  }
 0x533   :  { %5424 = vmatpush1.bf16.msra.mxu1 %v18909_v59  ;;  %5170 = vmatprep.subr.bf16.mxu0 %v18914_v34  ;;  %v18940_v59 = vld [vmem:[%s28255_s5 + $0x178] ss:$20 sps:$4 sm:$0xff]  }
 0x534   :  { %5425 = vmatprep.subr.bf16.mxu1 %v18917_v52  ;;  %v18941_v34 = vld [vmem:[%s28255_s5 + $0x3f8] ss:$20 sps:$4 sm:$0xff]  }
 0x535   :  { %v18943_v52 = vld [vmem:[%s28255_s5 + $0x2b8] ss:$20 sps:$4 sm:$0xff]  }
 0x536   :  { %5171 = vmatpush1.bf16.msra.mxu0 %v18912_v53  ;;  %v18944_v53 = vld [vmem:[%s28255_s5 + $0x1a0] ss:$20 sps:$4 sm:$0xff]  }
 0x537   :  { %5426 = vmatpush1.bf16.msra.mxu1 %v18915_v10  ;;  %5172 = vmatprep.subr.bf16.mxu0 %v18920_v18  ;;  %v18945_v10 = vld [vmem:[%s28255_s5 + $0x420] ss:$20 sps:$4 sm:$0xff]   ;;  %v23679_v18 = vpack.c.bf16 %v23010_v30, %v23010_v30  ;;  %v18949_v30 = vld [vmem:[%s28255_s5 + $0x448] ss:$20 sps:$4 sm:$0xff]  }
 0x538   :  { %5427 = vmatprep.subr.bf16.mxu1 %v18923_v60  ;;  %v18946_v60 = vld [vmem:[%s28255_s5 + $0x60] ss:$20 sps:$4 sm:$0xff]  }
 0x53a   :  { %5173 = vmatpush1.bf16.msra.mxu0 %v18918_v27  ;;  %v18947_v27 = vld [vmem:[%s28255_s5 + $0x2e0] ss:$20 sps:$4 sm:$0xff]  }
 0x53b   :  { %5428 = vmatpush1.bf16.msra.mxu1 %v18921_v40  ;;  %5174 = vmatprep.subr.bf16.mxu0 %v18926_v7  ;;  %v18948_v40 = vld [vmem:[%s28255_s5 + $0x1c8] ss:$20 sps:$4 sm:$0xff]  }
 0x53c   :  { %5429 = vmatprep.subr.bf16.mxu1 %v18929_v50  ;;  %v18950_v7 = vld [vmem:[%s28255_s5 + $0x88] ss:$20 sps:$4 sm:$0xff]  }
 0x53d   :  { %v18951_v50 = vld [vmem:[%s28255_s5 + $0x308] ss:$20 sps:$4 sm:$0xff]  }
 0x53e   :  { %5175 = vmatpush1.bf16.msra.mxu0 %v18924_v26  ;;  %v18952_v26 = vld [vmem:[%s28255_s5 + $0x1f0] ss:$20 sps:$4 sm:$0xff]  }
 0x53f   :  { %5430 = vmatpush1.bf16.msra.mxu1 %v18927_v57  ;;  %5176 = vmatprep.subr.bf16.mxu0 %v18932_v9  ;;  %v18953_v57 = vld [vmem:[%s28255_s5 + $0x470] ss:$20 sps:$4 sm:$0xff]  }
 0x540   :  { %5431 = vmatprep.subr.bf16.mxu1 %v18935_v20  ;;  %v18954_v9 = vld [vmem:[%s28255_s5 + $0xb0] ss:$20 sps:$4 sm:$0xff]  }
 0x541   :  { %v18955_v20 = vld [vmem:[%s28255_s5 + $0x330] ss:$20 sps:$4 sm:$0xff]  }
 0x542   :  { %5177 = vmatpush1.bf16.msra.mxu0 %v18930_v36  ;;  %v18956_v36 = vld [vmem:[%s28255_s5 + $0x218] ss:$20 sps:$4 sm:$0xff]  }
 0x543   :  { %5432 = vmatpush1.bf16.msra.mxu1 %v18933_v51  ;;  %16694 = vmatprep.subr.bf16.mxu0 %v18936_v61  ;;  %v18957_v51 = vld [vmem:[%s28255_s5 + $0x498] ss:$20 sps:$4 sm:$0xff]  }
 0x544   :  { %16722 = vmatprep.subr.bf16.mxu1 %v18937_v8  ;;  %v18958_v61 = vld [vmem:[%s28255_s5 + $0xd8] ss:$20 sps:$4 sm:$0xff]  }
 0x545   :  { %5183 = vmatmul.mubr.bf16.vlgmr.msra.gmra.mrb[40].mxu0 %v23033_v63  ;;  %v18959_v8 = vld [vmem:[%s28255_s5 + $0x358] ss:$20 sps:$4 sm:$0xff]  }
 0x546   :  { %5438 = vmatmul.mubr.bf16.vlgmr.msra.gmra.mrb[32].mxu1 %v23033_v63  ;;  %15458 = vmatprep.mubr.msk.bf16.mxu0 %vm1690_vm13, %v23648_v23 }
 0x547   :  { %15460 = vmatprep.mubr.msk.bf16.mxu1 %vm1690_vm13, %v23648_v23  ;;  %16695 = vmatpush3.bf16.msra.mxu0 %v18938_v2  ;;  %v18960_v2 = vld [vmem:[%s28255_s5 + $0x240] ss:$20 sps:$4 sm:$0xff]  }
 0x548   :  { %16723 = vmatpush3.bf16.msra.mxu1 %v18939_v6  ;;  %16696 = vmatprep.subr.bf16.mxu0 %v18940_v59  ;;  %v18961_v6 = vld [vmem:[%s28255_s5 + $0x4c0] ss:$20 sps:$4 sm:$0xff]  }
 0x549   :  { %16724 = vmatprep.subr.bf16.mxu1 %v18941_v34  ;;  %v18962_v59 = vld [vmem:[%s28255_s5 + $0x100] ss:$20 sps:$4 sm:$0xff]  }
 0x54a   :  { %v18963_v34 = vld [vmem:[%s28255_s5 + $0x380] ss:$20 sps:$4 sm:$0xff]  }
 0x54b   :  { %16697 = vmatpush3.bf16.msra.mxu0 %v18942_v3  ;;  %v18964_v3 = vld [vmem:[%s28255_s5 + $0x268] ss:$20 sps:$4 sm:$0xff]  }
 0x54c   :  { %16725 = vmatpush3.bf16.msra.mxu1 %v18943_v52  ;;  %16698 = vmatprep.subr.bf16.mxu0 %v18944_v53  ;;  %v18965_v52 = vld [vmem:[%s28255_s5 + $0x4e8] ss:$20 sps:$4 sm:$0xff]  }
 0x54d   :  { %5193 = vmatmul.mubr.bf16.gmra.mrb[44].mxu0 %v23679_v18  ;;  %16726 = vmatprep.subr.bf16.mxu1 %v18945_v10  ;;  %v18966_v53 = vld [vmem:[%s28255_s5 + $0x128] ss:$20 sps:$4 sm:$0xff]  }
 0x54e   :  { %5448 = vmatmul.mubr.bf16.gmra.mrb[36].mxu1 %v23679_v18  ;;  %5488 = vmatprep.mubr.bf16.mxu0 %v22422_v31  ;;  %v18967_v10 = vld [vmem:[%s28255_s5 + $0x3a8] ss:$20 sps:$4 sm:$0xff]  }
 0x54f   :  { %16699 = vmatpush3.bf16.msra.mxu0 %v18946_v60  ;;  %5536 = vmatprep.mubr.bf16.mxu1 %v22821_v4  ;;  %v18968_v60 = vld [vmem:[%s28255_s5 + $0x650] ss:$20 sps:$4 sm:$0xff]  }
 0x550   :  { %16727 = vmatpush3.bf16.msra.mxu1 %v18947_v27  ;;  %16700 = vmatprep.subr.bf16.mxu0 %v18948_v40  ;;  %v18969_v27 = vld [vmem:[%s28255_s5 + $0x8d0] ss:$20 sps:$4 sm:$0xff]  }
 0x551   :  { %16728 = vmatprep.subr.bf16.mxu1 %v18949_v30  ;;  %v18970_v40 = vld [vmem:[%s28255_s5 + $0x510] ss:$20 sps:$4 sm:$0xff]  }
 0x552   :  { %v18971_v30 = vld [vmem:[%s28255_s5 + $0x790] ss:$20 sps:$4 sm:$0xff]  }
 0x553   :  { %16701 = vmatpush3.bf16.msra.mxu0 %v18950_v7  ;;  %v18972_v7 = vld [vmem:[%s28255_s5 + $0x678] ss:$20 sps:$4 sm:$0xff]  }
 0x554   :  { %16729 = vmatpush3.bf16.msra.mxu1 %v18951_v50  ;;  %16702 = vmatprep.subr.bf16.mxu0 %v18952_v26  ;;  %v18973_v50 = vld [vmem:[%s28255_s5 + $0x8f8] ss:$20 sps:$4 sm:$0xff]  }
 0x555   :  { %16730 = vmatprep.subr.bf16.mxu1 %v18953_v57  ;;  %v18974_v26 = vld [vmem:[%s28255_s5 + $0x538] ss:$20 sps:$4 sm:$0xff]  }
 0x556   :  { %v18975_v57 = vld [vmem:[%s28255_s5 + $0x7b8] ss:$20 sps:$4 sm:$0xff]  }
 0x557   :  { %16703 = vmatpush3.bf16.msra.mxu0 %v18954_v9  ;;  %v18976_v9 = vld [vmem:[%s28255_s5 + $0x6a0] ss:$20 sps:$4 sm:$0xff]  }
 0x558   :  { %16731 = vmatpush3.bf16.msra.mxu1 %v18955_v20  ;;  %16704 = vmatprep.subr.bf16.mxu0 %v18956_v36  ;;  %v18977_v20 = vld [vmem:[%s28255_s5 + $0x920] ss:$20 sps:$4 sm:$0xff]  }
 0x559   :  { %16732 = vmatprep.subr.bf16.mxu1 %v18957_v51  ;;  %v18978_v36 = vld [vmem:[%s28255_s5 + $0x560] ss:$20 sps:$4 sm:$0xff]  }
 0x55a   :  { %v18979_v51 = vld [vmem:[%s28255_s5 + $0x7e0] ss:$20 sps:$4 sm:$0xff]  }
 0x55b   :  { %16705 = vmatpush3.bf16.msra.mxu0 %v18958_v61  ;;  %v18980_v61 = vld [vmem:[%s28255_s5 + $0x6c8] ss:$20 sps:$4 sm:$0xff]  }
 0x55c   :  { %16733 = vmatpush3.bf16.msra.mxu1 %v18959_v8  ;;  %16706 = vmatprep.subr.bf16.mxu0 %v18960_v2  ;;  %v18981_v8 = vld [vmem:[%s28255_s5 + $0x948] ss:$20 sps:$4 sm:$0xff]  }
 0x55d   :  { %16734 = vmatprep.subr.bf16.mxu1 %v18961_v6  ;;  %v18982_v2 = vld [vmem:[%s28255_s5 + $0x588] ss:$20 sps:$4 sm:$0xff]  }
 0x55e   :  { %v18983_v6 = vld [vmem:[%s28255_s5 + $0x808] ss:$20 sps:$4 sm:$0xff]  }
 0x55f   :  { %16707 = vmatpush3.bf16.msra.mxu0 %v18962_v59  ;;  %v18984_v59 = vld [vmem:[%s28255_s5 + $0x6f0] ss:$20 sps:$4 sm:$0xff]  }
 0x560   :  { %16735 = vmatpush3.bf16.msra.mxu1 %v18963_v34  ;;  %16708 = vmatprep.subr.bf16.mxu0 %v18964_v3  ;;  %v18985_v34 = vld [vmem:[%s28255_s5 + $0x970] ss:$20 sps:$4 sm:$0xff]  }
 0x561   :  { %16736 = vmatprep.subr.bf16.mxu1 %v18965_v52  ;;  %v18986_v3 = vld [vmem:[%s28255_s5 + $0x5b0] ss:$20 sps:$4 sm:$0xff]  }
 0x562   :  { %v18987_v52 = vld [vmem:[%s28255_s5 + $0x830] ss:$20 sps:$4 sm:$0xff]  }
 0x563   :  { %16709 = vmatpush3.bf16.msra.mxu0 %v18966_v53  ;;  %v18988_v53 = vld [vmem:[%s28255_s5 + $0x718] ss:$20 sps:$4 sm:$0xff]  }
 0x564   :  { %16737 = vmatpush3.bf16.msra.mxu1 %v18967_v10  ;;  %16750 = vmatprep.subr.bf16.mxu0 %v18968_v60  ;;  %v18989_v10 = vld [vmem:[%s28255_s5 + $0x998] ss:$20 sps:$4 sm:$0xff]  }
 0x565   :  { %16778 = vmatprep.subr.bf16.mxu1 %v18969_v27  ;;  %v18990_v60 = vld [vmem:[%s28255_s5 + $0x5d8] ss:$20 sps:$4 sm:$0xff]  }
 0x566   :  { %5489 = vmatmul.mubr.bf16.vlgmr.msra.gmra.mrb[48].mxu0 %v22451_v33  ;;  %v18991_v27 = vld [vmem:[%s28255_s5 + $0x858] ss:$20 sps:$4 sm:$0xff]  }
 0x567   :  { %5537 = vmatmul.mubr.bf16.vlgmr.msra.gmra.mrb[40].mxu1 %v22585_v37  ;;  %5496 = vmatprep.mubr.bf16.mxu0 %v22448_v15 }
 0x568   :  { %5544 = vmatprep.mubr.bf16.mxu1 %v22853_v44  ;;  %16751 = vmatpush3.bf16.msra.mxu0 %v18970_v40  ;;  %v18992_v40 = vld [vmem:[%s28255_s5 + $0x740] ss:$20 sps:$4 sm:$0xff]  }
 0x569   :  { %16779 = vmatpush3.bf16.msra.mxu1 %v18971_v30  ;;  %16752 = vmatprep.subr.bf16.mxu0 %v18972_v7  ;;  %v18993_v30 = vld [vmem:[%s28255_s5 + $0x9c0] ss:$20 sps:$4 sm:$0xff]  }
 0x56a   :  { %16780 = vmatprep.subr.bf16.mxu1 %v18973_v50  ;;  %v18994_v7 = vld [vmem:[%s28255_s5 + $0x600] ss:$20 sps:$4 sm:$0xff]  }
 0x56b   :  { %v18995_v50 = vld [vmem:[%s28255_s5 + $0x880] ss:$20 sps:$4 sm:$0xff]  }
 0x56c   :  { %16753 = vmatpush3.bf16.msra.mxu0 %v18974_v26  ;;  %v18996_v26 = vld [vmem:[%s28255_s5 + $0x768] ss:$20 sps:$4 sm:$0xff]  }
 0x56d   :  { %16781 = vmatpush3.bf16.msra.mxu1 %v18975_v57  ;;  %16754 = vmatprep.subr.bf16.mxu0 %v18976_v9  ;;  %v18997_v57 = vld [vmem:[%s28255_s5 + $0x9e8] ss:$20 sps:$4 sm:$0xff]  }
 0x56e   :  { %5497 = vmatmul.mubr.bf16.gmra.mrb[52].mxu0 %v22520_v32  ;;  %16782 = vmatprep.subr.bf16.mxu1 %v18977_v20  ;;  %v18998_v9 = vld [vmem:[%s28255_s5 + $0x628] ss:$20 sps:$4 sm:$0xff]  }
 0x56f   :  { %5545 = vmatmul.mubr.bf16.gmra.mrb[44].mxu1 %v22902_v16  ;;  %5584 = vmatprep.mubr.bf16.mxu0 %v22907_v38  ;;  %v18999_v20 = vld [vmem:[%s28255_s5 + $0x8a8] ss:$20 sps:$4 sm:$0xff]  }
 0x570   :  { %16755 = vmatpush3.bf16.msra.mxu0 %v18978_v36  ;;  %5632 = vmatprep.mubr.bf16.mxu1 %v23262_v45  ;;  %v19002_v36 = vld [vmem:[%s28256_s6 + $0x4] ss:$24 sps:$4 sm:$0xff]  }
 0x571   :  { %16783 = vmatpush3.bf16.msra.mxu1 %v18979_v51  ;;  %16756 = vmatprep.subr.bf16.mxu0 %v18980_v61  ;;  %v28549_v51 = vmov 0   ;;  %v19003_v61 = vld [vmem:[%s28255_s5 + $0xa10] ss:$20 sps:$4 sm:$0xff]  }
 0x572   :  { %16784 = vmatprep.subr.bf16.mxu1 %v18981_v8  ;;  %v19000_v8 = vld [vmem:[%s28256_s6] ss:$24 sps:$4 sm:$0xff]  }
 0x574   :  { %16757 = vmatpush3.bf16.msra.mxu0 %v18982_v2  ;;  %v19006_v2 = vld [vmem:[%s28256_s6 + $0x34] ss:$24 sps:$4 sm:$0xff]  }
 0x575   :  { %16785 = vmatpush3.bf16.msra.mxu1 %v18983_v6  ;;  %16758 = vmatprep.subr.bf16.mxu0 %v18984_v59  ;;  %v19007_v6 = vld [vmem:[%s28255_s5 + $0xa38] ss:$20 sps:$4 sm:$0xff]   ;;  %v19004_v59 = vld [vmem:[%s28256_s6 + $0x30] ss:$24 sps:$4 sm:$0xff]  }
 0x576   :  { %16786 = vmatprep.subr.bf16.mxu1 %v18985_v34  ;;  %v19010_v34 = vld [vmem:[%s28256_s6 + $0x64] ss:$24 sps:$4 sm:$0xff]  }
 0x578   :  { %16759 = vmatpush3.bf16.msra.mxu0 %v18986_v3  ;;  %v19011_v3 = vld [vmem:[%s28255_s5 + $0xa60] ss:$20 sps:$4 sm:$0xff]  }
 0x579   :  { %16787 = vmatpush3.bf16.msra.mxu1 %v18987_v52  ;;  %16760 = vmatprep.subr.bf16.mxu0 %v18988_v53  ;;  %v19008_v52 = vld [vmem:[%s28256_s6 + $0x60] ss:$24 sps:$4 sm:$0xff]   ;;  %v23892_v53 = vpack.c.bf16 %v22599_v1, %v22599_v1  ;;  %v19012_v1 = vld [vmem:[%s28256_s6 + $0x90] ss:$24 sps:$4 sm:$0xff]  }
 0x57a   :  { %16788 = vmatprep.subr.bf16.mxu1 %v18989_v10  ;;  %v19014_v10 = vld [vmem:[%s28256_s6 + $0x94] ss:$24 sps:$4 sm:$0xff]  }
 0x57c   :  { %16761 = vmatpush3.bf16.msra.mxu0 %v18990_v60  ;;  %v19015_v60 = vld [vmem:[%s28255_s5 + $0xa88] ss:$20 sps:$4 sm:$0xff]  }
 0x57d   :  { %16789 = vmatpush3.bf16.msra.mxu1 %v18991_v27  ;;  %16762 = vmatprep.subr.bf16.mxu0 %v18992_v40  ;;  %v19018_v27 = vld [vmem:[%s28256_s6 + $0xc4] ss:$24 sps:$4 sm:$0xff]  }
 0x57e   :  { %16790 = vmatprep.subr.bf16.mxu1 %v18993_v30  ;;  %v19019_v40 = vld [vmem:[%s28255_s5 + $0xab0] ss:$20 sps:$4 sm:$0xff]   ;;  %v19016_v30 = vld [vmem:[%s28256_s6 + $0xc0] ss:$24 sps:$4 sm:$0xff]  }
 0x580   :  { %16763 = vmatpush3.bf16.msra.mxu0 %v18994_v7  ;;  %v19022_v7 = vld [vmem:[%s28256_s6 + $0xf4] ss:$24 sps:$4 sm:$0xff]  }
 0x581   :  { %16791 = vmatpush3.bf16.msra.mxu1 %v18995_v50  ;;  %16764 = vmatprep.subr.bf16.mxu0 %v18996_v26  ;;  %v19023_v50 = vld [vmem:[%s28255_s5 + $0xad8] ss:$20 sps:$4 sm:$0xff]   ;;  %v19020_v26 = vld [vmem:[%s28256_s6 + $0xf0] ss:$24 sps:$4 sm:$0xff]  }
 0x582   :  { %16792 = vmatprep.subr.bf16.mxu1 %v18997_v57  ;;  %v19026_v57 = vld [vmem:[%s28256_s6 + $0x124] ss:$24 sps:$4 sm:$0xff]  }
 0x584   :  { %16765 = vmatpush3.bf16.msra.mxu0 %v18998_v9  ;;  %v19027_v9 = vld [vmem:[%s28255_s5 + $0xb00] ss:$20 sps:$4 sm:$0xff]  }
 0x585   :  { %16793 = vmatpush3.bf16.msra.mxu1 %v18999_v20  ;;  %5648 = vmatprep.subr.bf16.mxu0 %v28549_v51  ;;  %v19024_v20 = vld [vmem:[%s28256_s6 + $0x120] ss:$24 sps:$4 sm:$0xff]  }
 0x586   :  { %8607 = vmatprep.subr.bf16.mxu1 %v19002_v36  ;;  %v19030_v36 = vld [vmem:[%s28256_s6 + $0x154] ss:$24 sps:$4 sm:$0xff]  }
 0x587   :  { %5585 = vmatmul.mubr.bf16.vlgmr.msra.gmra.mrb[56].mxu0 %v22872_v58 }
 0x588   :  { %5633 = vmatmul.mubr.bf16.vlgmr.msra.gmra.mrb[48].mxu1 %v22965_v46  ;;  %5592 = vmatprep.mubr.bf16.mxu0 %v23215_v21 }
 0x589   :  { %5640 = vmatprep.mubr.bf16.mxu1 %v23451_v62  ;;  %5649 = vmatpush1.bf16.msra.mxu0 %v19003_v61  ;;  %v19031_v61 = vld [vmem:[%s28255_s5 + $0xb28] ss:$20 sps:$4 sm:$0xff]  }
 0x58a   :  { %8608 = vmatpush1.bf16.msra.mxu1 %v19000_v8  ;;  %5650 = vmatprep.subr.bf16.mxu0 %v28549_v51  ;;  %v19028_v8 = vld [vmem:[%s28256_s6 + $0x150] ss:$24 sps:$4 sm:$0xff]  }
 0x58b   :  { %8609 = vmatprep.subr.bf16.mxu1 %v19006_v2  ;;  %v19034_v2 = vld [vmem:[%s28256_s6 + $0x184] ss:$24 sps:$4 sm:$0xff]  }
 0x58d   :  { %5651 = vmatpush1.bf16.msra.mxu0 %v19007_v6  ;;  %v19035_v6 = vld [vmem:[%s28255_s5 + $0xb50] ss:$20 sps:$4 sm:$0xff]  }
 0x58e   :  { %8610 = vmatpush1.bf16.msra.mxu1 %v19004_v59  ;;  %5652 = vmatprep.subr.bf16.mxu0 %v28549_v51  ;;  %v19032_v59 = vld [vmem:[%s28256_s6 + $0x180] ss:$24 sps:$4 sm:$0xff]  }
 0x58f   :  { %5593 = vmatmul.mubr.bf16.gmra.mrb[60].mxu0 %v23255_v24  ;;  %8611 = vmatprep.subr.bf16.mxu1 %v19010_v34  ;;  %v19038_v34 = vld [vmem:[%s28256_s6 + $0x1b4] ss:$24 sps:$4 sm:$0xff]  }
 0x590   :  { %5641 = vmatmul.mubr.bf16.gmra.mrb[52].mxu1 %v23487_v12  ;;  %15461 = vmatprep.mubr.msk.bf16.mxu0 %vm1690_vm13, %v23497_v29 }
 0x591   :  { %5653 = vmatpush1.bf16.msra.mxu0 %v19011_v3  ;;  %8639 = vmatprep.mubr.bf16.mxu1 %v23892_v53  ;;  %v19039_v3 = vld [vmem:[%s28255_s5 + $0xb78] ss:$20 sps:$4 sm:$0xff]  }
 0x592   :  { %8612 = vmatpush1.bf16.msra.mxu1 %v19008_v52  ;;  %5654 = vmatprep.subr.bf16.mxu0 %v28549_v51  ;;  %v19036_v52 = vld [vmem:[%s28256_s6 + $0x1b0] ss:$24 sps:$4 sm:$0xff]  }
 0x593   :  { %8613 = vmatprep.subr.bf16.mxu1 %v19014_v10  ;;  %v19042_v10 = vld [vmem:[%s28256_s6 + $0x1e4] ss:$24 sps:$4 sm:$0xff]  }
 0x595   :  { %5655 = vmatpush1.bf16.msra.mxu0 %v19015_v60  ;;  %v19043_v60 = vld [vmem:[%s28255_s5 + $0xba0] ss:$20 sps:$4 sm:$0xff]  }
 0x596   :  { %8614 = vmatpush1.bf16.msra.mxu1 %v19012_v1  ;;  %5656 = vmatprep.subr.bf16.mxu0 %v28549_v51  ;;  %v19040_v1 = vld [vmem:[%s28256_s6 + $0x1e0] ss:$24 sps:$4 sm:$0xff]  }
 0x597   :  { %8615 = vmatprep.subr.bf16.mxu1 %v19018_v27  ;;  %v19046_v27 = vld [vmem:[%s28256_s6 + $0x214] ss:$24 sps:$4 sm:$0xff]  }
 0x599   :  { %5657 = vmatpush1.bf16.msra.mxu0 %v19019_v40  ;;  %v19047_v40 = vld [vmem:[%s28255_s5 + $0xbc8] ss:$20 sps:$4 sm:$0xff]  }
 0x59a   :  { %8616 = vmatpush1.bf16.msra.mxu1 %v19016_v30  ;;  %5658 = vmatprep.subr.bf16.mxu0 %v28549_v51  ;;  %v19044_v30 = vld [vmem:[%s28256_s6 + $0x210] ss:$24 sps:$4 sm:$0xff]  }
 0x59b   :  { %8617 = vmatprep.subr.bf16.mxu1 %v19022_v7  ;;  %v19050_v7 = vld [vmem:[%s28256_s6 + $0x244] ss:$24 sps:$4 sm:$0xff]  }
 0x59d   :  { %5659 = vmatpush1.bf16.msra.mxu0 %v19023_v50  ;;  %v19051_v50 = vld [vmem:[%s28255_s5 + $0xbf0] ss:$20 sps:$4 sm:$0xff]  }
 0x59e   :  { %8618 = vmatpush1.bf16.msra.mxu1 %v19020_v26  ;;  %5660 = vmatprep.subr.bf16.mxu0 %v28549_v51  ;;  %v19048_v26 = vld [vmem:[%s28256_s6 + $0x240] ss:$24 sps:$4 sm:$0xff]  }
 0x59f   :  { %8619 = vmatprep.subr.bf16.mxu1 %v19026_v57  ;;  %v19054_v57 = vld [vmem:[%s28256_s6 + $0x274] ss:$24 sps:$4 sm:$0xff]  }
 0x5a1   :  { %5661 = vmatpush1.bf16.msra.mxu0 %v19027_v9  ;;  %v19055_v9 = vld [vmem:[%s28255_s5 + $0xc18] ss:$20 sps:$4 sm:$0xff]  }
 0x5a2   :  { %8620 = vmatpush1.bf16.msra.mxu1 %v19024_v20  ;;  %5662 = vmatprep.subr.bf16.mxu0 %v28549_v51  ;;  %v19052_v20 = vld [vmem:[%s28256_s6 + $0x270] ss:$24 sps:$4 sm:$0xff]  }
 0x5a3   :  { %8621 = vmatprep.subr.bf16.mxu1 %v19030_v36  ;;  %v19061_v36 = vld [vmem:[%s28256_s6 + $0xc] ss:$24 sps:$4 sm:$0xff]  }
 0x5a5   :  { %5663 = vmatpush1.bf16.msra.mxu0 %v19031_v61  ;;  %v19058_v61 = vld [vmem:[%s28256_s6 + $0x2a4] ss:$24 sps:$4 sm:$0xff]  }
 0x5a6   :  { %8622 = vmatpush1.bf16.msra.mxu1 %v19028_v8  ;;  %5664 = vmatprep.subr.bf16.mxu0 %v28549_v51  ;;  %v19059_v8 = vld [vmem:[%s28256_s6 + $0x8] ss:$24 sps:$4 sm:$0xff]  }
 0x5a7   :  { %8623 = vmatprep.subr.bf16.mxu1 %v19034_v2  ;;  %v5709_v2 = vsel %vm1687_vm12, %v22490_v13, %v23029_v25  ;;  %v19065_v13 = vld [vmem:[%s28256_s6 + $0x38] ss:$24 sps:$4 sm:$0xff]  }
 0x5a8   :  { %v19062_v25 = vld [vmem:[%s28256_s6 + $0x2d0] ss:$24 sps:$4 sm:$0xff]  }
 0x5a9   :  { %5665 = vmatpush1.bf16.msra.mxu0 %v19035_v6  ;;  %v19056_v6 = vld [vmem:[%s28256_s6 + $0x2a0] ss:$24 sps:$4 sm:$0xff]  }
 0x5aa   :  { %8624 = vmatpush1.bf16.msra.mxu1 %v19032_v59  ;;  %5666 = vmatprep.subr.bf16.mxu0 %v28549_v51  ;;  %v19067_v59 = vld [vmem:[%s28256_s6 + $0x3c] ss:$24 sps:$4 sm:$0xff]  }
 0x5ab   :  { %8625 = vmatprep.subr.bf16.mxu1 %v19038_v34  ;;  %v19064_v34 = vld [vmem:[%s28256_s6 + $0x2d4] ss:$24 sps:$4 sm:$0xff]  }
 0x5ad   :  { %5667 = vmatpush1.bf16.msra.mxu0 %v19039_v3  ;;  %v5737_v3 = vrot.slane %v5709_v2, 5  ;;  %v19089_v2 = vld [vmem:[%s28256_s6 + $0xf8] ss:$24 sps:$4 sm:$0xff]  }
 0x5ae   :  { %8626 = vmatpush1.bf16.msra.mxu1 %v19036_v52  ;;  %5668 = vmatprep.subr.bf16.mxu0 %v28549_v51  ;;  %v19073_v52 = vld [vmem:[%s28256_s6 + $0x6c] ss:$24 sps:$4 sm:$0xff]  }
 0x5af   :  { %8627 = vmatprep.subr.bf16.mxu1 %v19042_v10  ;;  %v5759_v10 = vrot.slane %v22796_v5, 6  ;;  %v24054_v5 = vpack.c.bf16 %v22607_v49, %v22607_v49  ;;  %v19077_v49 = vld [vmem:[%s28256_s6 + $0x98] ss:$24 sps:$4 sm:$0xff]  }
 0x5b1   :  { %5669 = vmatpush1.bf16.msra.mxu0 %v19043_v60  ;;  %v19070_v60 = vld [vmem:[%s28256_s6 + $0x304] ss:$24 sps:$4 sm:$0xff]  }
 0x5b2   :  { %8628 = vmatpush1.bf16.msra.mxu1 %v19040_v1  ;;  %5670 = vmatprep.subr.bf16.mxu0 %v28549_v51  ;;  %v19071_v1 = vld [vmem:[%s28256_s6 + $0x68] ss:$24 sps:$4 sm:$0xff]  }
 0x5b3   :  { %8629 = vmatprep.subr.bf16.mxu1 %v19046_v27  ;;  %v5779_v27 = vsel %vm185_vm7, %v5737_v3, %v5759_v10  ;;  %v19095_v3 = vld [vmem:[%s28256_s6 + $0x128] ss:$24 sps:$4 sm:$0xff]   ;;  %v19101_v10 = vld [vmem:[%s28256_s6 + $0x158] ss:$24 sps:$4 sm:$0xff]  }
 0x5b5   :  { %5671 = vmatpush1.bf16.msra.mxu0 %v19047_v40  ;;  %v19068_v40 = vld [vmem:[%s28256_s6 + $0x300] ss:$24 sps:$4 sm:$0xff]  }
 0x5b6   :  { %8630 = vmatpush1.bf16.msra.mxu1 %v19044_v30  ;;  %5672 = vmatprep.subr.bf16.mxu0 %v28549_v51  ;;  %v19076_v30 = vld [vmem:[%s28256_s6 + $0x334] ss:$24 sps:$4 sm:$0xff]  }
 0x5b7   :  { %8631 = vmatprep.subr.bf16.mxu1 %v19050_v7  ;;  %v24060_v7 = vpack.c.bf16 %v5779_v27, %v5779_v27  ;;  %v19106_v27 = vld [vmem:[%s28256_s6 + $0x424] ss:$24 sps:$4 sm:$0xff]  }
 0x5b9   :  { %5673 = vmatpush1.bf16.msra.mxu0 %v19051_v50  ;;  %v19079_v50 = vld [vmem:[%s28256_s6 + $0x9c] ss:$24 sps:$4 sm:$0xff]  }
 0x5ba   :  { %8632 = vmatpush1.bf16.msra.mxu1 %v19048_v26  ;;  %5674 = vmatprep.subr.bf16.mxu0 %v28549_v51  ;;  %v19074_v26 = vld [vmem:[%s28256_s6 + $0x330] ss:$24 sps:$4 sm:$0xff]  }
 0x5bb   :  { %8633 = vmatprep.subr.bf16.mxu1 %v19054_v57  ;;  %v19085_v57 = vld [vmem:[%s28256_s6 + $0xcc] ss:$24 sps:$4 sm:$0xff]  }
 0x5bd   :  { %5675 = vmatpush1.bf16.msra.mxu0 %v19055_v9  ;;  %v19082_v9 = vld [vmem:[%s28256_s6 + $0x364] ss:$24 sps:$4 sm:$0xff]  }
 0x5be   :  { %8634 = vmatpush1.bf16.msra.mxu1 %v19052_v20  ;;  %8812 = vmatprep.subr.bf16.mxu0 %v19061_v36  ;;  %v19083_v20 = vld [vmem:[%s28256_s6 + $0xc8] ss:$24 sps:$4 sm:$0xff]  }
 0x5bf   :  { %8635 = vmatprep.subr.bf16.mxu1 %v19058_v61  ;;  %v19080_v36 = vld [vmem:[%s28256_s6 + $0x360] ss:$24 sps:$4 sm:$0xff]   ;;  %v19091_v61 = vld [vmem:[%s28256_s6 + $0xfc] ss:$24 sps:$4 sm:$0xff]  }
 0x5c0   :  { %5681 = vmatmul.mubr.bf16.vlgmr.msra.gmra.mrb[64].mxu0 %v23033_v63 }
 0x5c1   :  { %15462 = vmatprep.mubr.msk.bf16.mxu0 %vm1690_vm13, %v23648_v23  ;;  %8813 = vmatpush1.bf16.msra.mxu0 %v19059_v8  ;;  %v19088_v8 = vld [vmem:[%s28256_s6 + $0x394] ss:$24 sps:$4 sm:$0xff]  }
 0x5c2   :  { %8636 = vmatpush1.bf16.msra.mxu1 %v19056_v6  ;;  %8814 = vmatprep.subr.bf16.mxu0 %v19067_v59  ;;  %v19086_v6 = vld [vmem:[%s28256_s6 + $0x390] ss:$24 sps:$4 sm:$0xff]   ;;  %v19097_v59 = vld [vmem:[%s28256_s6 + $0x12c] ss:$24 sps:$4 sm:$0xff]  }
 0x5c3   :  { %8637 = vmatprep.subr.bf16.mxu1 %v19064_v34  ;;  %v19094_v34 = vld [vmem:[%s28256_s6 + $0x3c4] ss:$24 sps:$4 sm:$0xff]  }
 0x5c5   :  { %8815 = vmatpush1.bf16.msra.mxu0 %v19065_v13  ;;  %v19092_v13 = vld [vmem:[%s28256_s6 + $0x3c0] ss:$24 sps:$4 sm:$0xff]  }
 0x5c6   :  { %8638 = vmatpush1.bf16.msra.mxu1 %v19062_v25  ;;  %8816 = vmatprep.subr.bf16.mxu0 %v19073_v52  ;;  %v19103_v25 = vld [vmem:[%s28256_s6 + $0x15c] ss:$24 sps:$4 sm:$0xff]  }
 0x5c7   :  { %8648 = vmatprep.subr.bf16.mxu1 %v19070_v60  ;;  %v19100_v52 = vld [vmem:[%s28256_s6 + $0x3f4] ss:$24 sps:$4 sm:$0xff]   ;;  %v19098_v60 = vld [vmem:[%s28256_s6 + $0x3f0] ss:$24 sps:$4 sm:$0xff]  }
 0x5c8   :  { %5689 = vmatmul.mubr.bf16.gmra.mrb[68].mxu0 %v23679_v18 }
 0x5c9   :  { %8640 = vmatmul.mubr.bf16.vlgmr.msra.gmra.mrb[56].mxu1 %v24054_v5  ;;  %8817 = vmatpush1.bf16.msra.mxu0 %v19071_v1  ;;  %v19109_v1 = vld [vmem:[%s28256_s6 + $0x18c] ss:$24 sps:$4 sm:$0xff]  }
 0x5ca   :  { %8649 = vmatpush1.bf16.msra.mxu1 %v19068_v40  ;;  %8680 = vmatprep.mubr.bf16.mxu1 %v24060_v7  ;;  %v19107_v40 = vld [vmem:[%s28256_s6 + $0x188] ss:$24 sps:$4 sm:$0xff]  }
 0x5cb   :  { %8844 = vmatprep.mubr.bf16.mxu0 %v23892_v53  ;;  %8650 = vmatprep.subr.bf16.mxu1 %v19076_v30  ;;  %v19104_v30 = vld [vmem:[%s28256_s6 + $0x420] ss:$24 sps:$4 sm:$0xff]  }
 0x5cc   :  { %8818 = vmatprep.subr.bf16.mxu0 %v19079_v50  ;;  %v19115_v50 = vld [vmem:[%s28256_s6 + $0x1bc] ss:$24 sps:$4 sm:$0xff]  }
 0x5cd   :  { %8819 = vmatpush1.bf16.msra.mxu0 %v19077_v49  ;;  %v19112_v49 = vld [vmem:[%s28256_s6 + $0x454] ss:$24 sps:$4 sm:$0xff]  }
 0x5ce   :  { %8651 = vmatpush1.bf16.msra.mxu1 %v19074_v26  ;;  %8820 = vmatprep.subr.bf16.mxu0 %v19085_v57  ;;  %v19113_v26 = vld [vmem:[%s28256_s6 + $0x1b8] ss:$24 sps:$4 sm:$0xff]  }
 0x5cf   :  { %8652 = vmatprep.subr.bf16.mxu1 %v19082_v9  ;;  %v19110_v57 = vld [vmem:[%s28256_s6 + $0x450] ss:$24 sps:$4 sm:$0xff]   ;;  %v19121_v9 = vld [vmem:[%s28256_s6 + $0x1ec] ss:$24 sps:$4 sm:$0xff]  }
 0x5d1   :  { %8821 = vmatpush1.bf16.msra.mxu0 %v19083_v20  ;;  %v19118_v20 = vld [vmem:[%s28256_s6 + $0x484] ss:$24 sps:$4 sm:$0xff]  }
 0x5d2   :  { %8653 = vmatpush1.bf16.msra.mxu1 %v19080_v36  ;;  %8822 = vmatprep.subr.bf16.mxu0 %v19091_v61  ;;  %v19119_v36 = vld [vmem:[%s28256_s6 + $0x1e8] ss:$24 sps:$4 sm:$0xff]  }
 0x5d3   :  { %8654 = vmatprep.subr.bf16.mxu1 %v19088_v8  ;;  %v19116_v61 = vld [vmem:[%s28256_s6 + $0x480] ss:$24 sps:$4 sm:$0xff]   ;;  %v19127_v8 = vld [vmem:[%s28256_s6 + $0x21c] ss:$24 sps:$4 sm:$0xff]  }
 0x5d5   :  { %8823 = vmatpush1.bf16.msra.mxu0 %v19089_v2  ;;  %v19124_v2 = vld [vmem:[%s28256_s6 + $0x4b4] ss:$24 sps:$4 sm:$0xff]  }
 0x5d6   :  { %8655 = vmatpush1.bf16.msra.mxu1 %v19086_v6  ;;  %8824 = vmatprep.subr.bf16.mxu0 %v19097_v59  ;;  %v19125_v6 = vld [vmem:[%s28256_s6 + $0x218] ss:$24 sps:$4 sm:$0xff]  }
 0x5d7   :  { %8656 = vmatprep.subr.bf16.mxu1 %v19094_v34  ;;  %v19122_v59 = vld [vmem:[%s28256_s6 + $0x4b0] ss:$24 sps:$4 sm:$0xff]   ;;  %v19133_v34 = vld [vmem:[%s28256_s6 + $0x24c] ss:$24 sps:$4 sm:$0xff]  }
 0x5d9   :  { %8825 = vmatpush1.bf16.msra.mxu0 %v19095_v3  ;;  %v19130_v3 = vld [vmem:[%s28256_s6 + $0x4e4] ss:$24 sps:$4 sm:$0xff]  }
 0x5da   :  { %8657 = vmatpush1.bf16.msra.mxu1 %v19092_v13  ;;  %8826 = vmatprep.subr.bf16.mxu0 %v19103_v25  ;;  %v19131_v13 = vld [vmem:[%s28256_s6 + $0x248] ss:$24 sps:$4 sm:$0xff]  }
 0x5db   :  { %8658 = vmatprep.subr.bf16.mxu1 %v19100_v52  ;;  %v19128_v25 = vld [vmem:[%s28256_s6 + $0x4e0] ss:$24 sps:$4 sm:$0xff]   ;;  %v19139_v52 = vld [vmem:[%s28256_s6 + $0x27c] ss:$24 sps:$4 sm:$0xff]  }
 0x5dd   :  { %8827 = vmatpush1.bf16.msra.mxu0 %v19101_v10  ;;  %v19136_v10 = vld [vmem:[%s28256_s6 + $0x514] ss:$24 sps:$4 sm:$0xff]  }
 0x5de   :  { %8659 = vmatpush1.bf16.msra.mxu1 %v19098_v60  ;;  %8828 = vmatprep.subr.bf16.mxu0 %v19109_v1  ;;  %v19137_v60 = vld [vmem:[%s28256_s6 + $0x278] ss:$24 sps:$4 sm:$0xff]  }
 0x5df   :  { %8660 = vmatprep.subr.bf16.mxu1 %v19106_v27  ;;  %v19134_v1 = vld [vmem:[%s28256_s6 + $0x510] ss:$24 sps:$4 sm:$0xff]   ;;  %v19145_v27 = vld [vmem:[%s28256_s6 + $0x2ac] ss:$24 sps:$4 sm:$0xff]  }
 0x5e1   :  { %8829 = vmatpush1.bf16.msra.mxu0 %v19107_v40  ;;  %v19142_v40 = vld [vmem:[%s28256_s6 + $0x544] ss:$24 sps:$4 sm:$0xff]  }
 0x5e2   :  { %8661 = vmatpush1.bf16.msra.mxu1 %v19104_v30  ;;  %8830 = vmatprep.subr.bf16.mxu0 %v19115_v50  ;;  %v19143_v30 = vld [vmem:[%s28256_s6 + $0x2a8] ss:$24 sps:$4 sm:$0xff]  }
 0x5e3   :  { %8662 = vmatprep.subr.bf16.mxu1 %v19112_v49  ;;  %v19140_v50 = vld [vmem:[%s28256_s6 + $0x540] ss:$24 sps:$4 sm:$0xff]   ;;  %v19151_v49 = vld [vmem:[%s28256_s6 + $0x2dc] ss:$24 sps:$4 sm:$0xff]  }
 0x5e5   :  { %8831 = vmatpush1.bf16.msra.mxu0 %v19113_v26  ;;  %v19148_v26 = vld [vmem:[%s28256_s6 + $0x574] ss:$24 sps:$4 sm:$0xff]  }
 0x5e6   :  { %8663 = vmatpush1.bf16.msra.mxu1 %v19110_v57  ;;  %8832 = vmatprep.subr.bf16.mxu0 %v19121_v9  ;;  %v19149_v57 = vld [vmem:[%s28256_s6 + $0x2d8] ss:$24 sps:$4 sm:$0xff]  }
 0x5e7   :  { %8664 = vmatprep.subr.bf16.mxu1 %v19118_v20  ;;  %v19146_v9 = vld [vmem:[%s28256_s6 + $0x570] ss:$24 sps:$4 sm:$0xff]   ;;  %v19157_v20 = vld [vmem:[%s28256_s6 + $0x30c] ss:$24 sps:$4 sm:$0xff]  }
 0x5e9   :  { %8833 = vmatpush1.bf16.msra.mxu0 %v19119_v36  ;;  %v19154_v36 = vld [vmem:[%s28256_s6 + $0x5a4] ss:$24 sps:$4 sm:$0xff]  }
 0x5ea   :  { %8665 = vmatpush1.bf16.msra.mxu1 %v19116_v61  ;;  %8834 = vmatprep.subr.bf16.mxu0 %v19127_v8  ;;  %v19155_v61 = vld [vmem:[%s28256_s6 + $0x308] ss:$24 sps:$4 sm:$0xff]   ;;  %v28550_v8 = vunpack.i.h.bf16 %v23025_v43 }
 0x5eb   :  { %8666 = vmatprep.subr.bf16.mxu1 %v19124_v2  ;;  %v28551_v2 = vunpack.i.l.bf16 %v23025_v43 }
 0x5ed   :  { %8835 = vmatpush1.bf16.msra.mxu0 %v19125_v6  ;;  %v5705_v6 = vsel %vm1687_vm12, %v28551_v2, %v28550_v8  ;;  %v19184_v8 = vld [vmem:[%s28256_s6 + $0x694] ss:$24 sps:$4 sm:$0xff]   ;;  %v19185_v2 = vld [vmem:[%s28256_s6 + $0x3f8] ss:$24 sps:$4 sm:$0xff]  }
 0x5ee   :  { %8667 = vmatpush1.bf16.msra.mxu1 %v19122_v59  ;;  %8836 = vmatprep.subr.bf16.mxu0 %v19133_v34  ;;  %v19152_v59 = vld [vmem:[%s28256_s6 + $0x5a0] ss:$24 sps:$4 sm:$0xff]   ;;  %v19163_v34 = vld [vmem:[%s28256_s6 + $0x33c] ss:$24 sps:$4 sm:$0xff]   ;;  %v5739_v43 = vrot.slane %v5705_v6, 5 }
 0x5ef   :  { %8668 = vmatprep.subr.bf16.mxu1 %v19130_v3  ;;  %v19160_v3 = vld [vmem:[%s28256_s6 + $0x5d4] ss:$24 sps:$4 sm:$0xff]   ;;  %v19182_v6 = vld [vmem:[%s28256_s6 + $0x690] ss:$24 sps:$4 sm:$0xff]  }
 0x5f1   :  { %8837 = vmatpush1.bf16.msra.mxu0 %v19131_v13  ;;  %v19161_v13 = vld [vmem:[%s28256_s6 + $0x338] ss:$24 sps:$4 sm:$0xff]  }
 0x5f2   :  { %8669 = vmatpush1.bf16.msra.mxu1 %v19128_v25  ;;  %8838 = vmatprep.subr.bf16.mxu0 %v19139_v52  ;;  %v19158_v25 = vld [vmem:[%s28256_s6 + $0x5d0] ss:$24 sps:$4 sm:$0xff]   ;;  %v19169_v52 = vld [vmem:[%s28256_s6 + $0x36c] ss:$24 sps:$4 sm:$0xff]  }
 0x5f3   :  { %8670 = vmatprep.subr.bf16.mxu1 %v19136_v10  ;;  %v5761_v10 = vrot.slane %v22843_v41, 6  ;;  %v24265_v41 = vpack.c.bf16 %v22614_v39, %v22614_v39  ;;  %v19170_v39 = vld [vmem:[%s28256_s6 + $0x630] ss:$24 sps:$4 sm:$0xff]  }
 0x5f5   :  { %8839 = vmatpush1.bf16.msra.mxu0 %v19137_v60  ;;  %v19166_v60 = vld [vmem:[%s28256_s6 + $0x604] ss:$24 sps:$4 sm:$0xff]  }
 0x5f6   :  { %8671 = vmatpush1.bf16.msra.mxu1 %v19134_v1  ;;  %8840 = vmatprep.subr.bf16.mxu0 %v19145_v27  ;;  %v19167_v1 = vld [vmem:[%s28256_s6 + $0x368] ss:$24 sps:$4 sm:$0xff]   ;;  %v5781_v27 = vsel %vm185_vm7, %v5739_v43, %v5761_v10 }
 0x5f7   :  { %8672 = vmatprep.subr.bf16.mxu1 %v19142_v40  ;;  %v19164_v40 = vld [vmem:[%s28256_s6 + $0x600] ss:$24 sps:$4 sm:$0xff]  }
 0x5f8   :  { %v19188_v43 = vld [vmem:[%s28256_s6 + $0x6c0] ss:$24 sps:$4 sm:$0xff]  }
 0x5f9   :  { %8841 = vmatpush1.bf16.msra.mxu0 %v19143_v30  ;;  %v19172_v30 = vld [vmem:[%s28256_s6 + $0x634] ss:$24 sps:$4 sm:$0xff]  }
 0x5fa   :  { %8673 = vmatpush1.bf16.msra.mxu1 %v19140_v50  ;;  %8842 = vmatprep.subr.bf16.mxu0 %v19151_v49  ;;  %v19175_v50 = vld [vmem:[%s28256_s6 + $0x39c] ss:$24 sps:$4 sm:$0xff]   ;;  %v24273_v49 = vpack.c.bf16 %v5781_v27, %v5781_v27 }
 0x5fb   :  { %8674 = vmatprep.subr.bf16.mxu1 %v19148_v26  ;;  %v19173_v26 = vld [vmem:[%s28256_s6 + $0x398] ss:$24 sps:$4 sm:$0xff]  }
 0x5fd   :  { %8843 = vmatpush1.bf16.msra.mxu0 %v19149_v57  ;;  %v19181_v57 = vld [vmem:[%s28256_s6 + $0x3cc] ss:$24 sps:$4 sm:$0xff]  }
 0x5fe   :  { %8675 = vmatpush1.bf16.msra.mxu1 %v19146_v9  ;;  %8853 = vmatprep.subr.bf16.mxu0 %v19157_v20  ;;  %v19178_v9 = vld [vmem:[%s28256_s6 + $0x664] ss:$24 sps:$4 sm:$0xff]   ;;  %v19179_v20 = vld [vmem:[%s28256_s6 + $0x3c8] ss:$24 sps:$4 sm:$0xff]  }
 0x5ff   :  { %8676 = vmatprep.subr.bf16.mxu1 %v19154_v36  ;;  %v19176_v36 = vld [vmem:[%s28256_s6 + $0x660] ss:$24 sps:$4 sm:$0xff]  }
 0x600   :  { %8845 = vmatmul.mubr.bf16.vlgmr.msra.gmra.mrb[72].mxu0 %v24054_v5 }
 0x601   :  { %8854 = vmatpush1.bf16.msra.mxu0 %v19155_v61  ;;  %8885 = vmatprep.mubr.bf16.mxu0 %v24060_v7  ;;  %v19187_v61 = vld [vmem:[%s28256_s6 + $0x3fc] ss:$24 sps:$4 sm:$0xff]  }
 0x602   :  { %8677 = vmatpush1.bf16.msra.mxu1 %v19152_v59  ;;  %8855 = vmatprep.subr.bf16.mxu0 %v19163_v34  ;;  %v19193_v59 = vld [vmem:[%s28256_s6 + $0x42c] ss:$24 sps:$4 sm:$0xff]  }
 0x603   :  { %8678 = vmatprep.subr.bf16.mxu1 %v19160_v3  ;;  %v19190_v34 = vld [vmem:[%s28256_s6 + $0x6c4] ss:$24 sps:$4 sm:$0xff]   ;;  %v19191_v3 = vld [vmem:[%s28256_s6 + $0x428] ss:$24 sps:$4 sm:$0xff]  }
 0x605   :  { %8856 = vmatpush1.bf16.msra.mxu0 %v19161_v13  ;;  %v19199_v13 = vld [vmem:[%s28256_s6 + $0x45c] ss:$24 sps:$4 sm:$0xff]  }
 0x606   :  { %8679 = vmatpush1.bf16.msra.mxu1 %v19158_v25  ;;  %8857 = vmatprep.subr.bf16.mxu0 %v19169_v52  ;;  %v19196_v25 = vld [vmem:[%s28256_s6 + $0x6f4] ss:$24 sps:$4 sm:$0xff]  }
 0x607   :  { %8689 = vmatprep.subr.bf16.mxu1 %v19166_v60 }
 0x609   :  { %8681 = vmatmul.mubr.bf16.vlgmr.msra.gmra.mrb[56].mxu1 %v24265_v41  ;;  %8858 = vmatpush1.bf16.msra.mxu0 %v19167_v1  ;;  %v19197_v1 = vld [vmem:[%s28256_s6 + $0x458] ss:$24 sps:$4 sm:$0xff]  }
 0x60a   :  { %8690 = vmatpush1.bf16.msra.mxu1 %v19164_v40  ;;  %8721 = vmatprep.mubr.bf16.mxu1 %v24273_v49 }
 0x60b   :  { %8691 = vmatprep.subr.bf16.mxu1 %v19172_v30  ;;  %8859 = vmatprep.subr.bf16.mxu0 %v19175_v50  ;;  %v19194_v30 = vld [vmem:[%s28256_s6 + $0x6f0] ss:$24 sps:$4 sm:$0xff]  }
 0x60d   :  { %8860 = vmatpush1.bf16.msra.mxu0 %v19173_v26  ;;  %v19205_v26 = vld [vmem:[%s28256_s6 + $0x48c] ss:$24 sps:$4 sm:$0xff]  }
 0x60e   :  { %8692 = vmatpush1.bf16.msra.mxu1 %v19170_v39  ;;  %8861 = vmatprep.subr.bf16.mxu0 %v19181_v57 }
 0x60f   :  { %8693 = vmatprep.subr.bf16.mxu1 %v19178_v9 }
 0x611   :  { %8862 = vmatpush1.bf16.msra.mxu0 %v19179_v20 }
 0x612   :  { %8694 = vmatpush1.bf16.msra.mxu1 %v19176_v36  ;;  %8863 = vmatprep.subr.bf16.mxu0 %v19187_v61 }
 0x613   :  { %8695 = vmatprep.subr.bf16.mxu1 %v19184_v8  ;;  %v19202_v8 = vld [vmem:[%s28256_s6 + $0x724] ss:$24 sps:$4 sm:$0xff]  }
 0x615   :  { %8864 = vmatpush1.bf16.msra.mxu0 %v19185_v2 }
 0x616   :  { %8696 = vmatpush1.bf16.msra.mxu1 %v19182_v6  ;;  %8865 = vmatprep.subr.bf16.mxu0 %v19193_v59 }
 0x617   :  { %8697 = vmatprep.subr.bf16.mxu1 %v19190_v34 }
 0x618   :  { %v24325_v52 = vpop.f32.mrb[40].mxu0 }
 0x619   :  { %28552 = vst [vmem:[#allocation6_spill] sm:$0xff] %v24325_v52  ;;  %8866 = vmatpush1.bf16.msra.mxu0 %v19191_v3  ;;  %v24327_v10 = vpop.f32.mrb[32].mxu1  ;;  %v24329_v60 = vpop.f32.mrb[41].mxu0  ;;  %v10131_v27 = vmul.f32 %v24325_v52, %v24325_v52 }
 0x61a   :  { %28553 = vst [vmem:[#allocation14_spill] sm:$0xff] %v24327_v10  ;;  %28554 = vst [vmem:[#allocation7_spill] sm:$0xff] %v24329_v60  ;;  %8698 = vmatpush1.bf16.msra.mxu1 %v19188_v43  ;;  %v24336_v40 = vpop.f32.mrb[33].mxu1  ;;  %8867 = vmatprep.subr.bf16.mxu0 %v19199_v13  ;;  %v24341_v50 = vpop.f32.mrb[42].mxu0  ;;  %v10133_v39 = vmul.f32 %v24327_v10, %v24327_v10  ;;  %v10132_v57 = vmul.f32 %v24329_v60, %v24329_v60 }
 0x61b   :  { %28555 = vst [vmem:[#allocation15_spill] sm:$0xff] %v24336_v40  ;;  %28556 = vst [vmem:[#allocation8_spill] sm:$0xff] %v24341_v50  ;;  %8699 = vmatprep.subr.bf16.mxu1 %v19196_v25  ;;  %v10086_v9 = vadd.f32 %v24341_v50, %v24325_v52  ;;  %v10136_v20 = vmul.f32 %v24341_v50, %v24341_v50  ;;  %v24354_v36 = vpop.f32.mrb[34].mxu1  ;;  %v24356_v61 = vpop.f32.mrb[43].mxu0  ;;  %v10134_v43 = vmul.f32 %v24336_v40, %v24336_v40  ;;  %v19200_v52 = vld [vmem:[%s28256_s6 + $0x720] ss:$24 sps:$4 sm:$0xff]  }
 0x61c   :  { %28557 = vst [vmem:[#allocation18_spill] sm:$0xff] %v24354_v36  ;;  %28558 = vst [vmem:[#allocation9_spill] sm:$0xff] %v24356_v61  ;;  %v10104_v2 = vadd.f32 %v24354_v36, %v24327_v10  ;;  %v10138_v6 = vmul.f32 %v24354_v36, %v24354_v36  ;;  %v10095_v59 = vadd.f32 %v24356_v61, %v24329_v60  ;;  %v24369_v3 = vpop.f32.mrb[35].mxu1  ;;  %v19217_v50 = vld [vmem:[%s28256_s6 + $0x4ec] ss:$24 sps:$4 sm:$0xff]  }
 0x61d   :  { %v10137_v34 = vmul.f32 %v24356_v61, %v24356_v61  ;;  %28559 = vst [vmem:[#allocation10_spill] sm:$0xff] %v24369_v3  ;;  %v10146_v13 = vadd.f32 %v10136_v20, %v10131_v27  ;;  %8868 = vmatpush1.bf16.msra.mxu0 %v19197_v1  ;;  %v10113_v25 = vadd.f32 %v24369_v3, %v24336_v40  ;;  %v19211_v1 = vld [vmem:[%s28256_s6 + $0x4bc] ss:$24 sps:$4 sm:$0xff]  }
 0x61e   :  { %v10139_v55 = vmul.f32 %v24369_v3, %v24369_v3  ;;  %v10164_v28 = vadd.f32 %v10138_v6, %v10133_v39  ;;  %8700 = vmatpush1.bf16.msra.mxu1 %v19194_v30  ;;  %8869 = vmatprep.subr.bf16.mxu0 %v19205_v26  ;;  %v19208_v20 = vld [vmem:[%s28256_s6 + $0x754] ss:$24 sps:$4 sm:$0xff]   ;;  %v19206_v30 = vld [vmem:[%s28256_s6 + $0x750] ss:$24 sps:$4 sm:$0xff]  }
 0x61f   :  { %v10155_v54 = vadd.f32 %v10137_v34, %v10132_v57  ;;  %8701 = vmatprep.subr.bf16.mxu1 %v19202_v8  ;;  %v19209_v8 = vld [vmem:[%s28256_s6 + $0x4b8] ss:$24 sps:$4 sm:$0xff]  }
 0x620   :  { %v10173_v27 = vadd.f32 %v10139_v55, %v10134_v43  ;;  %v24389_v10 = vpop.f32.mrb[44].mxu0 }
 0x621   :  { %28560 = vst [vmem:[#allocation12_spill] sm:$0xff] %v24389_v10  ;;  %8870 = vmatpush1.bf16.msra.mxu0 %v19203_v48  ;;  %v10087_v26 = vsel %vm181_vm6, %v24389_v10, 0.0  ;;  %v10141_v39 = vmul.f32 %v24389_v10, %v24389_v10  ;;  %v24398_v57 = vpop.f32.mrb[36].mxu1  ;;  %v24400_v55 = vpop.f32.mrb[45].mxu0 }
 0x622   :  { %28561 = vst [vmem:[#allocation13_spill] sm:$0xff] %v24398_v57  ;;  %28562 = vst [vmem:[#allocation16_spill] sm:$0xff] %v24400_v55  ;;  %8702 = vmatpush1.bf16.msra.mxu1 %v19200_v52  ;;  %v24405_v6 = vadd.f32 %v10087_v26, %v10086_v9  ;;  %v10105_v48 = vsel %vm181_vm6, %v24398_v57, 0.0  ;;  %v10143_v34 = vmul.f32 %v24398_v57, %v24398_v57  ;;  %v10096_v43 = vsel %vm181_vm6, %v24400_v55, 0.0  ;;  %v24413_v60 = vpop.f32.mrb[37].mxu1  ;;  %v5198_v10 = vpop.f32.mrb[46].mxu0 }
 0x623   :  { %28563 = vst [vmem:[#allocation17_spill] sm:$0xff] %v24413_v60  ;;  %8871 = vmatprep.subr.bf16.mxu0 %v19211_v1  ;;  %v10147_v52 = vsel %vm181_vm6, %v10141_v39, 0.0  ;;  %v24419_v9 = vadd.f32 %v10105_v48, %v10104_v2  ;;  %v24421_v26 = vadd.f32 %v10096_v43, %v10095_v59  ;;  %v10142_v61 = vmul.f32 %v24400_v55, %v24400_v55  ;;  %v5453_v40 = vpop.f32.mrb[38].mxu1  ;;  %v5199_v57 = vpop.f32.mrb[47].mxu0  ;;  %v19214_v10 = vld [vmem:[%s28256_s6 + $0x784] ss:$24 sps:$4 sm:$0xff]  }
 0x624   :  { %8703 = vmatprep.subr.bf16.mxu1 %v19208_v20  ;;  %v24428_v1 = vadd.f32 %v10147_v52, %v10146_v13  ;;  %v10165_v36 = vsel %vm181_vm6, %v10143_v34, 0.0  ;;  %v10114_v2 = vsel %vm181_vm6, %v24413_v60, 0.0  ;;  %v5454_v39 = vpop.f32.mrb[39].mxu1  ;;  %v19215_v40 = vld [vmem:[%s28256_s6 + $0x4e8] ss:$24 sps:$4 sm:$0xff]   ;;  %v28567_v55 = vunpack.i.h.bf16 %v23053_v47 }
 0x625   :  { %v24433_v59 = vadd.f32 %v10165_v36, %v10164_v28  ;;  %v10156_v48 = vsel %vm181_vm6, %v10142_v61, 0.0  ;;  %8872 = vmatpush1.bf16.msra.mxu0 %v19209_v8  ;;  %v24441_v57 = vadd.f32 %v10114_v2, %v10113_v25  ;;  %v19212_v13 = vld [vmem:[%s28256_s6 + $0x780] ss:$24 sps:$4 sm:$0xff]   ;;  %v19223_v28 = vld [vmem:[%s28256_s6 + $0x51c] ss:$24 sps:$4 sm:$0xff]   ;;  %v10144_v36 = vmul.f32 %v24413_v60, %v24413_v60 }
 0x626   :  { %28564 = vst [vmem:[#allocation19_spill] sm:$0xff] %v24428_v1  ;;  %v24439_v20 = vadd.f32 %v10156_v48, %v10155_v54  ;;  %8704 = vmatpush1.bf16.msra.mxu1 %v19206_v30  ;;  %8873 = vmatprep.subr.bf16.mxu0 %v19217_v50  ;;  %v19220_v54 = vld [vmem:[%s28256_s6 + $0x7b4] ss:$24 sps:$4 sm:$0xff]   ;;  %v19221_v25 = vld [vmem:[%s28256_s6 + $0x518] ss:$24 sps:$4 sm:$0xff]  }
 0x627   :  { %28565 = vst [vmem:[#allocation21_spill] sm:$0xff] %v24433_v59  ;;  %8705 = vmatprep.subr.bf16.mxu1 %v19214_v10  ;;  %v10174_v61 = vsel %vm181_vm6, %v10144_v36, 0.0  ;;  %v19218_v30 = vld [vmem:[%s28256_s6 + $0x7b0] ss:$24 sps:$4 sm:$0xff]   ;;  %v19229_v8 = vld [vmem:[%s28256_s6 + $0x54c] ss:$24 sps:$4 sm:$0xff]  }
 0x628   :  { %v24458_v50 = vadd.f32 %v10174_v61, %v10173_v27  ;;  %v19226_v34 = vld [vmem:[%s28256_s6 + $0x7e4] ss:$24 sps:$4 sm:$0xff]   ;;  %v19227_v27 = vld [vmem:[%s28256_s6 + $0x548] ss:$24 sps:$4 sm:$0xff]   ;;  %v19232_v10 = vld [vmem:[%s28256_s6 + $0x814] ss:$24 sps:$4 sm:$0xff]  }
 0x629   :  { %8874 = vmatpush1.bf16.msra.mxu0 %v19215_v40  ;;  %v19224_v43 = vld [vmem:[%s28256_s6 + $0x7e0] ss:$24 sps:$4 sm:$0xff]   ;;  %v19235_v52 = vld [vmem:[%s28256_s6 + $0x57c] ss:$24 sps:$4 sm:$0xff]   ;;  %v19230_v39 = vld [vmem:[%s28256_s6 + $0x810] ss:$24 sps:$4 sm:$0xff]  }
 0x62a   :  { %28566 = vst [vmem:[#allocation20_spill] sm:$0xff] %v24458_v50  ;;  %8706 = vmatpush1.bf16.msra.mxu1 %v19212_v13  ;;  %8875 = vmatprep.subr.bf16.mxu0 %v19223_v28  ;;  %v19233_v2 = vld [vmem:[%s28256_s6 + $0x578] ss:$24 sps:$4 sm:$0xff]   ;;  %v19241_v48 = vld [vmem:[%s28256_s6 + $0x5ac] ss:$24 sps:$4 sm:$0xff]  }
 0x62b   :  { %8707 = vmatprep.subr.bf16.mxu1 %v19220_v54  ;;  %v19238_v40 = vld [vmem:[%s28256_s6 + $0x844] ss:$24 sps:$4 sm:$0xff]   ;;  %v19239_v13 = vld [vmem:[%s28256_s6 + $0x5a8] ss:$24 sps:$4 sm:$0xff]   ;;  %v19244_v54 = vld [vmem:[%s28256_s6 + $0x874] ss:$24 sps:$4 sm:$0xff]  }
 0x62c   :  { %v19236_v28 = vld [vmem:[%s28256_s6 + $0x840] ss:$24 sps:$4 sm:$0xff]   ;;  %v19247_v36 = vld [vmem:[%s28256_s6 + $0x5dc] ss:$24 sps:$4 sm:$0xff]  }
 0x62d   :  { %8876 = vmatpush1.bf16.msra.mxu0 %v19221_v25  ;;  %v19245_v25 = vld [vmem:[%s28256_s6 + $0x5d8] ss:$24 sps:$4 sm:$0xff]  }
 0x62e   :  { %8708 = vmatpush1.bf16.msra.mxu1 %v19218_v30  ;;  %8877 = vmatprep.subr.bf16.mxu0 %v19229_v8  ;;  %v10309_v1 = vld [vmem:[%s28258_s8 + $0x10] sm:$0xff] }
 0x62f   :  { %8709 = vmatprep.subr.bf16.mxu1 %v19226_v34  ;;  %v19242_v34 = vld [vmem:[%s28256_s6 + $0x870] ss:$24 sps:$4 sm:$0xff]  }
 0x631   :  { %8878 = vmatpush1.bf16.msra.mxu0 %v19227_v27  ;;  %v19253_v27 = vld [vmem:[%s28256_s6 + $0x60c] ss:$24 sps:$4 sm:$0xff]  }
 0x632   :  { %8710 = vmatpush1.bf16.msra.mxu1 %v19224_v43  ;;  %8879 = vmatprep.subr.bf16.mxu0 %v19235_v52 }
 0x633   :  { %8711 = vmatprep.subr.bf16.mxu1 %v19232_v10 }
 0x635   :  { %8880 = vmatpush1.bf16.msra.mxu0 %v19233_v2  ;;  %v19250_v2 = vld [vmem:[%s28256_s6 + $0x8a4] ss:$24 sps:$4 sm:$0xff]  }
 0x636   :  { %8712 = vmatpush1.bf16.msra.mxu1 %v19230_v39  ;;  %8881 = vmatprep.subr.bf16.mxu0 %v19241_v48 }
 0x637   :  { %8713 = vmatprep.subr.bf16.mxu1 %v19238_v40 }
 0x639   :  { %8882 = vmatpush1.bf16.msra.mxu0 %v19239_v13  ;;  %v16710_v61 = vpop.f32.mrb[48].mxu0 }
 0x63a   :  { %8714 = vmatpush1.bf16.msra.mxu1 %v19236_v28  ;;  %v16738_v30 = vpop.f32.mrb[40].mxu1  ;;  %v16711_v8 = vpop.f32.mrb[49].mxu0  ;;  %8883 = vmatprep.subr.bf16.mxu0 %v19247_v36  ;;  %v19251_v36 = vld [vmem:[%s28256_s6 + $0x608] ss:$24 sps:$4 sm:$0xff]  }
 0x63b   :  { %v16712_v43 = vadd.f32 %v16711_v8, %v16710_v61  ;;  %v16739_v52 = vpop.f32.mrb[41].mxu1  ;;  %8715 = vmatprep.subr.bf16.mxu1 %v19244_v54  ;;  %v16713_v10 = vpop.f32.mrb[50].mxu0  ;;  %v28568_v61 = vunpack.i.l.bf16 %v23053_v47  ;;  %v19256_v47 = vld [vmem:[%s28256_s6 + $0x8d4] ss:$24 sps:$4 sm:$0xff]  }
 0x63c   :  { %v16740_v39 = vadd.f32 %v16739_v52, %v16738_v30  ;;  %v16741_v48 = vpop.f32.mrb[42].mxu1  ;;  %v16714_v40 = vpop.f32.mrb[51].mxu0  ;;  %v19259_v30 = vld [vmem:[%s28256_s6 + $0x63c] ss:$24 sps:$4 sm:$0xff]  }
 0x63d   :  { %8884 = vmatpush1.bf16.msra.mxu0 %v19245_v25  ;;  %v16715_v13 = vadd.f32 %v16714_v40, %v16713_v10  ;;  %v16742_v28 = vpop.f32.mrb[43].mxu1  ;;  %v5727_v54 = vsel %vm825_vm9, %v28568_v61, %v28567_v55  ;;  %v19248_v25 = vld [vmem:[%s28256_s6 + $0x8a0] ss:$24 sps:$4 sm:$0xff]  }
 0x63e   :  { %v24525_v8 = vadd.f32 %v16740_v39, %v16712_v43  ;;  %8716 = vmatpush1.bf16.msra.mxu1 %v19242_v34  ;;  %v16743_v3 = vadd.f32 %v16742_v28, %v16741_v48  ;;  %8894 = vmatprep.subr.bf16.mxu0 %v19253_v27  ;;  %v5763_v55 = vrot.slane %v5727_v54, 6  ;;  %v19257_v27 = vld [vmem:[%s28256_s6 + $0x638] ss:$24 sps:$4 sm:$0xff]   ;;  %v5741_v39 = vrot.slane %v23243_v35, 5  ;;  %v19262_v28 = vld [vmem:[%s28256_s6 + $0x904] ss:$24 sps:$4 sm:$0xff]  }
 0x63f   :  { %8717 = vmatprep.subr.bf16.mxu1 %v19250_v2  ;;  %v19254_v2 = vld [vmem:[%s28256_s6 + $0x8d0] ss:$24 sps:$4 sm:$0xff]  }
 0x640   :  { %v24536_v52 = vadd.f32 %v16743_v3, %v16715_v13  ;;  %8886 = vmatmul.mubr.bf16.vlgmr.msra.gmra.mrb[72].mxu0 %v24265_v41  ;;  %v19265_v3 = vld [vmem:[%s28256_s6 + $0x66c] ss:$24 sps:$4 sm:$0xff]   ;;  %v5783_v60 = vsel %vm185_vm7, %v5741_v39, %v5763_v55  ;;  %v19271_v55 = vld [vmem:[%s28256_s6 + $0x69c] ss:$24 sps:$4 sm:$0xff]   ;;  %v19272_v39 = vld [vmem:[%s28256_s6 + $0x960] ss:$24 sps:$4 sm:$0xff]  }
 0x641   :  { %8895 = vmatpush1.bf16.msra.mxu0 %v19251_v36  ;;  %8926 = vmatprep.mubr.bf16.mxu0 %v24273_v49  ;;  %v16716_v34 = vpop.f32.mrb[52].mxu0 }
 0x642   :  { %8718 = vmatpush1.bf16.msra.mxu1 %v19248_v25  ;;  %v16744_v43 = vpop.f32.mrb[44].mxu1  ;;  %v16717_v10 = vpop.f32.mrb[53].mxu0  ;;  %8896 = vmatprep.subr.bf16.mxu0 %v19259_v30  ;;  %v19263_v30 = vld [vmem:[%s28256_s6 + $0x668] ss:$24 sps:$4 sm:$0xff]  }
 0x643   :  { %v16718_v48 = vadd.f32 %v16717_v10, %v16716_v34  ;;  %v16745_v40 = vpop.f32.mrb[45].mxu1  ;;  %8719 = vmatprep.subr.bf16.mxu1 %v19256_v47  ;;  %v16719_v13 = vpop.f32.mrb[54].mxu0  ;;  %v19260_v47 = vld [vmem:[%s28256_s6 + $0x900] ss:$24 sps:$4 sm:$0xff]   ;;  %v24564_v34 = vpack.c.bf16 %v23057_v42, %v23057_v42  ;;  %v19266_v42 = vld [vmem:[%s28256_s6 + $0x930] ss:$24 sps:$4 sm:$0xff]  }
 0x644   :  { %v16746_v36 = vadd.f32 %v16745_v40, %v16744_v43  ;;  %v16747_v61 = vpop.f32.mrb[46].mxu1  ;;  %v16720_v54 = vpop.f32.mrb[55].mxu0  ;;  %v24572_v43 = vpack.c.bf16 %v5783_v60, %v5783_v60  ;;  %v19269_v10 = vld [vmem:[%s28256_s6 + $0x698] ss:$24 sps:$4 sm:$0xff]   ;;  %v19274_v60 = vld [vmem:[%s28256_s6 + $0x964] ss:$24 sps:$4 sm:$0xff]  }
 0x645   :  { %8897 = vmatpush1.bf16.msra.mxu0 %v19257_v27  ;;  %v16748_v25 = vpop.f32.mrb[47].mxu1  ;;  %v19268_v27 = vld [vmem:[%s28256_s6 + $0x934] ss:$24 sps:$4 sm:$0xff]   ;;  %v19281_v13 = vld [vmem:[%s28256_s6 + $0x6f8] ss:$24 sps:$4 sm:$0xff]  }
 0x646   :  { %v24557_v35 = vadd.f32 %v16746_v36, %v16718_v48  ;;  %8720 = vmatpush1.bf16.msra.mxu1 %v19254_v2  ;;  %8898 = vmatprep.subr.bf16.mxu0 %v19265_v3  ;;  %v19277_v2 = vld [vmem:[%s28256_s6 + $0x6cc] ss:$24 sps:$4 sm:$0xff]   ;;  %v19275_v3 = vld [vmem:[%s28256_s6 + $0x6c8] ss:$24 sps:$4 sm:$0xff]   ;;  %v19283_v48 = vld [vmem:[%s28256_s6 + $0x6fc] ss:$24 sps:$4 sm:$0xff]  }
 0x647   :  { %8730 = vmatprep.subr.bf16.mxu1 %v19262_v28  ;;  %v19280_v40 = vld [vmem:[%s28256_s6 + $0x994] ss:$24 sps:$4 sm:$0xff]   ;;  %v19278_v28 = vld [vmem:[%s28256_s6 + $0x990] ss:$24 sps:$4 sm:$0xff]   ;;  %v19286_v61 = vld [vmem:[%s28256_s6 + $0x9c4] ss:$24 sps:$4 sm:$0xff]  }
 0x648   :  { %v19289_v36 = vld [vmem:[%s28256_s6 + $0x72c] ss:$24 sps:$4 sm:$0xff]   ;;  %v19287_v54 = vld [vmem:[%s28256_s6 + $0x728] ss:$24 sps:$4 sm:$0xff]  }
 0x649   :  { %8722 = vmatmul.mubr.bf16.vlgmr.msra.gmra.mrb[56].mxu1 %v24564_v34  ;;  %8899 = vmatpush1.bf16.msra.mxu0 %v19263_v30  ;;  %v19284_v25 = vld [vmem:[%s28256_s6 + $0x9c0] ss:$24 sps:$4 sm:$0xff]   ;;  %v19295_v30 = vld [vmem:[%s28256_s6 + $0x75c] ss:$24 sps:$4 sm:$0xff]  }
 0x64a   :  { %8731 = vmatpush1.bf16.msra.mxu1 %v19260_v47  ;;  %8762 = vmatprep.mubr.bf16.mxu1 %v24572_v43  ;;  %v19292_v47 = vld [vmem:[%s28256_s6 + $0x9f4] ss:$24 sps:$4 sm:$0xff]  }
 0x64b   :  { %8732 = vmatprep.subr.bf16.mxu1 %v19268_v27  ;;  %8900 = vmatprep.subr.bf16.mxu0 %v19271_v55  ;;  %v19293_v27 = vld [vmem:[%s28256_s6 + $0x758] ss:$24 sps:$4 sm:$0xff]  }
 0x64d   :  { %8901 = vmatpush1.bf16.msra.mxu0 %v19269_v10  ;;  %v19290_v10 = vld [vmem:[%s28256_s6 + $0x9f0] ss:$24 sps:$4 sm:$0xff]  }
 0x64e   :  { %8733 = vmatpush1.bf16.msra.mxu1 %v19266_v42  ;;  %8902 = vmatprep.subr.bf16.mxu0 %v19277_v2  ;;  %v19301_v42 = vld [vmem:[%s28256_s6 + $0x78c] ss:$24 sps:$4 sm:$0xff]  }
 0x64f   :  { %8734 = vmatprep.subr.bf16.mxu1 %v19274_v60 }
 0x651   :  { %8903 = vmatpush1.bf16.msra.mxu0 %v19275_v3  ;;  %v19298_v3 = vld [vmem:[%s28256_s6 + $0xa24] ss:$24 sps:$4 sm:$0xff]  }
 0x652   :  { %8735 = vmatpush1.bf16.msra.mxu1 %v19272_v39  ;;  %8904 = vmatprep.subr.bf16.mxu0 %v19283_v48 }
 0x653   :  { %8736 = vmatprep.subr.bf16.mxu1 %v19280_v40 }
 0x655   :  { %8905 = vmatpush1.bf16.msra.mxu0 %v19281_v13 }
 0x656   :  { %8737 = vmatpush1.bf16.msra.mxu1 %v19278_v28  ;;  %8906 = vmatprep.subr.bf16.mxu0 %v19289_v36 }
 0x657   :  { %8738 = vmatprep.subr.bf16.mxu1 %v19286_v61  ;;  %v19299_v61 = vld [vmem:[%s28256_s6 + $0x788] ss:$24 sps:$4 sm:$0xff]  }
 0x659   :  { %8907 = vmatpush1.bf16.msra.mxu0 %v19287_v54 }
 0x65a   :  { %8739 = vmatpush1.bf16.msra.mxu1 %v19284_v25  ;;  %v16766_v55 = vpop.f32.mrb[56].mxu0  ;;  %8908 = vmatprep.subr.bf16.mxu0 %v19295_v30 }
 0x65b   :  { %v16794_v2 = vpop.f32.mrb[48].mxu1  ;;  %v16767_v60 = vpop.f32.mrb[57].mxu0  ;;  %8740 = vmatprep.subr.bf16.mxu1 %v19292_v47  ;;  %v19296_v47 = vld [vmem:[%s28256_s6 + $0xa20] ss:$24 sps:$4 sm:$0xff]  }
 0x65c   :  { %v16768_v39 = vadd.f32 %v16767_v60, %v16766_v55  ;;  %v16795_v48 = vpop.f32.mrb[49].mxu1  ;;  %v16769_v40 = vpop.f32.mrb[58].mxu0  ;;  %v19307_v55 = vld [vmem:[%s28256_s6 + $0x7bc] ss:$24 sps:$4 sm:$0xff]   ;;  %v19305_v60 = vld [vmem:[%s28256_s6 + $0x7b8] ss:$24 sps:$4 sm:$0xff]  }
 0x65d   :  { %v16796_v13 = vadd.f32 %v16795_v48, %v16794_v2  ;;  %v16797_v28 = vpop.f32.mrb[50].mxu1  ;;  %8909 = vmatpush1.bf16.msra.mxu0 %v19293_v27  ;;  %v16770_v36 = vpop.f32.mrb[59].mxu0  ;;  %v19304_v2 = vld [vmem:[%s28256_s6 + $0xa54] ss:$24 sps:$4 sm:$0xff]  }
 0x65e   :  { %v5587_v54 = vadd.f32 %v16768_v39, %v24525_v8  ;;  %8741 = vmatpush1.bf16.msra.mxu1 %v19290_v10  ;;  %v16771_v25 = vadd.f32 %v16770_v36, %v16769_v40  ;;  %v16798_v30 = vpop.f32.mrb[51].mxu1  ;;  %8910 = vmatprep.subr.bf16.mxu0 %v19301_v42  ;;  %v19302_v39 = vld [vmem:[%s28256_s6 + $0xa50] ss:$24 sps:$4 sm:$0xff]  }
 0x65f   :  { %v16799_v27 = vadd.f32 %v16798_v30, %v16797_v28  ;;  %8742 = vmatprep.subr.bf16.mxu1 %v19298_v3  ;;  %v19313_v3 = vld [vmem:[%s28256_s6 + $0x7ec] ss:$24 sps:$4 sm:$0xff]  }
 0x660   :  { %v5590_v8 = vadd.f32 %v16771_v25, %v24536_v52  ;;  %v24650_v10 = vadd.f32 %v16796_v13, %v5587_v54  ;;  %v19310_v13 = vld [vmem:[%s28256_s6 + $0xa84] ss:$24 sps:$4 sm:$0xff]  }
 0x661   :  { %8911 = vmatpush1.bf16.msra.mxu0 %v19299_v61 }
 0x662   :  { %8743 = vmatpush1.bf16.msra.mxu1 %v19296_v47  ;;  %v16772_v42 = vpop.f32.mrb[60].mxu0  ;;  %8912 = vmatprep.subr.bf16.mxu0 %v19307_v55  ;;  %v24661_v48 = vadd.f32 %v16799_v27, %v5590_v8  ;;  %v19311_v47 = vld [vmem:[%s28256_s6 + $0x7e8] ss:$24 sps:$4 sm:$0xff]   ;;  %v19319_v8 = vld [vmem:[%s28256_s6 + $0x81c] ss:$24 sps:$4 sm:$0xff]  }
 0x663   :  { %v16800_v52 = vpop.f32.mrb[52].mxu1  ;;  %v16773_v40 = vpop.f32.mrb[61].mxu0  ;;  %8744 = vmatprep.subr.bf16.mxu1 %v19304_v2  ;;  %v19308_v2 = vld [vmem:[%s28256_s6 + $0xa80] ss:$24 sps:$4 sm:$0xff]  }
 0x664   :  { %v16774_v28 = vadd.f32 %v16773_v40, %v16772_v42  ;;  %v16801_v36 = vpop.f32.mrb[53].mxu1  ;;  %v16775_v61 = vpop.f32.mrb[62].mxu0  ;;  %v19323_v40 = vld [vmem:[%s28256_s6 + $0x848] ss:$24 sps:$4 sm:$0xff]  }
 0x665   :  { %v16802_v54 = vadd.f32 %v16801_v36, %v16800_v52  ;;  %v16803_v25 = vpop.f32.mrb[54].mxu1  ;;  %8913 = vmatpush1.bf16.msra.mxu0 %v19305_v60  ;;  %v16776_v30 = vpop.f32.mrb[63].mxu0  ;;  %v19316_v60 = vld [vmem:[%s28256_s6 + $0xab4] ss:$24 sps:$4 sm:$0xff]   ;;  %v19322_v52 = vld [vmem:[%s28256_s6 + $0xae4] ss:$24 sps:$4 sm:$0xff]  }
 0x666   :  { %v5595_v55 = vadd.f32 %v16774_v28, %v24557_v35  ;;  %8745 = vmatpush1.bf16.msra.mxu1 %v19302_v39  ;;  %v16804_v27 = vpop.f32.mrb[55].mxu1  ;;  %8914 = vmatprep.subr.bf16.mxu0 %v19313_v3  ;;  %v19317_v35 = vld [vmem:[%s28256_s6 + $0x818] ss:$24 sps:$4 sm:$0xff]   ;;  %v19325_v3 = vld [vmem:[%s28256_s6 + $0x84c] ss:$24 sps:$4 sm:$0xff]  }
 0x667   :  { %8746 = vmatprep.subr.bf16.mxu1 %v19310_v13  ;;  %v19314_v39 = vld [vmem:[%s28256_s6 + $0xab0] ss:$24 sps:$4 sm:$0xff]   ;;  %v19320_v13 = vld [vmem:[%s28256_s6 + $0xae0] ss:$24 sps:$4 sm:$0xff]   ;;  %v19331_v28 = vld [vmem:[%s28256_s6 + $0x87c] ss:$24 sps:$4 sm:$0xff]  }
 0x668   :  { %v24679_v42 = vadd.f32 %v16802_v54, %v5595_v55  ;;  %v19328_v36 = vld [vmem:[%s28256_s6 + $0xb14] ss:$24 sps:$4 sm:$0xff]   ;;  %v19329_v61 = vld [vmem:[%s28256_s6 + $0x878] ss:$24 sps:$4 sm:$0xff]   ;;  %v19334_v30 = vld [vmem:[%s28256_s6 + $0xb44] ss:$24 sps:$4 sm:$0xff]  }
 0x669   :  { %8915 = vmatpush1.bf16.msra.mxu0 %v19311_v47  ;;  %v19326_v54 = vld [vmem:[%s28256_s6 + $0xb10] ss:$24 sps:$4 sm:$0xff]   ;;  %v19337_v25 = vld [vmem:[%s28256_s6 + $0x8ac] ss:$24 sps:$4 sm:$0xff]   ;;  %v19332_v55 = vld [vmem:[%s28256_s6 + $0xb40] ss:$24 sps:$4 sm:$0xff]  }
 0x66a   :  { %8747 = vmatpush1.bf16.msra.mxu1 %v19308_v2  ;;  %8916 = vmatprep.subr.bf16.mxu0 %v19319_v8  ;;  %v19335_v47 = vld [vmem:[%s28256_s6 + $0x8a8] ss:$24 sps:$4 sm:$0xff]   ;;  %v19343_v27 = vld [vmem:[%s28256_s6 + $0x8dc] ss:$24 sps:$4 sm:$0xff]   ;;  %v19341_v8 = vld [vmem:[%s28256_s6 + $0x8d8] ss:$24 sps:$4 sm:$0xff]  }
 0x66b   :  { %8748 = vmatprep.subr.bf16.mxu1 %v19316_v60  ;;  %v19340_v2 = vld [vmem:[%s28256_s6 + $0xb74] ss:$24 sps:$4 sm:$0xff]   ;;  %v18370_v60 = vunpack.i.h.bf16 %v23080_v11 }
 0x66d   :  { %8917 = vmatpush1.bf16.msra.mxu0 %v19317_v35  ;;  %v19338_v35 = vld [vmem:[%s28256_s6 + $0xb70] ss:$24 sps:$4 sm:$0xff]  }
 0x66e   :  { %8749 = vmatpush1.bf16.msra.mxu1 %v19314_v39  ;;  %8918 = vmatprep.subr.bf16.mxu0 %v19325_v3  ;;  %v19349_v39 = vld [vmem:[%s28256_s6 + $0x90c] ss:$24 sps:$4 sm:$0xff]  }
 0x66f   :  { %8750 = vmatprep.subr.bf16.mxu1 %v19322_v52  ;;  %v19346_v3 = vld [vmem:[%s28256_s6 + $0xba4] ss:$24 sps:$4 sm:$0xff]   ;;  %v19347_v52 = vld [vmem:[%s28256_s6 + $0x908] ss:$24 sps:$4 sm:$0xff]  }
 0x671   :  { %8919 = vmatpush1.bf16.msra.mxu0 %v19323_v40  ;;  %v28569_v40 = vunpack.i.l.bf16 %v23080_v11 }
 0x672   :  { %8751 = vmatpush1.bf16.msra.mxu1 %v19320_v13  ;;  %8920 = vmatprep.subr.bf16.mxu0 %v19331_v28  ;;  %v19344_v28 = vld [vmem:[%s28256_s6 + $0xba0] ss:$24 sps:$4 sm:$0xff]  }
 0x673   :  { %8752 = vmatprep.subr.bf16.mxu1 %v19328_v36  ;;  %v5729_v13 = vsel %vm825_vm9, %v28569_v40, %v18370_v60  ;;  %v19355_v36 = vld [vmem:[%s28256_s6 + $0x93c] ss:$24 sps:$4 sm:$0xff]  }
 0x674   :  { %v5765_v11 = vrot.slane %v5729_v13, 6  ;;  %v19364_v60 = vld [vmem:[%s28256_s6 + $0xc34] ss:$24 sps:$4 sm:$0xff]   ;;  %v19370_v40 = vld [vmem:[%s28256_s6 + $0xc64] ss:$24 sps:$4 sm:$0xff]  }
 0x675   :  { %8921 = vmatpush1.bf16.msra.mxu0 %v19329_v61  ;;  %v19352_v61 = vld [vmem:[%s28256_s6 + $0xbd4] ss:$24 sps:$4 sm:$0xff]   ;;  %v19371_v13 = vld [vmem:[%s28256_s6 + $0x9c8] ss:$24 sps:$4 sm:$0xff]  }
 0x676   :  { %8753 = vmatpush1.bf16.msra.mxu1 %v19326_v54  ;;  %8922 = vmatprep.subr.bf16.mxu0 %v19337_v25  ;;  %v19353_v54 = vld [vmem:[%s28256_s6 + $0x938] ss:$24 sps:$4 sm:$0xff]  }
 0x677   :  { %8754 = vmatprep.subr.bf16.mxu1 %v19334_v30  ;;  %v19350_v25 = vld [vmem:[%s28256_s6 + $0xbd0] ss:$24 sps:$4 sm:$0xff]   ;;  %v19361_v30 = vld [vmem:[%s28256_s6 + $0x96c] ss:$24 sps:$4 sm:$0xff]  }
 0x679   :  { %8923 = vmatpush1.bf16.msra.mxu0 %v19335_v47  ;;  %v5743_v47 = vrot.slane %v23472_v17, 5  ;;  %v24781_v17 = vpack.c.bf16 %v23091_v0, %v23091_v0  ;;  %v19362_v0 = vld [vmem:[%s28256_s6 + $0xc30] ss:$24 sps:$4 sm:$0xff]  }
 0x67a   :  { %8755 = vmatpush1.bf16.msra.mxu1 %v19332_v55  ;;  %8924 = vmatprep.subr.bf16.mxu0 %v19343_v27  ;;  %v19358_v55 = vld [vmem:[%s28256_s6 + $0xc04] ss:$24 sps:$4 sm:$0xff]   ;;  %v19359_v27 = vld [vmem:[%s28256_s6 + $0x968] ss:$24 sps:$4 sm:$0xff]  }
 0x67b   :  { %8756 = vmatprep.subr.bf16.mxu1 %v19340_v2  ;;  %v5785_v2 = vsel %vm185_vm7, %v5743_v47, %v5765_v11  ;;  %v19377_v11 = vld [vmem:[%s28256_s6 + $0x9f8] ss:$24 sps:$4 sm:$0xff]   ;;  %v19382_v47 = vld [vmem:[%s28256_s6 + $0xcc4] ss:$24 sps:$4 sm:$0xff]  }
 0x67d   :  { %8925 = vmatpush1.bf16.msra.mxu0 %v19341_v8  ;;  %v19356_v8 = vld [vmem:[%s28256_s6 + $0xc00] ss:$24 sps:$4 sm:$0xff]  }
 0x67e   :  { %8757 = vmatpush1.bf16.msra.mxu1 %v19338_v35  ;;  %8935 = vmatprep.subr.bf16.mxu0 %v19349_v39  ;;  %v19367_v35 = vld [vmem:[%s28256_s6 + $0x99c] ss:$24 sps:$4 sm:$0xff]   ;;  %v24789_v39 = vpack.c.bf16 %v5785_v2, %v5785_v2 }
 0x67f   :  { %8758 = vmatprep.subr.bf16.mxu1 %v19346_v3  ;;  %v19365_v3 = vld [vmem:[%s28256_s6 + $0x998] ss:$24 sps:$4 sm:$0xff]  }
 0x680   :  { %8927 = vmatmul.mubr.bf16.vlgmr.msra.gmra.mrb[72].mxu0 %v24564_v34 }
 0x681   :  { %8936 = vmatpush1.bf16.msra.mxu0 %v19347_v52  ;;  %8967 = vmatprep.mubr.bf16.mxu0 %v24572_v43  ;;  %v19373_v52 = vld [vmem:[%s28256_s6 + $0x9cc] ss:$24 sps:$4 sm:$0xff]  }
 0x682   :  { %8759 = vmatpush1.bf16.msra.mxu1 %v19344_v28  ;;  %8937 = vmatprep.subr.bf16.mxu0 %v19355_v36  ;;  %v19368_v28 = vld [vmem:[%s28256_s6 + $0xc60] ss:$24 sps:$4 sm:$0xff]   ;;  %v19379_v36 = vld [vmem:[%s28256_s6 + $0x9fc] ss:$24 sps:$4 sm:$0xff]  }
 0x683   :  { %8760 = vmatprep.subr.bf16.mxu1 %v19352_v61  ;;  %v19376_v61 = vld [vmem:[%s28256_s6 + $0xc94] ss:$24 sps:$4 sm:$0xff]  }
 0x685   :  { %8938 = vmatpush1.bf16.msra.mxu0 %v19353_v54  ;;  %v19374_v54 = vld [vmem:[%s28256_s6 + $0xc90] ss:$24 sps:$4 sm:$0xff]  }
 0x686   :  { %8761 = vmatpush1.bf16.msra.mxu1 %v19350_v25  ;;  %8939 = vmatprep.subr.bf16.mxu0 %v19361_v30  ;;  %v19385_v25 = vld [vmem:[%s28256_s6 + $0xa2c] ss:$24 sps:$4 sm:$0xff]  }
 0x687   :  { %8771 = vmatprep.subr.bf16.mxu1 %v19358_v55 }
 0x689   :  { %8763 = vmatmul.mubr.bf16.vlgmr.msra.gmra.mrb[56].mxu1 %v24781_v17  ;;  %8940 = vmatpush1.bf16.msra.mxu0 %v19359_v27 }
 0x68a   :  { %8772 = vmatpush1.bf16.msra.mxu1 %v19356_v8  ;;  %15931 = vmatprep.mubr.msk.bf16.mxu1 %vm1690_vm13, %v24789_v39  ;;  %v19383_v8 = vld [vmem:[%s28256_s6 + $0xa28] ss:$24 sps:$4 sm:$0xff]  }
 0x68b   :  { %8773 = vmatprep.subr.bf16.mxu1 %v19364_v60  ;;  %8941 = vmatprep.subr.bf16.mxu0 %v19367_v35 }
 0x68d   :  { %8942 = vmatpush1.bf16.msra.mxu0 %v19365_v3  ;;  %v19380_v3 = vld [vmem:[%s28256_s6 + $0xcc0] ss:$24 sps:$4 sm:$0xff]  }
 0x68e   :  { %8774 = vmatpush1.bf16.msra.mxu1 %v19362_v0  ;;  %8943 = vmatprep.subr.bf16.mxu0 %v19373_v52  ;;  %v19388_v0 = vld [vmem:[%s28256_s6 + $0xcf4] ss:$24 sps:$4 sm:$0xff]   ;;  %v19386_v52 = vld [vmem:[%s28256_s6 + $0xcf0] ss:$24 sps:$4 sm:$0xff]  }
 0x68f   :  { %8775 = vmatprep.subr.bf16.mxu1 %v19370_v40  ;;  %v19397_v40 = vld [vmem:[%s28256_s6 + $0xa8c] ss:$24 sps:$4 sm:$0xff]  }
 0x691   :  { %8944 = vmatpush1.bf16.msra.mxu0 %v19371_v13 }
 0x692   :  { %8776 = vmatpush1.bf16.msra.mxu1 %v19368_v28  ;;  %8945 = vmatprep.subr.bf16.mxu0 %v19379_v36  ;;  %v19394_v28 = vld [vmem:[%s28256_s6 + $0xd24] ss:$24 sps:$4 sm:$0xff]  }
 0x693   :  { %v5682_v30 = vpop.f32.mrb[64].mxu0  ;;  %8777 = vmatprep.subr.bf16.mxu1 %v19376_v61 }
 0x694   :  { %v24831_v55 = vadd.f32 %v5682_v30, %v24650_v10  ;;  %v5684_v27 = vpop.f32.mrb[65].mxu0  ;;  %v19391_v10 = vld [vmem:[%s28256_s6 + $0xa5c] ss:$24 sps:$4 sm:$0xff]   ;;  %v19392_v30 = vld [vmem:[%s28256_s6 + $0xd20] ss:$24 sps:$4 sm:$0xff]  }
 0x695   :  { %v5685_v2 = vpop.f32.mrb[66].mxu0  ;;  %8946 = vmatpush1.bf16.msra.mxu0 %v19377_v11  ;;  %v19401_v27 = vld [vmem:[%s28256_s6 + $0xab8] ss:$24 sps:$4 sm:$0xff]  }
 0x696   :  { %v24837_v60 = vadd.f32 %v5685_v2, %v24661_v48  ;;  %8778 = vmatpush1.bf16.msra.mxu1 %v19374_v54  ;;  %v5687_v35 = vpop.f32.mrb[67].mxu0  ;;  %8947 = vmatprep.subr.bf16.mxu0 %v19385_v25  ;;  %v19389_v48 = vld [vmem:[%s28256_s6 + $0xa58] ss:$24 sps:$4 sm:$0xff]   ;;  %v19395_v54 = vld [vmem:[%s28256_s6 + $0xa88] ss:$24 sps:$4 sm:$0xff]  }
 0x697   :  { %8779 = vmatprep.subr.bf16.mxu1 %v19382_v47  ;;  %v19403_v47 = vld [vmem:[%s28256_s6 + $0xabc] ss:$24 sps:$4 sm:$0xff]   ;;  %v19398_v2 = vld [vmem:[%s28256_s6 + $0xd50] ss:$24 sps:$4 sm:$0xff]  }
 0x698   :  { %v19406_v35 = vld [vmem:[%s28256_s6 + $0xd84] ss:$24 sps:$4 sm:$0xff]  }
 0x699   :  { %8948 = vmatpush1.bf16.msra.mxu0 %v19383_v8  ;;  %v19409_v8 = vld [vmem:[%s28256_s6 + $0xaec] ss:$24 sps:$4 sm:$0xff]  }
 0x69a   :  { %8780 = vmatpush1.bf16.msra.mxu1 %v19380_v3  ;;  %8949 = vmatprep.subr.bf16.mxu0 %v19391_v10  ;;  %v19407_v3 = vld [vmem:[%s28256_s6 + $0xae8] ss:$24 sps:$4 sm:$0xff]  }
 0x69b   :  { %v5690_v13 = vpop.f32.mrb[68].mxu0  ;;  %8781 = vmatprep.subr.bf16.mxu1 %v19388_v0  ;;  %v19404_v10 = vld [vmem:[%s28256_s6 + $0xd80] ss:$24 sps:$4 sm:$0xff]   ;;  %v19415_v0 = vld [vmem:[%s28256_s6 + $0xb1c] ss:$24 sps:$4 sm:$0xff]  }
 0x69c   :  { %v24861_v36 = vadd.f32 %v5690_v13, %v24679_v42  ;;  %v5692_v61 = vpop.f32.mrb[69].mxu0  ;;  %v19400_v42 = vld [vmem:[%s28256_s6 + $0xd54] ss:$24 sps:$4 sm:$0xff]  }
 0x69d   :  { %v5693_v11 = vpop.f32.mrb[70].mxu0  ;;  %8950 = vmatpush1.bf16.msra.mxu0 %v19389_v48  ;;  %v19412_v48 = vld [vmem:[%s28256_s6 + $0xdb4] ss:$24 sps:$4 sm:$0xff]   ;;  %v19419_v61 = vld [vmem:[%s28256_s6 + $0xb48] ss:$24 sps:$4 sm:$0xff]  }
 0x69e   :  { %8782 = vmatpush1.bf16.msra.mxu1 %v19386_v52  ;;  %v5694_v25 = vpop.f32.mrb[71].mxu0  ;;  %8951 = vmatprep.subr.bf16.mxu0 %v19397_v40  ;;  %v19413_v52 = vld [vmem:[%s28256_s6 + $0xb18] ss:$24 sps:$4 sm:$0xff]   ;;  %v19421_v13 = vld [vmem:[%s28256_s6 + $0xb4c] ss:$24 sps:$4 sm:$0xff]  }
 0x69f   :  { %8783 = vmatprep.subr.bf16.mxu1 %v19394_v28  ;;  %v19410_v40 = vld [vmem:[%s28256_s6 + $0xdb0] ss:$24 sps:$4 sm:$0xff]   ;;  %v19418_v28 = vld [vmem:[%s28256_s6 + $0xde4] ss:$24 sps:$4 sm:$0xff]   ;;  %v19416_v11 = vld [vmem:[%s28256_s6 + $0xde0] ss:$24 sps:$4 sm:$0xff]  }
 0x6a0   :  { %v19424_v25 = vld [vmem:[%s28256_s6 + $0xe14] ss:$24 sps:$4 sm:$0xff]  }
 0x6a1   :  { %8952 = vmatpush1.bf16.msra.mxu0 %v19395_v54  ;;  %v19427_v54 = vld [vmem:[%s28256_s6 + $0xb7c] ss:$24 sps:$4 sm:$0xff]  }
 0x6a2   :  { %8784 = vmatpush1.bf16.msra.mxu1 %v19392_v30  ;;  %8953 = vmatprep.subr.bf16.mxu0 %v19403_v47  ;;  %v19425_v30 = vld [vmem:[%s28256_s6 + $0xb78] ss:$24 sps:$4 sm:$0xff]  }
 0x6a3   :  { %8785 = vmatprep.subr.bf16.mxu1 %v19400_v42  ;;  %v19422_v47 = vld [vmem:[%s28256_s6 + $0xe10] ss:$24 sps:$4 sm:$0xff]   ;;  %v19433_v42 = vld [vmem:[%s28256_s6 + $0xbac] ss:$24 sps:$4 sm:$0xff]  }
 0x6a5   :  { %8954 = vmatpush1.bf16.msra.mxu0 %v19401_v27  ;;  %v19430_v27 = vld [vmem:[%s28256_s6 + $0xe44] ss:$24 sps:$4 sm:$0xff]  }
 0x6a6   :  { %8786 = vmatpush1.bf16.msra.mxu1 %v19398_v2  ;;  %8955 = vmatprep.subr.bf16.mxu0 %v19409_v8  ;;  %v19431_v2 = vld [vmem:[%s28256_s6 + $0xba8] ss:$24 sps:$4 sm:$0xff]  }
 0x6a7   :  { %8787 = vmatprep.subr.bf16.mxu1 %v19406_v35  ;;  %v19428_v8 = vld [vmem:[%s28256_s6 + $0xe40] ss:$24 sps:$4 sm:$0xff]   ;;  %v19439_v35 = vld [vmem:[%s28256_s6 + $0xbdc] ss:$24 sps:$4 sm:$0xff]  }
 0x6a9   :  { %8956 = vmatpush1.bf16.msra.mxu0 %v19407_v3  ;;  %v19436_v3 = vld [vmem:[%s28256_s6 + $0xe74] ss:$24 sps:$4 sm:$0xff]  }
 0x6aa   :  { %8788 = vmatpush1.bf16.msra.mxu1 %v19404_v10  ;;  %8957 = vmatprep.subr.bf16.mxu0 %v19415_v0  ;;  %v19437_v10 = vld [vmem:[%s28256_s6 + $0xbd8] ss:$24 sps:$4 sm:$0xff]  }
 0x6ab   :  { %8789 = vmatprep.subr.bf16.mxu1 %v19412_v48  ;;  %v19434_v0 = vld [vmem:[%s28256_s6 + $0xe70] ss:$24 sps:$4 sm:$0xff]   ;;  %v19442_v48 = vld [vmem:[%s28256_s6 + $0xc0c] ss:$24 sps:$4 sm:$0xff]  }
 0x6ad   :  { %8958 = vmatpush1.bf16.msra.mxu0 %v19413_v52  ;;  %v19445_v52 = vld [vmem:[%s28256_s6 + $0x14] ss:$24 sps:$4 sm:$0xff]  }
 0x6ae   :  { %8790 = vmatpush1.bf16.msra.mxu1 %v19410_v40  ;;  %8959 = vmatprep.subr.bf16.mxu0 %v19421_v13  ;;  %v19440_v40 = vld [vmem:[%s28256_s6 + $0xc08] ss:$24 sps:$4 sm:$0xff]  }
 0x6af   :  { %8791 = vmatprep.subr.bf16.mxu1 %v19418_v28  ;;  %v19443_v13 = vld [vmem:[%s28256_s6 + $0x10] ss:$24 sps:$4 sm:$0xff]   ;;  %v24967_v28 = vpack.c.bf16 %v23112_v14, %v23112_v14  ;;  %v19449_v14 = vld [vmem:[%s28256_s6 + $0x40] ss:$24 sps:$4 sm:$0xff]  }
 0x6b1   :  { %8960 = vmatpush1.bf16.msra.mxu0 %v19419_v61  ;;  %v19448_v61 = vld [vmem:[%s28256_s6 + $0xc3c] ss:$24 sps:$4 sm:$0xff]  }
 0x6b2   :  { %8792 = vmatpush1.bf16.msra.mxu1 %v19416_v11  ;;  %8961 = vmatprep.subr.bf16.mxu0 %v19427_v54  ;;  %v19451_v11 = vld [vmem:[%s28256_s6 + $0x44] ss:$24 sps:$4 sm:$0xff]   ;;  %v19446_v54 = vld [vmem:[%s28256_s6 + $0xc38] ss:$24 sps:$4 sm:$0xff]  }
 0x6b3   :  { %8793 = vmatprep.subr.bf16.mxu1 %v19424_v25  ;;  %v19454_v25 = vld [vmem:[%s28256_s6 + $0xc6c] ss:$24 sps:$4 sm:$0xff]  }
 0x6b5   :  { %8962 = vmatpush1.bf16.msra.mxu0 %v19425_v30  ;;  %v19457_v30 = vld [vmem:[%s28256_s6 + $0x74] ss:$24 sps:$4 sm:$0xff]  }
 0x6b6   :  { %8794 = vmatpush1.bf16.msra.mxu1 %v19422_v47  ;;  %8963 = vmatprep.subr.bf16.mxu0 %v19433_v42  ;;  %v19452_v47 = vld [vmem:[%s28256_s6 + $0xc68] ss:$24 sps:$4 sm:$0xff]  }
 0x6b7   :  { %8795 = vmatprep.subr.bf16.mxu1 %v19430_v27  ;;  %v19455_v42 = vld [vmem:[%s28256_s6 + $0x70] ss:$24 sps:$4 sm:$0xff]   ;;  %v19463_v27 = vld [vmem:[%s28256_s6 + $0xa4] ss:$24 sps:$4 sm:$0xff]  }
 0x6b9   :  { %8964 = vmatpush1.bf16.msra.mxu0 %v19431_v2  ;;  %v19458_v2 = vld [vmem:[%s28256_s6 + $0xc98] ss:$24 sps:$4 sm:$0xff]  }
 0x6ba   :  { %8796 = vmatpush1.bf16.msra.mxu1 %v19428_v8  ;;  %8965 = vmatprep.subr.bf16.mxu0 %v19439_v35  ;;  %v19461_v8 = vld [vmem:[%s28256_s6 + $0xa0] ss:$24 sps:$4 sm:$0xff]   ;;  %v19466_v35 = vld [vmem:[%s28256_s6 + $0xccc] ss:$24 sps:$4 sm:$0xff]  }
 0x6bb   :  { %8797 = vmatprep.subr.bf16.mxu1 %v19436_v3  ;;  %v19469_v3 = vld [vmem:[%s28256_s6 + $0xd4] ss:$24 sps:$4 sm:$0xff]  }
 0x6bd   :  { %8966 = vmatpush1.bf16.msra.mxu0 %v19437_v10  ;;  %v19464_v10 = vld [vmem:[%s28256_s6 + $0xcc8] ss:$24 sps:$4 sm:$0xff]  }
 0x6be   :  { %8798 = vmatpush1.bf16.msra.mxu1 %v19434_v0  ;;  %8976 = vmatprep.subr.bf16.mxu0 %v19442_v48  ;;  %v19467_v0 = vld [vmem:[%s28256_s6 + $0xd0] ss:$24 sps:$4 sm:$0xff]   ;;  %v19472_v48 = vld [vmem:[%s28256_s6 + $0xcfc] ss:$24 sps:$4 sm:$0xff]  }
 0x6bf   :  { %9017 = vmatprep.subr.bf16.mxu1 %v19445_v52  ;;  %v19475_v52 = vld [vmem:[%s28256_s6 + $0x104] ss:$24 sps:$4 sm:$0xff]  }
 0x6c0   :  { %8968 = vmatmul.mubr.bf16.vlgmr.msra.gmra.mrb[72].mxu0 %v24781_v17 }
 0x6c1   :  { %8804 = vmatmul.mubr.bf16.vlgmr.msra.gmra.mrb[56].mxu1 %v24967_v28  ;;  %8977 = vmatpush1.bf16.msra.mxu0 %v19440_v40  ;;  %v19470_v40 = vld [vmem:[%s28256_s6 + $0xcf8] ss:$24 sps:$4 sm:$0xff]  }
 0x6c2   :  { %15932 = vmatprep.mubr.msk.bf16.mxu0 %vm1690_vm13, %v24789_v39  ;;  %9018 = vmatpush1.bf16.msra.mxu1 %v19443_v13  ;;  %v19473_v13 = vld [vmem:[%s28256_s6 + $0x100] ss:$24 sps:$4 sm:$0xff]  }
 0x6c3   :  { %9049 = vmatprep.mubr.bf16.mxu1 %v23892_v53  ;;  %8978 = vmatprep.subr.bf16.mxu0 %v19448_v61  ;;  %v19460_v53 = vld [vmem:[%s28256_s6 + $0xc9c] ss:$24 sps:$4 sm:$0xff]   ;;  %v19478_v61 = vld [vmem:[%s28256_s6 + $0xd2c] ss:$24 sps:$4 sm:$0xff]  }
 0x6c4   :  { %9019 = vmatprep.subr.bf16.mxu1 %v19451_v11  ;;  %v19481_v11 = vld [vmem:[%s28256_s6 + $0x134] ss:$24 sps:$4 sm:$0xff]  }
 0x6c5   :  { %8979 = vmatpush1.bf16.msra.mxu0 %v19446_v54  ;;  %v19476_v54 = vld [vmem:[%s28256_s6 + $0xd28] ss:$24 sps:$4 sm:$0xff]  }
 0x6c6   :  { %9020 = vmatpush1.bf16.msra.mxu1 %v19449_v14  ;;  %8980 = vmatprep.subr.bf16.mxu0 %v19454_v25  ;;  %v19479_v14 = vld [vmem:[%s28256_s6 + $0x130] ss:$24 sps:$4 sm:$0xff]   ;;  %v19484_v25 = vld [vmem:[%s28256_s6 + $0xd5c] ss:$24 sps:$4 sm:$0xff]  }
 0x6c7   :  { %9021 = vmatprep.subr.bf16.mxu1 %v19457_v30  ;;  %v19487_v30 = vld [vmem:[%s28256_s6 + $0x164] ss:$24 sps:$4 sm:$0xff]  }
 0x6c9   :  { %8981 = vmatpush1.bf16.msra.mxu0 %v19452_v47  ;;  %v19482_v47 = vld [vmem:[%s28256_s6 + $0xd58] ss:$24 sps:$4 sm:$0xff]  }
 0x6ca   :  { %9022 = vmatpush1.bf16.msra.mxu1 %v19455_v42  ;;  %8982 = vmatprep.subr.bf16.mxu0 %v19460_v53  ;;  %v19485_v42 = vld [vmem:[%s28256_s6 + $0x160] ss:$24 sps:$4 sm:$0xff]   ;;  %v19490_v53 = vld [vmem:[%s28256_s6 + $0xd8c] ss:$24 sps:$4 sm:$0xff]  }
 0x6cb   :  { %9023 = vmatprep.subr.bf16.mxu1 %v19463_v27  ;;  %v19493_v27 = vld [vmem:[%s28256_s6 + $0x194] ss:$24 sps:$4 sm:$0xff]  }
 0x6cd   :  { %8983 = vmatpush1.bf16.msra.mxu0 %v19458_v2  ;;  %v19488_v2 = vld [vmem:[%s28256_s6 + $0xd88] ss:$24 sps:$4 sm:$0xff]  }
 0x6ce   :  { %9024 = vmatpush1.bf16.msra.mxu1 %v19461_v8  ;;  %8984 = vmatprep.subr.bf16.mxu0 %v19466_v35  ;;  %v19491_v8 = vld [vmem:[%s28256_s6 + $0x190] ss:$24 sps:$4 sm:$0xff]   ;;  %v19496_v35 = vld [vmem:[%s28256_s6 + $0xdbc] ss:$24 sps:$4 sm:$0xff]  }
 0x6cf   :  { %9025 = vmatprep.subr.bf16.mxu1 %v19469_v3  ;;  %v19499_v3 = vld [vmem:[%s28256_s6 + $0x1c4] ss:$24 sps:$4 sm:$0xff]  }
 0x6d1   :  { %8985 = vmatpush1.bf16.msra.mxu0 %v19464_v10  ;;  %v19494_v10 = vld [vmem:[%s28256_s6 + $0xdb8] ss:$24 sps:$4 sm:$0xff]  }
 0x6d2   :  { %9026 = vmatpush1.bf16.msra.mxu1 %v19467_v0  ;;  %8986 = vmatprep.subr.bf16.mxu0 %v19472_v48  ;;  %v19497_v0 = vld [vmem:[%s28256_s6 + $0x1c0] ss:$24 sps:$4 sm:$0xff]   ;;  %v19502_v48 = vld [vmem:[%s28256_s6 + $0xdec] ss:$24 sps:$4 sm:$0xff]  }
 0x6d3   :  { %9027 = vmatprep.subr.bf16.mxu1 %v19475_v52  ;;  %v19505_v52 = vld [vmem:[%s28256_s6 + $0x1f4] ss:$24 sps:$4 sm:$0xff]  }
 0x6d5   :  { %8987 = vmatpush1.bf16.msra.mxu0 %v19470_v40  ;;  %v19500_v40 = vld [vmem:[%s28256_s6 + $0xde8] ss:$24 sps:$4 sm:$0xff]  }
 0x6d6   :  { %9028 = vmatpush1.bf16.msra.mxu1 %v19473_v13  ;;  %8988 = vmatprep.subr.bf16.mxu0 %v19478_v61  ;;  %v19503_v13 = vld [vmem:[%s28256_s6 + $0x1f0] ss:$24 sps:$4 sm:$0xff]   ;;  %v19508_v61 = vld [vmem:[%s28256_s6 + $0xe1c] ss:$24 sps:$4 sm:$0xff]  }
 0x6d7   :  { %9029 = vmatprep.subr.bf16.mxu1 %v19481_v11  ;;  %v19511_v11 = vld [vmem:[%s28256_s6 + $0x224] ss:$24 sps:$4 sm:$0xff]  }
 0x6d9   :  { %8989 = vmatpush1.bf16.msra.mxu0 %v19476_v54  ;;  %v19506_v54 = vld [vmem:[%s28256_s6 + $0xe18] ss:$24 sps:$4 sm:$0xff]  }
 0x6da   :  { %9030 = vmatpush1.bf16.msra.mxu1 %v19479_v14  ;;  %8990 = vmatprep.subr.bf16.mxu0 %v19484_v25  ;;  %v19509_v14 = vld [vmem:[%s28256_s6 + $0x220] ss:$24 sps:$4 sm:$0xff]   ;;  %v19514_v25 = vld [vmem:[%s28256_s6 + $0xe4c] ss:$24 sps:$4 sm:$0xff]  }
 0x6db   :  { %9031 = vmatprep.subr.bf16.mxu1 %v19487_v30  ;;  %v19517_v30 = vld [vmem:[%s28256_s6 + $0x254] ss:$24 sps:$4 sm:$0xff]  }
 0x6dd   :  { %8991 = vmatpush1.bf16.msra.mxu0 %v19482_v47  ;;  %v19512_v47 = vld [vmem:[%s28256_s6 + $0xe48] ss:$24 sps:$4 sm:$0xff]  }
 0x6de   :  { %9032 = vmatpush1.bf16.msra.mxu1 %v19485_v42  ;;  %8992 = vmatprep.subr.bf16.mxu0 %v19490_v53  ;;  %v19515_v42 = vld [vmem:[%s28256_s6 + $0x250] ss:$24 sps:$4 sm:$0xff]   ;;  %v19520_v53 = vld [vmem:[%s28256_s6 + $0xe7c] ss:$24 sps:$4 sm:$0xff]  }
 0x6df   :  { %9033 = vmatprep.subr.bf16.mxu1 %v19493_v27  ;;  %v19523_v27 = vld [vmem:[%s28256_s6 + $0x284] ss:$24 sps:$4 sm:$0xff]  }
 0x6e1   :  { %8993 = vmatpush1.bf16.msra.mxu0 %v19488_v2  ;;  %v19518_v2 = vld [vmem:[%s28256_s6 + $0xe78] ss:$24 sps:$4 sm:$0xff]  }
 0x6e2   :  { %9034 = vmatpush1.bf16.msra.mxu1 %v19491_v8  ;;  %8994 = vmatprep.subr.bf16.mxu0 %v19496_v35  ;;  %v19521_v8 = vld [vmem:[%s28256_s6 + $0x280] ss:$24 sps:$4 sm:$0xff]  }
 0x6e3   :  { %9035 = vmatprep.subr.bf16.mxu1 %v19499_v3  ;;  %v19527_v35 = vld [vmem:[%s28257_s7 + $0x40] sm:$0xff]   ;;  %v19526_v3 = vld [vmem:[%s28256_s6 + $0x2b4] ss:$24 sps:$4 sm:$0xff]  }
 0x6e5   :  { %8995 = vmatpush1.bf16.msra.mxu0 %v19494_v10  ;;  %v19528_v10 = vld [vmem:[%s28257_s7] sm:$0xff]  }
 0x6e6   :  { %9036 = vmatpush1.bf16.msra.mxu1 %v19497_v0  ;;  %8996 = vmatprep.subr.bf16.mxu0 %v19502_v48  ;;  %v19524_v0 = vld [vmem:[%s28256_s6 + $0x2b0] ss:$24 sps:$4 sm:$0xff]  }
 0x6e7   :  { %9037 = vmatprep.subr.bf16.mxu1 %v19505_v52  ;;  %v19532_v48 = vld [vmem:[%s28257_s7 + $0x48] sm:$0xff]   ;;  %v19531_v52 = vld [vmem:[%s28256_s6 + $0x2e4] ss:$24 sps:$4 sm:$0xff]  }
 0x6e9   :  { %8997 = vmatpush1.bf16.msra.mxu0 %v19500_v40  ;;  %v19533_v40 = vld [vmem:[%s28257_s7 + $0x8] sm:$0xff]  }
 0x6ea   :  { %9038 = vmatpush1.bf16.msra.mxu1 %v19503_v13  ;;  %8998 = vmatprep.subr.bf16.mxu0 %v19508_v61  ;;  %v19529_v13 = vld [vmem:[%s28256_s6 + $0x2e0] ss:$24 sps:$4 sm:$0xff]   ;;  %v19537_v61 = vld [vmem:[%s28257_s7 + $0x50] sm:$0xff]  }
 0x6eb   :  { %9039 = vmatprep.subr.bf16.mxu1 %v19511_v11  ;;  %v19536_v11 = vld [vmem:[%s28256_s6 + $0x314] ss:$24 sps:$4 sm:$0xff]  }
 0x6ed   :  { %8999 = vmatpush1.bf16.msra.mxu0 %v19506_v54  ;;  %v19534_v54 = vld [vmem:[%s28256_s6 + $0x310] ss:$24 sps:$4 sm:$0xff]  }
 0x6ee   :  { %9040 = vmatpush1.bf16.msra.mxu1 %v19509_v14  ;;  %9000 = vmatprep.subr.bf16.mxu0 %v19514_v25  ;;  %v19541_v14 = vld [vmem:[%s28256_s6 + $0x344] ss:$24 sps:$4 sm:$0xff]  }
 0x6ef   :  { %9041 = vmatprep.subr.bf16.mxu1 %v19517_v30  ;;  %v19542_v25 = vld [vmem:[%s28257_s7 + $0x58] sm:$0xff]  }
 0x6f0   :  { %v19543_v30 = vld [vmem:[%s28257_s7 + $0x18] sm:$0xff]  }
 0x6f1   :  { %9001 = vmatpush1.bf16.msra.mxu0 %v19512_v47  ;;  %v19539_v47 = vld [vmem:[%s28256_s6 + $0x340] ss:$24 sps:$4 sm:$0xff]  }
 0x6f2   :  { %9042 = vmatpush1.bf16.msra.mxu1 %v19515_v42  ;;  %9002 = vmatprep.subr.bf16.mxu0 %v19520_v53  ;;  %v19547_v42 = vld [vmem:[%s28257_s7 + $0x60] sm:$0xff]  }
 0x6f3   :  { %9043 = vmatprep.subr.bf16.mxu1 %v19523_v27  ;;  %v19548_v53 = vld [vmem:[%s28257_s7 + $0x20] sm:$0xff]   ;;  %v19552_v27 = vld [vmem:[%s28257_s7 + $0x68] sm:$0xff]  }
 0x6f5   :  { %9003 = vmatpush1.bf16.msra.mxu0 %v19518_v2  ;;  %v19551_v2 = vld [vmem:[%s28256_s6 + $0x3a4] ss:$24 sps:$4 sm:$0xff]  }
 0x6f6   :  { %9044 = vmatpush1.bf16.msra.mxu1 %v19521_v8  ;;  %16806 = vmatprep.subr.bf16.mxu0 %v19527_v35  ;;  %v19553_v8 = vld [vmem:[%s28257_s7 + $0x28] sm:$0xff]   ;;  %v19549_v35 = vld [vmem:[%s28256_s6 + $0x3a0] ss:$24 sps:$4 sm:$0xff]  }
 0x6f7   :  { %9045 = vmatprep.subr.bf16.mxu1 %v19526_v3  ;;  %v19557_v3 = vld [vmem:[%s28257_s7 + $0x70] sm:$0xff]  }
 0x6f8   :  { %9009 = vmatmul.mubr.bf16.vlgmr.msra.gmra.mrb[72].mxu0 %v24967_v28 }
 0x6f9   :  { %16807 = vmatpush3.bf16.msra.mxu0 %v19528_v10  ;;  %9878 = vmatprep.mubr.bf16.mxu0 %v22422_v31  ;;  %v19538_v31 = vld [vmem:[%s28257_s7 + $0x10] sm:$0xff]  }
 0x6fa   :  { %9046 = vmatpush1.bf16.msra.mxu1 %v19524_v0  ;;  %16808 = vmatprep.subr.bf16.mxu0 %v19532_v48  ;;  %v19556_v10 = vld [vmem:[%s28256_s6 + $0x3d4] ss:$24 sps:$4 sm:$0xff]   ;;  %v19554_v48 = vld [vmem:[%s28256_s6 + $0x3d0] ss:$24 sps:$4 sm:$0xff]  }
 0x6fb   :  { %9047 = vmatprep.subr.bf16.mxu1 %v19531_v52  ;;  %v19558_v0 = vld [vmem:[%s28257_s7 + $0x30] sm:$0xff]   ;;  %v19562_v52 = vld [vmem:[%s28257_s7 + $0x78] sm:$0xff]  }
 0x6fd   :  { %16809 = vmatpush3.bf16.msra.mxu0 %v19533_v40  ;;  %v19561_v40 = vld [vmem:[%s28256_s6 + $0x404] ss:$24 sps:$4 sm:$0xff]  }
 0x6fe   :  { %9048 = vmatpush1.bf16.msra.mxu1 %v19529_v13  ;;  %16810 = vmatprep.subr.bf16.mxu0 %v19537_v61  ;;  %v19563_v13 = vld [vmem:[%s28257_s7 + $0x38] sm:$0xff]  }
 0x6ff   :  { %9058 = vmatprep.subr.bf16.mxu1 %v19536_v11  ;;  %v19559_v61 = vld [vmem:[%s28256_s6 + $0x400] ss:$24 sps:$4 sm:$0xff]  }
 0x700   :  { %v19567_v11 = vld [vmem:[%s28257_s7 + $0xc0] sm:$0xff]  }
 0x701   :  { %9050 = vmatmul.mubr.bf16.vlgmr.msra.gmra.mrb[60].mxu1 %v24054_v5  ;;  %16811 = vmatpush3.bf16.msra.mxu0 %v19538_v31  ;;  %v19546_v5 = vld [vmem:[%s28256_s6 + $0x374] ss:$24 sps:$4 sm:$0xff]  }
 0x702   :  { %9059 = vmatpush1.bf16.msra.mxu1 %v19534_v54  ;;  %9090 = vmatprep.mubr.bf16.mxu1 %v24060_v7  ;;  %v19544_v7 = vld [vmem:[%s28256_s6 + $0x370] ss:$24 sps:$4 sm:$0xff]   ;;  %v19566_v31 = vld [vmem:[%s28256_s6 + $0x434] ss:$24 sps:$4 sm:$0xff]   ;;  %v19568_v54 = vld [vmem:[%s28257_s7 + $0x80] sm:$0xff]  }
 0x703   :  { %9060 = vmatprep.subr.bf16.mxu1 %v19541_v14  ;;  %16812 = vmatprep.subr.bf16.mxu0 %v19542_v25  ;;  %v19564_v14 = vld [vmem:[%s28256_s6 + $0x430] ss:$24 sps:$4 sm:$0xff]  }
 0x704   :  { %v19572_v25 = vld [vmem:[%s28257_s7 + $0xc8] sm:$0xff]  }
 0x705   :  { %16813 = vmatpush3.bf16.msra.mxu0 %v19543_v30  ;;  %v19571_v30 = vld [vmem:[%s28256_s6 + $0x464] ss:$24 sps:$4 sm:$0xff]  }
 0x706   :  { %9061 = vmatpush1.bf16.msra.mxu1 %v19539_v47  ;;  %16814 = vmatprep.subr.bf16.mxu0 %v19547_v42  ;;  %v19573_v47 = vld [vmem:[%s28257_s7 + $0x88] sm:$0xff]   ;;  %v19569_v42 = vld [vmem:[%s28256_s6 + $0x460] ss:$24 sps:$4 sm:$0xff]  }
 0x707   :  { %9062 = vmatprep.subr.bf16.mxu1 %v19546_v5  ;;  %v19577_v5 = vld [vmem:[%s28257_s7 + $0xd0] sm:$0xff]  }
 0x709   :  { %16815 = vmatpush3.bf16.msra.mxu0 %v19548_v53  ;;  %v19574_v53 = vld [vmem:[%s28256_s6 + $0x490] ss:$24 sps:$4 sm:$0xff]  }
 0x70a   :  { %9063 = vmatpush1.bf16.msra.mxu1 %v19544_v7  ;;  %16816 = vmatprep.subr.bf16.mxu0 %v19552_v27  ;;  %v19582_v7 = vld [vmem:[%s28257_s7 + $0xd8] sm:$0xff]  }
 0x70b   :  { %9064 = vmatprep.subr.bf16.mxu1 %v19551_v2  ;;  %v19581_v27 = vld [vmem:[%s28256_s6 + $0x4c4] ss:$24 sps:$4 sm:$0xff]  }
 0x70c   :  { %v19583_v2 = vld [vmem:[%s28257_s7 + $0x98] sm:$0xff]  }
 0x70d   :  { %16817 = vmatpush3.bf16.msra.mxu0 %v19553_v8  ;;  %v19579_v8 = vld [vmem:[%s28256_s6 + $0x4c0] ss:$24 sps:$4 sm:$0xff]  }
 0x70e   :  { %9065 = vmatpush1.bf16.msra.mxu1 %v19549_v35  ;;  %16818 = vmatprep.subr.bf16.mxu0 %v19557_v3  ;;  %v19587_v35 = vld [vmem:[%s28257_s7 + $0xe0] sm:$0xff]   ;;  %v19584_v3 = vld [vmem:[%s28256_s6 + $0x4f0] ss:$24 sps:$4 sm:$0xff]  }
 0x70f   :  { %9066 = vmatprep.subr.bf16.mxu1 %v19556_v10  ;;  %v19592_v10 = vld [vmem:[%s28257_s7 + $0xe8] sm:$0xff]  }
 0x711   :  { %16819 = vmatpush3.bf16.msra.mxu0 %v19558_v0  ;;  %v19591_v0 = vld [vmem:[%s28256_s6 + $0x524] ss:$24 sps:$4 sm:$0xff]  }
 0x712   :  { %9067 = vmatpush1.bf16.msra.mxu1 %v19554_v48  ;;  %16820 = vmatprep.subr.bf16.mxu0 %v19562_v52  ;;  %v19593_v48 = vld [vmem:[%s28257_s7 + $0xa8] sm:$0xff]   ;;  %v19589_v52 = vld [vmem:[%s28256_s6 + $0x520] ss:$24 sps:$4 sm:$0xff]  }
 0x713   :  { %9068 = vmatprep.subr.bf16.mxu1 %v19561_v40  ;;  %v19597_v40 = vld [vmem:[%s28257_s7 + $0xf0] sm:$0xff]  }
 0x715   :  { %16821 = vmatpush3.bf16.msra.mxu0 %v19563_v13  ;;  %v19596_v13 = vld [vmem:[%s28256_s6 + $0x554] ss:$24 sps:$4 sm:$0xff]  }
 0x716   :  { %9069 = vmatpush1.bf16.msra.mxu1 %v19559_v61  ;;  %16834 = vmatprep.subr.bf16.mxu0 %v19567_v11  ;;  %v19598_v61 = vld [vmem:[%s28257_s7 + $0xb0] sm:$0xff]  }
 0x717   :  { %9070 = vmatprep.subr.bf16.mxu1 %v19566_v31  ;;  %v19594_v11 = vld [vmem:[%s28256_s6 + $0x550] ss:$24 sps:$4 sm:$0xff]   ;;  %v19602_v31 = vld [vmem:[%s28257_s7 + $0xf8] sm:$0xff]  }
 0x718   :  { %9879 = vmatmul.mubr.bf16.vlgmr.msra.gmra.mrb[76].mxu0 %v22451_v33  ;;  %v19578_v33 = vld [vmem:[%s28257_s7 + $0x90] sm:$0xff]  }
 0x719   :  { %9886 = vmatprep.mubr.bf16.mxu0 %v22448_v15  ;;  %16835 = vmatpush3.bf16.msra.mxu0 %v19568_v54  ;;  %v19576_v15 = vld [vmem:[%s28256_s6 + $0x494] ss:$24 sps:$4 sm:$0xff]   ;;  %v19601_v54 = vld [vmem:[%s28256_s6 + $0x584] ss:$24 sps:$4 sm:$0xff]  }
 0x71a   :  { %9071 = vmatpush1.bf16.msra.mxu1 %v19564_v14  ;;  %16836 = vmatprep.subr.bf16.mxu0 %v19572_v25  ;;  %v19603_v14 = vld [vmem:[%s28257_s7 + $0xb8] sm:$0xff]  }
 0x71b   :  { %9072 = vmatprep.subr.bf16.mxu1 %v19571_v30  ;;  %v19599_v25 = vld [vmem:[%s28256_s6 + $0x580] ss:$24 sps:$4 sm:$0xff]  }
 0x71c   :  { %v19607_v30 = vld [vmem:[%s28257_s7 + $0x140] sm:$0xff]  }
 0x71d   :  { %16837 = vmatpush3.bf16.msra.mxu0 %v19573_v47  ;;  %v19606_v47 = vld [vmem:[%s28256_s6 + $0x5b4] ss:$24 sps:$4 sm:$0xff]  }
 0x71e   :  { %9073 = vmatpush1.bf16.msra.mxu1 %v19569_v42  ;;  %16838 = vmatprep.subr.bf16.mxu0 %v19577_v5  ;;  %v19608_v42 = vld [vmem:[%s28257_s7 + $0x100] sm:$0xff]   ;;  %v19604_v5 = vld [vmem:[%s28256_s6 + $0x5b0] ss:$24 sps:$4 sm:$0xff]  }
 0x71f   :  { %9074 = vmatprep.subr.bf16.mxu1 %v19576_v15  ;;  %v19612_v15 = vld [vmem:[%s28257_s7 + $0x148] sm:$0xff]  }
 0x720   :  { %9887 = vmatmul.mubr.bf16.gmra.mrb[80].mxu0 %v22520_v32  ;;  %v19586_v32 = vld [vmem:[%s28256_s6 + $0x4f4] ss:$24 sps:$4 sm:$0xff]  }
 0x721   :  { %16839 = vmatpush3.bf16.msra.mxu0 %v19578_v33  ;;  %9926 = vmatprep.mubr.bf16.mxu0 %v22821_v4  ;;  %v19588_v4 = vld [vmem:[%s28257_s7 + $0xa0] sm:$0xff]  }
 0x722   :  { %9075 = vmatpush1.bf16.msra.mxu1 %v19574_v53  ;;  %16840 = vmatprep.subr.bf16.mxu0 %v19582_v7  ;;  %v19611_v33 = vld [vmem:[%s28256_s6 + $0x5e4] ss:$24 sps:$4 sm:$0xff]   ;;  %v19613_v53 = vld [vmem:[%s28257_s7 + $0x108] sm:$0xff]   ;;  %v19609_v7 = vld [vmem:[%s28256_s6 + $0x5e0] ss:$24 sps:$4 sm:$0xff]  }
 0x723   :  { %9076 = vmatprep.subr.bf16.mxu1 %v19581_v27  ;;  %v19617_v27 = vld [vmem:[%s28257_s7 + $0x150] sm:$0xff]  }
 0x725   :  { %16841 = vmatpush3.bf16.msra.mxu0 %v19583_v2  ;;  %v19614_v2 = vld [vmem:[%s28256_s6 + $0x610] ss:$24 sps:$4 sm:$0xff]  }
 0x726   :  { %9077 = vmatpush1.bf16.msra.mxu1 %v19579_v8  ;;  %16842 = vmatprep.subr.bf16.mxu0 %v19587_v35  ;;  %v19621_v8 = vld [vmem:[%s28256_s6 + $0x644] ss:$24 sps:$4 sm:$0xff]  }
 0x727   :  { %9078 = vmatprep.subr.bf16.mxu1 %v19586_v32  ;;  %v19622_v35 = vld [vmem:[%s28257_s7 + $0x158] sm:$0xff]  }
 0x728   :  { %v19623_v32 = vld [vmem:[%s28257_s7 + $0x118] sm:$0xff]  }
 0x729   :  { %16843 = vmatpush3.bf16.msra.mxu0 %v19588_v4  ;;  %v19619_v4 = vld [vmem:[%s28256_s6 + $0x640] ss:$24 sps:$4 sm:$0xff]  }
 0x72a   :  { %9079 = vmatpush1.bf16.msra.mxu1 %v19584_v3  ;;  %16844 = vmatprep.subr.bf16.mxu0 %v19592_v10  ;;  %v19624_v3 = vld [vmem:[%s28256_s6 + $0x670] ss:$24 sps:$4 sm:$0xff]   ;;  %v19631_v10 = vld [vmem:[%s28256_s6 + $0x6a4] ss:$24 sps:$4 sm:$0xff]  }
 0x72b   :  { %9080 = vmatprep.subr.bf16.mxu1 %v19591_v0  ;;  %v19633_v0 = vld [vmem:[%s28257_s7 + $0x128] sm:$0xff]  }
 0x72d   :  { %16845 = vmatpush3.bf16.msra.mxu0 %v19593_v48  ;;  %v19629_v48 = vld [vmem:[%s28256_s6 + $0x6a0] ss:$24 sps:$4 sm:$0xff]  }
 0x72e   :  { %9081 = vmatpush1.bf16.msra.mxu1 %v19589_v52  ;;  %16846 = vmatprep.subr.bf16.mxu0 %v19597_v40  ;;  %v19637_v52 = vld [vmem:[%s28257_s7 + $0x170] sm:$0xff]  }
 0x72f   :  { %9082 = vmatprep.subr.bf16.mxu1 %v19596_v13  ;;  %v19636_v40 = vld [vmem:[%s28256_s6 + $0x6d4] ss:$24 sps:$4 sm:$0xff]  }
 0x730   :  { %v19638_v13 = vld [vmem:[%s28257_s7 + $0x130] sm:$0xff]  }
 0x731   :  { %16847 = vmatpush3.bf16.msra.mxu0 %v19598_v61  ;;  %v19634_v61 = vld [vmem:[%s28256_s6 + $0x6d0] ss:$24 sps:$4 sm:$0xff]  }
 0x732   :  { %9083 = vmatpush1.bf16.msra.mxu1 %v19594_v11  ;;  %16848 = vmatprep.subr.bf16.mxu0 %v19602_v31  ;;  %v19642_v11 = vld [vmem:[%s28257_s7 + $0x178] sm:$0xff]  }
 0x733   :  { %9084 = vmatprep.subr.bf16.mxu1 %v19601_v54  ;;  %v19641_v31 = vld [vmem:[%s28256_s6 + $0x704] ss:$24 sps:$4 sm:$0xff]  }
 0x734   :  { %v19643_v54 = vld [vmem:[%s28257_s7 + $0x138] sm:$0xff]  }
 0x735   :  { %16849 = vmatpush3.bf16.msra.mxu0 %v19603_v14  ;;  %v19639_v14 = vld [vmem:[%s28256_s6 + $0x700] ss:$24 sps:$4 sm:$0xff]  }
 0x736   :  { %9085 = vmatpush1.bf16.msra.mxu1 %v19599_v25  ;;  %16862 = vmatprep.subr.bf16.mxu0 %v19607_v30  ;;  %v19647_v25 = vld [vmem:[%s28257_s7 + $0x1c0] sm:$0xff]   ;;  %v19646_v30 = vld [vmem:[%s28256_s6 + $0x734] ss:$24 sps:$4 sm:$0xff]  }
 0x737   :  { %9086 = vmatprep.subr.bf16.mxu1 %v19606_v47  ;;  %v19648_v47 = vld [vmem:[%s28257_s7 + $0x180] sm:$0xff]  }
 0x738   :  { %9927 = vmatmul.mubr.bf16.vlgmr.msra.gmra.mrb[84].mxu0 %v22585_v37  ;;  %v19616_v37 = vld [vmem:[%s28256_s6 + $0x614] ss:$24 sps:$4 sm:$0xff]  }
 0x739   :  { %9934 = vmatprep.mubr.bf16.mxu0 %v22853_v44  ;;  %16863 = vmatpush3.bf16.msra.mxu0 %v19608_v42  ;;  %v19618_v44 = vld [vmem:[%s28257_s7 + $0x110] sm:$0xff]  }
 0x73a   :  { %9087 = vmatpush1.bf16.msra.mxu1 %v19604_v5  ;;  %16864 = vmatprep.subr.bf16.mxu0 %v19612_v15  ;;  %v19644_v42 = vld [vmem:[%s28256_s6 + $0x730] ss:$24 sps:$4 sm:$0xff]   ;;  %v19651_v15 = vld [vmem:[%s28256_s6 + $0x764] ss:$24 sps:$4 sm:$0xff]  }
 0x73b   :  { %9088 = vmatprep.subr.bf16.mxu1 %v19611_v33  ;;  %v19652_v5 = vld [vmem:[%s28257_s7 + $0x1c8] sm:$0xff]  }
 0x73c   :  { %v19653_v33 = vld [vmem:[%s28257_s7 + $0x188] sm:$0xff]  }
 0x73d   :  { %16865 = vmatpush3.bf16.msra.mxu0 %v19613_v53  ;;  %v19649_v53 = vld [vmem:[%s28256_s6 + $0x760] ss:$24 sps:$4 sm:$0xff]  }
 0x73e   :  { %9089 = vmatpush1.bf16.msra.mxu1 %v19609_v7  ;;  %16866 = vmatprep.subr.bf16.mxu0 %v19617_v27  ;;  %v19657_v7 = vld [vmem:[%s28257_s7 + $0x1d0] sm:$0xff]  }
 0x73f   :  { %9099 = vmatprep.subr.bf16.mxu1 %v19616_v37  ;;  %v19654_v27 = vld [vmem:[%s28256_s6 + $0x790] ss:$24 sps:$4 sm:$0xff]   ;;  %v19662_v37 = vld [vmem:[%s28257_s7 + $0x1d8] sm:$0xff]  }
 0x740   :  { %9935 = vmatmul.mubr.bf16.gmra.mrb[88].mxu0 %v22902_v16  ;;  %v19627_v16 = vld [vmem:[%s28257_s7 + $0x160] sm:$0xff]  }
 0x741   :  { %9091 = vmatmul.mubr.bf16.vlgmr.msra.gmra.mrb[60].mxu1 %v24265_v41  ;;  %16867 = vmatpush3.bf16.msra.mxu0 %v19618_v44  ;;  %v19626_v41 = vld [vmem:[%s28256_s6 + $0x674] ss:$24 sps:$4 sm:$0xff]   ;;  %v19661_v44 = vld [vmem:[%s28256_s6 + $0x7c4] ss:$24 sps:$4 sm:$0xff]  }
 0x742   :  { %9100 = vmatpush1.bf16.msra.mxu1 %v19614_v2  ;;  %9131 = vmatprep.mubr.bf16.mxu1 %v24273_v49  ;;  %v19628_v49 = vld [vmem:[%s28257_s7 + $0x120] sm:$0xff]   ;;  %v19663_v2 = vld [vmem:[%s28257_s7 + $0x198] sm:$0xff]  }
 0x743   :  { %9974 = vmatprep.mubr.bf16.mxu0 %v22907_v38  ;;  %9101 = vmatprep.subr.bf16.mxu1 %v19621_v8  ;;  %v19632_v38 = vld [vmem:[%s28257_s7 + $0x168] sm:$0xff]   ;;  %v19659_v8 = vld [vmem:[%s28256_s6 + $0x7c0] ss:$24 sps:$4 sm:$0xff]  }
 0x744   :  { %16868 = vmatprep.subr.bf16.mxu0 %v19622_v35  ;;  %v19667_v35 = vld [vmem:[%s28257_s7 + $0x1e0] sm:$0xff]  }
 0x745   :  { %16869 = vmatpush3.bf16.msra.mxu0 %v19623_v32  ;;  %v19664_v32 = vld [vmem:[%s28256_s6 + $0x7f0] ss:$24 sps:$4 sm:$0xff]  }
 0x746   :  { %9102 = vmatpush1.bf16.msra.mxu1 %v19619_v4  ;;  %16870 = vmatprep.subr.bf16.mxu0 %v19627_v16  ;;  %v19672_v4 = vld [vmem:[%s28257_s7 + $0x1e8] sm:$0xff]   ;;  %v19671_v16 = vld [vmem:[%s28256_s6 + $0x824] ss:$24 sps:$4 sm:$0xff]  }
 0x747   :  { %9103 = vmatprep.subr.bf16.mxu1 %v19626_v41  ;;  %v19673_v41 = vld [vmem:[%s28257_s7 + $0x1a8] sm:$0xff]  }
 0x749   :  { %16871 = vmatpush3.bf16.msra.mxu0 %v19628_v49  ;;  %v19669_v49 = vld [vmem:[%s28256_s6 + $0x820] ss:$24 sps:$4 sm:$0xff]  }
 0x74a   :  { %9104 = vmatpush1.bf16.msra.mxu1 %v19624_v3  ;;  %16872 = vmatprep.subr.bf16.mxu0 %v19632_v38  ;;  %v19677_v3 = vld [vmem:[%s28257_s7 + $0x1f0] sm:$0xff]  }
 0x74b   :  { %9105 = vmatprep.subr.bf16.mxu1 %v19631_v10  ;;  %v19676_v38 = vld [vmem:[%s28256_s6 + $0x854] ss:$24 sps:$4 sm:$0xff]  }
 0x74c   :  { %v19678_v10 = vld [vmem:[%s28257_s7 + $0x1b0] sm:$0xff]  }
 0x74d   :  { %16873 = vmatpush3.bf16.msra.mxu0 %v19633_v0  ;;  %v19674_v0 = vld [vmem:[%s28256_s6 + $0x850] ss:$24 sps:$4 sm:$0xff]  }
 0x74e   :  { %9106 = vmatpush1.bf16.msra.mxu1 %v19629_v48  ;;  %16874 = vmatprep.subr.bf16.mxu0 %v19637_v52  ;;  %v19682_v48 = vld [vmem:[%s28257_s7 + $0x1f8] sm:$0xff]  }
 0x74f   :  { %9107 = vmatprep.subr.bf16.mxu1 %v19636_v40  ;;  %v19681_v52 = vld [vmem:[%s28256_s6 + $0x884] ss:$24 sps:$4 sm:$0xff]  }
 0x750   :  { %v19683_v40 = vld [vmem:[%s28257_s7 + $0x1b8] sm:$0xff]  }
 0x751   :  { %16875 = vmatpush3.bf16.msra.mxu0 %v19638_v13  ;;  %v19679_v13 = vld [vmem:[%s28256_s6 + $0x880] ss:$24 sps:$4 sm:$0xff]  }
 0x752   :  { %9108 = vmatpush1.bf16.msra.mxu1 %v19634_v61  ;;  %16876 = vmatprep.subr.bf16.mxu0 %v19642_v11  ;;  %v19686_v61 = vld [vmem:[%s28256_s6 + $0x8b4] ss:$24 sps:$4 sm:$0xff]   ;;  %v19687_v11 = vld [vmem:[%s28257_s7 + $0x200] sm:$0xff]  }
 0x753   :  { %9109 = vmatprep.subr.bf16.mxu1 %v19641_v31  ;;  %v19684_v31 = vld [vmem:[%s28256_s6 + $0x8b0] ss:$24 sps:$4 sm:$0xff]  }
 0x755   :  { %16877 = vmatpush3.bf16.msra.mxu0 %v19643_v54  ;;  %v19690_v54 = vld [vmem:[%s28256_s6 + $0x8e4] ss:$24 sps:$4 sm:$0xff]  }
 0x756   :  { %9110 = vmatpush1.bf16.msra.mxu1 %v19639_v14  ;;  %16890 = vmatprep.subr.bf16.mxu0 %v19647_v25  ;;  %v19691_v14 = vld [vmem:[%s28257_s7 + $0x208] sm:$0xff]   ;;  %v19688_v25 = vld [vmem:[%s28256_s6 + $0x8e0] ss:$24 sps:$4 sm:$0xff]  }
 0x757   :  { %9111 = vmatprep.subr.bf16.mxu1 %v19646_v30  ;;  %v19694_v30 = vld [vmem:[%s28256_s6 + $0x914] ss:$24 sps:$4 sm:$0xff]  }
 0x758   :  { %9975 = vmatmul.mubr.bf16.vlgmr.msra.gmra.mrb[92].mxu0 %v22872_v58  ;;  %v19656_v58 = vld [vmem:[%s28256_s6 + $0x794] ss:$24 sps:$4 sm:$0xff]  }
 0x759   :  { %9982 = vmatprep.mubr.bf16.mxu0 %v23215_v21  ;;  %16891 = vmatpush3.bf16.msra.mxu0 %v19648_v47  ;;  %v19658_v21 = vld [vmem:[%s28257_s7 + $0x190] sm:$0xff]   ;;  %v19698_v47 = vld [vmem:[%s28256_s6 + $0x944] ss:$24 sps:$4 sm:$0xff]  }
 0x75a   :  { %9112 = vmatpush1.bf16.msra.mxu1 %v19644_v42  ;;  %16892 = vmatprep.subr.bf16.mxu0 %v19652_v5  ;;  %v19699_v42 = vld [vmem:[%s28257_s7 + $0x218] sm:$0xff]  }
 0x75b   :  { %9113 = vmatprep.subr.bf16.mxu1 %v19651_v15  ;;  %v19696_v5 = vld [vmem:[%s28256_s6 + $0x940] ss:$24 sps:$4 sm:$0xff]   ;;  %v19707_v15 = vld [vmem:[%s28257_s7 + $0x228] sm:$0xff]  }
 0x75d   :  { %16893 = vmatpush3.bf16.msra.mxu0 %v19653_v33  ;;  %v19704_v33 = vld [vmem:[%s28256_s6 + $0x9a0] ss:$24 sps:$4 sm:$0xff]  }
 0x75e   :  { %9114 = vmatpush1.bf16.msra.mxu1 %v19649_v53  ;;  %16894 = vmatprep.subr.bf16.mxu0 %v19657_v7  ;;  %v19710_v53 = vld [vmem:[%s28256_s6 + $0x9d4] ss:$24 sps:$4 sm:$0xff]  }
 0x75f   :  { %9115 = vmatprep.subr.bf16.mxu1 %v19656_v58  ;;  %v19711_v7 = vld [vmem:[%s28257_s7 + $0x230] sm:$0xff]  }
 0x760   :  { %9983 = vmatmul.mubr.bf16.gmra.mrb[96].mxu0 %v23255_v24  ;;  %v19666_v24 = vld [vmem:[%s28256_s6 + $0x7f4] ss:$24 sps:$4 sm:$0xff]   ;;  %v19708_v58 = vld [vmem:[%s28256_s6 + $0x9d0] ss:$24 sps:$4 sm:$0xff]  }
 0x761   :  { %16895 = vmatpush3.bf16.msra.mxu0 %v19658_v21  ;;  %10022 = vmatprep.mubr.bf16.mxu0 %v23262_v45  ;;  %v19668_v45 = vld [vmem:[%s28257_s7 + $0x1a0] sm:$0xff]  }
 0x762   :  { %9116 = vmatpush1.bf16.msra.mxu1 %v19654_v27  ;;  %16896 = vmatprep.subr.bf16.mxu0 %v19662_v37  ;;  %v19714_v21 = vld [vmem:[%s28256_s6 + $0xa04] ss:$24 sps:$4 sm:$0xff]   ;;  %v19712_v37 = vld [vmem:[%s28256_s6 + $0xa00] ss:$24 sps:$4 sm:$0xff]  }
 0x763   :  { %9117 = vmatprep.subr.bf16.mxu1 %v19661_v44  ;;  %v19715_v27 = vld [vmem:[%s28257_s7 + $0x238] sm:$0xff]   ;;  %v19718_v44 = vld [vmem:[%s28256_s6 + $0xa34] ss:$24 sps:$4 sm:$0xff]  }
 0x765   :  { %16897 = vmatpush3.bf16.msra.mxu0 %v19663_v2 }
 0x766   :  { %9118 = vmatpush1.bf16.msra.mxu1 %v19659_v8  ;;  %16898 = vmatprep.subr.bf16.mxu0 %v19667_v35  ;;  %v19719_v35 = vld [vmem:[%s28257_s7 + $0x240] sm:$0xff]  }
 0x767   :  { %9119 = vmatprep.subr.bf16.mxu1 %v19666_v24 }
 0x769   :  { %16899 = vmatpush3.bf16.msra.mxu0 %v19668_v45  ;;  %v19716_v45 = vld [vmem:[%s28256_s6 + $0xa30] ss:$24 sps:$4 sm:$0xff]  }
 0x76a   :  { %9120 = vmatpush1.bf16.msra.mxu1 %v19664_v32  ;;  %16900 = vmatprep.subr.bf16.mxu0 %v19672_v4  ;;  %v19722_v4 = vld [vmem:[%s28256_s6 + $0xa64] ss:$24 sps:$4 sm:$0xff]  }
 0x76b   :  { %9121 = vmatprep.subr.bf16.mxu1 %v19671_v16  ;;  %v19723_v16 = vld [vmem:[%s28257_s7 + $0x248] sm:$0xff]  }
 0x76d   :  { %16901 = vmatpush3.bf16.msra.mxu0 %v19673_v41  ;;  %v19720_v41 = vld [vmem:[%s28256_s6 + $0xa60] ss:$24 sps:$4 sm:$0xff]  }
 0x76e   :  { %9122 = vmatpush1.bf16.msra.mxu1 %v19669_v49  ;;  %16902 = vmatprep.subr.bf16.mxu0 %v19677_v3  ;;  %v19726_v49 = vld [vmem:[%s28256_s6 + $0xa94] ss:$24 sps:$4 sm:$0xff]  }
 0x76f   :  { %9123 = vmatprep.subr.bf16.mxu1 %v19676_v38  ;;  %v19727_v3 = vld [vmem:[%s28257_s7 + $0x250] sm:$0xff]  }
 0x770   :  { %v19724_v38 = vld [vmem:[%s28256_s6 + $0xa90] ss:$24 sps:$4 sm:$0xff]  }
 0x771   :  { %16903 = vmatpush3.bf16.msra.mxu0 %v19678_v10  ;;  %v19730_v10 = vld [vmem:[%s28256_s6 + $0xac4] ss:$24 sps:$4 sm:$0xff]  }
 0x772   :  { %9124 = vmatpush1.bf16.msra.mxu1 %v19674_v0  ;;  %16904 = vmatprep.subr.bf16.mxu0 %v19682_v48  ;;  %v19731_v48 = vld [vmem:[%s28257_s7 + $0x258] sm:$0xff]  }
 0x773   :  { %9125 = vmatprep.subr.bf16.mxu1 %v19681_v52  ;;  %v19728_v52 = vld [vmem:[%s28256_s6 + $0xac0] ss:$24 sps:$4 sm:$0xff]  }
 0x775   :  { %16905 = vmatpush3.bf16.msra.mxu0 %v19683_v40 }
 0x776   :  { %9126 = vmatpush1.bf16.msra.mxu1 %v19679_v13  ;;  %10038 = vmatprep.subr.bf16.mxu0 %v28549_v51  ;;  %v19734_v13 = vld [vmem:[%s28256_s6 + $0xaf4] ss:$24 sps:$4 sm:$0xff]  }
 0x777   :  { %9127 = vmatprep.subr.bf16.mxu1 %v19686_v61  ;;  %v19735_v61 = vld [vmem:[%s28257_s7 + $0x260] sm:$0xff]  }
 0x778   :  { %10023 = vmatmul.mubr.bf16.vlgmr.msra.gmra.mrb[100].mxu0 %v22965_v46  ;;  %v19695_v46 = vld [vmem:[%s28257_s7 + $0x210] sm:$0xff]  }
 0x779   :  { %10030 = vmatprep.mubr.bf16.mxu0 %v23451_v62  ;;  %10039 = vmatpush1.bf16.msra.mxu0 %v19687_v11  ;;  %v19692_v62 = vld [vmem:[%s28256_s6 + $0x910] ss:$24 sps:$4 sm:$0xff]  }
 0x77a   :  { %9128 = vmatpush1.bf16.msra.mxu1 %v19684_v31  ;;  %10040 = vmatprep.subr.bf16.mxu0 %v28549_v51  ;;  %v19732_v11 = vld [vmem:[%s28256_s6 + $0xaf0] ss:$24 sps:$4 sm:$0xff]  }
 0x77b   :  { %9129 = vmatprep.subr.bf16.mxu1 %v19690_v54  ;;  %v19738_v54 = vld [vmem:[%s28256_s6 + $0xb24] ss:$24 sps:$4 sm:$0xff]  }
 0x77d   :  { %10041 = vmatpush1.bf16.msra.mxu0 %v19691_v14  ;;  %v10403_v14 = vld [vmem:[%s28259_s9 + $0x80] sm:$0xff] }
 0x77e   :  { %9130 = vmatpush1.bf16.msra.mxu1 %v19688_v25  ;;  %10042 = vmatprep.subr.bf16.mxu0 %v28549_v51  ;;  %v10404_v25 = vld [vmem:[%s28259_s9 + $0x88] sm:$0xff] }
 0x77f   :  { %9140 = vmatprep.subr.bf16.mxu1 %v19694_v30  ;;  %v19739_v30 = vld [vmem:[%s28257_s7 + $0x268] sm:$0xff]  }
 0x780   :  { %10031 = vmatmul.mubr.bf16.gmra.mrb[104].mxu0 %v23487_v12  ;;  %v19702_v12 = vld [vmem:[%s28256_s6 + $0x974] ss:$24 sps:$4 sm:$0xff]  }
 0x781   :  { %9132 = vmatmul.mubr.bf16.vlgmr.msra.gmra.mrb[60].mxu1 %v24564_v34  ;;  %10043 = vmatpush1.bf16.msra.mxu0 %v19695_v46  ;;  %v19703_v34 = vld [vmem:[%s28257_s7 + $0x220] sm:$0xff]  }
 0x782   :  { %9141 = vmatpush1.bf16.msra.mxu1 %v19692_v62  ;;  %9172 = vmatprep.mubr.bf16.mxu1 %v24572_v43  ;;  %v19700_v43 = vld [vmem:[%s28256_s6 + $0x970] ss:$24 sps:$4 sm:$0xff]   ;;  %v19736_v46 = vld [vmem:[%s28256_s6 + $0xb20] ss:$24 sps:$4 sm:$0xff]   ;;  %v25691_v62 = vpack.c.bf16 %v10404_v25, %v10403_v14  ;;  %v19754_v25 = vld [vmem:[%s28256_s6 + $0xc14] ss:$24 sps:$4 sm:$0xff]  }
 0x783   :  { %16012 = vmatprep.mubr.msk.bf16.mxu0 %vm1690_vm13, %v23497_v29  ;;  %9142 = vmatprep.subr.bf16.mxu1 %v19698_v47  ;;  %v19706_v29 = vld [vmem:[%s28256_s6 + $0x9a4] ss:$24 sps:$4 sm:$0xff]  }
 0x784   :  { %10044 = vmatprep.subr.bf16.mxu0 %v28549_v51  ;;  %v10387_v47 = vld [vmem:[%s28259_s9] sm:$0xff] }
 0x785   :  { %10045 = vmatpush1.bf16.msra.mxu0 %v19699_v42  ;;  %v10388_v42 = vld [vmem:[%s28259_s9 + $0x8] sm:$0xff]  ;;  %v10395_v14 = vld [vmem:[%s28259_s9 + $0x40] sm:$0xff] }
 0x786   :  { %9143 = vmatpush1.bf16.msra.mxu1 %v19696_v5  ;;  %10046 = vmatprep.subr.bf16.mxu0 %v28549_v51 }
 0x787   :  { %9144 = vmatprep.subr.bf16.mxu1 %v19702_v12  ;;  %v19742_v12 = vld [vmem:[%s28256_s6 + $0xb54] ss:$24 sps:$4 sm:$0xff]  }
 0x789   :  { %10047 = vmatpush1.bf16.msra.mxu0 %v19703_v34  ;;  %v10405_v34 = vld [vmem:[%s28259_s9 + $0x90] sm:$0xff] }
 0x78a   :  { %9145 = vmatpush1.bf16.msra.mxu1 %v19700_v43  ;;  %10048 = vmatprep.subr.bf16.mxu0 %v28549_v51  ;;  %v10406_v43 = vld [vmem:[%s28259_s9 + $0x98] sm:$0xff] }
 0x78b   :  { %9146 = vmatprep.subr.bf16.mxu1 %v19706_v29  ;;  %v25708_v29 = vpack.c.bf16 %v10388_v42, %v10387_v47 }
 0x78d   :  { %10049 = vmatpush1.bf16.msra.mxu0 %v19707_v15  ;;  %v19740_v15 = vld [vmem:[%s28256_s6 + $0xb50] ss:$24 sps:$4 sm:$0xff]  }
 0x78e   :  { %9147 = vmatpush1.bf16.msra.mxu1 %v19704_v33  ;;  %10050 = vmatprep.subr.bf16.mxu0 %v28549_v51  ;;  %v25714_v33 = vpack.c.bf16 %v10406_v43, %v10405_v34  ;;  %v10398_v34 = vld [vmem:[%s28259_s9 + $0x58] sm:$0xff] }
 0x78f   :  { %9148 = vmatprep.subr.bf16.mxu1 %v19710_v53  ;;  %v10389_v53 = vld [vmem:[%s28259_s9 + $0x10] sm:$0xff]  ;;  %v19757_v43 = vld [vmem:[%s28256_s6 + $0xc44] ss:$24 sps:$4 sm:$0xff]  }
 0x791   :  { %10051 = vmatpush1.bf16.msra.mxu0 %v19711_v7  ;;  %v10390_v7 = vld [vmem:[%s28259_s9 + $0x18] sm:$0xff] }
 0x792   :  { %9149 = vmatpush1.bf16.msra.mxu1 %v19708_v58  ;;  %10052 = vmatprep.subr.bf16.mxu0 %v28549_v51 }
 0x793   :  { %9150 = vmatprep.subr.bf16.mxu1 %v19714_v21  ;;  %v19745_v21 = vld [vmem:[%s28256_s6 + $0xb84] ss:$24 sps:$4 sm:$0xff]  }
 0x794   :  { %v25622_v2 = vpop.f32.mrb[56].mxu1 }
 0x795   :  { %v25624_v8 = vpop.f32.mrb[57].mxu1  ;;  %10053 = vmatpush1.bf16.msra.mxu0 %v19715_v27  ;;  %v10407_v27 = vld [vmem:[%s28259_s9 + $0xa0] sm:$0xff] }
 0x796   :  { %v8809_v24 = vpop.f32.mrb[58].mxu1  ;;  %9151 = vmatpush1.bf16.msra.mxu1 %v19712_v37  ;;  %10054 = vmatprep.subr.bf16.mxu0 %v28549_v51  ;;  %v10198_v0 = vsel %vm183_vm0, %v25624_v8, 0.0  ;;  %v10408_v37 = vld [vmem:[%s28259_s9 + $0xa8] sm:$0xff] }
 0x797   :  { %v8810_v32 = vpop.f32.mrb[59].mxu1  ;;  %9152 = vmatprep.subr.bf16.mxu1 %v19718_v44  ;;  %v10199_v40 = vrot.slane %v10198_v0, 4  ;;  %v25735_v44 = vpack.c.bf16 %v10390_v7, %v10389_v53  ;;  %v25741_v24 = vpack.c.bf16 %v10408_v37, %v10407_v27  ;;  %v10415_v53 = vld [vmem:[%s28259_s9 + $0xe0] sm:$0xff]  ;;  %v10416_v7 = vld [vmem:[%s28259_s9 + $0xe8] sm:$0xff] }
 0x798   :  { %v19755_v27 = vld [vmem:[%s28256_s6 + $0xc40] ss:$24 sps:$4 sm:$0xff]   ;;  %v25842_v37 = vpack.c.bf16 %v10416_v7, %v10415_v53 }
 0x799   :  { %10055 = vmatpush1.bf16.msra.mxu0 %v19719_v35  ;;  %v10200_v31 = vadd.f32 %v10199_v40, %v10198_v0  ;;  %v19743_v35 = vld [vmem:[%s28256_s6 + $0xb80] ss:$24 sps:$4 sm:$0xff]   ;;  %v10191_v0 = vsel %vm183_vm0, %v25622_v2, 0.0 }
 0x79a   :  { %9153 = vmatpush1.bf16.msra.mxu1 %v19716_v45  ;;  %10056 = vmatprep.subr.bf16.mxu0 %v28549_v51  ;;  %v19748_v45 = vld [vmem:[%s28256_s6 + $0xbb4] ss:$24 sps:$4 sm:$0xff]   ;;  %v10411_v40 = vld [vmem:[%s28259_s9 + $0xc0] sm:$0xff] }
 0x79b   :  { %9154 = vmatprep.subr.bf16.mxu1 %v19722_v4  ;;  %v10201_v5 = vrot.slane %v10200_v31, 2  ;;  %v10409_v4 = vld [vmem:[%s28259_s9 + $0xb0] sm:$0xff] }
 0x79d   :  { %10057 = vmatpush1.bf16.msra.mxu0 %v19723_v16  ;;  %v10202_v58 = vadd.f32 %v10201_v5, %v10200_v31  ;;  %v10410_v16 = vld [vmem:[%s28259_s9 + $0xb8] sm:$0xff]  ;;  %v19752_v5 = vld [vmem:[%s28256_s6 + $0xc10] ss:$24 sps:$4 sm:$0xff]  }
 0x79e   :  { %9155 = vmatpush1.bf16.msra.mxu1 %v19720_v41  ;;  %10058 = vmatprep.subr.bf16.mxu0 %v28549_v51  ;;  %v19749_v31 = vld [vmem:[%s28256_s6 + $0xbe0] ss:$24 sps:$4 sm:$0xff]  }
 0x79f   :  { %9156 = vmatprep.subr.bf16.mxu1 %v19726_v49  ;;  %v10203_v32 = vrot.slane %v10202_v58, 1  ;;  %v19746_v49 = vld [vmem:[%s28256_s6 + $0xbb0] ss:$24 sps:$4 sm:$0xff]  }
 0x7a1   :  { %10059 = vmatpush1.bf16.msra.mxu0 %v19727_v3  ;;  %v25765_v3 = vpack.c.bf16 %v10410_v16, %v10409_v4  ;;  %v19758_v4 = vld [vmem:[%s28256_s6 + $0xc70] ss:$24 sps:$4 sm:$0xff]  }
 0x7a2   :  { %9157 = vmatpush1.bf16.msra.mxu1 %v19724_v38  ;;  %10060 = vmatprep.subr.bf16.mxu0 %v28549_v51  ;;  %v10393_v38 = vld [vmem:[%s28259_s9 + $0x30] sm:$0xff] }
 0x7a3   :  { %9158 = vmatprep.subr.bf16.mxu1 %v19730_v10  ;;  %v10394_v10 = vld [vmem:[%s28259_s9 + $0x38] sm:$0xff] }
 0x7a5   :  { %10061 = vmatpush1.bf16.msra.mxu0 %v19731_v48  ;;  %v10204_v48 = vadd.f32 %v10203_v32, %v10202_v58 }
 0x7a6   :  { %9159 = vmatpush1.bf16.msra.mxu1 %v19728_v52  ;;  %10062 = vmatprep.subr.bf16.mxu0 %v28549_v51  ;;  %v19751_v52 = vld [vmem:[%s28256_s6 + $0xbe4] ss:$24 sps:$4 sm:$0xff]  }
 0x7a7   :  { %9160 = vmatprep.subr.bf16.mxu1 %v19734_v13  ;;  %v10412_v13 = vld [vmem:[%s28259_s9 + $0xc8] sm:$0xff] }
 0x7a9   :  { %10063 = vmatpush1.bf16.msra.mxu0 %v19735_v61  ;;  %v25786_v61 = vpack.c.bf16 %v10394_v10, %v10393_v38  ;;  %v10402_v38 = vld [vmem:[%s28259_s9 + $0x78] sm:$0xff] }
 0x7aa   :  { %9161 = vmatpush1.bf16.msra.mxu1 %v19732_v11  ;;  %10064 = vmatprep.subr.bf16.mxu0 %v28549_v51  ;;  %v10192_v11 = vrot.slane %v10191_v0, 4  ;;  %v19763_v10 = vld [vmem:[%s28256_s6 + $0xca4] ss:$24 sps:$4 sm:$0xff]   ;;  %v19788_v51 = vld [vmem:[%s28256_s6 + $0xe50] ss:$24 sps:$4 sm:$0xff]  }
 0x7ab   :  { %9162 = vmatprep.subr.bf16.mxu1 %v19738_v54  ;;  %v25792_v54 = vpack.c.bf16 %v10412_v13, %v10411_v40  ;;  %v19761_v13 = vld [vmem:[%s28256_s6 + $0xca0] ss:$24 sps:$4 sm:$0xff]  }
 0x7ac   :  { %v10193_v42 = vadd.f32 %v10192_v11, %v10191_v0  ;;  %v10435_v0 = vld [vmem:[%s28259_s9 + $0x180] sm:$0xff] }
 0x7ad   :  { %10065 = vmatpush1.bf16.msra.mxu0 %v19739_v30  ;;  %v10413_v30 = vld [vmem:[%s28259_s9 + $0xd0] sm:$0xff] }
 0x7ae   :  { %9163 = vmatpush1.bf16.msra.mxu1 %v19736_v46  ;;  %17621 = vmatprep.subr.bf16.mxu0 %v25691_v62  ;;  %v10414_v46 = vld [vmem:[%s28259_s9 + $0xd8] sm:$0xff] }
 0x7af   :  { %9164 = vmatprep.subr.bf16.mxu1 %v19742_v12  ;;  %v10397_v12 = vld [vmem:[%s28259_s9 + $0x50] sm:$0xff] }
 0x7b0   :  { %10071 = vmatmul.mubr.bf16.vlgmr.msra.gmra.mrb[108].mxu0 %v23033_v63  ;;  %v10391_v63 = vld [vmem:[%s28259_s9 + $0x20] sm:$0xff]  ;;  %v25835_v58 = vpack.c.bf16 %v10398_v34, %v10397_v12 }
 0x7b1   :  { %16013 = vmatprep.mubr.msk.bf16.mxu0 %vm1690_vm13, %v23648_v23  ;;  %17623 = vmatpush3.bf16.msra.mxu0 %v25708_v29  ;;  %v10392_v23 = vld [vmem:[%s28259_s9 + $0x28] sm:$0xff] }
 0x7b2   :  { %9165 = vmatpush1.bf16.msra.mxu1 %v19740_v15  ;;  %17625 = vmatprep.subr.bf16.mxu0 %v25714_v33  ;;  %v25759_v41 = vpack.c.bf16 %v10392_v23, %v10391_v63  ;;  %v25825_v15 = vpack.c.bf16 %v10414_v46, %v10413_v30  ;;  %v10417_v63 = vld [vmem:[%s28259_s9 + $0xf0] sm:$0xff]  ;;  %v10418_v23 = vld [vmem:[%s28259_s9 + $0xf8] sm:$0xff] }
 0x7b3   :  { %9166 = vmatprep.subr.bf16.mxu1 %v19745_v21  ;;  %v10194_v21 = vrot.slane %v10193_v42, 2  ;;  %v25867_v16 = vpack.c.bf16 %v10418_v23, %v10417_v63  ;;  %v10437_v30 = vld [vmem:[%s28259_s9 + $0x190] sm:$0xff]  ;;  %v10438_v46 = vld [vmem:[%s28259_s9 + $0x198] sm:$0xff]  ;;  %v10439_v63 = vld [vmem:[%s28259_s9 + $0x1a0] sm:$0xff] }
 0x7b4   :  { %v10440_v23 = vld [vmem:[%s28259_s9 + $0x1a8] sm:$0xff] }
 0x7b5   :  { %17627 = vmatpush3.bf16.msra.mxu0 %v25735_v44  ;;  %v10195_v32 = vadd.f32 %v10194_v21, %v10193_v42  ;;  %v19764_v21 = vld [vmem:[%s28256_s6 + $0xcd0] ss:$24 sps:$4 sm:$0xff]  }
 0x7b6   :  { %9167 = vmatpush1.bf16.msra.mxu1 %v19743_v35  ;;  %17629 = vmatprep.subr.bf16.mxu0 %v25741_v24  ;;  %v10399_v35 = vld [vmem:[%s28259_s9 + $0x60] sm:$0xff] }
 0x7b7   :  { %9168 = vmatprep.subr.bf16.mxu1 %v19748_v45  ;;  %v10196_v40 = vrot.slane %v10195_v32, 1 }
 0x7b8   :  { %10079 = vmatmul.mubr.bf16.gmra.mrb[112].mxu0 %v23679_v18  ;;  %v10396_v18 = vld [vmem:[%s28259_s9 + $0x48] sm:$0xff] }
 0x7b9   :  { %17631 = vmatpush3.bf16.msra.mxu0 %v25759_v41  ;;  %10542 = vmatprep.mubr.f32.mxu0 %v10204_v48  ;;  %v25810_v47 = vpack.c.bf16 %v10396_v18, %v10395_v14  ;;  %v10436_v48 = vld [vmem:[%s28259_s9 + $0x188] sm:$0xff] }
 0x7ba   :  { %9169 = vmatpush1.bf16.msra.mxu1 %v19746_v49  ;;  %17633 = vmatprep.subr.bf16.mxu0 %v25765_v3  ;;  %v10401_v49 = vld [vmem:[%s28259_s9 + $0x70] sm:$0xff]  ;;  %v25891_v11 = vpack.c.bf16 %v10436_v48, %v10435_v0  ;;  %v10420_v14 = vld [vmem:[%s28259_s9 + $0x108] sm:$0xff]  ;;  %v10423_v0 = vld [vmem:[%s28259_s9 + $0x120] sm:$0xff] }
 0x7bb   :  { %9170 = vmatprep.subr.bf16.mxu1 %v19751_v52  ;;  %v25885_v52 = vpack.c.bf16 %v10402_v38, %v10401_v49  ;;  %v19767_v38 = vld [vmem:[%s28256_s6 + $0xd00] ss:$24 sps:$4 sm:$0xff]   ;;  %v10424_v48 = vld [vmem:[%s28259_s9 + $0x128] sm:$0xff] }
 0x7bd   :  { %17635 = vmatpush3.bf16.msra.mxu0 %v25786_v61 }
 0x7be   :  { %9171 = vmatpush1.bf16.msra.mxu1 %v19749_v31  ;;  %17637 = vmatprep.subr.bf16.mxu0 %v25792_v54  ;;  %v10419_v31 = vld [vmem:[%s28259_s9 + $0x100] sm:$0xff] }
 0x7bf   :  { %9181 = vmatprep.subr.bf16.mxu1 %v19754_v25  ;;  %v19766_v25 = vld [vmem:[%s28256_s6 + $0xcd4] ss:$24 sps:$4 sm:$0xff]   ;;  %v25915_v34 = vpack.c.bf16 %v10420_v14, %v10419_v31  ;;  %v10442_v14 = vld [vmem:[%s28259_s9 + $0x1b8] sm:$0xff] }
 0x7c0   :  { %v10441_v31 = vld [vmem:[%s28259_s9 + $0x1b0] sm:$0xff] }
 0x7c1   :  { %9173 = vmatmul.mubr.bf16.vlgmr.msra.gmra.mrb[60].mxu1 %v24781_v17  ;;  %17639 = vmatpush3.bf16.msra.mxu0 %v25810_v47  ;;  %v10400_v17 = vld [vmem:[%s28259_s9 + $0x68] sm:$0xff] }
 0x7c2   :  { %9182 = vmatpush1.bf16.msra.mxu1 %v19752_v5  ;;  %15933 = vmatprep.mubr.msk.bf16.mxu1 %vm1690_vm13, %v24789_v39  ;;  %v19760_v39 = vld [vmem:[%s28256_s6 + $0xc74] ss:$24 sps:$4 sm:$0xff]   ;;  %v25861_v45 = vpack.c.bf16 %v10400_v17, %v10399_v35  ;;  %v10422_v17 = vld [vmem:[%s28259_s9 + $0x118] sm:$0xff] }
 0x7c3   :  { %9183 = vmatprep.subr.bf16.mxu1 %v19757_v43  ;;  %17641 = vmatprep.subr.bf16.mxu0 %v25825_v15  ;;  %v10197_v43 = vadd.f32 %v10196_v40, %v10195_v32  ;;  %v10421_v35 = vld [vmem:[%s28259_s9 + $0x110] sm:$0xff] }
 0x7c4   :  { %v19772_v40 = vld [vmem:[%s28256_s6 + $0xd34] ss:$24 sps:$4 sm:$0xff]  }
 0x7c5   :  { %17643 = vmatpush3.bf16.msra.mxu0 %v25835_v58 }
 0x7c6   :  { %9184 = vmatpush1.bf16.msra.mxu1 %v19755_v27  ;;  %17645 = vmatprep.subr.bf16.mxu0 %v25842_v37  ;;  %v25921_v27 = vpack.c.bf16 %v10438_v46, %v10437_v30  ;;  %v19770_v30 = vld [vmem:[%s28256_s6 + $0xd30] ss:$24 sps:$4 sm:$0xff]  }
 0x7c7   :  { %9185 = vmatprep.subr.bf16.mxu1 %v19760_v39  ;;  %v19769_v39 = vld [vmem:[%s28256_s6 + $0xd04] ss:$24 sps:$4 sm:$0xff]  }
 0x7c9   :  { %17647 = vmatpush3.bf16.msra.mxu0 %v25861_v45 }
 0x7ca   :  { %9186 = vmatpush1.bf16.msra.mxu1 %v19758_v4  ;;  %17649 = vmatprep.subr.bf16.mxu0 %v25867_v16  ;;  %v25939_v4 = vpack.c.bf16 %v10422_v17, %v10421_v35  ;;  %v10444_v35 = vld [vmem:[%s28259_s9 + $0x1c8] sm:$0xff] }
 0x7cb   :  { %v25899_v18 = vpop.f32.mrb[72].mxu0  ;;  %9187 = vmatprep.subr.bf16.mxu1 %v19763_v10  ;;  %v25945_v10 = vpack.c.bf16 %v10440_v23, %v10439_v63  ;;  %v19773_v23 = vld [vmem:[%s28256_s6 + $0xd60] ss:$24 sps:$4 sm:$0xff]  }
 0x7cc   :  { %v25910_v42 = vpop.f32.mrb[73].mxu0 }
 0x7cd   :  { %v10212_v5 = vsel %vm183_vm0, %v25910_v42, 0.0  ;;  %v9014_v12 = vpop.f32.mrb[74].mxu0  ;;  %17651 = vmatpush3.bf16.msra.mxu0 %v25885_v52 }
 0x7ce   :  { %v10213_v53 = vrot.slane %v10212_v5, 4  ;;  %9188 = vmatpush1.bf16.msra.mxu1 %v19761_v13  ;;  %v9015_v7 = vpop.f32.mrb[75].mxu0  ;;  %17653 = vmatprep.subr.bf16.mxu0 %v25891_v11  ;;  %v10426_v12 = vld [vmem:[%s28259_s9 + $0x138] sm:$0xff] }
 0x7cf   :  { %9189 = vmatprep.subr.bf16.mxu1 %v19766_v25  ;;  %v25963_v25 = vpack.c.bf16 %v10424_v48, %v10423_v0  ;;  %v25980_v7 = vpack.c.bf16 %v10442_v14, %v10441_v31  ;;  %v19778_v0 = vld [vmem:[%s28256_s6 + $0xd94] ss:$24 sps:$4 sm:$0xff]   ;;  %v19776_v14 = vld [vmem:[%s28256_s6 + $0xd90] ss:$24 sps:$4 sm:$0xff]  }
 0x7d0   :  { %v10214_v32 = vadd.f32 %v10213_v53, %v10212_v5  ;;  %10543 = vmatmul.mubr.f32.vlgmr.msra.gmra.mrb[116].mxu0 %v10197_v43  ;;  %v10425_v5 = vld [vmem:[%s28259_s9 + $0x130] sm:$0xff]  ;;  %v10205_v43 = vsel %vm183_vm0, %v25899_v18, 0.0  ;;  %v19775_v53 = vld [vmem:[%s28256_s6 + $0xd64] ss:$24 sps:$4 sm:$0xff]  }
 0x7d1   :  { %17655 = vmatpush3.bf16.msra.mxu0 %v25915_v34  ;;  %v10206_v63 = vrot.slane %v10205_v43, 4  ;;  %v10445_v48 = vld [vmem:[%s28259_s9 + $0x1d0] sm:$0xff] }
 0x7d2   :  { %v10215_v49 = vrot.slane %v10214_v32, 2  ;;  %9190 = vmatpush1.bf16.msra.mxu1 %v19764_v21  ;;  %17657 = vmatprep.subr.bf16.mxu0 %v25921_v27  ;;  %v10443_v21 = vld [vmem:[%s28259_s9 + $0x1c0] sm:$0xff] }
 0x7d3   :  { %9191 = vmatprep.subr.bf16.mxu1 %v19769_v39  ;;  %v25989_v39 = vpack.c.bf16 %v10426_v12, %v10425_v5  ;;  %v10207_v31 = vadd.f32 %v10206_v63, %v10205_v43  ;;  %v10430_v5 = vld [vmem:[%s28259_s9 + $0x158] sm:$0xff]  ;;  %v10447_v43 = vld [vmem:[%s28259_s9 + $0x1e0] sm:$0xff] }
 0x7d4   :  { %v10216_v13 = vadd.f32 %v10215_v49, %v10214_v32  ;;  %v25994_v32 = vpack.c.bf16 %v10444_v35, %v10443_v21  ;;  %v10427_v49 = vld [vmem:[%s28259_s9 + $0x140] sm:$0xff] }
 0x7d5   :  { %17659 = vmatpush3.bf16.msra.mxu0 %v25939_v4  ;;  %v19781_v12 = vld [vmem:[%s28256_s6 + $0xdc4] ss:$24 sps:$4 sm:$0xff]   ;;  %v10208_v35 = vrot.slane %v10207_v31, 2 }
 0x7d6   :  { %9192 = vmatpush1.bf16.msra.mxu1 %v19767_v38  ;;  %17661 = vmatprep.subr.bf16.mxu0 %v25945_v10  ;;  %v10217_v46 = vrot.slane %v10216_v13, 1  ;;  %v10428_v38 = vld [vmem:[%s28259_s9 + $0x148] sm:$0xff] }
 0x7d7   :  { %9193 = vmatprep.subr.bf16.mxu1 %v19772_v40  ;;  %v10446_v40 = vld [vmem:[%s28259_s9 + $0x1d8] sm:$0xff] }
 0x7d8   :  { %v10218_v17 = vadd.f32 %v10217_v46, %v10216_v13  ;;  %v26013_v13 = vpack.c.bf16 %v10428_v38, %v10427_v49  ;;  %v10429_v46 = vld [vmem:[%s28259_s9 + $0x150] sm:$0xff]  ;;  %v10432_v49 = vld [vmem:[%s28259_s9 + $0x168] sm:$0xff] }
 0x7d9   :  { %17663 = vmatpush3.bf16.msra.mxu0 %v25963_v25  ;;  %v26037_v21 = vpack.c.bf16 %v10430_v5, %v10429_v46  ;;  %v19784_v38 = vld [vmem:[%s28256_s6 + $0xdf4] ss:$24 sps:$4 sm:$0xff]   ;;  %v10209_v46 = vadd.f32 %v10208_v35, %v10207_v31  ;;  %v19782_v5 = vld [vmem:[%s28256_s6 + $0xdf0] ss:$24 sps:$4 sm:$0xff]   ;;  %v19787_v31 = vld [vmem:[%s28256_s6 + $0xe24] ss:$24 sps:$4 sm:$0xff]  }
 0x7da   :  { %9194 = vmatpush1.bf16.msra.mxu1 %v19770_v30  ;;  %10612 = vmatprep.mubr.f32.mxu0 %v10218_v17  ;;  %v26019_v30 = vpack.c.bf16 %v10446_v40, %v10445_v48  ;;  %v19779_v17 = vld [vmem:[%s28256_s6 + $0xdc0] ss:$24 sps:$4 sm:$0xff]   ;;  %v10098_v40 = vrot.slane %v24421_v26, 4 }
 0x7db   :  { %9195 = vmatprep.subr.bf16.mxu1 %v19775_v53  ;;  %17665 = vmatprep.subr.bf16.mxu0 %v25980_v7  ;;  %v10448_v53 = vld [vmem:[%s28259_s9 + $0x1e8] sm:$0xff]  ;;  %28570 = vst [vmem:[#allocation23_spill] sm:$0xff] %v26037_v21  ;;  %v10450_v48 = vld [vmem:[%s28259_s9 + $0x1f8] sm:$0xff] }
 0x7dc   :  { %v26043_v63 = vpack.c.bf16 %v10448_v53, %v10447_v43  ;;  %v10433_v43 = vld [vmem:[%s28259_s9 + $0x170] sm:$0xff]  ;;  %v10434_v53 = vld [vmem:[%s28259_s9 + $0x178] sm:$0xff]  ;;  %v10099_v35 = vadd.f32 %v10098_v40, %v24421_v26 }
 0x7dd   :  { %17667 = vmatpush3.bf16.msra.mxu0 %v25989_v39 }
 0x7de   :  { %9196 = vmatpush1.bf16.msra.mxu1 %v19773_v23  ;;  %17669 = vmatprep.subr.bf16.mxu0 %v25994_v32  ;;  %28571 = vst [vmem:[#allocation25_spill] sm:$0xff] %v26043_v63  ;;  %v10431_v23 = vld [vmem:[%s28259_s9 + $0x160] sm:$0xff]  ;;  %v10100_v26 = vrot.slane %v10099_v35, 2 }
 0x7df   :  { %9197 = vmatprep.subr.bf16.mxu1 %v19778_v0  ;;  %v10449_v0 = vld [vmem:[%s28259_s9 + $0x1f0] sm:$0xff] }
 0x7e1   :  { %17671 = vmatpush3.bf16.msra.mxu0 %v26013_v13 }
 0x7e2   :  { %9198 = vmatpush1.bf16.msra.mxu1 %v19776_v14  ;;  %17673 = vmatprep.subr.bf16.mxu0 %v26019_v30  ;;  %v26062_v14 = vpack.c.bf16 %v10432_v49, %v10431_v23  ;;  %v10210_v23 = vrot.slane %v10209_v46, 1  ;;  %v19785_v49 = vld [vmem:[%s28256_s6 + $0xe20] ss:$24 sps:$4 sm:$0xff]  }
 0x7e3   :  { %9199 = vmatprep.subr.bf16.mxu1 %v19781_v12  ;;  %v26068_v12 = vpack.c.bf16 %v10450_v48, %v10449_v0 }
 0x7e4   :  { %28572 = vst [vmem:[#allocation24_spill] sm:$0xff] %v26062_v14 }
 0x7e5   :  { %17675 = vmatpush3.bf16.msra.mxu0 %v26037_v21  ;;  %28573 = vst [vmem:[#allocation27_spill] sm:$0xff] %v26068_v12 }
 0x7e6   :  { %9200 = vmatpush1.bf16.msra.mxu1 %v19779_v17  ;;  %17677 = vmatprep.subr.bf16.mxu0 %v26043_v63  ;;  %v26081_v17 = vpack.c.bf16 %v10434_v53, %v10433_v43 }
 0x7e7   :  { %9201 = vmatprep.subr.bf16.mxu1 %v19784_v38  ;;  %v19790_v38 = vld [vmem:[%s28256_s6 + $0xe54] ss:$24 sps:$4 sm:$0xff]  }
 0x7e8   :  { %28574 = vst [vmem:[#allocation29_spill] sm:$0xff] %v26081_v17 }
 0x7e9   :  { %17679 = vmatpush3.bf16.msra.mxu0 %v26062_v14  ;;  %v10321_v14 = vld [vmem:[%s28258_s8 + $0x70] sm:$0xff] }
 0x7ea   :  { %9202 = vmatpush1.bf16.msra.mxu1 %v19782_v5  ;;  %17681 = vmatprep.subr.bf16.mxu0 %v26068_v12  ;;  %v10211_v5 = vadd.f32 %v10210_v23, %v10209_v46  ;;  %v10323_v46 = vld [vmem:[%s28258_s8 + $0x80] sm:$0xff]  ;;  %v10324_v23 = vld [vmem:[%s28258_s8 + $0x88] sm:$0xff] }
 0x7eb   :  { %v16822_v0 = vpop.f32.mrb[76].mxu0  ;;  %9203 = vmatprep.subr.bf16.mxu1 %v19787_v31 }
 0x7ec   :  { %v16823_v48 = vpop.f32.mrb[77].mxu0 }
 0x7ed   :  { %v26090_v40 = vadd.f32 %v16823_v48, %v16822_v0  ;;  %v16825_v43 = vpop.f32.mrb[78].mxu0  ;;  %17683 = vmatpush3.bf16.msra.mxu0 %v26081_v17  ;;  %v19793_v0 = vld [vmem:[%s28256_s6 + $0xe84] ss:$24 sps:$4 sm:$0xff]   ;;  %v19791_v48 = vld [vmem:[%s28256_s6 + $0xe80] ss:$24 sps:$4 sm:$0xff]  }
 0x7ee   :  { %9204 = vmatpush1.bf16.msra.mxu1 %v19785_v49  ;;  %v16826_v53 = vpop.f32.mrb[79].mxu0  ;;  %17684 = vmatprep.subr.bf16.mxu0 %v28465_v22  ;;  %v10101_v49 = vadd.f32 %v10100_v26, %v10099_v35  ;;  %v10326_v35 = vld [vmem:[%s28258_s8 + $0x98] sm:$0xff] }
 0x7ef   :  { %v26097_v31 = vadd.f32 %v16826_v53, %v16825_v43  ;;  %9205 = vmatprep.subr.bf16.mxu1 %v19790_v38  ;;  %v26111_v43 = vpack.c.bf16 %v10324_v23, %v10323_v46  ;;  %v10308_v53 = vld [vmem:[%s28258_s8 + $0x8] sm:$0xff]  ;;  %v10310_v17 = vld [vmem:[%s28258_s8 + $0x18] sm:$0xff] }
 0x7f0   :  { %10613 = vmatmul.mubr.f32.vlgmr.msra.gmra.mrb[118].mxu0 %v10211_v5  ;;  %v10307_v5 = vld [vmem:[%s28258_s8] sm:$0xff]  ;;  %v10102_v59 = vrot.slane %v10101_v49, 1 }
 0x7f1   :  { %28575 = vst [vmem:[#allocation28_spill] sm:$0xff] %v26111_v43  ;;  %v26127_v23 = vpack.c.bf16 %v10308_v53, %v10307_v5  ;;  %v10313_v53 = vld [vmem:[%s28258_s8 + $0x30] sm:$0xff] }
 0x7f2   :  { %9206 = vmatpush1.bf16.msra.mxu1 %v19788_v51  ;;  %v10325_v51 = vld [vmem:[%s28258_s8 + $0x90] sm:$0xff]  ;;  %v10103_v12 = vadd.f32 %v10102_v59, %v10101_v49  ;;  %v10311_v59 = vld [vmem:[%s28258_s8 + $0x20] sm:$0xff]  ;;  %v10312_v49 = vld [vmem:[%s28258_s8 + $0x28] sm:$0xff] }
 0x7f3   :  { %v16828_v38 = vpop.f32.mrb[80].mxu0  ;;  %9207 = vmatprep.subr.bf16.mxu1 %v19793_v0  ;;  %28576 = vst [vmem:[#allocation31_spill] sm:$0xff] %v26127_v23  ;;  %v26130_v50 = vpack.c.bf16 %v10326_v35, %v10325_v51  ;;  %v10314_v51 = vld [vmem:[%s28258_s8 + $0x38] sm:$0xff]  ;;  %v10331_v35 = vld [vmem:[%s28258_s8 + $0xc0] sm:$0xff] }
 0x7f4   :  { %v16829_v19 = vpop.f32.mrb[81].mxu0 }
 0x7f5   :  { %v26125_v26 = vadd.f32 %v16829_v19, %v16828_v38  ;;  %v16831_v0 = vpop.f32.mrb[82].mxu0  ;;  %28577 = vst [vmem:[#allocation33_spill] sm:$0xff] %v26130_v50  ;;  %v10327_v19 = vld [vmem:[%s28258_s8 + $0xa0] sm:$0xff]  ;;  %v26146_v38 = vpack.c.bf16 %v10310_v17, %v10309_v1  ;;  %v10330_v1 = vld [vmem:[%s28258_s8 + $0xb8] sm:$0xff] }
 0x7f6   :  { %9208 = vmatpush1.bf16.msra.mxu1 %v19791_v48  ;;  %v16832_v46 = vpop.f32.mrb[83].mxu0  ;;  %v10328_v48 = vld [vmem:[%s28258_s8 + $0xa8] sm:$0xff] }
 0x7f7   :  { %17721 = vmatprep.subr.bf16.mxu1 %v26111_v43  ;;  %28578 = vst [vmem:[#allocation32_spill] sm:$0xff] %v26146_v38  ;;  %v26149_v5 = vpack.c.bf16 %v10328_v48, %v10327_v19  ;;  %v10332_v0 = vld [vmem:[%s28258_s8 + $0xc8] sm:$0xff]  ;;  %v26182_v46 = vpack.c.bf16 %v10314_v51, %v10313_v53  ;;  %v10089_v19 = vrot.slane %v24405_v6, 4  ;;  %v10334_v53 = vld [vmem:[%s28258_s8 + $0xd8] sm:$0xff] }
 0x7f8   :  { %v26186_v48 = vpack.c.bf16 %v10332_v0, %v10331_v35 }
 0x7f9   :  { %9214 = vmatmul.mubr.bf16.vlgmr.msra.gmra.mrb[60].mxu1 %v24967_v28  ;;  %28579 = vst [vmem:[#allocation35_spill] sm:$0xff] %v26149_v5  ;;  %v10329_v28 = vld [vmem:[%s28258_s8 + $0xb0] sm:$0xff]  ;;  %28582 = vst [vmem:[#allocation39_spill] sm:$0xff] %v26182_v46  ;;  %v10090_v35 = vadd.f32 %v10089_v19, %v24405_v6  ;;  %v10336_v6 = vld [vmem:[%s28258_s8 + $0xe8] sm:$0xff] }
 0x7fa   :  { %17723 = vmatpush3.bf16.msra.mxu1 %v26127_v23  ;;  %10752 = vmatprep.mubr.f32.mxu1 %v10103_v12  ;;  %v26164_v12 = vpack.c.bf16 %v10312_v49, %v10311_v59  ;;  %v26167_v17 = vpack.c.bf16 %v10330_v1, %v10329_v28  ;;  %28583 = vst [vmem:[#allocation41_spill] sm:$0xff] %v26186_v48  ;;  %v10315_v59 = vld [vmem:[%s28258_s8 + $0x40] sm:$0xff]  ;;  %v10316_v49 = vld [vmem:[%s28258_s8 + $0x48] sm:$0xff]  ;;  %v10116_v28 = vrot.slane %v24441_v57, 4  ;;  %v10333_v1 = vld [vmem:[%s28258_s8 + $0xd0] sm:$0xff] }
 0x7fb   :  { %17725 = vmatprep.subr.bf16.mxu1 %v26130_v50  ;;  %v26202_v51 = vpack.c.bf16 %v10316_v49, %v10315_v59  ;;  %v26206_v0 = vpack.c.bf16 %v10334_v53, %v10333_v1  ;;  %v10335_v59 = vld [vmem:[%s28258_s8 + $0xe0] sm:$0xff]  ;;  %v10091_v49 = vrot.slane %v10090_v35, 2 }
 0x7fc   :  { %28580 = vst [vmem:[#allocation37_spill] sm:$0xff] %v26164_v12  ;;  %28581 = vst [vmem:[#allocation36_spill] sm:$0xff] %v26167_v17  ;;  %v26225_v53 = vpack.c.bf16 %v10336_v6, %v10335_v59 }
 0x7fd   :  { %28584 = vst [vmem:[#allocation40_spill] sm:$0xff] %v26202_v51  ;;  %28585 = vst [vmem:[#allocation43_spill] sm:$0xff] %v26206_v0 }
 0x7fe   :  { %17727 = vmatpush3.bf16.msra.mxu1 %v26146_v38  ;;  %28587 = vst [vmem:[#allocation44_spill] sm:$0xff] %v26225_v53  ;;  %v10092_v38 = vadd.f32 %v10091_v49, %v10090_v35  ;;  %v10355_v35 = vld [vmem:[%s28258_s8 + $0x180] sm:$0xff] }
 0x7ff   :  { %17729 = vmatprep.subr.bf16.mxu1 %v26149_v5  ;;  %v10117_v5 = vadd.f32 %v10116_v28, %v24441_v57  ;;  %v10319_v57 = vld [vmem:[%s28258_s8 + $0x60] sm:$0xff]  ;;  %v10320_v28 = vld [vmem:[%s28258_s8 + $0x68] sm:$0xff] }
 0x802   :  { %17731 = vmatpush3.bf16.msra.mxu1 %v26164_v12  ;;  %v10318_v12 = vld [vmem:[%s28258_s8 + $0x58] sm:$0xff] }
 0x803   :  { %17733 = vmatprep.subr.bf16.mxu1 %v26167_v17  ;;  %v10317_v17 = vld [vmem:[%s28258_s8 + $0x50] sm:$0xff] }
 0x804   :  { %v26222_v19 = vpack.c.bf16 %v10318_v12, %v10317_v17  ;;  %v10337_v12 = vld [vmem:[%s28258_s8 + $0xf0] sm:$0xff]  ;;  %v10338_v17 = vld [vmem:[%s28258_s8 + $0xf8] sm:$0xff] }
 0x805   :  { %v26246_v43 = vpack.c.bf16 %v10338_v17, %v10337_v12  ;;  %v10339_v17 = vld [vmem:[%s28258_s8 + $0x100] sm:$0xff] }
 0x806   :  { %17735 = vmatpush3.bf16.msra.mxu1 %v26182_v46  ;;  %28586 = vst [vmem:[#allocation45_spill] sm:$0xff] %v26222_v19  ;;  %v26240_v46 = vpack.c.bf16 %v10320_v28, %v10319_v57  ;;  %v10093_v28 = vrot.slane %v10092_v38, 1 }
 0x807   :  { %17737 = vmatprep.subr.bf16.mxu1 %v26186_v48  ;;  %28589 = vst [vmem:[#allocation52_spill] sm:$0xff] %v26246_v43 }
 0x808   :  { %28588 = vst [vmem:[#allocation48_spill] sm:$0xff] %v26240_v46 }
 0x80a   :  { %17739 = vmatpush3.bf16.msra.mxu1 %v26202_v51 }
 0x80b   :  { %v16850_v1 = vpop.f32.mrb[84].mxu0  ;;  %17741 = vmatprep.subr.bf16.mxu1 %v26206_v0  ;;  %v10118_v0 = vrot.slane %v10117_v5, 2 }
 0x80c   :  { %v16851_v48 = vpop.f32.mrb[85].mxu0 }
 0x80d   :  { %v16852_v59 = vadd.f32 %v16851_v48, %v16850_v1  ;;  %v16853_v6 = vpop.f32.mrb[86].mxu0  ;;  %v10322_v48 = vld [vmem:[%s28258_s8 + $0x78] sm:$0xff] }
 0x80e   :  { %17743 = vmatpush3.bf16.msra.mxu1 %v26222_v19  ;;  %v16854_v51 = vpop.f32.mrb[87].mxu0  ;;  %v26264_v1 = vpack.c.bf16 %v10322_v48, %v10321_v14  ;;  %v10357_v14 = vld [vmem:[%s28258_s8 + $0x190] sm:$0xff] }
 0x80f   :  { %v26243_v50 = vadd.f32 %v16852_v59, %v26090_v40  ;;  %v16855_v23 = vadd.f32 %v16854_v51, %v16853_v6  ;;  %17745 = vmatprep.subr.bf16.mxu1 %v26225_v53  ;;  %v10356_v40 = vld [vmem:[%s28258_s8 + $0x188] sm:$0xff]  ;;  %v10119_v51 = vadd.f32 %v10118_v0, %v10117_v5  ;;  %v10358_v0 = vld [vmem:[%s28258_s8 + $0x198] sm:$0xff]  ;;  %v10341_v53 = vld [vmem:[%s28258_s8 + $0x110] sm:$0xff] }
 0x810   :  { %28590 = vst [vmem:[#allocation50_spill] sm:$0xff] %v26264_v1  ;;  %v26267_v12 = vpack.c.bf16 %v10356_v40, %v10355_v35  ;;  %v10340_v5 = vld [vmem:[%s28258_s8 + $0x108] sm:$0xff] }
 0x811   :  { %v26261_v49 = vadd.f32 %v16855_v23, %v26097_v31  ;;  %v10120_v23 = vrot.slane %v10119_v51, 1  ;;  %v26282_v35 = vpack.c.bf16 %v10340_v5, %v10339_v17  ;;  %v10359_v17 = vld [vmem:[%s28258_s8 + $0x1a0] sm:$0xff]  ;;  %v10344_v5 = vld [vmem:[%s28258_s8 + $0x128] sm:$0xff] }
 0x812   :  { %17747 = vmatpush3.bf16.msra.mxu1 %v26240_v46  ;;  %28591 = vst [vmem:[#allocation56_spill] sm:$0xff] %v26267_v12  ;;  %v26288_v46 = vpack.c.bf16 %v10358_v0, %v10357_v14 }
 0x813   :  { %v16856_v57 = vpop.f32.mrb[88].mxu0  ;;  %17749 = vmatprep.subr.bf16.mxu1 %v26246_v43  ;;  %28592 = vst [vmem:[#allocation47_spill] sm:$0xff] %v26282_v35  ;;  %v10094_v43 = vadd.f32 %v10093_v28, %v10092_v38 }
 0x814   :  { %v16857_v31 = vpop.f32.mrb[89].mxu0  ;;  %28593 = vst [vmem:[#allocation49_spill] sm:$0xff] %v26288_v46 }
 0x815   :  { %v16858_v59 = vadd.f32 %v16857_v31, %v16856_v57  ;;  %v16859_v6 = vpop.f32.mrb[90].mxu0  ;;  %v10342_v57 = vld [vmem:[%s28258_s8 + $0x118] sm:$0xff]  ;;  %v10121_v31 = vadd.f32 %v10120_v23, %v10119_v51  ;;  %v10343_v51 = vld [vmem:[%s28258_s8 + $0x120] sm:$0xff]  ;;  %v10235_v23 = vmul.f32 %v25624_v8, %v25624_v8 }
 0x816   :  { %17751 = vmatpush3.bf16.msra.mxu1 %v26264_v1  ;;  %v16860_v48 = vpop.f32.mrb[91].mxu0  ;;  %v26303_v38 = vpack.c.bf16 %v10342_v57, %v10341_v53  ;;  %v10362_v53 = vld [vmem:[%s28258_s8 + $0x1b8] sm:$0xff]  ;;  %v26323_v14 = vpack.c.bf16 %v10344_v5, %v10343_v51  ;;  %v10363_v8 = vld [vmem:[%s28258_s8 + $0x1c0] sm:$0xff]  ;;  %v10348_v5 = vld [vmem:[%s28258_s8 + $0x148] sm:$0xff] }
 0x817   :  { %v26285_v40 = vadd.f32 %v16858_v59, %v26125_v26  ;;  %17753 = vmatprep.subr.bf16.mxu1 %v26267_v12  ;;  %v10360_v26 = vld [vmem:[%s28258_s8 + $0x1a8] sm:$0xff]  ;;  %v10345_v59 = vld [vmem:[%s28258_s8 + $0x130] sm:$0xff]  ;;  %v10346_v6 = vld [vmem:[%s28258_s8 + $0x138] sm:$0xff]  ;;  %v10247_v57 = vsel %vm183_vm0, %v10235_v23, 0.0 }
 0x818   :  { %28594 = vst [vmem:[#allocation53_spill] sm:$0xff] %v26303_v38  ;;  %v26306_v28 = vpack.c.bf16 %v10360_v26, %v10359_v17  ;;  %28596 = vst [vmem:[#allocation55_spill] sm:$0xff] %v26323_v14  ;;  %v10364_v48 = vld [vmem:[%s28258_s8 + $0x1c8] sm:$0xff]  ;;  %v10107_v17 = vrot.slane %v24419_v9, 4  ;;  %v10347_v51 = vld [vmem:[%s28258_s8 + $0x140] sm:$0xff] }
 0x819   :  { %10753 = vmatmul.mubr.f32.vlgmr.msra.gmra.mrb[64].mxu1 %v10094_v43  ;;  %v10361_v43 = vld [vmem:[%s28258_s8 + $0x1b0] sm:$0xff]  ;;  %v26346_v26 = vpack.c.bf16 %v10364_v48, %v10363_v8  ;;  %v10366_v23 = vld [vmem:[%s28258_s8 + $0x1d8] sm:$0xff]  ;;  %v26370_v48 = vpack.c.bf16 %v10348_v5, %v10347_v51 }
 0x81a   :  { %17755 = vmatpush3.bf16.msra.mxu1 %v26282_v35  ;;  %10822 = vmatprep.mubr.f32.mxu1 %v10121_v31  ;;  %28595 = vst [vmem:[#allocation30_spill] sm:$0xff] %v26306_v28  ;;  %v26326_v0 = vpack.c.bf16 %v10362_v53, %v10361_v43  ;;  %v26342_v31 = vpack.c.bf16 %v10346_v6, %v10345_v59  ;;  %v10248_v43 = vrot.slane %v10247_v57, 4  ;;  %v10365_v53 = vld [vmem:[%s28258_s8 + $0x1d0] sm:$0xff]  ;;  %v10451_v59 = vld [vmem:[%s28259_s9 + $0x200] sm:$0xff]  ;;  %v10452_v6 = vld [vmem:[%s28259_s9 + $0x208] sm:$0xff] }
 0x81b   :  { %17757 = vmatprep.subr.bf16.mxu1 %v26288_v46  ;;  %28599 = vst [vmem:[#allocation58_spill] sm:$0xff] %v26346_v26  ;;  %v10453_v8 = vld [vmem:[%s28259_s9 + $0x210] sm:$0xff]  ;;  %28600 = vst [vmem:[#allocation59_spill] sm:$0xff] %v26370_v48  ;;  %v10350_v51 = vld [vmem:[%s28258_s8 + $0x158] sm:$0xff] }
 0x81c   :  { %28597 = vst [vmem:[#allocation57_spill] sm:$0xff] %v26326_v0  ;;  %28598 = vst [vmem:[#allocation34_spill] sm:$0xff] %v26342_v31  ;;  %v10349_v46 = vld [vmem:[%s28258_s8 + $0x150] sm:$0xff]  ;;  %v10249_v5 = vadd.f32 %v10248_v43, %v10247_v57  ;;  %v10456_v57 = vld [vmem:[%s28259_s9 + $0x228] sm:$0xff] }
 0x81d   :  { %v26404_v43 = vpack.c.bf16 %v10350_v51, %v10349_v46  ;;  %v10369_v46 = vld [vmem:[%s28258_s8 + $0x1f0] sm:$0xff]  ;;  %v10370_v51 = vld [vmem:[%s28258_s8 + $0x1f8] sm:$0xff] }
 0x81e   :  { %17759 = vmatpush3.bf16.msra.mxu1 %v26303_v38  ;;  %v26379_v38 = vpack.c.bf16 %v10366_v23, %v10365_v53  ;;  %v10455_v53 = vld [vmem:[%s28259_s9 + $0x220] sm:$0xff]  ;;  %v10458_v12 = vld [vmem:[%s28259_s9 + $0x238] sm:$0xff] }
 0x81f   :  { %17761 = vmatprep.subr.bf16.mxu1 %v26306_v28  ;;  %v10108_v28 = vadd.f32 %v10107_v17, %v24419_v9  ;;  %v10368_v9 = vld [vmem:[%s28258_s8 + $0x1e8] sm:$0xff]  ;;  %28602 = vst [vmem:[#allocation60_spill] sm:$0xff] %v26404_v43 }
 0x820   :  { %28601 = vst [vmem:[#allocation42_spill] sm:$0xff] %v26379_v38 }
 0x821   :  { %v10109_v23 = vrot.slane %v10108_v28, 2 }
 0x822   :  { %17763 = vmatpush3.bf16.msra.mxu1 %v26323_v14  ;;  %v10454_v14 = vld [vmem:[%s28259_s9 + $0x218] sm:$0xff] }
 0x823   :  { %17765 = vmatprep.subr.bf16.mxu1 %v26326_v0  ;;  %v26372_v0 = vpack.c.bf16 %v10452_v6, %v10451_v59  ;;  %v10367_v59 = vld [vmem:[%s28258_s8 + $0x1e0] sm:$0xff]  ;;  %v26394_v17 = vpack.c.bf16 %v10454_v14, %v10453_v8  ;;  %v10110_v63 = vadd.f32 %v10109_v23, %v10108_v28 }
 0x824   :  { %v26407_v14 = vpack.c.bf16 %v10368_v9, %v10367_v59  ;;  %v10351_v8 = vld [vmem:[%s28258_s8 + $0x160] sm:$0xff]  ;;  %v26422_v59 = vpack.c.bf16 %v10456_v57, %v10455_v53  ;;  %v26438_v57 = vpack.c.bf16 %v10370_v51, %v10369_v46  ;;  %v10461_v46 = vld [vmem:[%s28259_s9 + $0x250] sm:$0xff] }
 0x825   :  { %17686 = vmatpush1.bf16.msra.mxu0 %v26372_v0 }
 0x826   :  { %17767 = vmatpush3.bf16.msra.mxu1 %v26342_v31  ;;  %17687 = vmatprep.subr.bf16.mxu0 %v28465_v22  ;;  %v10250_v31 = vrot.slane %v10249_v5, 2 }
 0x827   :  { %17769 = vmatprep.subr.bf16.mxu1 %v26346_v26  ;;  %v10352_v26 = vld [vmem:[%s28258_s8 + $0x168] sm:$0xff] }
 0x828   :  { %v26432_v19 = vpack.c.bf16 %v10352_v26, %v10351_v8  ;;  %v10251_v21 = vadd.f32 %v10250_v31, %v10249_v5 }
 0x829   :  { %17689 = vmatpush1.bf16.msra.mxu0 %v26394_v17 }
 0x82a   :  { %17771 = vmatpush3.bf16.msra.mxu1 %v26370_v48  ;;  %17690 = vmatprep.subr.bf16.mxu0 %v28465_v22  ;;  %v10457_v48 = vld [vmem:[%s28259_s9 + $0x230] sm:$0xff] }
 0x82b   :  { %v16878_v6 = vpop.f32.mrb[92].mxu0  ;;  %17773 = vmatprep.subr.bf16.mxu1 %v26379_v38  ;;  %v26447_v28 = vpack.c.bf16 %v10458_v12, %v10457_v48  ;;  %v10111_v12 = vrot.slane %v10110_v63, 1  ;;  %v10252_v48 = vrot.slane %v10251_v21, 1 }
 0x82c   :  { %v16879_v35 = vpop.f32.mrb[93].mxu0 }
 0x82d   :  { %v16880_v9 = vadd.f32 %v16879_v35, %v16878_v6  ;;  %v16881_v38 = vpop.f32.mrb[94].mxu0  ;;  %v10353_v6 = vld [vmem:[%s28258_s8 + $0x170] sm:$0xff]  ;;  %17692 = vmatpush1.bf16.msra.mxu0 %v26422_v59 }
 0x82e   :  { %17775 = vmatpush3.bf16.msra.mxu1 %v26404_v43  ;;  %v16882_v1 = vpop.f32.mrb[95].mxu0  ;;  %v10354_v43 = vld [vmem:[%s28258_s8 + $0x178] sm:$0xff]  ;;  %17693 = vmatprep.subr.bf16.mxu0 %v28465_v22 }
 0x82f   :  { %v26435_v53 = vadd.f32 %v16880_v9, %v26243_v50  ;;  %v16883_v35 = vadd.f32 %v16882_v1, %v16881_v38  ;;  %17777 = vmatprep.subr.bf16.mxu1 %v26407_v14  ;;  %v10459_v1 = vld [vmem:[%s28259_s9 + $0x240] sm:$0xff]  ;;  %v10460_v38 = vld [vmem:[%s28259_s9 + $0x248] sm:$0xff]  ;;  %v26460_v31 = vpack.c.bf16 %v10354_v43, %v10353_v6  ;;  %v10462_v43 = vld [vmem:[%s28259_s9 + $0x258] sm:$0xff]  ;;  %v10253_v6 = vadd.f32 %v10252_v48, %v10251_v21 }
 0x830   :  { %v26464_v5 = vpack.c.bf16 %v10460_v38, %v10459_v1  ;;  %v26477_v1 = vpack.c.bf16 %v10462_v43, %v10461_v46  ;;  %v10234_v38 = vmul.f32 %v25622_v2, %v25622_v2  ;;  %v10464_v2 = vld [vmem:[%s28259_s9 + $0x268] sm:$0xff] }
 0x831   :  { %v26450_v50 = vadd.f32 %v16883_v35, %v26261_v49  ;;  %17695 = vmatpush1.bf16.msra.mxu0 %v26447_v28  ;;  %v10112_v35 = vadd.f32 %v10111_v12, %v10110_v63 }
 0x832   :  { %17779 = vmatpush3.bf16.msra.mxu1 %v26432_v19  ;;  %17696 = vmatprep.subr.bf16.mxu0 %v28465_v22 }
 0x833   :  { %v16884_v26 = vpop.f32.mrb[96].mxu0  ;;  %17781 = vmatprep.subr.bf16.mxu1 %v26438_v57 }
 0x834   :  { %v16885_v49 = vpop.f32.mrb[97].mxu0 }
 0x835   :  { %v16886_v23 = vadd.f32 %v16885_v49, %v16884_v26  ;;  %v16887_v8 = vpop.f32.mrb[98].mxu0  ;;  %17698 = vmatpush1.bf16.msra.mxu0 %v26464_v5 }
 0x836   :  { %17783 = vmatpush3.bf16.msra.mxu1 %v26460_v31  ;;  %v16888_v51 = vpop.f32.mrb[99].mxu0  ;;  %17699 = vmatprep.subr.bf16.mxu0 %v28465_v22 }
 0x837   :  { %v9985_v9 = vadd.f32 %v16886_v23, %v26285_v40  ;;  %17809 = vmatprep.subr.bf16.mxu1 %v25691_v62  ;;  %v10240_v62 = vsel %vm183_vm0, %v10234_v38, 0.0  ;;  %v10472_v38 = vld [vmem:[%s28259_s9 + $0x2a8] sm:$0xff] }
 0x838   :  { %v10241_v21 = vrot.slane %v10240_v62, 4 }
 0x839   :  { %10823 = vmatmul.mubr.f32.vlgmr.msra.gmra.mrb[66].mxu1 %v10112_v35  ;;  %17701 = vmatpush1.bf16.msra.mxu0 %v26477_v1 }
 0x83a   :  { %17811 = vmatpush3.bf16.msra.mxu1 %v25708_v29  ;;  %10966 = vmatprep.mubr.f32.mxu1 %v10253_v6  ;;  %v10463_v29 = vld [vmem:[%s28259_s9 + $0x260] sm:$0xff] }
 0x83b   :  { %17813 = vmatprep.subr.bf16.mxu1 %v25714_v33  ;;  %17702 = vmatprep.subr.bf16.mxu0 %v28465_v22  ;;  %v26497_v33 = vpack.c.bf16 %v10464_v2, %v10463_v29 }
 0x83d   :  { %17704 = vmatpush1.bf16.msra.mxu0 %v26497_v33 }
 0x83e   :  { %17815 = vmatpush3.bf16.msra.mxu1 %v25735_v44  ;;  %v10465_v44 = vld [vmem:[%s28259_s9 + $0x270] sm:$0xff]  ;;  %17705 = vmatprep.subr.bf16.mxu0 %v28465_v22 }
 0x83f   :  { %17817 = vmatprep.subr.bf16.mxu1 %v25741_v24  ;;  %v10466_v24 = vld [vmem:[%s28259_s9 + $0x278] sm:$0xff] }
 0x842   :  { %17819 = vmatpush3.bf16.msra.mxu1 %v25759_v41  ;;  %v26507_v41 = vpack.c.bf16 %v10466_v24, %v10465_v44 }
 0x843   :  { %17821 = vmatprep.subr.bf16.mxu1 %v25765_v3  ;;  %v10242_v3 = vadd.f32 %v10241_v21, %v10240_v62  ;;  %v10473_v62 = vld [vmem:[%s28259_s9 + $0x2b0] sm:$0xff]  ;;  %v10474_v21 = vld [vmem:[%s28259_s9 + $0x2b8] sm:$0xff] }
 0x844   :  { %17707 = vmatpush1.bf16.msra.mxu0 %v26507_v41 }
 0x845   :  { %v10243_v63 = vrot.slane %v10242_v3, 2  ;;  %17708 = vmatprep.subr.bf16.mxu0 %v28465_v22 }
 0x846   :  { %17823 = vmatpush3.bf16.msra.mxu1 %v25786_v61 }
 0x847   :  { %17825 = vmatprep.subr.bf16.mxu1 %v25792_v54  ;;  %v10244_v48 = vadd.f32 %v10243_v63, %v10242_v3 }
 0x849   :  { %v10245_v8 = vrot.slane %v10244_v48, 1 }
 0x84a   :  { %17827 = vmatpush3.bf16.msra.mxu1 %v25810_v47 }
 0x84b   :  { %v16906_v40 = vpop.f32.mrb[100].mxu0  ;;  %17829 = vmatprep.subr.bf16.mxu1 %v25825_v15  ;;  %v10246_v35 = vadd.f32 %v10245_v8, %v10244_v48 }
 0x84c   :  { %v16907_v61 = vpop.f32.mrb[101].mxu0 }
 0x84d   :  { %v16908_v26 = vadd.f32 %v16907_v61, %v16906_v40  ;;  %v16909_v12 = vpop.f32.mrb[102].mxu0 }
 0x84e   :  { %17831 = vmatpush3.bf16.msra.mxu1 %v25835_v58  ;;  %v16910_v49 = vpop.f32.mrb[103].mxu0 }
 0x84f   :  { %v16911_v54 = vadd.f32 %v16910_v49, %v16909_v12  ;;  %17833 = vmatprep.subr.bf16.mxu1 %v25842_v37  ;;  %v10025_v47 = vadd.f32 %v16908_v26, %v26435_v53  ;;  %v10467_v37 = vld [vmem:[%s28259_s9 + $0x280] sm:$0xff]  ;;  %v10469_v53 = vld [vmem:[%s28259_s9 + $0x290] sm:$0xff] }
 0x851   :  { %v10028_v23 = vadd.f32 %v16911_v54, %v26450_v50 }
 0x852   :  { %17835 = vmatpush3.bf16.msra.mxu1 %v25861_v45  ;;  %v10468_v45 = vld [vmem:[%s28259_s9 + $0x288] sm:$0xff] }
 0x853   :  { %v16912_v15 = vpop.f32.mrb[104].mxu0  ;;  %17837 = vmatprep.subr.bf16.mxu1 %v25867_v16  ;;  %v17709_v16 = vpack.c.bf16 %v10468_v45, %v10467_v37 }
 0x854   :  { %v16913_v46 = vpop.f32.mrb[105].mxu0 }
 0x855   :  { %v16914_v43 = vadd.f32 %v16913_v46, %v16912_v15  ;;  %v16915_v51 = vpop.f32.mrb[106].mxu0  ;;  %17710 = vmatpush1.bf16.msra.mxu0 %v17709_v16 }
 0x856   :  { %17839 = vmatpush3.bf16.msra.mxu1 %v25885_v52  ;;  %v16916_v58 = vpop.f32.mrb[107].mxu0  ;;  %v10470_v52 = vld [vmem:[%s28259_s9 + $0x298] sm:$0xff]  ;;  %17711 = vmatprep.subr.bf16.mxu0 %v28465_v22 }
 0x857   :  { %v10033_v6 = vadd.f32 %v16914_v43, %v9985_v9  ;;  %17872 = vmatprep.subr.bf16.mxu1 %v28465_v22  ;;  %v17712_v50 = vpack.c.bf16 %v10470_v52, %v10469_v53  ;;  %v10471_v9 = vld [vmem:[%s28259_s9 + $0x2a0] sm:$0xff]  ;;  %s20463_s9 = smov [#allocation2]  }
 0x858   :  { %s14982_s7 = sshll.u32 %s20463_s9, 4  ;;  %s14983_s7 = int_to_ptr.vmem [resolvable:$true] %s14982_s7 }
 0x859   :  { %10967 = vmatmul.mubr.f32.vlgmr.msra.gmra.mrb[68].mxu1 %v10246_v35  ;;  %17713 = vmatpush1.bf16.msra.mxu0 %v17712_v50  ;;  %s20430_s2 = scalar_lea.vmem %s14983_s7, 32  ;;  %p20435_p1 = scmp.lt.s32.totalorder %s14983_s7, %s14983_s7 }
 0x85a   :  { %17874 = vmatpush1.bf16.msra.mxu1 %v26372_v0  ;;  %v17715_v0 = vpack.c.bf16 %v10472_v38, %v10471_v9  ;;  %17714 = vmatprep.subr.bf16.mxu0 %v28465_v22  ;;  %p20431_p0 = scmp.ne.s32.totalorder %s14983_s7, %s20430_s2  ;;  %p20436_p2 = scmp.lt.s32.totalorder %s20430_s2, %s20430_s2 }
 0x85b   :  { %17875 = vmatprep.subr.bf16.mxu1 %v28465_v22 }
 0x85c   :  { %p20437_p3 = por %p20436_p2, %p20435_p1 }
 0x85d   :  { %17716 = vmatpush1.bf16.msra.mxu0 %v17715_v0 }
 0x85e   :  { %17877 = vmatpush1.bf16.msra.mxu1 %v26394_v17  ;;  %v17718_v17 = vpack.c.bf16 %v10474_v21, %v10473_v62  ;;  %17717 = vmatprep.subr.bf16.mxu0 %v28465_v22  ;;  %p20438_p4 = pnand %p20437_p3, %p20431_p0 }
 0x85f   :  { %17878 = vmatprep.subr.bf16.mxu1 %v28465_v22 }
 0x861   :  { %17719 = vmatpush1.bf16.msra.mxu0 %v17718_v17 }
 0x862   :  { %17880 = vmatpush1.bf16.msra.mxu1 %v26422_v59  ;;  %17784 = vmatprep.subr.bf16.mxu0 %v28465_v22 }
 0x863   :  { %17881 = vmatprep.subr.bf16.mxu1 %v28465_v22 }
 0x866   :  { %17883 = vmatpush1.bf16.msra.mxu1 %v26447_v28 }
 0x867   :  { %17884 = vmatprep.subr.bf16.mxu1 %v28465_v22 }
 0x86a   :  { %17886 = vmatpush1.bf16.msra.mxu1 %v26464_v5 }
 0x86b   :  { %17887 = vmatprep.subr.bf16.mxu1 %v28465_v22 }
 0x86e   :  { %17889 = vmatpush1.bf16.msra.mxu1 %v26477_v1 }
 0x86f   :  { %17890 = vmatprep.subr.bf16.mxu1 %v28465_v22 }
 0x872   :  { %17892 = vmatpush1.bf16.msra.mxu1 %v26497_v33 }
 0x873   :  { %17893 = vmatprep.subr.bf16.mxu1 %v28465_v22 }
 0x876   :  { %17895 = vmatpush1.bf16.msra.mxu1 %v26507_v41 }
 0x877   :  { %17896 = vmatprep.subr.bf16.mxu1 %v28465_v22 }
 0x87a   :  { %17898 = vmatpush1.bf16.msra.mxu1 %v17709_v16 }
 0x87b   :  { %17899 = vmatprep.subr.bf16.mxu1 %v28465_v22 }
 0x87e   :  { %17901 = vmatpush1.bf16.msra.mxu1 %v17712_v50 }
 0x87f   :  { %17902 = vmatprep.subr.bf16.mxu1 %v28465_v22 }
 0x882   :  { %17904 = vmatpush1.bf16.msra.mxu1 %v17715_v0 }
 0x883   :  { %v10072_v59 = vpop.f32.mrb[108].mxu0  ;;  %17905 = vmatprep.subr.bf16.mxu1 %v28465_v22 }
 0x884   :  { %v10073_v28 = vadd.f32 %v10072_v59, %v10025_v47  ;;  %v10074_v5 = vpop.f32.mrb[109].mxu0 }
 0x885   :  { %v10075_v1 = vpop.f32.mrb[110].mxu0 }
 0x886   :  { %v10293_v29 = vmul.f32 %v10073_v28, %v10073_v28  ;;  %v10076_v2 = vadd.f32 %v10075_v1, %v10028_v23  ;;  %v10077_v33 = vpop.f32.mrb[111].mxu0  ;;  %17907 = vmatpush1.bf16.msra.mxu1 %v17718_v17  ;;  %v10282_v44 = vsel %vm825_vm9, %v10073_v28, 0.0 }
 0x887   :  { %17972 = vmatprep.subr.bf16.mxu1 %v28465_v22 }
 0x888   :  { %v10283_v24 = vsel %vm825_vm9, %v10076_v2, 0.0  ;;  %v10294_v41 = vmul.f32 %v10076_v2, %v10076_v2  ;;  %v10296_v63 = vsel %vm825_vm9, %v10293_v29, 0.0 }
 0x889   :  { %v10284_v3 = vadd.f32 %v10283_v24, %v10282_v44 }
 0x88a   :  { %v10297_v40 = vsel %vm825_vm9, %v10294_v41, 0.0 }
 0x88b   :  { %v10298_v61 = vadd.f32 %v10297_v40, %v10296_v63  ;;  %v10080_v26 = vpop.f32.mrb[112].mxu0 }
 0x88c   :  { %v10081_v12 = vadd.f32 %v10080_v26, %v10033_v6  ;;  %v10082_v49 = vpop.f32.mrb[113].mxu0 }
 0x88d   :  { %v10083_v48 = vpop.f32.mrb[114].mxu0  ;;  %v10371_v49 = vld [vmem:[%s28258_s8 + $0x200] sm:$0xff] }
 0x88e   :  { %v10285_v54 = vsel %vm837_vm10, %v10081_v12, 0.0  ;;  %v10295_v47 = vmul.f32 %v10081_v12, %v10081_v12  ;;  %v10084_v23 = vpop.f32.mrb[115].mxu0  ;;  %v10372_v48 = vld [vmem:[%s28258_s8 + $0x208] sm:$0xff] }
 0x88f   :  { %v26576_v8 = vadd.f32 %v10285_v54, %v10284_v3 }
 0x890   :  { %v10299_v15 = vsel %vm837_vm10, %v10295_v47, 0.0 }
 0x891   :  { %v26579_v46 = vadd.f32 %v10299_v15, %v10298_v61 }
 0x8a3   :  { %v16950_v43 = vpop.f32.mrb[116].mxu0 }
 0x8a4   :  { %v16951_v51 = vpop.f32.mrb[117].mxu0 }
 0x8a5   :  { %v16952_v58 = vadd.f32 %v16951_v51, %v16950_v43  ;;  %v17785_v51 = vpack.c.bf16 %v10372_v48, %v10371_v49 }
 0x8c3   :  { %v16985_v35 = vpop.f32.mrb[118].mxu0 }
 0x8c4   :  { %v16986_v37 = vpop.f32.mrb[119].mxu0 }
 0x8c5   :  { %v16987_v45 = vadd.f32 %v16986_v37, %v16985_v35  ;;  %v10373_v35 = vld [vmem:[%s28258_s8 + $0x210] sm:$0xff]  ;;  %v10374_v37 = vld [vmem:[%s28258_s8 + $0x218] sm:$0xff] }
 0x8c7   :  { %v26581_v16 = vadd.f32 %v16987_v45, %v16952_v58 }
 0x8cc   :  { %v9215_v6 = vpop.f32.mrb[60].mxu1 }
 0x8cd   :  { %v10219_v53 = vsel %vm183_vm0, %v9215_v6, 0.0  ;;  %v10238_v52 = vmul.f32 %v9215_v6, %v9215_v6  ;;  %v9217_v50 = vpop.f32.mrb[61].mxu1 }
 0x8ce   :  { %v10220_v9 = vrot.slane %v10219_v53, 4  ;;  %v10227_v38 = vsel %vm10226_vm15, %v9217_v50, 0.0  ;;  %v10239_v0 = vmul.f32 %v9217_v50, %v9217_v50  ;;  %v9219_v62 = vpop.f32.mrb[62].mxu1  ;;  %v10140_v50 = vmul.f32 %v24837_v60, %v24837_v60 }
 0x8cf   :  { %v10268_v21 = vsel %vm183_vm0, %v10238_v52, 0.0  ;;  %v10228_v17 = vrot.slane %v10227_v38, 4  ;;  %v9220_v59 = vpop.f32.mrb[63].mxu1  ;;  %v17788_v52 = vpack.c.bf16 %v10374_v37, %v10373_v35  ;;  %v10135_v62 = vmul.f32 %v24831_v55, %v24831_v55 }
 0x8d0   :  { %v10221_v28 = vadd.f32 %v10220_v9, %v10219_v53  ;;  %v10269_v5 = vrot.slane %v10268_v21, 4  ;;  %v10275_v1 = vsel %vm10226_vm15, %v10239_v0, 0.0  ;;  %v10145_v53 = vmul.f32 %v24861_v36, %v24861_v36  ;;  %v10375_v9 = vld [vmem:[%s28258_s8 + $0x220] sm:$0xff] }
 0x8d1   :  { %v10229_v29 = vadd.f32 %v10228_v17, %v10227_v38  ;;  %v10276_v2 = vrot.slane %v10275_v1, 4  ;;  %v10376_v38 = vld [vmem:[%s28258_s8 + $0x228] sm:$0xff]  ;;  %v10123_v0 = vsel %vm181_vm6, %v24861_v36, 0.0  ;;  %v10237_v17 = vmul.f32 %v25910_v42, %v25910_v42  ;;  %v10378_v42 = vld [vmem:[%s28258_s8 + $0x238] sm:$0xff] }
 0x8d2   :  { %v10222_v33 = vrot.slane %v10221_v28, 2  ;;  %v10270_v44 = vadd.f32 %v10269_v5, %v10268_v21  ;;  %v10122_v21 = vadd.f32 %v24837_v60, %v24831_v55  ;;  %v10183_v59 = vsel %vm181_vm6, %v10145_v53, 0.0  ;;  %v10386_v53 = vld [vmem:[%s28258_s8 + $0x278] sm:$0xff] }
 0x8d3   :  { %v10230_v24 = vrot.slane %v10229_v29, 2  ;;  %v10277_v41 = vadd.f32 %v10276_v2, %v10275_v1  ;;  %v10182_v5 = vadd.f32 %v10140_v50, %v10135_v62 }
 0x8d4   :  { %v10223_v3 = vadd.f32 %v10222_v33, %v10221_v28  ;;  %v10271_v63 = vrot.slane %v10270_v44, 2  ;;  %v17791_v28 = vpack.c.bf16 %v10376_v38, %v10375_v9  ;;  %v10124_v1 = vadd.f32 %v10123_v0, %v10122_v21 }
 0x8d5   :  { %v10231_v40 = vadd.f32 %v10230_v24, %v10229_v29  ;;  %v10278_v61 = vrot.slane %v10277_v41, 2  ;;  %v10377_v29 = vld [vmem:[%s28258_s8 + $0x230] sm:$0xff]  ;;  %v10184_v2 = vadd.f32 %v10183_v59, %v10182_v5  ;;  %v10379_v24 = vld [vmem:[%s28258_s8 + $0x240] sm:$0xff]  ;;  %v10236_v5 = vmul.f32 %v25899_v18, %v25899_v18 }
 0x8d6   :  { %v10224_v26 = vrot.slane %v10223_v3, 1  ;;  %v10272_v12 = vadd.f32 %v10271_v63, %v10270_v44  ;;  %v17794_v33 = vpack.c.bf16 %v10378_v42, %v10377_v29  ;;  %v10125_v44 = vrot.slane %v10124_v1, 4 }
 0x8d7   :  { %v10232_v54 = vrot.slane %v10231_v40, 1  ;;  %v10279_v47 = vadd.f32 %v10278_v61, %v10277_v41  ;;  %v10380_v41 = vld [vmem:[%s28258_s8 + $0x248] sm:$0xff]  ;;  %v10185_v63 = vrot.slane %v10184_v2, 4 }
 0x8d8   :  { %v10273_v23 = vrot.slane %v10272_v12, 1  ;;  %v10225_v58 = vadd.f32 %v10224_v26, %v10223_v3  ;;  %v10126_v61 = vadd.f32 %v10125_v44, %v10124_v1  ;;  %v10381_v26 = vld [vmem:[%s28258_s8 + $0x250] sm:$0xff] }
 0x8d9   :  { %v10233_v15 = vadd.f32 %v10232_v54, %v10231_v40  ;;  %v10280_v43 = vrot.slane %v10279_v47, 1  ;;  %v17797_v40 = vpack.c.bf16 %v10380_v41, %v10379_v24  ;;  %v10186_v48 = vadd.f32 %v10185_v63, %v10184_v2  ;;  %v28604_v2 = vld [vmem:[#allocation25_spill] sm:$0xff]  ;;  %v28608_v24 = vld [vmem:[#allocation28_spill] sm:$0xff] }
 0x8da   :  { %v10274_v6 = vadd.f32 %v10273_v23, %v10272_v12  ;;  %v10382_v12 = vld [vmem:[%s28258_s8 + $0x258] sm:$0xff] }
 0x8db   :  { %16014 = vmatprep.mubr.msk.f32.mxu0 %vm825_vm9, %v10233_v15  ;;  %v10281_v45 = vadd.f32 %v10280_v43, %v10279_v47  ;;  %v17800_v23 = vpack.c.bf16 %v10382_v12, %v10381_v26  ;;  %v10127_v15 = vrot.slane %v10126_v61, 2  ;;  %v10187_v37 = vrot.slane %v10186_v48, 2  ;;  %v28611_v63 = vld [vmem:[#allocation32_spill] sm:$0xff]  ;;  %v28614_v26 = vld [vmem:[#allocation19_spill] sm:$0xff] }
 0x8dc   :  { %10683 = vmatmul.mubr.f32.vlgmr.msra.gmra.mrb[120].mxu0 %v10225_v58  ;;  %v10384_v58 = vld [vmem:[%s28258_s8 + $0x268] sm:$0xff]  ;;  %v10149_v12 = vrot.slane %v28614_v26, 4 }
 0x8dd   :  { %17786 = vmatpush3.bf16.msra.mxu0 %v17785_v51  ;;  %16015 = vmatprep.mubr.msk.f32.mxu1 %vm825_vm9, %v10281_v45  ;;  %v10188_v9 = vadd.f32 %v10187_v37, %v10186_v48  ;;  %v28616_v48 = vld [vmem:[#allocation20_spill] sm:$0xff] }
 0x8de   :  { %11107 = vmatmul.mubr.f32.vlgmr.msra.gmra.mrb[70].mxu1 %v10274_v6  ;;  %17787 = vmatprep.subr.bf16.mxu0 %v28465_v22  ;;  %v10385_v6 = vld [vmem:[%s28258_s8 + $0x270] sm:$0xff] }
 0x8df   :  { %17974 = vmatpush3.bf16.msra.mxu1 %v17785_v51  ;;  %17366 = vmatprep.mubr.msk.f32.mxu0 %vm20458_vm11, %v28482_v56  ;;  %v10383_v51 = vld [vmem:[%s28258_s8 + $0x260] sm:$0xff]  ;;  %v17806_v38 = vpack.c.bf16 %v10386_v53, %v10385_v6  ;;  %v10189_v21 = vrot.slane %v10188_v9, 1  ;;  %v28620_v53 = vld [vmem:[#allocation43_spill] sm:$0xff] }
 0x8e0   :  { %17975 = vmatprep.subr.bf16.mxu1 %v28465_v22  ;;  %17401 = vmatprep.mubr.msk.f32.mxu1 %vm20458_vm11, %v28482_v56  ;;  %v10261_v56 = vsel %vm183_vm0, %v10237_v17, 0.0  ;;  %v17803_v45 = vpack.c.bf16 %v10384_v58, %v10383_v51 }
 0x8e1   :  { %17789 = vmatpush3.bf16.msra.mxu0 %v17788_v52  ;;  %v10262_v3 = vrot.slane %v10261_v56, 4 }
 0x8e2   :  { %17790 = vmatprep.subr.bf16.mxu0 %v28465_v22 }
 0x8e3   :  { %17977 = vmatpush3.bf16.msra.mxu1 %v17788_v52  ;;  %v10263_v49 = vadd.f32 %v10262_v3, %v10261_v56  ;;  %v10128_v52 = vadd.f32 %v10127_v15, %v10126_v61  ;;  %v28605_v56 = vld [vmem:[#allocation24_spill] sm:$0xff]  ;;  %v28610_v3 = vld [vmem:[#allocation33_spill] sm:$0xff] }
 0x8e4   :  { %17978 = vmatprep.subr.bf16.mxu1 %v28465_v22  ;;  %v28613_v61 = vld [vmem:[#allocation37_spill] sm:$0xff] }
 0x8e5   :  { %17792 = vmatpush3.bf16.msra.mxu0 %v17791_v28  ;;  %v10264_v35 = vrot.slane %v10263_v49, 2  ;;  %v10129_v0 = vrot.slane %v10128_v52, 1  ;;  %v28618_v15 = vld [vmem:[#allocation41_spill] sm:$0xff] }
 0x8e6   :  { %17793 = vmatprep.subr.bf16.mxu0 %v28465_v22 }
 0x8e7   :  { %17980 = vmatpush3.bf16.msra.mxu1 %v17791_v28  ;;  %v10265_v50 = vadd.f32 %v10264_v35, %v10263_v49  ;;  %v10130_v17 = vadd.f32 %v10129_v0, %v10128_v52  ;;  %v10190_v28 = vadd.f32 %v10189_v21, %v10188_v9  ;;  %v28615_v49 = vld [vmem:[#allocation36_spill] sm:$0xff] }
 0x8e8   :  { %17981 = vmatprep.subr.bf16.mxu1 %v28465_v22  ;;  %v28619_v35 = vld [vmem:[#allocation40_spill] sm:$0xff] }
 0x8e9   :  { %17795 = vmatpush3.bf16.msra.mxu0 %v17794_v33  ;;  %v10266_v62 = vrot.slane %v10265_v50, 1  ;;  %v28622_v9 = vld [vmem:[#allocation44_spill] sm:$0xff] }
 0x8ea   :  { %17796 = vmatprep.subr.bf16.mxu0 %v28465_v22  ;;  %v28624_v21 = vld [vmem:[#allocation52_spill] sm:$0xff] }
 0x8eb   :  { %17983 = vmatpush3.bf16.msra.mxu1 %v17794_v33  ;;  %v10267_v59 = vadd.f32 %v10266_v62, %v10265_v50  ;;  %v28621_v50 = vld [vmem:[#allocation45_spill] sm:$0xff]  ;;  %v28623_v62 = vld [vmem:[#allocation48_spill] sm:$0xff] }
 0x8ec   :  { %v17020_v54 = vpop.f32.mrb[64].mxu1  ;;  %17984 = vmatprep.subr.bf16.mxu1 %v28465_v22 }
 0x8ed   :  { %17798 = vmatpush3.bf16.msra.mxu0 %v17797_v40  ;;  %v17021_v47 = vpop.f32.mrb[65].mxu1 }
 0x8ee   :  { %v26649_v43 = vadd.f32 %v17021_v47, %v17020_v54  ;;  %17799 = vmatprep.subr.bf16.mxu0 %v28465_v22  ;;  %v10176_v54 = vrot.slane %v28616_v48, 4  ;;  %v28617_v47 = vld [vmem:[#allocation39_spill] sm:$0xff] }
 0x8ef   :  { %17986 = vmatpush3.bf16.msra.mxu1 %v17797_v40  ;;  %v28612_v40 = vld [vmem:[#allocation35_spill] sm:$0xff] }
 0x8f0   :  { %17987 = vmatprep.subr.bf16.mxu1 %v28465_v22  ;;  %v10177_v51 = vadd.f32 %v10176_v54, %v28616_v48 }
 0x8f1   :  { %17801 = vmatpush3.bf16.msra.mxu0 %v17800_v23 }
 0x8f2   :  { %17802 = vmatprep.subr.bf16.mxu0 %v28465_v22  ;;  %v10178_v52 = vrot.slane %v10177_v51, 2 }
 0x8f3   :  { %17989 = vmatpush3.bf16.msra.mxu1 %v17800_v23  ;;  %v10150_v23 = vadd.f32 %v10149_v12, %v28614_v26  ;;  %v10287_v26 = vrot.slane %v26576_v8, 4 }
 0x8f4   :  { %17990 = vmatprep.subr.bf16.mxu1 %v28465_v22  ;;  %v10179_v0 = vadd.f32 %v10178_v52, %v10177_v51 }
 0x8f5   :  { %17804 = vmatpush3.bf16.msra.mxu0 %v17803_v45 }
 0x8f6   :  { %17805 = vmatprep.subr.bf16.mxu0 %v28465_v22 }
 0x8f7   :  { %17992 = vmatpush3.bf16.msra.mxu1 %v17803_v45  ;;  %v10151_v45 = vrot.slane %v10150_v23, 2 }
 0x8f8   :  { %17993 = vmatprep.subr.bf16.mxu1 %v28465_v22  ;;  %v10254_v22 = vsel %vm183_vm0, %v10236_v5, 0.0 }
 0x8f9   :  { %17807 = vmatpush3.bf16.msra.mxu0 %v17806_v38 }
 0x8fa   :  { %17841 = vmatprep.subr.bf16.mxu0 %v25891_v11  ;;  %v10255_v11 = vrot.slane %v10254_v22, 4 }
 0x8fb   :  { %17995 = vmatpush3.bf16.msra.mxu1 %v17806_v38  ;;  %v10152_v38 = vadd.f32 %v10151_v45, %v10150_v23 }
 0x8fc   :  { %17367 = vmatmul.mubr.f32.vlgmr.msra.gmra.mrb[122].mxu0 %v10130_v17  ;;  %v10256_v1 = vadd.f32 %v10255_v11, %v10254_v22  ;;  %v28626_v22 = vld [vmem:[#allocation56_spill] sm:$0xff] }
 0x8fd   :  { %17843 = vmatpush3.bf16.msra.mxu0 %v25915_v34  ;;  %11036 = vmatprep.mubr.f32.mxu0 %v10267_v59  ;;  %v10158_v34 = vrot.slane %v24439_v20, 4  ;;  %v10153_v17 = vrot.slane %v10152_v38, 1  ;;  %v10180_v59 = vrot.slane %v10179_v0, 1 }
 0x8fe   :  { %17402 = vmatmul.mubr.f32.vlgmr.msra.gmra.mrb[72].mxu1 %v10190_v28  ;;  %17845 = vmatprep.subr.bf16.mxu0 %v25921_v27  ;;  %v28625_v28 = vld [vmem:[#allocation50_spill] sm:$0xff] }
 0x8ff   :  { %v10159_v18 = vadd.f32 %v10158_v34, %v24439_v20  ;;  %v28606_v20 = vld [vmem:[#allocation27_spill] sm:$0xff]  ;;  %v10154_v5 = vadd.f32 %v10153_v17, %v10152_v38  ;;  %v10181_v11 = vadd.f32 %v10180_v59, %v10179_v0 }
 0x900   :  { %v28627_v34 = vld [vmem:[#allocation47_spill] sm:$0xff] }
 0x901   :  { %17847 = vmatpush3.bf16.msra.mxu0 %v25939_v4 }
 0x902   :  { %17849 = vmatprep.subr.bf16.mxu0 %v25945_v10  ;;  %v10257_v10 = vrot.slane %v10256_v1, 2 }
 0x904   :  { %v10258_v42 = vadd.f32 %v10257_v10, %v10256_v1  ;;  %v28628_v1 = vld [vmem:[#allocation49_spill] sm:$0xff] }
 0x905   :  { %17851 = vmatpush3.bf16.msra.mxu0 %v25963_v25  ;;  %v10160_v25 = vrot.slane %v10159_v18, 2  ;;  %v28632_v10 = vld [vmem:[#allocation21_spill] sm:$0xff] }
 0x906   :  { %17853 = vmatprep.subr.bf16.mxu0 %v25980_v7  ;;  %v28603_v7 = vld [vmem:[#allocation23_spill] sm:$0xff] }
 0x909   :  { %17855 = vmatpush3.bf16.msra.mxu0 %v25989_v39  ;;  %v10161_v39 = vadd.f32 %v10160_v25, %v10159_v18  ;;  %v28629_v18 = vld [vmem:[#allocation53_spill] sm:$0xff]  ;;  %v10167_v25 = vrot.slane %v28632_v10, 4 }
 0x90a   :  { %17857 = vmatprep.subr.bf16.mxu0 %v25994_v32  ;;  %v10259_v32 = vrot.slane %v10258_v42, 1 }
 0x90b   :  { %v10162_v33 = vrot.slane %v10161_v39, 1 }
 0x90c   :  { %v17055_v27 = vpop.f32.mrb[66].mxu1  ;;  %v10260_v44 = vadd.f32 %v10259_v32, %v10258_v42  ;;  %v28634_v42 = vld [vmem:[#allocation34_spill] sm:$0xff] }
 0x90d   :  { %17859 = vmatpush3.bf16.msra.mxu0 %v26013_v13  ;;  %v17056_v4 = vpop.f32.mrb[67].mxu1  ;;  %v28607_v13 = vld [vmem:[#allocation29_spill] sm:$0xff]  ;;  %v10163_v41 = vadd.f32 %v10162_v33, %v10161_v39  ;;  %v28635_v39 = vld [vmem:[#allocation58_spill] sm:$0xff]  ;;  %v28638_v33 = vld [vmem:[#allocation60_spill] sm:$0xff] }
 0x90e   :  { %v26684_v29 = vadd.f32 %v17056_v4, %v17055_v27  ;;  %17861 = vmatprep.subr.bf16.mxu0 %v26019_v30  ;;  %v28609_v30 = vld [vmem:[#allocation31_spill] sm:$0xff]  ;;  %v28630_v27 = vld [vmem:[#allocation30_spill] sm:$0xff] }
 0x90f   :  { %v28631_v4 = vld [vmem:[#allocation55_spill] sm:$0xff] }
 0x911   :  { %17863 = vmatpush3.bf16.msra.mxu0 %v28603_v7  ;;  %v28633_v7 = vld [vmem:[#allocation57_spill] sm:$0xff] }
 0x912   :  { %17865 = vmatprep.subr.bf16.mxu0 %v28604_v2  ;;  %v10168_v2 = vadd.f32 %v10167_v25, %v28632_v10  ;;  %v11331_v10 = vld [vmem:[%s28261_s11] sm:$0x1]  ;;  %v28639_v25 = vld [vmem:[#allocation11_spill] sm:$0xff] }
 0x914   :  { %v10169_v32 = vrot.slane %v10168_v2, 2 }
 0x915   :  { %17867 = vmatpush3.bf16.msra.mxu0 %v28605_v56  ;;  %v28636_v56 = vld [vmem:[#allocation59_spill] sm:$0xff] }
 0x916   :  { %17869 = vmatprep.subr.bf16.mxu0 %v28606_v20  ;;  %v28637_v20 = vld [vmem:[#allocation42_spill] sm:$0xff] }
 0x919   :  { %17871 = vmatpush3.bf16.msra.mxu0 %v28607_v13  ;;  %v10170_v13 = vadd.f32 %v10169_v32, %v10168_v2  ;;  %v19796_v32 = vld [vmem:[%s28262_s12 + $0x4] ss:$16 sps:$4 sm:$0xff]  }
 0x91a   :  { %17909 = vmatprep.subr.bf16.mxu0 %v28608_v24 }
 0x91c   :  { %11037 = vmatmul.mubr.f32.vlgmr.msra.gmra.mrb[124].mxu0 %v10260_v44  ;;  %v10171_v44 = vrot.slane %v10170_v13, 1 }
 0x91d   :  { %17911 = vmatpush3.bf16.msra.mxu0 %v28609_v30  ;;  %11176 = vmatprep.mubr.f32.mxu0 %v10163_v41 }
 0x91e   :  { %17913 = vmatprep.subr.bf16.mxu0 %v28610_v3  ;;  %v10172_v24 = vadd.f32 %v10171_v44, %v10170_v13  ;;  %v19802_v13 = vld [vmem:[%s28262_s12 + $0x24] ss:$16 sps:$4 sm:$0xff]   ;;  %v19805_v44 = vld [vmem:[%s28262_s12 + $0x2c] ss:$16 sps:$4 sm:$0xff]  }
 0x921   :  { %17915 = vmatpush3.bf16.msra.mxu0 %v28611_v63 }
 0x922   :  { %17917 = vmatprep.subr.bf16.mxu0 %v28612_v40 }
 0x925   :  { %17919 = vmatpush3.bf16.msra.mxu0 %v28613_v61 }
 0x926   :  { %17921 = vmatprep.subr.bf16.mxu0 %v28615_v49 }
 0x929   :  { %17923 = vmatpush3.bf16.msra.mxu0 %v28617_v47 }
 0x92a   :  { %17925 = vmatprep.subr.bf16.mxu0 %v28618_v15 }
 0x92c   :  { %v17107_v58 = vpop.f32.mrb[68].mxu1 }
 0x92d   :  { %17927 = vmatpush3.bf16.msra.mxu0 %v28619_v35  ;;  %v17108_v37 = vpop.f32.mrb[69].mxu1 }
 0x92e   :  { %v17109_v6 = vadd.f32 %v17108_v37, %v17107_v58  ;;  %17929 = vmatprep.subr.bf16.mxu0 %v28620_v53 }
 0x931   :  { %17931 = vmatpush3.bf16.msra.mxu0 %v28621_v50 }
 0x932   :  { %17933 = vmatprep.subr.bf16.mxu0 %v28622_v9 }
 0x935   :  { %17935 = vmatpush3.bf16.msra.mxu0 %v28623_v62 }
 0x936   :  { %17937 = vmatprep.subr.bf16.mxu0 %v28624_v21 }
 0x939   :  { %17939 = vmatpush3.bf16.msra.mxu0 %v28625_v28 }
 0x93a   :  { %17941 = vmatprep.subr.bf16.mxu0 %v28626_v22 }
 0x93c   :  { %11177 = vmatmul.mubr.f32.vlgmr.msra.gmra.mrb[126].mxu0 %v10154_v5 }
 0x93d   :  { %17943 = vmatpush3.bf16.msra.mxu0 %v28627_v34  ;;  %11246 = vmatprep.mubr.f32.mxu0 %v10181_v11 }
 0x93e   :  { %17945 = vmatprep.subr.bf16.mxu0 %v28628_v1 }
 0x941   :  { %17947 = vmatpush3.bf16.msra.mxu0 %v28629_v18 }
 0x942   :  { %17949 = vmatprep.subr.bf16.mxu0 %v28630_v27 }
 0x945   :  { %17951 = vmatpush3.bf16.msra.mxu0 %v28631_v4 }
 0x946   :  { %17953 = vmatprep.subr.bf16.mxu0 %v28633_v7 }
 0x949   :  { %17955 = vmatpush3.bf16.msra.mxu0 %v28634_v42 }
 0x94a   :  { %17957 = vmatprep.subr.bf16.mxu0 %v28635_v39 }
 0x94d   :  { %17959 = vmatpush3.bf16.msra.mxu0 %v28636_v56  ;;  %v19794_v56 = vld [vmem:[%s28262_s12] ss:$16 sps:$4 sm:$0xff]  }
 0x94e   :  { %17961 = vmatprep.subr.bf16.mxu0 %v28637_v20  ;;  %v19797_v20 = vld [vmem:[%s28262_s12 + $0x8] ss:$16 sps:$4 sm:$0xff]  }
 0x951   :  { %17963 = vmatpush3.bf16.msra.mxu0 %v28638_v33  ;;  %v19799_v33 = vld [vmem:[%s28262_s12 + $0xc] ss:$16 sps:$4 sm:$0xff]  }
 0x952   :  { %17965 = vmatprep.subr.bf16.mxu0 %v26407_v14  ;;  %14337 = vmatprep.subr.bf16.mxu1 %v19799_v33  ;;  %v28643_v33 = vld [vmem:[#allocation13_spill] sm:$0xff] }
 0x953   :  { %14338 = vmatpush1.bf16.msra.mxu1 %v19797_v20 }
 0x954   :  { %14339 = vmatprep.subr.bf16.mxu1 %v19805_v44  ;;  %v28644_v44 = vld [vmem:[#allocation15_spill] sm:$0xff] }
 0x955   :  { %17967 = vmatpush3.bf16.msra.mxu0 %v26432_v19  ;;  %v10288_v19 = vadd.f32 %v10287_v26, %v26576_v8  ;;  %v10301_v8 = vrot.slane %v26579_v46, 4  ;;  %v19812_v26 = vld [vmem:[%s28262_s12 + $0x60] ss:$16 sps:$4 sm:$0xff]  }
 0x956   :  { %17969 = vmatprep.subr.bf16.mxu0 %v26438_v57 }
 0x957   :  { %v10289_v57 = vrot.slane %v10288_v19, 2  ;;  %v10302_v50 = vadd.f32 %v10301_v8, %v26579_v46  ;;  %v11327_v46 = vld [vmem:[%s28260_s10] sm:$0x1]  ;;  %v19845_v8 = vld [vmem:[%s28262_s12 + $0x108] ss:$16 sps:$4 sm:$0xff]  }
 0x959   :  { %17971 = vmatpush3.bf16.msra.mxu0 %v26460_v31  ;;  %v10290_v12 = vadd.f32 %v10289_v57, %v10288_v19  ;;  %v10303_v9 = vrot.slane %v10302_v50, 2  ;;  %v19815_v19 = vld [vmem:[%s28262_s12 + $0x68] ss:$16 sps:$4 sm:$0xff]   ;;  %v19820_v57 = vld [vmem:[%s28262_s12 + $0x84] ss:$16 sps:$4 sm:$0xff]  }
 0x95a   :  { %14050 = vmatprep.subr.bf16.mxu0 %v19796_v32  ;;  %v28642_v32 = vld [vmem:[#allocation18_spill] sm:$0xff] }
 0x95b   :  { %v10291_v49 = vrot.slane %v10290_v12, 1  ;;  %v10304_v38 = vadd.f32 %v10303_v9, %v10302_v50  ;;  %v19850_v50 = vld [vmem:[%s28262_s12 + $0x124] ss:$16 sps:$4 sm:$0xff]   ;;  %v19853_v9 = vld [vmem:[%s28262_s12 + $0x12c] ss:$16 sps:$4 sm:$0xff]  }
 0x95c   :  { %11247 = vmatmul.mubr.f32.vlgmr.msra.gmra.mrb[128].mxu0 %v10172_v24  ;;  %v19800_v24 = vld [vmem:[%s28262_s12 + $0x20] ss:$16 sps:$4 sm:$0xff]  }
 0x95d   :  { %v10292_v48 = vadd.f32 %v10291_v49, %v10290_v12  ;;  %v10305_v21 = vrot.slane %v10304_v38, 1  ;;  %14051 = vmatpush1.bf16.msra.mxu0 %v19794_v56  ;;  %v19823_v12 = vld [vmem:[%s28262_s12 + $0x8c] ss:$16 sps:$4 sm:$0xff]   ;;  %v19818_v49 = vld [vmem:[%s28262_s12 + $0x80] ss:$16 sps:$4 sm:$0xff]  }
 0x95e   :  { %14052 = vmatprep.subr.bf16.mxu0 %v19802_v13 }
 0x95f   :  { %v10306_v5 = vadd.f32 %v10305_v21, %v10304_v38  ;;  %v19848_v38 = vld [vmem:[%s28262_s12 + $0x120] ss:$16 sps:$4 sm:$0xff]   ;;  %v19859_v21 = vld [vmem:[%s28262_s12 + $0x14c] ss:$16 sps:$4 sm:$0xff]  }
 0x961   :  { %14053 = vmatpush1.bf16.msra.mxu0 %v19800_v24 }
 0x9af   :  { %v10684_v41 = vpop.f32.mrb[120].mxu0 }
 0x9b0   :  { %v10685_v30 = vadd.f32 %v10684_v41, %v26581_v16  ;;  %v10686_v3 = vpop.f32.mrb[121].mxu0  ;;  %v19803_v41 = vld [vmem:[%s28262_s12 + $0x28] ss:$16 sps:$4 sm:$0xff]  }
 0x9b1   :  { %v11108_v63 = vpop.f32.mrb[70].mxu1  ;;  %v19811_v3 = vld [vmem:[%s28262_s12 + $0x4c] ss:$16 sps:$4 sm:$0xff]   ;;  %14340 = vmatpush1.bf16.msra.mxu1 %v19803_v41 }
 0x9b2   :  { %v10755_v40 = vadd.f32 %v26649_v43, %v10685_v30  ;;  %v11110_v61 = vpop.f32.mrb[71].mxu1  ;;  %v19808_v30 = vld [vmem:[%s28262_s12 + $0x44] ss:$16 sps:$4 sm:$0xff]   ;;  %14341 = vmatprep.subr.bf16.mxu1 %v19811_v3 }
 0x9b3   :  { %14054 = vmatprep.subr.bf16.mxu0 %v19808_v30  ;;  %v19814_v61 = vld [vmem:[%s28262_s12 + $0x64] ss:$16 sps:$4 sm:$0xff]   ;;  %v28645_v30 = vld [vmem:[#allocation16_spill] sm:$0xff] }
 0x9b4   :  { %v10825_v14 = vadd.f32 %v26684_v29, %v10755_v40  ;;  %v19809_v40 = vld [vmem:[%s28262_s12 + $0x48] ss:$16 sps:$4 sm:$0xff]  }
 0x9b5   :  { %14342 = vmatpush1.bf16.msra.mxu1 %v19809_v40  ;;  %v28647_v40 = vld [vmem:[#allocation8_spill] sm:$0xff] }
 0x9cf   :  { %v10894_v31 = vpop.f32.mrb[122].mxu0 }
 0x9d0   :  { %v10895_v54 = vadd.f32 %v10894_v31, %v10825_v14  ;;  %v17368_v47 = vpop.f32.mrb[123].mxu0  ;;  %v19817_v14 = vld [vmem:[%s28262_s12 + $0x6c] ss:$16 sps:$4 sm:$0xff]   ;;  %v19821_v31 = vld [vmem:[%s28262_s12 + $0x88] ss:$16 sps:$4 sm:$0xff]  }
 0x9d1   :  { %v11318_v23 = vpop.f32.mrb[72].mxu1  ;;  %14343 = vmatprep.subr.bf16.mxu1 %v19817_v14  ;;  %v19824_v47 = vld [vmem:[%s28262_s12 + $0xa0] ss:$16 sps:$4 sm:$0xff]  }
 0x9d2   :  { %v10898_v16 = vadd.f32 %v10895_v54, %v10292_v48  ;;  %v17403_v15 = vpop.f32.mrb[73].mxu1  ;;  %14344 = vmatpush1.bf16.msra.mxu1 %v19815_v19  ;;  %v19826_v48 = vld [vmem:[%s28262_s12 + $0xa4] ss:$16 sps:$4 sm:$0xff]   ;;  %v19829_v54 = vld [vmem:[%s28262_s12 + $0xac] ss:$16 sps:$4 sm:$0xff]  }
 0x9d3   :  { %14345 = vmatprep.subr.bf16.mxu1 %v19823_v12  ;;  %v19835_v15 = vld [vmem:[%s28262_s12 + $0xcc] ss:$16 sps:$4 sm:$0xff]  }
 0x9d4   :  { %v11323_v28 = vmul.f32 0.004132231, %v10898_v16  ;;  %v19832_v16 = vld [vmem:[%s28262_s12 + $0xc4] ss:$16 sps:$4 sm:$0xff]   ;;  %v28648_v14 = vld [vmem:[#allocation12_spill] sm:$0xff] }
 0x9d6   :  { %v11325_v11 = vmul.f32 %v11323_v28, %v11323_v28  ;;  %14346 = vmatpush1.bf16.msra.mxu1 %v19821_v31 }
 0x9d7   :  { %14347 = vmatprep.subr.bf16.mxu1 %v19829_v54 }
 0x9ef   :  { %v17142_v51 = vpop.f32.mrb[124].mxu0 }
 0x9f0   :  { %v17143_v58 = vpop.f32.mrb[125].mxu0 }
 0x9f1   :  { %v17144_v43 = vadd.f32 %v17143_v58, %v17142_v51  ;;  %v19830_v51 = vld [vmem:[%s28262_s12 + $0xc0] ss:$16 sps:$4 sm:$0xff]   ;;  %v19833_v58 = vld [vmem:[%s28262_s12 + $0xc8] ss:$16 sps:$4 sm:$0xff]  }
 0x9f3   :  { %v11039_v35 = vadd.f32 %v17144_v43, %v17109_v6  ;;  %v19838_v43 = vld [vmem:[%s28262_s12 + $0xe4] ss:$16 sps:$4 sm:$0xff]  }
 0x9f5   :  { %v11109_v37 = vadd.f32 %v11108_v63, %v11039_v35  ;;  %v19806_v63 = vld [vmem:[%s28262_s12 + $0x40] ss:$16 sps:$4 sm:$0xff]   ;;  %v19841_v35 = vld [vmem:[%s28262_s12 + $0xec] ss:$16 sps:$4 sm:$0xff]  }
 0x9f6   :  { %14055 = vmatpush1.bf16.msra.mxu0 %v19806_v63 }
 0x9f7   :  { %14056 = vmatprep.subr.bf16.mxu0 %v19814_v61 }
 0x9fa   :  { %14057 = vmatpush1.bf16.msra.mxu0 %v19812_v26  ;;  %v28649_v26 = vld [vmem:[#allocation7_spill] sm:$0xff] }
 0x9fb   :  { %14058 = vmatprep.subr.bf16.mxu0 %v19820_v57 }
 0x9fe   :  { %14059 = vmatpush1.bf16.msra.mxu0 %v19818_v49 }
 0x9ff   :  { %14060 = vmatprep.subr.bf16.mxu0 %v19826_v48 }
 0xa02   :  { %14061 = vmatpush1.bf16.msra.mxu0 %v19824_v47  ;;  %v19866_v47 = vld [vmem:[%s28262_s12 + $0x180] ss:$16 sps:$4 sm:$0xff]  }
 0xa03   :  { %14062 = vmatprep.subr.bf16.mxu0 %v19832_v16 }
 0xa06   :  { %14063 = vmatpush1.bf16.msra.mxu0 %v19830_v51 }
 0xa07   :  { %14064 = vmatprep.subr.bf16.mxu0 %v19838_v43  ;;  %v19871_v43 = vld [vmem:[%s28262_s12 + $0x18c] ss:$16 sps:$4 sm:$0xff]  }
 0xa0f   :  { %v17177_v29 = vpop.f32.mrb[126].mxu0 }
 0xa10   :  { %v17178_v45 = vpop.f32.mrb[127].mxu0 }
 0xa11   :  { %v17179_v53 = vadd.f32 %v17178_v45, %v17177_v29  ;;  %v19839_v29 = vld [vmem:[%s28262_s12 + $0xe8] ss:$16 sps:$4 sm:$0xff]   ;;  %v19844_v45 = vld [vmem:[%s28262_s12 + $0x104] ss:$16 sps:$4 sm:$0xff]  }
 0xa13   :  { %v11179_v52 = vadd.f32 %v17179_v53, %v11109_v37  ;;  %v19836_v37 = vld [vmem:[%s28262_s12 + $0xe0] ss:$16 sps:$4 sm:$0xff]   ;;  %v19847_v53 = vld [vmem:[%s28262_s12 + $0x10c] ss:$16 sps:$4 sm:$0xff]  }
 0xa14   :  { %14065 = vmatpush1.bf16.msra.mxu0 %v19836_v37 }
 0xa15   :  { %14066 = vmatprep.subr.bf16.mxu0 %v19844_v45  ;;  %v19869_v45 = vld [vmem:[%s28262_s12 + $0x188] ss:$16 sps:$4 sm:$0xff]  }
 0xa2f   :  { %v17212_v0 = vpop.f32.mrb[128].mxu0 }
 0xa30   :  { %v17213_v62 = vpop.f32.mrb[129].mxu0 }
 0xa31   :  { %v17214_v17 = vadd.f32 %v17213_v62, %v17212_v0  ;;  %v19851_v0 = vld [vmem:[%s28262_s12 + $0x128] ss:$16 sps:$4 sm:$0xff]   ;;  %v19856_v62 = vld [vmem:[%s28262_s12 + $0x144] ss:$16 sps:$4 sm:$0xff]  }
 0xa33   :  { %v11249_v59 = vadd.f32 %v17214_v17, %v11179_v52  ;;  %v19842_v52 = vld [vmem:[%s28262_s12 + $0x100] ss:$16 sps:$4 sm:$0xff]  }
 0xa34   :  { %14067 = vmatpush1.bf16.msra.mxu0 %v19842_v52  ;;  %v19854_v17 = vld [vmem:[%s28262_s12 + $0x140] ss:$16 sps:$4 sm:$0xff]  }
 0xa35   :  { %v11319_v22 = vadd.f32 %v11318_v23, %v11249_v59  ;;  %v19827_v23 = vld [vmem:[%s28262_s12 + $0xa8] ss:$16 sps:$4 sm:$0xff]   ;;  %14068 = vmatprep.subr.bf16.mxu0 %v19850_v50 }
 0xa36   :  { %14348 = vmatpush1.bf16.msra.mxu1 %v19827_v23  ;;  %v19857_v59 = vld [vmem:[%s28262_s12 + $0x148] ss:$16 sps:$4 sm:$0xff]   ;;  %v19868_v23 = vld [vmem:[%s28262_s12 + $0x184] ss:$16 sps:$4 sm:$0xff]  }
 0xa37   :  { %v11322_v6 = vadd.f32 %v11319_v22, %v10306_v5  ;;  %14349 = vmatprep.subr.bf16.mxu1 %v19835_v15  ;;  %v19865_v5 = vld [vmem:[%s28262_s12 + $0x16c] ss:$16 sps:$4 sm:$0xff]   ;;  %v19860_v22 = vld [vmem:[%s28262_s12 + $0x160] ss:$16 sps:$4 sm:$0xff]  }
 0xa38   :  { %14069 = vmatpush1.bf16.msra.mxu0 %v19848_v38 }
 0xa39   :  { %v11324_v34 = vmul.f32 0.004132231, %v11322_v6  ;;  %14070 = vmatprep.subr.bf16.mxu0 %v19856_v62  ;;  %v19863_v6 = vld [vmem:[%s28262_s12 + $0x168] ss:$16 sps:$4 sm:$0xff]  }
 0xa3a   :  { %14350 = vmatpush1.bf16.msra.mxu1 %v19833_v58 }
 0xa3b   :  { %v11326_v1 = vsub.f32 %v11324_v34, %v11325_v11  ;;  %14351 = vmatprep.subr.bf16.mxu1 %v19841_v35 }
 0xa3c   :  { %14071 = vmatpush1.bf16.msra.mxu0 %v19854_v17 }
 0xa3d   :  { %v11328_v18 = vadd.f32 1e-05, %v11326_v1 }
 0xa3e   :  { %14352 = vmatpush1.bf16.msra.mxu1 %v19839_v29 }
 0xa3f   :  { %20428 = vrsqrt.f32 %v11328_v18  ;;  %14353 = vmatprep.subr.bf16.mxu1 %v19847_v53 }
 0xa42   :  { %14354 = vmatpush1.bf16.msra.mxu1 %v19845_v8 }
 0xa43   :  { %14355 = vmatprep.subr.bf16.mxu1 %v19853_v9 }
 0xa46   :  { %14356 = vmatpush1.bf16.msra.mxu1 %v19851_v0  ;;  %v28650_v0 = vld [vmem:[#allocation14_spill] sm:$0xff] }
 0xa47   :  { %14357 = vmatprep.subr.bf16.mxu1 %v19859_v21 }
 0xa49   :  { %v20429_v27 = vpop.eup %20428 }
 0xa4a   :  { %v26740_v4 = vmul.f32 %v20429_v27, %v11327_v46  ;;  %14358 = vmatpush1.bf16.msra.mxu1 %v19857_v59  ;;  %v28640_v46 = vld [vmem:[#allocation17_spill] sm:$0xff] }
 0xa4b   :  { %14359 = vmatprep.subr.bf16.mxu1 %v19865_v5  ;;  %v19872_v59 = vld [vmem:[%s28262_s12 + $0x1a0] ss:$16 sps:$4 sm:$0xff]  }
 0xa4c   :  { %v11338_v7 = vrot.slane %v26740_v4, %v28639_v25  ;;  %v11332_v42 = vmul.f32 %v26740_v4, %v11323_v28  ;;  %v19862_v28 = vld [vmem:[%s28262_s12 + $0x164] ss:$16 sps:$4 sm:$0xff]   ;;  %v28651_v5 = vld [vmem:[#allocation6_spill] sm:$0xff] }
 0xa4d   :  { %14072 = vmatprep.subr.bf16.mxu0 %v19862_v28  ;;  %v19874_v28 = vld [vmem:[%s28262_s12 + $0x1a4] ss:$16 sps:$4 sm:$0xff]  }
 0xa4e   :  { %11339 = vrot.lane.b32.xlu0 %v11338_v7, %s20460_s23  ;;  %v26749_v2 = vsub.f32 %v11331_v10, %v11332_v42  ;;  %14073 = vmatpush1.bf16.msra.mxu0 %v19860_v22  ;;  %v28641_v7 = vld [vmem:[#allocation10_spill] sm:$0xff] }
 0xa4f   :  { %14360 = vmatpush1.bf16.msra.mxu1 %v19863_v6  ;;  %14074 = vmatprep.subr.bf16.mxu0 %v19868_v23 }
 0xa50   :  { %v11347_v39 = vrot.slane %v26749_v2, %v28639_v25  ;;  %14361 = vmatprep.subr.bf16.mxu1 %v19871_v43 }
 0xa52   :  { %11348 = vrot.lane.b32.xlu1 %v11347_v39, %s20460_s23  ;;  %14075 = vmatpush1.bf16.msra.mxu0 %v19866_v47 }
 0xa53   :  { %14362 = vmatpush1.bf16.msra.mxu1 %v19869_v45  ;;  %14076 = vmatprep.subr.bf16.mxu0 %v19874_v28 }
 0xa56   :  { %14077 = vmatpush1.bf16.msra.mxu0 %v19872_v59 }
 0xac0   :  { %v11340_v11 = vpop.permute.xlu0 %11339 }
 0xac1   :  { %v11342_v34 = vsel %vm825_vm9, %v26740_v4, %v11340_v11 }
 0xac2   :  { %v11355_v1 = vrot.slane %v11342_v34, %v28639_v25 }
 0xac4   :  { %v11349_v18 = vpop.permute.xlu1 %11348  ;;  %v11369_v27 = vmul.f32 %v11355_v1, %v28640_v46  ;;  %v11370_v10 = vmul.f32 %v11355_v1, %v24861_v36  ;;  %v11364_v42 = vmul.f32 %v11355_v1, %v28641_v7  ;;  %v11365_v56 = vmul.f32 %v11355_v1, %v24837_v60  ;;  %v28646_v36 = vld [vmem:[#allocation9_spill] sm:$0xff]  ;;  %v19877_v46 = vld [vmem:[%s28262_s12 + $0x1ac] ss:$16 sps:$4 sm:$0xff]  }
 0xac5   :  { %v11351_v39 = vsel %vm825_vm9, %v26749_v2, %v11349_v18  ;;  %v11363_v20 = vmul.f32 %v11355_v1, %v28642_v32  ;;  %v11368_v13 = vmul.f32 %v11355_v1, %v28643_v33  ;;  %v11359_v24 = vmul.f32 %v11355_v1, %v28644_v44  ;;  %v19875_v18 = vld [vmem:[%s28262_s12 + $0x1a8] ss:$16 sps:$4 sm:$0xff]   ;;  %14363 = vmatprep.subr.bf16.mxu1 %v19877_v46  ;;  %v19878_v7 = vld [vmem:[%s28262_s12 + $0x1c0] ss:$16 sps:$4 sm:$0xff]   ;;  %v19889_v32 = vld [vmem:[%s28262_s12 + $0x1ec] ss:$16 sps:$4 sm:$0xff]  }
 0xac6   :  { %v11374_v4 = vrot.slane %v11351_v39, %v28639_v25  ;;  %v11360_v41 = vmul.f32 %v11355_v1, %v24831_v55  ;;  %v11367_v3 = vmul.f32 %v11355_v1, %v28645_v30  ;;  %v11362_v63 = vmul.f32 %v11355_v1, %v28646_v36  ;;  %14364 = vmatpush1.bf16.msra.mxu1 %v19875_v18  ;;  %v19881_v39 = vld [vmem:[%s28262_s12 + $0x1c8] ss:$16 sps:$4 sm:$0xff]  }
 0xac7   :  { %v11361_v61 = vmul.f32 %v11355_v1, %v28647_v40  ;;  %v11366_v2 = vmul.f32 %v11355_v1, %v28648_v14  ;;  %v11357_v60 = vmul.f32 %v11355_v1, %v28649_v26  ;;  %v11358_v62 = vmul.f32 %v11355_v1, %v28650_v0  ;;  %v19887_v33 = vld [vmem:[%s28262_s12 + $0x1e8] ss:$16 sps:$4 sm:$0xff]  }
 0xac8   :  { %v11388_v19 = vadd.f32 %v11374_v4, %v11369_v27  ;;  %v11389_v57 = vadd.f32 %v11374_v4, %v11370_v10  ;;  %v11383_v12 = vadd.f32 %v11374_v4, %v11364_v42  ;;  %v11384_v49 = vadd.f32 %v11374_v4, %v11365_v56  ;;  %v19883_v10 = vld [vmem:[%s28262_s12 + $0x1cc] ss:$16 sps:$4 sm:$0xff]   ;;  %v19886_v56 = vld [vmem:[%s28262_s12 + $0x1e4] ss:$16 sps:$4 sm:$0xff]  }
 0xac9   :  { %v26917_v31 = vadd.f32 %v11374_v4, %v11363_v20  ;;  %v26919_v48 = vadd.f32 %v11374_v4, %v11368_v13  ;;  %v11378_v54 = vadd.f32 %v11374_v4, %v11359_v24  ;;  %v11379_v55 = vadd.f32 %v11374_v4, %v11360_v41  ;;  %14365 = vmatprep.subr.bf16.mxu1 %v19883_v10  ;;  %v19884_v20 = vld [vmem:[%s28262_s12 + $0x1e0] ss:$16 sps:$4 sm:$0xff]   ;;  %v19892_v13 = vld [vmem:[%s28262_s12 + $0x204] ss:$16 sps:$4 sm:$0xff]  }
 0xaca   :  { %v11403_v16 = vmax.f32 %v11388_v19, 0.0  ;;  %v11404_v15 = vmax.f32 %v11389_v57, 0.0  ;;  %v11398_v51 = vmax.f32 %v11383_v12, 0.0  ;;  %v11399_v58 = vmax.f32 %v11384_v49, 0.0  ;;  %14366 = vmatpush1.bf16.msra.mxu1 %v19881_v39 }
 0xacb   :  { %v11397_v35 = vmax.f32 %v26917_v31, 0.0  ;;  %v11402_v37 = vmax.f32 %v26919_v48, 0.0  ;;  %v11393_v29 = vmax.f32 %v11378_v54, 0.0  ;;  %v11394_v8 = vmax.f32 %v11379_v55, 0.0  ;;  %14367 = vmatprep.subr.bf16.mxu1 %v19889_v32 }
 0xacc   :  { %v18376_v53 = vpack.i.bf16 %v11404_v15, %v11403_v16  ;;  %v18371_v52 = vpack.i.bf16 %v11399_v58, %v11398_v51  ;;  %v11386_v50 = vadd.f32 %v11374_v4, %v11367_v3  ;;  %v11381_v9 = vadd.f32 %v11374_v4, %v11362_v63 }
 0xacd   :  { %v26935_v38 = vadd.f32 %v11374_v4, %v11366_v2  ;;  %v26940_v21 = vadd.f32 %v11374_v4, %v11361_v61  ;;  %v26942_v17 = vadd.f32 %v11374_v4, %v11357_v60  ;;  %v11356_v22 = vmul.f32 %v11355_v1, %v28651_v5  ;;  %v19880_v1 = vld [vmem:[%s28262_s12 + $0x1c4] ss:$16 sps:$4 sm:$0xff]  }
 0xace   :  { %18377 = vrot.lane.b32.xlu1 %v18376_v53, %s20460_s23  ;;  %18372 = vrot.lane.b32.xlu0 %v18371_v52, %s20460_s23  ;;  %v18381_v6 = vpack.i.bf16 %v11402_v37, %v11397_v35  ;;  %v18386_v11 = vpack.i.bf16 %v11394_v8, %v11393_v29  ;;  %v26955_v34 = vadd.f32 %v11374_v4, %v11358_v62  ;;  %v11401_v63 = vmax.f32 %v11386_v50, 0.0 }
 0xacf   :  { %v26963_v27 = vadd.f32 %v11374_v4, %v11356_v22  ;;  %14078 = vmatprep.subr.bf16.mxu0 %v19880_v1  ;;  %14368 = vmatpush1.bf16.msra.mxu1 %v19887_v33  ;;  %v19895_v4 = vld [vmem:[%s28262_s12 + $0x20c] ss:$16 sps:$4 sm:$0xff]   ;;  %v11396_v40 = vmax.f32 %v11381_v9, 0.0  ;;  %v11400_v57 = vmax.f32 %v26935_v38, 0.0  ;;  %v11395_v47 = vmax.f32 %v26940_v21, 0.0 }
 0xad0   :  { %v11392_v42 = vmax.f32 %v26955_v34, 0.0  ;;  %14079 = vmatpush1.bf16.msra.mxu0 %v19878_v7  ;;  %14378 = vmatprep.subr.bf16.mxu1 %v19895_v4  ;;  %v11391_v23 = vmax.f32 %v26942_v17, 0.0 }
 0xad1   :  { %14080 = vmatprep.subr.bf16.mxu0 %v19886_v56 }
 0xad2   :  { %18382 = vrot.lane.b32.xlu0 %v18381_v6, %s20460_s23  ;;  %18387 = vrot.lane.b32.xlu1 %v18386_v11, %s20460_s23 }
 0xad4   :  { %14081 = vmatpush1.bf16.msra.mxu0 %v19884_v20 }
 0xad5   :  { %14091 = vmatprep.subr.bf16.mxu0 %v19892_v13 }
 0xad6   :  { %11408 = vrot.lane.b32.xlu0 %v11392_v42, %s20460_s23 }
 0xb40   :  { %v18378_v44 = vpop.permute.xlu1 %18377  ;;  %v18373_v24 = vpop.permute.xlu0 %18372 }
 0xb41   :  { %v18380_v41 = vunpack.i.h.bf16 %v18378_v44  ;;  %v18379_v30 = vunpack.i.l.bf16 %v18378_v44  ;;  %v18375_v3 = vunpack.i.h.bf16 %v18373_v24  ;;  %v18374_v36 = vunpack.i.l.bf16 %v18373_v24  ;;  %v19890_v24 = vld [vmem:[%s28262_s12 + $0x200] ss:$16 sps:$4 sm:$0xff]  }
 0xb43   :  { %v11515_v61 = vsel %vm825_vm9, %v18379_v30, %v18380_v41  ;;  %v11521_v14 = vmax.f32 %v11402_v37, %v18380_v41  ;;  %v11432_v2 = vsel %vm825_vm9, %v18374_v36, %v18375_v3  ;;  %v11438_v19 = vmax.f32 %v11397_v35, %v18375_v3 }
 0xb44   :  { %v11520_v26 = vmax.f32 %v11401_v63, %v11515_v61  ;;  %v11437_v60 = vmax.f32 %v11396_v40, %v11432_v2  ;;  %v18383_v12 = vpop.permute.xlu0 %18382  ;;  %v18388_v49 = vpop.permute.xlu1 %18387  ;;  %v11390_v35 = vmax.f32 %v26963_v27, 0.0  ;;  %v19901_v2 = vld [vmem:[%s28262_s12 + $0x22c] ss:$16 sps:$4 sm:$0xff]  }
 0xb45   :  { %v18385_v54 = vunpack.i.h.bf16 %v18383_v12  ;;  %v18384_v55 = vunpack.i.l.bf16 %v18383_v12  ;;  %v18390_v15 = vunpack.i.h.bf16 %v18388_v49  ;;  %v18389_v51 = vunpack.i.l.bf16 %v18388_v49 }
 0xb46   :  { %v11527_v16 = vrot.slane %v11520_v26, 5  ;;  %v11449_v48 = vrot.slane %v11437_v60, 5  ;;  %v11529_v58 = vrot.slane %v11521_v14, 5  ;;  %v11452_v37 = vrot.slane %v11438_v19, 5  ;;  %v19898_v14 = vld [vmem:[%s28262_s12 + $0x224] ss:$16 sps:$4 sm:$0xff]  }
 0xb47   :  { %v11514_v43 = vsel %vm825_vm9, %v18385_v54, %v18379_v30  ;;  %v11431_v31 = vsel %vm825_vm9, %v18384_v55, %v18374_v36  ;;  %v11415_v50 = vsel %vm825_vm9, %v18389_v51, %v18390_v15  ;;  %v11421_v9 = vmax.f32 %v11392_v42, %v18390_v15  ;;  %v19893_v30 = vld [vmem:[%s28262_s12 + $0x208] ss:$16 sps:$4 sm:$0xff]   ;;  %v19896_v54 = vld [vmem:[%s28262_s12 + $0x220] ss:$16 sps:$4 sm:$0xff]   ;;  %v19907_v15 = vld [vmem:[%s28262_s12 + $0x24c] ss:$16 sps:$4 sm:$0xff]  }
 0xb48   :  { %v11528_v29 = vsel %vm1949_vm14, %v11449_v48, %v11527_v16  ;;  %v11519_v45 = vmax.f32 %v11400_v57, %v11514_v43  ;;  %v11436_v53 = vmax.f32 %v11395_v47, %v11431_v31  ;;  %v11409_v52 = vpop.permute.xlu0 %11408  ;;  %v11420_v21 = vmax.f32 %v11391_v23, %v11415_v50  ;;  %v19899_v47 = vld [vmem:[%s28262_s12 + $0x228] ss:$16 sps:$4 sm:$0xff]   ;;  %v19910_v31 = vld [vmem:[%s28262_s12 + $0x264] ss:$16 sps:$4 sm:$0xff]  }
 0xb49   :  { %v27012_v8 = vmax.f32 %v11437_v60, %v11528_v29  ;;  %v11414_v38 = vsel %vm825_vm9, %v11409_v52, %v18389_v51  ;;  %v11451_v5 = vrot.slane %v11421_v9, 5  ;;  %v11530_v6 = vsel %vm1949_vm14, %v11452_v37, %v11529_v58  ;;  %v19902_v58 = vld [vmem:[%s28262_s12 + $0x240] ss:$16 sps:$4 sm:$0xff]   ;;  %v19905_v43 = vld [vmem:[%s28262_s12 + $0x248] ss:$16 sps:$4 sm:$0xff]  }
 0xb4a   :  { %v11525_v0 = vrot.slane %v11519_v45, 5  ;;  %v11446_v62 = vrot.slane %v11436_v53, 5  ;;  %v11419_v17 = vmax.f32 %v11390_v35, %v11414_v38  ;;  %v11448_v28 = vrot.slane %v11420_v21, 5  ;;  %v19913_v45 = vld [vmem:[%s28262_s12 + $0x26c] ss:$16 sps:$4 sm:$0xff]  }
 0xb4b   :  { %v11541_v1 = vrot.slane %v27012_v8, 1  ;;  %v27023_v7 = vmax.f32 %v11438_v19, %v11530_v6  ;;  %v11453_v42 = vsel %vm1949_vm14, %v11451_v5, %v11452_v37  ;;  %v11557_v44 = vrot.slane %v27012_v8, 3  ;;  %v19908_v52 = vld [vmem:[%s28262_s12 + $0x260] ss:$16 sps:$4 sm:$0xff]   ;;  %v19916_v50 = vld [vmem:[%s28262_s12 + $0x284] ss:$16 sps:$4 sm:$0xff]  }
 0xb4c   :  { %v11526_v59 = vsel %vm1949_vm14, %v11446_v62, %v11525_v0  ;;  %v11445_v22 = vrot.slane %v11419_v17, 5  ;;  %v11450_v34 = vsel %vm1949_vm14, %v11448_v28, %v11449_v48  ;;  %v16019_v63 = vrot.slane %v27012_v8, 5  ;;  %v19904_v48 = vld [vmem:[%s28262_s12 + $0x244] ss:$16 sps:$4 sm:$0xff]   ;;  %v19911_v8 = vld [vmem:[%s28262_s12 + $0x268] ss:$16 sps:$4 sm:$0xff]  }
 0xb4d   :  { %v11534_v11 = vmax.f32 %v11436_v53, %v11526_v59  ;;  %v27020_v46 = vmax.f32 %v11420_v21, %v11450_v34  ;;  %v27040_v40 = vmax.f32 %v11421_v9, %v11453_v42  ;;  %v11542_v19 = vrot.slane %v27023_v7, 1  ;;  %v19919_v38 = vld [vmem:[%s28262_s12 + $0x28c] ss:$16 sps:$4 sm:$0xff]   ;;  %v19914_v0 = vld [vmem:[%s28262_s12 + $0x280] ss:$16 sps:$4 sm:$0xff]  }
 0xb4e   :  { %v11447_v18 = vsel %vm1949_vm14, %v11445_v22, %v11446_v62  ;;  %v11558_v51 = vrot.slane %v27023_v7, 3  ;;  %v19917_v62 = vld [vmem:[%s28262_s12 + $0x288] ss:$16 sps:$4 sm:$0xff]   ;;  %v19922_v21 = vld [vmem:[%s28262_s12 + $0x2a4] ss:$16 sps:$4 sm:$0xff]  }
 0xb4f   :  { %v11457_v27 = vmax.f32 %v11419_v17, %v11447_v18  ;;  %v11540_v10 = vrot.slane %v11534_v11, 1  ;;  %v11600_v39 = vsel %vm185_vm7, %v27020_v46, %v11541_v1  ;;  %v11464_v4 = vrot.slane %v27020_v46, 1  ;;  %v19925_v17 = vld [vmem:[%s28262_s12 + $0x2ac] ss:$16 sps:$4 sm:$0xff]   ;;  %v19920_v59 = vld [vmem:[%s28262_s12 + $0x2a0] ss:$16 sps:$4 sm:$0xff]  }
 0xb50   :  { %v11613_v33 = vpack.c.bf16 %v11600_v39, %v11600_v39  ;;  %v11556_v41 = vrot.slane %v11534_v11, 3  ;;  %v11478_v36 = vrot.slane %v27020_v46, 2  ;;  %v11498_v26 = vrot.slane %v27020_v46, 4  ;;  %v19923_v28 = vld [vmem:[%s28262_s12 + $0x2a8] ss:$16 sps:$4 sm:$0xff]  }
 0xb51   :  { %v18391_v56 = vpack.i.bf16 %v11541_v1, %v11540_v10  ;;  %v11599_v32 = vsel %vm185_vm7, %v11457_v27, %v11540_v10  ;;  %v11463_v20 = vrot.slane %v11457_v27, 1  ;;  %v11477_v3 = vrot.slane %v11457_v27, 2  ;;  %v19928_v5 = vld [vmem:[%s28262_s12 + $0x2c4] ss:$16 sps:$4 sm:$0xff]   ;;  %v19931_v22 = vld [vmem:[%s28262_s12 + $0x2cc] ss:$16 sps:$4 sm:$0xff]  }
 0xb52   :  { %v11612_v13 = vpack.c.bf16 %v11599_v32, %v11599_v32  ;;  %14082 = vmatprep.mubr.bf16.mxu0 %v11613_v33  ;;  %14369 = vmatprep.mubr.bf16.mxu1 %v11613_v33  ;;  %v11497_v60 = vrot.slane %v11457_v27, 4  ;;  %v27054_v12 = vsel %vm185_vm7, %v11478_v36, %v11557_v44  ;;  %v16018_v49 = vrot.slane %v11534_v11, 5  ;;  %v19926_v6 = vld [vmem:[%s28262_s12 + $0x2c0] ss:$16 sps:$4 sm:$0xff]   ;;  %v19929_v11 = vld [vmem:[%s28262_s12 + $0x2c8] ss:$16 sps:$4 sm:$0xff]  }
 0xb53   :  { %18392 = vrot.lane.b32.xlu1 %v18391_v56, %s20460_s23  ;;  %v18396_v61 = vpack.i.bf16 %v11464_v4, %v11463_v20  ;;  %v27051_v57 = vsel %vm185_vm7, %v11477_v3, %v11556_v41  ;;  %v27061_v55 = vsel %vm185_vm7, %v11498_v26, %v16019_v63  ;;  %v11465_v16 = vrot.slane %v27040_v40, 1  ;;  %v19934_v34 = vld [vmem:[%s28262_s12 + $0x2e4] ss:$16 sps:$4 sm:$0xff]   ;;  %v19937_v18 = vld [vmem:[%s28262_s12 + $0x2ec] ss:$16 sps:$4 sm:$0xff]  }
 0xb54   :  { %14083 = vmatmul.mubr.bf16.vlgmr.msra.gmra.mrb[132].mxu0 %v11612_v13  ;;  %14370 = vmatmul.mubr.bf16.vlgmr.msra.gmra.mrb[76].mxu1 %v11612_v13  ;;  %v27068_v23 = vsel %vm185_vm7, %v11497_v60, %v16018_v49  ;;  %v11483_v35 = vrot.slane %v11457_v27, 3  ;;  %v11484_v37 = vrot.slane %v27020_v46, 3  ;;  %v11485_v29 = vrot.slane %v27040_v40, 3  ;;  %v19932_v46 = vld [vmem:[%s28262_s12 + $0x2e0] ss:$16 sps:$4 sm:$0xff]  }
 0xb55   :  { %18397 = vrot.lane.b32.xlu0 %v18396_v61, %s20460_s23  ;;  %14092 = vmatpush1.bf16.msra.mxu0 %v19890_v24  ;;  %v18401_v53 = vpack.i.bf16 %v11558_v51, %v11557_v44  ;;  %v19935_v27 = vld [vmem:[%s28262_s12 + $0x2e8] ss:$16 sps:$4 sm:$0xff]   ;;  %v19940_v1 = vld [vmem:[%s28262_s12 + $0x304] ss:$16 sps:$4 sm:$0xff]   ;;  %v19943_v10 = vld [vmem:[%s28262_s12 + $0x30c] ss:$16 sps:$4 sm:$0xff]  }
 0xb56   :  { %14379 = vmatpush1.bf16.msra.mxu1 %v19893_v30  ;;  %14093 = vmatprep.subr.bf16.mxu0 %v19898_v14  ;;  %v18406_v9 = vpack.i.bf16 %v11485_v29, %v11484_v37  ;;  %v19938_v42 = vld [vmem:[%s28262_s12 + $0x300] ss:$16 sps:$4 sm:$0xff]   ;;  %v19941_v39 = vld [vmem:[%s28262_s12 + $0x308] ss:$16 sps:$4 sm:$0xff]   ;;  %v19946_v56 = vld [vmem:[%s28262_s12 + $0x324] ss:$16 sps:$4 sm:$0xff]  }
 0xb57   :  { %11547 = vrot.lane.b32.xlu1 %v11542_v19, %s20460_s23  ;;  %14380 = vmatprep.subr.bf16.mxu1 %v19901_v2  ;;  %v19949_v32 = vld [vmem:[%s28262_s12 + $0x32c] ss:$16 sps:$4 sm:$0xff]   ;;  %v19944_v20 = vld [vmem:[%s28262_s12 + $0x320] ss:$16 sps:$4 sm:$0xff]   ;;  %v19947_v33 = vld [vmem:[%s28262_s12 + $0x328] ss:$16 sps:$4 sm:$0xff]  }
 0xb58   :  { %v19952_v13 = vld [vmem:[%s28262_s12 + $0x344] ss:$16 sps:$4 sm:$0xff]   ;;  %v19955_v4 = vld [vmem:[%s28262_s12 + $0x34c] ss:$16 sps:$4 sm:$0xff]   ;;  %v19950_v44 = vld [vmem:[%s28262_s12 + $0x340] ss:$16 sps:$4 sm:$0xff]  }
 0xb59   :  { %11470 = vrot.lane.b32.xlu0 %v11465_v16, %s20460_s23  ;;  %14094 = vmatpush1.bf16.msra.mxu0 %v19896_v54  ;;  %v19953_v24 = vld [vmem:[%s28262_s12 + $0x348] ss:$16 sps:$4 sm:$0xff]   ;;  %v19961_v30 = vld [vmem:[%s28262_s12 + $0x36c] ss:$16 sps:$4 sm:$0xff]   ;;  %v19956_v3 = vld [vmem:[%s28262_s12 + $0x360] ss:$16 sps:$4 sm:$0xff]  }
 0xb5a   :  { %14381 = vmatpush1.bf16.msra.mxu1 %v19899_v47  ;;  %14095 = vmatprep.subr.bf16.mxu0 %v19904_v48  ;;  %v19959_v36 = vld [vmem:[%s28262_s12 + $0x368] ss:$16 sps:$4 sm:$0xff]   ;;  %v19964_v63 = vld [vmem:[%s28262_s12 + $0x384] ss:$16 sps:$4 sm:$0xff]   ;;  %v19967_v61 = vld [vmem:[%s28262_s12 + $0x38c] ss:$16 sps:$4 sm:$0xff]  }
 0xb5b   :  { %11559 = vrot.lane.b32.xlu1 %v11556_v41, %s20460_s23  ;;  %14382 = vmatprep.subr.bf16.mxu1 %v19907_v15  ;;  %v19958_v41 = vld [vmem:[%s28262_s12 + $0x364] ss:$16 sps:$4 sm:$0xff]   ;;  %v19962_v14 = vld [vmem:[%s28262_s12 + $0x380] ss:$16 sps:$4 sm:$0xff]   ;;  %v19965_v2 = vld [vmem:[%s28262_s12 + $0x388] ss:$16 sps:$4 sm:$0xff]  }
 0xb5c   :  { %v19970_v26 = vld [vmem:[%s28262_s12 + $0x3a4] ss:$16 sps:$4 sm:$0xff]   ;;  %v19973_v60 = vld [vmem:[%s28262_s12 + $0x3ac] ss:$16 sps:$4 sm:$0xff]   ;;  %v19968_v19 = vld [vmem:[%s28262_s12 + $0x3a0] ss:$16 sps:$4 sm:$0xff]  }
 0xb5d   :  { %11486 = vrot.lane.b32.xlu0 %v11483_v35, %s20460_s23  ;;  %14096 = vmatpush1.bf16.msra.mxu0 %v19902_v58  ;;  %v19971_v49 = vld [vmem:[%s28262_s12 + $0x3a8] ss:$16 sps:$4 sm:$0xff]   ;;  %v19976_v54 = vld [vmem:[%s28262_s12 + $0x3c4] ss:$16 sps:$4 sm:$0xff]   ;;  %v19979_v47 = vld [vmem:[%s28262_s12 + $0x3cc] ss:$16 sps:$4 sm:$0xff]  }
 0xb5e   :  { %14383 = vmatpush1.bf16.msra.mxu1 %v19905_v43  ;;  %14097 = vmatprep.subr.bf16.mxu0 %v19910_v31  ;;  %v19974_v16 = vld [vmem:[%s28262_s12 + $0x3c0] ss:$16 sps:$4 sm:$0xff]   ;;  %v19977_v48 = vld [vmem:[%s28262_s12 + $0x3c8] ss:$16 sps:$4 sm:$0xff]   ;;  %v19982_v15 = vld [vmem:[%s28262_s12 + $0x3e4] ss:$16 sps:$4 sm:$0xff]  }
 0xb5f   :  { %18402 = vrot.lane.b32.xlu1 %v18401_v53, %s20460_s23  ;;  %14384 = vmatprep.subr.bf16.mxu1 %v19913_v45  ;;  %v19985_v51 = vld [vmem:[%s28262_s12 + $0x3ec] ss:$16 sps:$4 sm:$0xff]   ;;  %v19980_v58 = vld [vmem:[%s28262_s12 + $0x3e0] ss:$16 sps:$4 sm:$0xff]   ;;  %v19983_v43 = vld [vmem:[%s28262_s12 + $0x3e8] ss:$16 sps:$4 sm:$0xff]  }
 0xb60   :  { %v19988_v31 = vld [vmem:[%s28262_s12 + $0x404] ss:$16 sps:$4 sm:$0xff]   ;;  %v19991_v35 = vld [vmem:[%s28262_s12 + $0x40c] ss:$16 sps:$4 sm:$0xff]  }
 0xb61   :  { %18407 = vrot.lane.b32.xlu0 %v18406_v9, %s20460_s23  ;;  %14098 = vmatpush1.bf16.msra.mxu0 %v19908_v52 }
 0xb62   :  { %14385 = vmatpush1.bf16.msra.mxu1 %v19911_v8  ;;  %14099 = vmatprep.subr.bf16.mxu0 %v19916_v50 }
 0xb63   :  { %14386 = vmatprep.subr.bf16.mxu1 %v19919_v38 }
 0xb65   :  { %14100 = vmatpush1.bf16.msra.mxu0 %v19914_v0 }
 0xb66   :  { %14387 = vmatpush1.bf16.msra.mxu1 %v19917_v62  ;;  %14101 = vmatprep.subr.bf16.mxu0 %v19922_v21 }
 0xb67   :  { %14388 = vmatprep.subr.bf16.mxu1 %v19925_v17 }
 0xb69   :  { %14102 = vmatpush1.bf16.msra.mxu0 %v19920_v59 }
 0xb6a   :  { %14389 = vmatpush1.bf16.msra.mxu1 %v19923_v28  ;;  %14103 = vmatprep.subr.bf16.mxu0 %v19928_v5 }
 0xb6b   :  { %14390 = vmatprep.subr.bf16.mxu1 %v19931_v22 }
 0xb6d   :  { %14104 = vmatpush1.bf16.msra.mxu0 %v19926_v6 }
 0xb6e   :  { %14391 = vmatpush1.bf16.msra.mxu1 %v19929_v11  ;;  %14105 = vmatprep.subr.bf16.mxu0 %v19934_v34 }
 0xb6f   :  { %14392 = vmatprep.subr.bf16.mxu1 %v19937_v18 }
 0xb71   :  { %14106 = vmatpush1.bf16.msra.mxu0 %v19932_v46  ;;  %v19986_v46 = vld [vmem:[%s28262_s12 + $0x400] ss:$16 sps:$4 sm:$0xff]  }
 0xb72   :  { %14393 = vmatpush1.bf16.msra.mxu1 %v19935_v27  ;;  %14107 = vmatprep.subr.bf16.mxu0 %v19940_v1  ;;  %v19989_v27 = vld [vmem:[%s28262_s12 + $0x408] ss:$16 sps:$4 sm:$0xff]  }
 0xb73   :  { %14394 = vmatprep.subr.bf16.mxu1 %v19943_v10 }
 0xb75   :  { %14108 = vmatpush1.bf16.msra.mxu0 %v19938_v42  ;;  %v19994_v42 = vld [vmem:[%s28262_s12 + $0x424] ss:$16 sps:$4 sm:$0xff]  }
 0xb76   :  { %14395 = vmatpush1.bf16.msra.mxu1 %v19941_v39  ;;  %14109 = vmatprep.subr.bf16.mxu0 %v19946_v56  ;;  %v19997_v39 = vld [vmem:[%s28262_s12 + $0x42c] ss:$16 sps:$4 sm:$0xff]  }
 0xb77   :  { %14396 = vmatprep.subr.bf16.mxu1 %v19949_v32  ;;  %v11617_v32 = vpack.c.bf16 %v27051_v57, %v27051_v57  ;;  %v20000_v57 = vld [vmem:[%s28262_s12 + $0x444] ss:$16 sps:$4 sm:$0xff]  }
 0xb79   :  { %14110 = vmatpush1.bf16.msra.mxu0 %v19944_v20 }
 0xb7a   :  { %14397 = vmatpush1.bf16.msra.mxu1 %v19947_v33  ;;  %14111 = vmatprep.subr.bf16.mxu0 %v19952_v13  ;;  %v19992_v33 = vld [vmem:[%s28262_s12 + $0x420] ss:$16 sps:$4 sm:$0xff]   ;;  %v19995_v13 = vld [vmem:[%s28262_s12 + $0x428] ss:$16 sps:$4 sm:$0xff]  }
 0xb7b   :  { %14398 = vmatprep.subr.bf16.mxu1 %v19955_v4 }
 0xb7d   :  { %14112 = vmatpush1.bf16.msra.mxu0 %v19950_v44  ;;  %v20003_v44 = vld [vmem:[%s28262_s12 + $0x44c] ss:$16 sps:$4 sm:$0xff]  }
 0xb7e   :  { %14399 = vmatpush1.bf16.msra.mxu1 %v19953_v24  ;;  %14113 = vmatprep.subr.bf16.mxu0 %v19958_v41 }
 0xb7f   :  { %14400 = vmatprep.subr.bf16.mxu1 %v19961_v30 }
 0xb81   :  { %14114 = vmatpush1.bf16.msra.mxu0 %v19956_v3 }
 0xb82   :  { %14401 = vmatpush1.bf16.msra.mxu1 %v19959_v36  ;;  %14115 = vmatprep.subr.bf16.mxu0 %v19964_v63  ;;  %v19998_v36 = vld [vmem:[%s28262_s12 + $0x440] ss:$16 sps:$4 sm:$0xff]   ;;  %v20001_v63 = vld [vmem:[%s28262_s12 + $0x448] ss:$16 sps:$4 sm:$0xff]  }
 0xb83   :  { %14402 = vmatprep.subr.bf16.mxu1 %v19967_v61  ;;  %v20006_v61 = vld [vmem:[%s28262_s12 + $0x464] ss:$16 sps:$4 sm:$0xff]  }
 0xb85   :  { %14116 = vmatpush1.bf16.msra.mxu0 %v19962_v14  ;;  %v20009_v14 = vld [vmem:[%s28262_s12 + $0x46c] ss:$16 sps:$4 sm:$0xff]  }
 0xb86   :  { %14403 = vmatpush1.bf16.msra.mxu1 %v19965_v2  ;;  %14117 = vmatprep.subr.bf16.mxu0 %v19970_v26 }
 0xb87   :  { %14404 = vmatprep.subr.bf16.mxu1 %v19973_v60  ;;  %v20004_v60 = vld [vmem:[%s28262_s12 + $0x460] ss:$16 sps:$4 sm:$0xff]  }
 0xb89   :  { %14118 = vmatpush1.bf16.msra.mxu0 %v19968_v19  ;;  %v20007_v19 = vld [vmem:[%s28262_s12 + $0x468] ss:$16 sps:$4 sm:$0xff]  }
 0xb8a   :  { %14405 = vmatpush1.bf16.msra.mxu1 %v19971_v49  ;;  %14119 = vmatprep.subr.bf16.mxu0 %v19976_v54  ;;  %v20012_v49 = vld [vmem:[%s28262_s12 + $0x484] ss:$16 sps:$4 sm:$0xff]   ;;  %v20015_v54 = vld [vmem:[%s28262_s12 + $0x48c] ss:$16 sps:$4 sm:$0xff]  }
 0xb8b   :  { %14406 = vmatprep.subr.bf16.mxu1 %v19979_v47  ;;  %v20010_v47 = vld [vmem:[%s28262_s12 + $0x480] ss:$16 sps:$4 sm:$0xff]  }
 0xb8d   :  { %14120 = vmatpush1.bf16.msra.mxu0 %v19974_v16  ;;  %v20013_v16 = vld [vmem:[%s28262_s12 + $0x488] ss:$16 sps:$4 sm:$0xff]  }
 0xb8e   :  { %14407 = vmatpush1.bf16.msra.mxu1 %v19977_v48  ;;  %14121 = vmatprep.subr.bf16.mxu0 %v19982_v15  ;;  %v20018_v48 = vld [vmem:[%s28262_s12 + $0x4a4] ss:$16 sps:$4 sm:$0xff]   ;;  %v20021_v15 = vld [vmem:[%s28262_s12 + $0x4ac] ss:$16 sps:$4 sm:$0xff]  }
 0xb8f   :  { %14408 = vmatprep.subr.bf16.mxu1 %v19985_v51  ;;  %v20016_v51 = vld [vmem:[%s28262_s12 + $0x4a0] ss:$16 sps:$4 sm:$0xff]  }
 0xb91   :  { %14122 = vmatpush1.bf16.msra.mxu0 %v19980_v58  ;;  %v20019_v58 = vld [vmem:[%s28262_s12 + $0x4a8] ss:$16 sps:$4 sm:$0xff]  }
 0xb92   :  { %14409 = vmatpush1.bf16.msra.mxu1 %v19983_v43  ;;  %14132 = vmatprep.subr.bf16.mxu0 %v19988_v31  ;;  %v20024_v43 = vld [vmem:[%s28262_s12 + $0x4c4] ss:$16 sps:$4 sm:$0xff]   ;;  %v20027_v31 = vld [vmem:[%s28262_s12 + $0x4cc] ss:$16 sps:$4 sm:$0xff]  }
 0xb93   :  { %14419 = vmatprep.subr.bf16.mxu1 %v19991_v35  ;;  %v20022_v35 = vld [vmem:[%s28262_s12 + $0x4c0] ss:$16 sps:$4 sm:$0xff]  }
 0xbc5   :  { %v18393_v37 = vpop.permute.xlu1 %18392 }
 0xbc6   :  { %v18395_v29 = vunpack.i.h.bf16 %v18393_v37  ;;  %v18394_v45 = vunpack.i.l.bf16 %v18393_v37  ;;  %v20025_v37 = vld [vmem:[%s28262_s12 + $0x4c8] ss:$16 sps:$4 sm:$0xff]  }
 0xbc7   :  { %v18398_v8 = vpop.permute.xlu0 %18397 }
 0xbc8   :  { %v11549_v53 = vsel %vm825_vm9, %v18394_v45, %v18395_v29  ;;  %v11571_v52 = vsel %vm825_vm9, %v27023_v7, %v18394_v45  ;;  %v18400_v38 = vunpack.i.h.bf16 %v18398_v8  ;;  %v18399_v0 = vunpack.i.l.bf16 %v18398_v8  ;;  %v20033_v45 = vld [vmem:[%s28262_s12 + $0x4ec] ss:$16 sps:$4 sm:$0xff]   ;;  %v20036_v8 = vld [vmem:[%s28262_s12 + $0x504] ss:$16 sps:$4 sm:$0xff]  }
 0xbc9   :  { %v11575_v50 = vrot.slane %v11571_v52, 1  ;;  %v11576_v9 = vrot.slane %v11549_v53, 1  ;;  %v11548_v62 = vpop.permute.xlu1 %11547  ;;  %v20028_v53 = vld [vmem:[%s28262_s12 + $0x4e0] ss:$16 sps:$4 sm:$0xff]   ;;  %v20031_v52 = vld [vmem:[%s28262_s12 + $0x4e8] ss:$16 sps:$4 sm:$0xff]  }
 0xbca   :  { %v11550_v21 = vsel %vm825_vm9, %v18395_v29, %v11548_v62  ;;  %v11472_v17 = vsel %vm825_vm9, %v18399_v0, %v18400_v38  ;;  %v11503_v59 = vsel %vm825_vm9, %v27040_v40, %v18399_v0  ;;  %v20030_v29 = vld [vmem:[%s28262_s12 + $0x4e4] ss:$16 sps:$4 sm:$0xff]   ;;  %v20045_v62 = vld [vmem:[%s28262_s12 + $0x52c] ss:$16 sps:$4 sm:$0xff]  }
 0xbcb   :  { %v11577_v28 = vrot.slane %v11550_v21, 1  ;;  %v11471_v5 = vpop.permute.xlu0 %11470  ;;  %v11602_v22 = vsel %vm185_vm7, %v11472_v17, %v11576_v9  ;;  %v11601_v6 = vsel %vm185_vm7, %v11503_v59, %v11575_v50  ;;  %v20039_v50 = vld [vmem:[%s28262_s12 + $0x50c] ss:$16 sps:$4 sm:$0xff]   ;;  %v20034_v9 = vld [vmem:[%s28262_s12 + $0x500] ss:$16 sps:$4 sm:$0xff]  }
 0xbcc   :  { %v11473_v11 = vsel %vm825_vm9, %v18400_v38, %v11471_v5  ;;  %v11615_v18 = vpack.c.bf16 %v11602_v22, %v11602_v22  ;;  %v11614_v1 = vpack.c.bf16 %v11601_v6, %v11601_v6  ;;  %v20037_v38 = vld [vmem:[%s28262_s12 + $0x508] ss:$16 sps:$4 sm:$0xff]   ;;  %v20042_v0 = vld [vmem:[%s28262_s12 + $0x524] ss:$16 sps:$4 sm:$0xff]   ;;  %v20040_v21 = vld [vmem:[%s28262_s12 + $0x520] ss:$16 sps:$4 sm:$0xff]  }
 0xbcd   :  { %v27263_v34 = vpop.permute.xlu1 %11559  ;;  %v27272_v10 = vsel %vm185_vm7, %v11473_v11, %v11577_v28  ;;  %v20043_v17 = vld [vmem:[%s28262_s12 + $0x528] ss:$16 sps:$4 sm:$0xff]   ;;  %v20048_v59 = vld [vmem:[%s28262_s12 + $0x544] ss:$16 sps:$4 sm:$0xff]   ;;  %v20051_v28 = vld [vmem:[%s28262_s12 + $0x54c] ss:$16 sps:$4 sm:$0xff]  }
 0xbce   :  { %14123 = vmatprep.mubr.bf16.mxu0 %v11615_v18  ;;  %14410 = vmatprep.mubr.bf16.mxu1 %v11615_v18  ;;  %v20046_v5 = vld [vmem:[%s28262_s12 + $0x540] ss:$16 sps:$4 sm:$0xff]   ;;  %v20049_v22 = vld [vmem:[%s28262_s12 + $0x548] ss:$16 sps:$4 sm:$0xff]   ;;  %v20054_v6 = vld [vmem:[%s28262_s12 + $0x564] ss:$16 sps:$4 sm:$0xff]  }
 0xbcf   :  { %v27280_v56 = vpop.permute.xlu0 %11486  ;;  %14124 = vmatmul.mubr.bf16.vlgmr.msra.gmra.mrb[132].mxu0 %v11614_v1  ;;  %14411 = vmatmul.mubr.bf16.vlgmr.msra.gmra.mrb[76].mxu1 %v11614_v1  ;;  %v20057_v11 = vld [vmem:[%s28262_s12 + $0x56c] ss:$16 sps:$4 sm:$0xff]   ;;  %v20052_v18 = vld [vmem:[%s28262_s12 + $0x560] ss:$16 sps:$4 sm:$0xff]  }
 0xbd0   :  { %14133 = vmatpush1.bf16.msra.mxu0 %v19986_v46  ;;  %14420 = vmatpush1.bf16.msra.mxu1 %v19989_v27  ;;  %v20055_v46 = vld [vmem:[%s28262_s12 + $0x568] ss:$16 sps:$4 sm:$0xff]   ;;  %v20060_v27 = vld [vmem:[%s28262_s12 + $0x584] ss:$16 sps:$4 sm:$0xff]   ;;  %v20063_v1 = vld [vmem:[%s28262_s12 + $0x58c] ss:$16 sps:$4 sm:$0xff]  }
 0xbd1   :  { %v27284_v20 = vpop.permute.xlu1 %18402  ;;  %14164 = vmatprep.mubr.bf16.mxu0 %v11617_v32  ;;  %14451 = vmatprep.mubr.bf16.mxu1 %v11617_v32  ;;  %v20066_v32 = vld [vmem:[%s28262_s12 + $0x5a4] ss:$16 sps:$4 sm:$0xff]  }
 0xbd2   :  { %v18404_v4 = vunpack.i.l.bf16 %v27284_v20  ;;  %14134 = vmatprep.subr.bf16.mxu0 %v19994_v42  ;;  %14421 = vmatprep.subr.bf16.mxu1 %v19997_v39  ;;  %v20058_v42 = vld [vmem:[%s28262_s12 + $0x580] ss:$16 sps:$4 sm:$0xff]   ;;  %v20061_v39 = vld [vmem:[%s28262_s12 + $0x588] ss:$16 sps:$4 sm:$0xff]  }
 0xbd3   :  { %v27303_v41 = vpop.permute.xlu0 %18407 }
 0xbd4   :  { %v11565_v24 = vsel %vm825_vm9, %v27263_v34, %v18404_v4  ;;  %v18409_v3 = vunpack.i.l.bf16 %v27303_v41  ;;  %14135 = vmatpush1.bf16.msra.mxu0 %v19992_v33  ;;  %14422 = vmatpush1.bf16.msra.mxu1 %v19995_v13  ;;  %v20069_v33 = vld [vmem:[%s28262_s12 + $0x5ac] ss:$16 sps:$4 sm:$0xff]   ;;  %v20064_v13 = vld [vmem:[%s28262_s12 + $0x5a0] ss:$16 sps:$4 sm:$0xff]  }
 0xbd5   :  { %v11581_v30 = vrot.slane %v11565_v24, 1  ;;  %14136 = vmatprep.subr.bf16.mxu0 %v20000_v57  ;;  %14423 = vmatprep.subr.bf16.mxu1 %v20003_v44  ;;  %v20067_v57 = vld [vmem:[%s28262_s12 + $0x5a8] ss:$16 sps:$4 sm:$0xff]   ;;  %v20072_v44 = vld [vmem:[%s28262_s12 + $0x5c4] ss:$16 sps:$4 sm:$0xff]  }
 0xbd6   :  { %v11492_v2 = vsel %vm825_vm9, %v27280_v56, %v18409_v3  ;;  %v20075_v24 = vld [vmem:[%s28262_s12 + $0x5cc] ss:$16 sps:$4 sm:$0xff]  }
 0xbd7   :  { %v27323_v26 = vsel %vm185_vm7, %v11492_v2, %v11581_v30  ;;  %v11554_v30 = vrot.slane %v27023_v7, 2  ;;  %v11479_v2 = vrot.slane %v27040_v40, 2 }
 0xbd8   :  { %14137 = vmatpush1.bf16.msra.mxu0 %v19998_v36  ;;  %14424 = vmatpush1.bf16.msra.mxu1 %v20001_v63  ;;  %v20070_v63 = vld [vmem:[%s28262_s12 + $0x5c0] ss:$16 sps:$4 sm:$0xff]  }
 0xbd9   :  { %14138 = vmatprep.subr.bf16.mxu0 %v20006_v61  ;;  %14425 = vmatprep.subr.bf16.mxu1 %v20009_v14  ;;  %v11572_v36 = vsel %vm825_vm9, %v11554_v30, %v27263_v34  ;;  %v20073_v61 = vld [vmem:[%s28262_s12 + $0x5c8] ss:$16 sps:$4 sm:$0xff]   ;;  %v20078_v14 = vld [vmem:[%s28262_s12 + $0x5e4] ss:$16 sps:$4 sm:$0xff]   ;;  %v20081_v34 = vld [vmem:[%s28262_s12 + $0x5ec] ss:$16 sps:$4 sm:$0xff]  }
 0xbda   :  { %v20139_v30 = vld [vmem:[%s28262_s12 + $0x728] ss:$16 sps:$4 sm:$0xff]  }
 0xbdc   :  { %14139 = vmatpush1.bf16.msra.mxu0 %v20004_v60  ;;  %14426 = vmatpush1.bf16.msra.mxu1 %v20007_v19  ;;  %v11580_v60 = vrot.slane %v11572_v36, 1  ;;  %v11504_v19 = vsel %vm825_vm9, %v11479_v2, %v27280_v56  ;;  %v20087_v56 = vld [vmem:[%s28262_s12 + $0x60c] ss:$16 sps:$4 sm:$0xff]   ;;  %v20144_v36 = vld [vmem:[%s28262_s12 + $0x744] ss:$16 sps:$4 sm:$0xff]  }
 0xbdd   :  { %14140 = vmatprep.subr.bf16.mxu0 %v20012_v49  ;;  %14427 = vmatprep.subr.bf16.mxu1 %v20015_v54  ;;  %v20076_v49 = vld [vmem:[%s28262_s12 + $0x5e0] ss:$16 sps:$4 sm:$0xff]   ;;  %v20079_v54 = vld [vmem:[%s28262_s12 + $0x5e8] ss:$16 sps:$4 sm:$0xff]   ;;  %v20153_v2 = vld [vmem:[%s28262_s12 + $0x76c] ss:$16 sps:$4 sm:$0xff]  }
 0xbe0   :  { %14141 = vmatpush1.bf16.msra.mxu0 %v20010_v47  ;;  %14428 = vmatpush1.bf16.msra.mxu1 %v20013_v16  ;;  %v20084_v47 = vld [vmem:[%s28262_s12 + $0x604] ss:$16 sps:$4 sm:$0xff]   ;;  %v11606_v16 = vsel %vm185_vm7, %v11504_v19, %v11580_v60  ;;  %v20148_v60 = vld [vmem:[%s28262_s12 + $0x760] ss:$16 sps:$4 sm:$0xff]   ;;  %v20151_v19 = vld [vmem:[%s28262_s12 + $0x768] ss:$16 sps:$4 sm:$0xff]  }
 0xbe1   :  { %14142 = vmatprep.subr.bf16.mxu0 %v20018_v48  ;;  %14429 = vmatprep.subr.bf16.mxu1 %v20021_v15  ;;  %v20082_v48 = vld [vmem:[%s28262_s12 + $0x600] ss:$16 sps:$4 sm:$0xff]   ;;  %v11616_v15 = vpack.c.bf16 %v27272_v10, %v27272_v10 }
 0xbe2   :  { %v20088_v10 = vld [vmem:[%s28262_s12 + $0x620] ss:$16 sps:$4 sm:$0xff]  }
 0xbe4   :  { %14143 = vmatpush1.bf16.msra.mxu0 %v20016_v51  ;;  %14430 = vmatpush1.bf16.msra.mxu1 %v20019_v58  ;;  %v20085_v51 = vld [vmem:[%s28262_s12 + $0x608] ss:$16 sps:$4 sm:$0xff]   ;;  %v11619_v58 = vpack.c.bf16 %v11606_v16, %v11606_v16  ;;  %v20162_v16 = vld [vmem:[%s28262_s12 + $0x7a4] ss:$16 sps:$4 sm:$0xff]  }
 0xbe5   :  { %14144 = vmatprep.subr.bf16.mxu0 %v20024_v43  ;;  %14431 = vmatprep.subr.bf16.mxu1 %v20027_v31  ;;  %v20090_v43 = vld [vmem:[%s28262_s12 + $0x624] ss:$16 sps:$4 sm:$0xff]   ;;  %v20093_v31 = vld [vmem:[%s28262_s12 + $0x62c] ss:$16 sps:$4 sm:$0xff]  }
 0xbe8   :  { %14145 = vmatpush1.bf16.msra.mxu0 %v20022_v35  ;;  %14432 = vmatpush1.bf16.msra.mxu1 %v20025_v37  ;;  %v20091_v35 = vld [vmem:[%s28262_s12 + $0x628] ss:$16 sps:$4 sm:$0xff]   ;;  %v20096_v37 = vld [vmem:[%s28262_s12 + $0x644] ss:$16 sps:$4 sm:$0xff]  }
 0xbe9   :  { %14146 = vmatprep.subr.bf16.mxu0 %v20030_v29  ;;  %14433 = vmatprep.subr.bf16.mxu1 %v20033_v45  ;;  %v20099_v29 = vld [vmem:[%s28262_s12 + $0x64c] ss:$16 sps:$4 sm:$0xff]   ;;  %v20094_v45 = vld [vmem:[%s28262_s12 + $0x640] ss:$16 sps:$4 sm:$0xff]  }
 0xbec   :  { %14147 = vmatpush1.bf16.msra.mxu0 %v20028_v53  ;;  %14434 = vmatpush1.bf16.msra.mxu1 %v20031_v52  ;;  %v20097_v53 = vld [vmem:[%s28262_s12 + $0x648] ss:$16 sps:$4 sm:$0xff]   ;;  %v20102_v52 = vld [vmem:[%s28262_s12 + $0x664] ss:$16 sps:$4 sm:$0xff]  }
 0xbed   :  { %14148 = vmatprep.subr.bf16.mxu0 %v20036_v8  ;;  %14435 = vmatprep.subr.bf16.mxu1 %v20039_v50  ;;  %v20105_v8 = vld [vmem:[%s28262_s12 + $0x66c] ss:$16 sps:$4 sm:$0xff]   ;;  %v20100_v50 = vld [vmem:[%s28262_s12 + $0x660] ss:$16 sps:$4 sm:$0xff]  }
 0xbf0   :  { %14149 = vmatpush1.bf16.msra.mxu0 %v20034_v9  ;;  %14436 = vmatpush1.bf16.msra.mxu1 %v20037_v38  ;;  %v20103_v9 = vld [vmem:[%s28262_s12 + $0x668] ss:$16 sps:$4 sm:$0xff]   ;;  %v20108_v38 = vld [vmem:[%s28262_s12 + $0x684] ss:$16 sps:$4 sm:$0xff]  }
 0xbf1   :  { %14150 = vmatprep.subr.bf16.mxu0 %v20042_v0  ;;  %14437 = vmatprep.subr.bf16.mxu1 %v20045_v62  ;;  %v20111_v0 = vld [vmem:[%s28262_s12 + $0x68c] ss:$16 sps:$4 sm:$0xff]   ;;  %v20106_v62 = vld [vmem:[%s28262_s12 + $0x680] ss:$16 sps:$4 sm:$0xff]  }
 0xbf4   :  { %14151 = vmatpush1.bf16.msra.mxu0 %v20040_v21  ;;  %14438 = vmatpush1.bf16.msra.mxu1 %v20043_v17  ;;  %v20109_v21 = vld [vmem:[%s28262_s12 + $0x688] ss:$16 sps:$4 sm:$0xff]   ;;  %v20114_v17 = vld [vmem:[%s28262_s12 + $0x6a4] ss:$16 sps:$4 sm:$0xff]  }
 0xbf5   :  { %14152 = vmatprep.subr.bf16.mxu0 %v20048_v59  ;;  %14439 = vmatprep.subr.bf16.mxu1 %v20051_v28  ;;  %v20117_v59 = vld [vmem:[%s28262_s12 + $0x6ac] ss:$16 sps:$4 sm:$0xff]   ;;  %v20112_v28 = vld [vmem:[%s28262_s12 + $0x6a0] ss:$16 sps:$4 sm:$0xff]  }
 0xbf8   :  { %14153 = vmatpush1.bf16.msra.mxu0 %v20046_v5  ;;  %14440 = vmatpush1.bf16.msra.mxu1 %v20049_v22  ;;  %v20115_v5 = vld [vmem:[%s28262_s12 + $0x6a8] ss:$16 sps:$4 sm:$0xff]   ;;  %v20120_v22 = vld [vmem:[%s28262_s12 + $0x6c4] ss:$16 sps:$4 sm:$0xff]  }
 0xbf9   :  { %14154 = vmatprep.subr.bf16.mxu0 %v20054_v6  ;;  %14441 = vmatprep.subr.bf16.mxu1 %v20057_v11  ;;  %v20123_v6 = vld [vmem:[%s28262_s12 + $0x6cc] ss:$16 sps:$4 sm:$0xff]   ;;  %v20118_v11 = vld [vmem:[%s28262_s12 + $0x6c0] ss:$16 sps:$4 sm:$0xff]  }
 0xbfc   :  { %14155 = vmatpush1.bf16.msra.mxu0 %v20052_v18  ;;  %14442 = vmatpush1.bf16.msra.mxu1 %v20055_v46  ;;  %v20121_v18 = vld [vmem:[%s28262_s12 + $0x6c8] ss:$16 sps:$4 sm:$0xff]   ;;  %v20126_v46 = vld [vmem:[%s28262_s12 + $0x6e4] ss:$16 sps:$4 sm:$0xff]  }
 0xbfd   :  { %14156 = vmatprep.subr.bf16.mxu0 %v20060_v27  ;;  %14443 = vmatprep.subr.bf16.mxu1 %v20063_v1  ;;  %v20129_v27 = vld [vmem:[%s28262_s12 + $0x6ec] ss:$16 sps:$4 sm:$0xff]   ;;  %v20124_v1 = vld [vmem:[%s28262_s12 + $0x6e0] ss:$16 sps:$4 sm:$0xff]  }
 0xc00   :  { %14157 = vmatpush1.bf16.msra.mxu0 %v20058_v42  ;;  %14444 = vmatpush1.bf16.msra.mxu1 %v20061_v39  ;;  %v20127_v42 = vld [vmem:[%s28262_s12 + $0x6e8] ss:$16 sps:$4 sm:$0xff]   ;;  %v20132_v39 = vld [vmem:[%s28262_s12 + $0x704] ss:$16 sps:$4 sm:$0xff]  }
 0xc01   :  { %14158 = vmatprep.subr.bf16.mxu0 %v20066_v32  ;;  %14445 = vmatprep.subr.bf16.mxu1 %v20069_v33  ;;  %v20135_v32 = vld [vmem:[%s28262_s12 + $0x70c] ss:$16 sps:$4 sm:$0xff]   ;;  %v20130_v33 = vld [vmem:[%s28262_s12 + $0x700] ss:$16 sps:$4 sm:$0xff]  }
 0xc04   :  { %14159 = vmatpush1.bf16.msra.mxu0 %v20064_v13  ;;  %14446 = vmatpush1.bf16.msra.mxu1 %v20067_v57  ;;  %v20133_v13 = vld [vmem:[%s28262_s12 + $0x708] ss:$16 sps:$4 sm:$0xff]   ;;  %v20138_v57 = vld [vmem:[%s28262_s12 + $0x724] ss:$16 sps:$4 sm:$0xff]  }
 0xc05   :  { %14160 = vmatprep.subr.bf16.mxu0 %v20072_v44  ;;  %14447 = vmatprep.subr.bf16.mxu1 %v20075_v24  ;;  %v20141_v44 = vld [vmem:[%s28262_s12 + $0x72c] ss:$16 sps:$4 sm:$0xff]   ;;  %v20136_v24 = vld [vmem:[%s28262_s12 + $0x720] ss:$16 sps:$4 sm:$0xff]  }
 0xc08   :  { %14161 = vmatpush1.bf16.msra.mxu0 %v20070_v63  ;;  %14448 = vmatpush1.bf16.msra.mxu1 %v20073_v61  ;;  %v20147_v63 = vld [vmem:[%s28262_s12 + $0x74c] ss:$16 sps:$4 sm:$0xff]   ;;  %v20142_v61 = vld [vmem:[%s28262_s12 + $0x740] ss:$16 sps:$4 sm:$0xff]  }
 0xc09   :  { %14162 = vmatprep.subr.bf16.mxu0 %v20078_v14  ;;  %14449 = vmatprep.subr.bf16.mxu1 %v20081_v34  ;;  %v20145_v14 = vld [vmem:[%s28262_s12 + $0x748] ss:$16 sps:$4 sm:$0xff]   ;;  %v20150_v34 = vld [vmem:[%s28262_s12 + $0x764] ss:$16 sps:$4 sm:$0xff]  }
 0xc0c   :  { %14163 = vmatpush1.bf16.msra.mxu0 %v20076_v49  ;;  %14450 = vmatpush1.bf16.msra.mxu1 %v20079_v54  ;;  %v20156_v49 = vld [vmem:[%s28262_s12 + $0x784] ss:$16 sps:$4 sm:$0xff]   ;;  %v20159_v54 = vld [vmem:[%s28262_s12 + $0x78c] ss:$16 sps:$4 sm:$0xff]  }
 0xc0d   :  { %14173 = vmatprep.subr.bf16.mxu0 %v20084_v47  ;;  %14460 = vmatprep.subr.bf16.mxu1 %v20087_v56  ;;  %v20154_v47 = vld [vmem:[%s28262_s12 + $0x780] ss:$16 sps:$4 sm:$0xff]   ;;  %v20157_v56 = vld [vmem:[%s28262_s12 + $0x788] ss:$16 sps:$4 sm:$0xff]  }
 0xc0f   :  { %14165 = vmatmul.mubr.bf16.vlgmr.msra.gmra.mrb[132].mxu0 %v11616_v15  ;;  %14452 = vmatmul.mubr.bf16.vlgmr.msra.gmra.mrb[76].mxu1 %v11616_v15  ;;  %v20160_v15 = vld [vmem:[%s28262_s12 + $0x7a0] ss:$16 sps:$4 sm:$0xff]  }
 0xc10   :  { %14174 = vmatpush1.bf16.msra.mxu0 %v20082_v48  ;;  %14205 = vmatprep.mubr.bf16.mxu0 %v11619_v58  ;;  %v20165_v48 = vld [vmem:[%s28262_s12 + $0x7ac] ss:$16 sps:$4 sm:$0xff]  }
 0xc11   :  { %14461 = vmatpush1.bf16.msra.mxu1 %v20085_v51  ;;  %14492 = vmatprep.mubr.bf16.mxu1 %v11619_v58  ;;  %v18405_v51 = vunpack.i.h.bf16 %v27284_v20  ;;  %v20163_v58 = vld [vmem:[%s28262_s12 + $0x7a8] ss:$16 sps:$4 sm:$0xff]  }
 0xc12   :  { %14175 = vmatprep.subr.bf16.mxu0 %v20090_v43  ;;  %14462 = vmatprep.subr.bf16.mxu1 %v20093_v31  ;;  %v20168_v43 = vld [vmem:[%s28262_s12 + $0x7c4] ss:$16 sps:$4 sm:$0xff]   ;;  %v20171_v31 = vld [vmem:[%s28262_s12 + $0x7cc] ss:$16 sps:$4 sm:$0xff]  }
 0xc14   :  { %14176 = vmatpush1.bf16.msra.mxu0 %v20088_v10  ;;  %v20166_v10 = vld [vmem:[%s28262_s12 + $0x7c0] ss:$16 sps:$4 sm:$0xff]  }
 0xc15   :  { %14463 = vmatpush1.bf16.msra.mxu1 %v20091_v35  ;;  %14177 = vmatprep.subr.bf16.mxu0 %v20096_v37  ;;  %v11566_v35 = vsel %vm825_vm9, %v18404_v4, %v18405_v51  ;;  %v18410_v37 = vunpack.i.h.bf16 %v27303_v41  ;;  %v20172_v4 = vld [vmem:[%s28262_s12 + $0x7e0] ss:$16 sps:$4 sm:$0xff]   ;;  %v20243_v51 = vld [vmem:[%s28262_s12 + $0x94c] ss:$16 sps:$4 sm:$0xff]  }
 0xc16   :  { %14464 = vmatprep.subr.bf16.mxu1 %v20099_v29  ;;  %v20169_v29 = vld [vmem:[%s28262_s12 + $0x7c8] ss:$16 sps:$4 sm:$0xff]   ;;  %v11582_v20 = vrot.slane %v11566_v35, 1  ;;  %v20178_v41 = vld [vmem:[%s28262_s12 + $0x800] ss:$16 sps:$4 sm:$0xff]  }
 0xc17   :  { %v20244_v35 = vld [vmem:[%s28262_s12 + $0x960] ss:$16 sps:$4 sm:$0xff]  }
 0xc18   :  { %14178 = vmatpush1.bf16.msra.mxu0 %v20094_v45  ;;  %v20174_v45 = vld [vmem:[%s28262_s12 + $0x7e4] ss:$16 sps:$4 sm:$0xff]  }
 0xc19   :  { %14465 = vmatpush1.bf16.msra.mxu1 %v20097_v53  ;;  %14179 = vmatprep.subr.bf16.mxu0 %v20102_v52  ;;  %v20177_v53 = vld [vmem:[%s28262_s12 + $0x7ec] ss:$16 sps:$4 sm:$0xff]   ;;  %v11493_v52 = vsel %vm825_vm9, %v18409_v3, %v18410_v37  ;;  %v20247_v37 = vld [vmem:[%s28262_s12 + $0x968] ss:$16 sps:$4 sm:$0xff]  }
 0xc1a   :  { %14466 = vmatprep.subr.bf16.mxu1 %v20105_v8  ;;  %v20175_v8 = vld [vmem:[%s28262_s12 + $0x7e8] ss:$16 sps:$4 sm:$0xff]   ;;  %v11608_v3 = vsel %vm185_vm7, %v11493_v52, %v11582_v20  ;;  %v20261_v52 = vld [vmem:[%s28262_s12 + $0x9ac] ss:$16 sps:$4 sm:$0xff]  }
 0xc1b   :  { %v20253_v20 = vld [vmem:[%s28262_s12 + $0x988] ss:$16 sps:$4 sm:$0xff]  }
 0xc1c   :  { %14180 = vmatpush1.bf16.msra.mxu0 %v20100_v50  ;;  %v20180_v50 = vld [vmem:[%s28262_s12 + $0x804] ss:$16 sps:$4 sm:$0xff]  }
 0xc1d   :  { %14467 = vmatpush1.bf16.msra.mxu1 %v20103_v9  ;;  %14181 = vmatprep.subr.bf16.mxu0 %v20108_v38  ;;  %v20183_v9 = vld [vmem:[%s28262_s12 + $0x80c] ss:$16 sps:$4 sm:$0xff]   ;;  %v11618_v38 = vpack.c.bf16 %v27054_v12, %v27054_v12  ;;  %v20184_v12 = vld [vmem:[%s28262_s12 + $0x820] ss:$16 sps:$4 sm:$0xff]  }
 0xc1e   :  { %14468 = vmatprep.subr.bf16.mxu1 %v20111_v0  ;;  %v20181_v0 = vld [vmem:[%s28262_s12 + $0x808] ss:$16 sps:$4 sm:$0xff]  }
 0xc20   :  { %14182 = vmatpush1.bf16.msra.mxu0 %v20106_v62  ;;  %v20186_v62 = vld [vmem:[%s28262_s12 + $0x824] ss:$16 sps:$4 sm:$0xff]  }
 0xc21   :  { %14469 = vmatpush1.bf16.msra.mxu1 %v20109_v21  ;;  %14183 = vmatprep.subr.bf16.mxu0 %v20114_v17  ;;  %v11621_v21 = vpack.c.bf16 %v11608_v3, %v11608_v3  ;;  %v20189_v17 = vld [vmem:[%s28262_s12 + $0x82c] ss:$16 sps:$4 sm:$0xff]   ;;  %v20262_v3 = vld [vmem:[%s28262_s12 + $0x9c0] ss:$16 sps:$4 sm:$0xff]  }
 0xc22   :  { %14470 = vmatprep.subr.bf16.mxu1 %v20117_v59  ;;  %v20187_v59 = vld [vmem:[%s28262_s12 + $0x828] ss:$16 sps:$4 sm:$0xff]  }
 0xc24   :  { %14184 = vmatpush1.bf16.msra.mxu0 %v20112_v28  ;;  %v20192_v28 = vld [vmem:[%s28262_s12 + $0x844] ss:$16 sps:$4 sm:$0xff]  }
 0xc25   :  { %14471 = vmatpush1.bf16.msra.mxu1 %v20115_v5  ;;  %14185 = vmatprep.subr.bf16.mxu0 %v20120_v22  ;;  %v20195_v5 = vld [vmem:[%s28262_s12 + $0x84c] ss:$16 sps:$4 sm:$0xff]   ;;  %v20190_v22 = vld [vmem:[%s28262_s12 + $0x840] ss:$16 sps:$4 sm:$0xff]  }
 0xc26   :  { %14472 = vmatprep.subr.bf16.mxu1 %v20123_v6  ;;  %v20193_v6 = vld [vmem:[%s28262_s12 + $0x848] ss:$16 sps:$4 sm:$0xff]  }
 0xc28   :  { %14186 = vmatpush1.bf16.msra.mxu0 %v20118_v11  ;;  %v20198_v11 = vld [vmem:[%s28262_s12 + $0x864] ss:$16 sps:$4 sm:$0xff]  }
 0xc29   :  { %14473 = vmatpush1.bf16.msra.mxu1 %v20121_v18  ;;  %14187 = vmatprep.subr.bf16.mxu0 %v20126_v46  ;;  %v20201_v18 = vld [vmem:[%s28262_s12 + $0x86c] ss:$16 sps:$4 sm:$0xff]   ;;  %v20196_v46 = vld [vmem:[%s28262_s12 + $0x860] ss:$16 sps:$4 sm:$0xff]  }
 0xc2a   :  { %14474 = vmatprep.subr.bf16.mxu1 %v20129_v27  ;;  %v20199_v27 = vld [vmem:[%s28262_s12 + $0x868] ss:$16 sps:$4 sm:$0xff]  }
 0xc2c   :  { %14188 = vmatpush1.bf16.msra.mxu0 %v20124_v1  ;;  %v20204_v1 = vld [vmem:[%s28262_s12 + $0x884] ss:$16 sps:$4 sm:$0xff]  }
 0xc2d   :  { %14475 = vmatpush1.bf16.msra.mxu1 %v20127_v42  ;;  %14189 = vmatprep.subr.bf16.mxu0 %v20132_v39  ;;  %v20207_v42 = vld [vmem:[%s28262_s12 + $0x88c] ss:$16 sps:$4 sm:$0xff]   ;;  %v20202_v39 = vld [vmem:[%s28262_s12 + $0x880] ss:$16 sps:$4 sm:$0xff]  }
 0xc2e   :  { %14476 = vmatprep.subr.bf16.mxu1 %v20135_v32  ;;  %v20205_v32 = vld [vmem:[%s28262_s12 + $0x888] ss:$16 sps:$4 sm:$0xff]  }
 0xc30   :  { %14190 = vmatpush1.bf16.msra.mxu0 %v20130_v33  ;;  %v20210_v33 = vld [vmem:[%s28262_s12 + $0x8a4] ss:$16 sps:$4 sm:$0xff]  }
 0xc31   :  { %14477 = vmatpush1.bf16.msra.mxu1 %v20133_v13  ;;  %14191 = vmatprep.subr.bf16.mxu0 %v20138_v57  ;;  %v20213_v13 = vld [vmem:[%s28262_s12 + $0x8ac] ss:$16 sps:$4 sm:$0xff]   ;;  %v20208_v57 = vld [vmem:[%s28262_s12 + $0x8a0] ss:$16 sps:$4 sm:$0xff]  }
 0xc32   :  { %14478 = vmatprep.subr.bf16.mxu1 %v20141_v44  ;;  %v20211_v44 = vld [vmem:[%s28262_s12 + $0x8a8] ss:$16 sps:$4 sm:$0xff]  }
 0xc34   :  { %14192 = vmatpush1.bf16.msra.mxu0 %v20136_v24  ;;  %v20216_v24 = vld [vmem:[%s28262_s12 + $0x8c4] ss:$16 sps:$4 sm:$0xff]  }
 0xc35   :  { %14479 = vmatpush1.bf16.msra.mxu1 %v20139_v30  ;;  %14193 = vmatprep.subr.bf16.mxu0 %v20144_v36  ;;  %v20219_v30 = vld [vmem:[%s28262_s12 + $0x8cc] ss:$16 sps:$4 sm:$0xff]   ;;  %v20214_v36 = vld [vmem:[%s28262_s12 + $0x8c0] ss:$16 sps:$4 sm:$0xff]  }
 0xc36   :  { %14480 = vmatprep.subr.bf16.mxu1 %v20147_v63  ;;  %v20217_v63 = vld [vmem:[%s28262_s12 + $0x8c8] ss:$16 sps:$4 sm:$0xff]  }
 0xc38   :  { %14194 = vmatpush1.bf16.msra.mxu0 %v20142_v61  ;;  %v20222_v61 = vld [vmem:[%s28262_s12 + $0x8e4] ss:$16 sps:$4 sm:$0xff]  }
 0xc39   :  { %14481 = vmatpush1.bf16.msra.mxu1 %v20145_v14  ;;  %14195 = vmatprep.subr.bf16.mxu0 %v20150_v34  ;;  %v20225_v14 = vld [vmem:[%s28262_s12 + $0x8ec] ss:$16 sps:$4 sm:$0xff]   ;;  %v20220_v34 = vld [vmem:[%s28262_s12 + $0x8e0] ss:$16 sps:$4 sm:$0xff]  }
 0xc3a   :  { %14482 = vmatprep.subr.bf16.mxu1 %v20153_v2  ;;  %v20223_v2 = vld [vmem:[%s28262_s12 + $0x8e8] ss:$16 sps:$4 sm:$0xff]  }
 0xc3c   :  { %14196 = vmatpush1.bf16.msra.mxu0 %v20148_v60  ;;  %v20228_v60 = vld [vmem:[%s28262_s12 + $0x904] ss:$16 sps:$4 sm:$0xff]  }
 0xc3d   :  { %14483 = vmatpush1.bf16.msra.mxu1 %v20151_v19  ;;  %14197 = vmatprep.subr.bf16.mxu0 %v20156_v49  ;;  %v20231_v19 = vld [vmem:[%s28262_s12 + $0x90c] ss:$16 sps:$4 sm:$0xff]   ;;  %v20226_v49 = vld [vmem:[%s28262_s12 + $0x900] ss:$16 sps:$4 sm:$0xff]  }
 0xc3e   :  { %14484 = vmatprep.subr.bf16.mxu1 %v20159_v54  ;;  %v20229_v54 = vld [vmem:[%s28262_s12 + $0x908] ss:$16 sps:$4 sm:$0xff]  }
 0xc40   :  { %14198 = vmatpush1.bf16.msra.mxu0 %v20154_v47  ;;  %v20234_v47 = vld [vmem:[%s28262_s12 + $0x924] ss:$16 sps:$4 sm:$0xff]  }
 0xc41   :  { %14485 = vmatpush1.bf16.msra.mxu1 %v20157_v56  ;;  %14199 = vmatprep.subr.bf16.mxu0 %v20162_v16  ;;  %v20237_v56 = vld [vmem:[%s28262_s12 + $0x92c] ss:$16 sps:$4 sm:$0xff]   ;;  %v20232_v16 = vld [vmem:[%s28262_s12 + $0x920] ss:$16 sps:$4 sm:$0xff]  }
 0xc42   :  { %14486 = vmatprep.subr.bf16.mxu1 %v20165_v48  ;;  %v20235_v48 = vld [vmem:[%s28262_s12 + $0x928] ss:$16 sps:$4 sm:$0xff]  }
 0xc44   :  { %14200 = vmatpush1.bf16.msra.mxu0 %v20160_v15  ;;  %v20240_v15 = vld [vmem:[%s28262_s12 + $0x944] ss:$16 sps:$4 sm:$0xff]  }
 0xc45   :  { %14487 = vmatpush1.bf16.msra.mxu1 %v20163_v58  ;;  %14201 = vmatprep.subr.bf16.mxu0 %v20168_v43  ;;  %v20238_v58 = vld [vmem:[%s28262_s12 + $0x940] ss:$16 sps:$4 sm:$0xff]   ;;  %v20241_v43 = vld [vmem:[%s28262_s12 + $0x948] ss:$16 sps:$4 sm:$0xff]  }
 0xc46   :  { %14488 = vmatprep.subr.bf16.mxu1 %v20171_v31  ;;  %v20246_v31 = vld [vmem:[%s28262_s12 + $0x964] ss:$16 sps:$4 sm:$0xff]  }
 0xc48   :  { %14202 = vmatpush1.bf16.msra.mxu0 %v20166_v10  ;;  %v20249_v10 = vld [vmem:[%s28262_s12 + $0x96c] ss:$16 sps:$4 sm:$0xff]  }
 0xc49   :  { %14489 = vmatpush1.bf16.msra.mxu1 %v20169_v29  ;;  %14203 = vmatprep.subr.bf16.mxu0 %v20174_v45  ;;  %v20252_v29 = vld [vmem:[%s28262_s12 + $0x984] ss:$16 sps:$4 sm:$0xff]   ;;  %v20255_v45 = vld [vmem:[%s28262_s12 + $0x98c] ss:$16 sps:$4 sm:$0xff]  }
 0xc4a   :  { %14490 = vmatprep.subr.bf16.mxu1 %v20177_v53  ;;  %v20250_v53 = vld [vmem:[%s28262_s12 + $0x980] ss:$16 sps:$4 sm:$0xff]  }
 0xc4c   :  { %14204 = vmatpush1.bf16.msra.mxu0 %v20172_v4  ;;  %v20258_v4 = vld [vmem:[%s28262_s12 + $0x9a4] ss:$16 sps:$4 sm:$0xff]  }
 0xc4d   :  { %14491 = vmatpush1.bf16.msra.mxu1 %v20175_v8  ;;  %14214 = vmatprep.subr.bf16.mxu0 %v20180_v50  ;;  %v20256_v8 = vld [vmem:[%s28262_s12 + $0x9a0] ss:$16 sps:$4 sm:$0xff]   ;;  %v20259_v50 = vld [vmem:[%s28262_s12 + $0x9a8] ss:$16 sps:$4 sm:$0xff]  }
 0xc4e   :  { %14501 = vmatprep.subr.bf16.mxu1 %v20183_v9  ;;  %v20264_v9 = vld [vmem:[%s28262_s12 + $0x9c4] ss:$16 sps:$4 sm:$0xff]  }
 0xc4f   :  { %14206 = vmatmul.mubr.bf16.vlgmr.msra.gmra.mrb[132].mxu0 %v11618_v38 }
 0xc50   :  { %14493 = vmatmul.mubr.bf16.vlgmr.msra.gmra.mrb[76].mxu1 %v11618_v38  ;;  %14215 = vmatpush1.bf16.msra.mxu0 %v20178_v41  ;;  %v20267_v41 = vld [vmem:[%s28262_s12 + $0x9cc] ss:$16 sps:$4 sm:$0xff]   ;;  %v20265_v38 = vld [vmem:[%s28262_s12 + $0x9c8] ss:$16 sps:$4 sm:$0xff]  }
 0xc51   :  { %14246 = vmatprep.mubr.bf16.mxu0 %v11621_v21  ;;  %14502 = vmatpush1.bf16.msra.mxu1 %v20181_v0  ;;  %v20270_v0 = vld [vmem:[%s28262_s12 + $0x9e4] ss:$16 sps:$4 sm:$0xff]  }
 0xc52   :  { %14533 = vmatprep.mubr.bf16.mxu1 %v11621_v21  ;;  %14216 = vmatprep.subr.bf16.mxu0 %v20186_v62  ;;  %v20273_v62 = vld [vmem:[%s28262_s12 + $0x9ec] ss:$16 sps:$4 sm:$0xff]   ;;  %v20268_v21 = vld [vmem:[%s28262_s12 + $0x9e0] ss:$16 sps:$4 sm:$0xff]  }
 0xc53   :  { %14503 = vmatprep.subr.bf16.mxu1 %v20189_v17  ;;  %v20271_v17 = vld [vmem:[%s28262_s12 + $0x9e8] ss:$16 sps:$4 sm:$0xff]  }
 0xc54   :  { %14217 = vmatpush1.bf16.msra.mxu0 %v20184_v12  ;;  %v20276_v12 = vld [vmem:[%s28262_s12 + $0xa04] ss:$16 sps:$4 sm:$0xff]  }
 0xc55   :  { %14504 = vmatpush1.bf16.msra.mxu1 %v20187_v59  ;;  %14218 = vmatprep.subr.bf16.mxu0 %v20192_v28  ;;  %v20279_v59 = vld [vmem:[%s28262_s12 + $0xa0c] ss:$16 sps:$4 sm:$0xff]   ;;  %v20274_v28 = vld [vmem:[%s28262_s12 + $0xa00] ss:$16 sps:$4 sm:$0xff]  }
 0xc56   :  { %14505 = vmatprep.subr.bf16.mxu1 %v20195_v5  ;;  %v11620_v5 = vpack.c.bf16 %v27323_v26, %v27323_v26  ;;  %v20280_v26 = vld [vmem:[%s28262_s12 + $0xa20] ss:$16 sps:$4 sm:$0xff]  }
 0xc58   :  { %14219 = vmatpush1.bf16.msra.mxu0 %v20190_v22  ;;  %v20277_v22 = vld [vmem:[%s28262_s12 + $0xa08] ss:$16 sps:$4 sm:$0xff]  }
 0xc59   :  { %14506 = vmatpush1.bf16.msra.mxu1 %v20193_v6  ;;  %14220 = vmatprep.subr.bf16.mxu0 %v20198_v11  ;;  %v20282_v6 = vld [vmem:[%s28262_s12 + $0xa24] ss:$16 sps:$4 sm:$0xff]   ;;  %v11623_v11 = vpack.c.bf16 %v27061_v55, %v27061_v55 }
 0xc5a   :  { %14507 = vmatprep.subr.bf16.mxu1 %v20201_v18  ;;  %v20285_v18 = vld [vmem:[%s28262_s12 + $0xa2c] ss:$16 sps:$4 sm:$0xff]   ;;  %v20288_v55 = vld [vmem:[%s28262_s12 + $0xa44] ss:$16 sps:$4 sm:$0xff]  }
 0xc5c   :  { %14221 = vmatpush1.bf16.msra.mxu0 %v20196_v46  ;;  %v20283_v46 = vld [vmem:[%s28262_s12 + $0xa28] ss:$16 sps:$4 sm:$0xff]  }
 0xc5d   :  { %14508 = vmatpush1.bf16.msra.mxu1 %v20199_v27  ;;  %14222 = vmatprep.subr.bf16.mxu0 %v20204_v1  ;;  %v20291_v27 = vld [vmem:[%s28262_s12 + $0xa4c] ss:$16 sps:$4 sm:$0xff]   ;;  %v20286_v1 = vld [vmem:[%s28262_s12 + $0xa40] ss:$16 sps:$4 sm:$0xff]  }
 0xc5e   :  { %14509 = vmatprep.subr.bf16.mxu1 %v20207_v42  ;;  %v20289_v42 = vld [vmem:[%s28262_s12 + $0xa48] ss:$16 sps:$4 sm:$0xff]  }
 0xc60   :  { %14223 = vmatpush1.bf16.msra.mxu0 %v20202_v39  ;;  %v20294_v39 = vld [vmem:[%s28262_s12 + $0xa64] ss:$16 sps:$4 sm:$0xff]  }
 0xc61   :  { %14510 = vmatpush1.bf16.msra.mxu1 %v20205_v32  ;;  %14224 = vmatprep.subr.bf16.mxu0 %v20210_v33  ;;  %v20297_v32 = vld [vmem:[%s28262_s12 + $0xa6c] ss:$16 sps:$4 sm:$0xff]   ;;  %v20292_v33 = vld [vmem:[%s28262_s12 + $0xa60] ss:$16 sps:$4 sm:$0xff]  }
 0xc62   :  { %14511 = vmatprep.subr.bf16.mxu1 %v20213_v13  ;;  %v20295_v13 = vld [vmem:[%s28262_s12 + $0xa68] ss:$16 sps:$4 sm:$0xff]  }
 0xc64   :  { %14225 = vmatpush1.bf16.msra.mxu0 %v20208_v57  ;;  %v20300_v57 = vld [vmem:[%s28262_s12 + $0xa84] ss:$16 sps:$4 sm:$0xff]  }
 0xc65   :  { %14512 = vmatpush1.bf16.msra.mxu1 %v20211_v44  ;;  %14226 = vmatprep.subr.bf16.mxu0 %v20216_v24  ;;  %v20303_v44 = vld [vmem:[%s28262_s12 + $0xa8c] ss:$16 sps:$4 sm:$0xff]   ;;  %v20298_v24 = vld [vmem:[%s28262_s12 + $0xa80] ss:$16 sps:$4 sm:$0xff]  }
 0xc66   :  { %14513 = vmatprep.subr.bf16.mxu1 %v20219_v30  ;;  %v20301_v30 = vld [vmem:[%s28262_s12 + $0xa88] ss:$16 sps:$4 sm:$0xff]  }
 0xc68   :  { %14227 = vmatpush1.bf16.msra.mxu0 %v20214_v36  ;;  %v20306_v36 = vld [vmem:[%s28262_s12 + $0xaa4] ss:$16 sps:$4 sm:$0xff]  }
 0xc69   :  { %14514 = vmatpush1.bf16.msra.mxu1 %v20217_v63  ;;  %14228 = vmatprep.subr.bf16.mxu0 %v20222_v61  ;;  %v20309_v63 = vld [vmem:[%s28262_s12 + $0xaac] ss:$16 sps:$4 sm:$0xff]   ;;  %v20304_v61 = vld [vmem:[%s28262_s12 + $0xaa0] ss:$16 sps:$4 sm:$0xff]  }
 0xc6a   :  { %14515 = vmatprep.subr.bf16.mxu1 %v20225_v14  ;;  %v20307_v14 = vld [vmem:[%s28262_s12 + $0xaa8] ss:$16 sps:$4 sm:$0xff]  }
 0xc6c   :  { %14229 = vmatpush1.bf16.msra.mxu0 %v20220_v34  ;;  %v20312_v34 = vld [vmem:[%s28262_s12 + $0xac4] ss:$16 sps:$4 sm:$0xff]  }
 0xc6d   :  { %14516 = vmatpush1.bf16.msra.mxu1 %v20223_v2  ;;  %14230 = vmatprep.subr.bf16.mxu0 %v20228_v60  ;;  %v20315_v2 = vld [vmem:[%s28262_s12 + $0xacc] ss:$16 sps:$4 sm:$0xff]   ;;  %v20310_v60 = vld [vmem:[%s28262_s12 + $0xac0] ss:$16 sps:$4 sm:$0xff]  }
 0xc6e   :  { %14517 = vmatprep.subr.bf16.mxu1 %v20231_v19  ;;  %v20313_v19 = vld [vmem:[%s28262_s12 + $0xac8] ss:$16 sps:$4 sm:$0xff]  }
 0xc70   :  { %14231 = vmatpush1.bf16.msra.mxu0 %v20226_v49  ;;  %v20318_v49 = vld [vmem:[%s28262_s12 + $0xae4] ss:$16 sps:$4 sm:$0xff]  }
 0xc71   :  { %14518 = vmatpush1.bf16.msra.mxu1 %v20229_v54  ;;  %14232 = vmatprep.subr.bf16.mxu0 %v20234_v47  ;;  %v20321_v54 = vld [vmem:[%s28262_s12 + $0xaec] ss:$16 sps:$4 sm:$0xff]   ;;  %v20316_v47 = vld [vmem:[%s28262_s12 + $0xae0] ss:$16 sps:$4 sm:$0xff]  }
 0xc72   :  { %14519 = vmatprep.subr.bf16.mxu1 %v20237_v56  ;;  %v20319_v56 = vld [vmem:[%s28262_s12 + $0xae8] ss:$16 sps:$4 sm:$0xff]  }
 0xc74   :  { %14233 = vmatpush1.bf16.msra.mxu0 %v20232_v16  ;;  %v20324_v16 = vld [vmem:[%s28262_s12 + $0xb04] ss:$16 sps:$4 sm:$0xff]  }
 0xc75   :  { %14520 = vmatpush1.bf16.msra.mxu1 %v20235_v48  ;;  %14234 = vmatprep.subr.bf16.mxu0 %v20240_v15  ;;  %v20327_v48 = vld [vmem:[%s28262_s12 + $0xb0c] ss:$16 sps:$4 sm:$0xff]   ;;  %v20322_v15 = vld [vmem:[%s28262_s12 + $0xb00] ss:$16 sps:$4 sm:$0xff]  }
 0xc76   :  { %14521 = vmatprep.subr.bf16.mxu1 %v20243_v51  ;;  %v20325_v51 = vld [vmem:[%s28262_s12 + $0xb08] ss:$16 sps:$4 sm:$0xff]  }
 0xc78   :  { %14235 = vmatpush1.bf16.msra.mxu0 %v20238_v58  ;;  %v20330_v58 = vld [vmem:[%s28262_s12 + $0xb24] ss:$16 sps:$4 sm:$0xff]  }
 0xc79   :  { %14522 = vmatpush1.bf16.msra.mxu1 %v20241_v43  ;;  %14236 = vmatprep.subr.bf16.mxu0 %v20246_v31  ;;  %v20333_v43 = vld [vmem:[%s28262_s12 + $0xb2c] ss:$16 sps:$4 sm:$0xff]   ;;  %v20328_v31 = vld [vmem:[%s28262_s12 + $0xb20] ss:$16 sps:$4 sm:$0xff]  }
 0xc7a   :  { %14523 = vmatprep.subr.bf16.mxu1 %v20249_v10  ;;  %v20331_v10 = vld [vmem:[%s28262_s12 + $0xb28] ss:$16 sps:$4 sm:$0xff]  }
 0xc7c   :  { %14237 = vmatpush1.bf16.msra.mxu0 %v20244_v35  ;;  %v20336_v35 = vld [vmem:[%s28262_s12 + $0xb44] ss:$16 sps:$4 sm:$0xff]  }
 0xc7d   :  { %14524 = vmatpush1.bf16.msra.mxu1 %v20247_v37  ;;  %14238 = vmatprep.subr.bf16.mxu0 %v20252_v29  ;;  %v20339_v37 = vld [vmem:[%s28262_s12 + $0xb4c] ss:$16 sps:$4 sm:$0xff]   ;;  %v20334_v29 = vld [vmem:[%s28262_s12 + $0xb40] ss:$16 sps:$4 sm:$0xff]  }
 0xc7e   :  { %14525 = vmatprep.subr.bf16.mxu1 %v20255_v45  ;;  %v20337_v45 = vld [vmem:[%s28262_s12 + $0xb48] ss:$16 sps:$4 sm:$0xff]  }
 0xc80   :  { %14239 = vmatpush1.bf16.msra.mxu0 %v20250_v53  ;;  %v20342_v53 = vld [vmem:[%s28262_s12 + $0xb64] ss:$16 sps:$4 sm:$0xff]  }
 0xc81   :  { %14526 = vmatpush1.bf16.msra.mxu1 %v20253_v20  ;;  %14240 = vmatprep.subr.bf16.mxu0 %v20258_v4  ;;  %v20345_v20 = vld [vmem:[%s28262_s12 + $0xb6c] ss:$16 sps:$4 sm:$0xff]   ;;  %v20340_v4 = vld [vmem:[%s28262_s12 + $0xb60] ss:$16 sps:$4 sm:$0xff]  }
 0xc82   :  { %14527 = vmatprep.subr.bf16.mxu1 %v20261_v52  ;;  %v20343_v52 = vld [vmem:[%s28262_s12 + $0xb68] ss:$16 sps:$4 sm:$0xff]  }
 0xc84   :  { %14241 = vmatpush1.bf16.msra.mxu0 %v20256_v8  ;;  %v20348_v8 = vld [vmem:[%s28262_s12 + $0xb84] ss:$16 sps:$4 sm:$0xff]  }
 0xc85   :  { %14528 = vmatpush1.bf16.msra.mxu1 %v20259_v50  ;;  %14242 = vmatprep.subr.bf16.mxu0 %v20264_v9  ;;  %v20351_v50 = vld [vmem:[%s28262_s12 + $0xb8c] ss:$16 sps:$4 sm:$0xff]   ;;  %v20346_v9 = vld [vmem:[%s28262_s12 + $0xb80] ss:$16 sps:$4 sm:$0xff]  }
 0xc86   :  { %14529 = vmatprep.subr.bf16.mxu1 %v20267_v41  ;;  %v20349_v41 = vld [vmem:[%s28262_s12 + $0xb88] ss:$16 sps:$4 sm:$0xff]  }
 0xc88   :  { %14243 = vmatpush1.bf16.msra.mxu0 %v20262_v3  ;;  %v20354_v3 = vld [vmem:[%s28262_s12 + $0xba4] ss:$16 sps:$4 sm:$0xff]  }
 0xc89   :  { %14530 = vmatpush1.bf16.msra.mxu1 %v20265_v38  ;;  %14244 = vmatprep.subr.bf16.mxu0 %v20270_v0  ;;  %v20357_v38 = vld [vmem:[%s28262_s12 + $0xbac] ss:$16 sps:$4 sm:$0xff]   ;;  %v20352_v0 = vld [vmem:[%s28262_s12 + $0xba0] ss:$16 sps:$4 sm:$0xff]  }
 0xc8a   :  { %14531 = vmatprep.subr.bf16.mxu1 %v20273_v62  ;;  %v20355_v62 = vld [vmem:[%s28262_s12 + $0xba8] ss:$16 sps:$4 sm:$0xff]  }
 0xc8c   :  { %14245 = vmatpush1.bf16.msra.mxu0 %v20268_v21  ;;  %v20360_v21 = vld [vmem:[%s28262_s12 + $0xbc4] ss:$16 sps:$4 sm:$0xff]  }
 0xc8d   :  { %14532 = vmatpush1.bf16.msra.mxu1 %v20271_v17  ;;  %14255 = vmatprep.subr.bf16.mxu0 %v20276_v12  ;;  %v20363_v17 = vld [vmem:[%s28262_s12 + $0xbcc] ss:$16 sps:$4 sm:$0xff]   ;;  %v20358_v12 = vld [vmem:[%s28262_s12 + $0xbc0] ss:$16 sps:$4 sm:$0xff]  }
 0xc8e   :  { %14542 = vmatprep.subr.bf16.mxu1 %v20279_v59  ;;  %v20361_v59 = vld [vmem:[%s28262_s12 + $0xbc8] ss:$16 sps:$4 sm:$0xff]  }
 0xc8f   :  { %14247 = vmatmul.mubr.bf16.vlgmr.msra.gmra.mrb[132].mxu0 %v11620_v5 }
 0xc90   :  { %14534 = vmatmul.mubr.bf16.vlgmr.msra.gmra.mrb[76].mxu1 %v11620_v5  ;;  %14256 = vmatpush1.bf16.msra.mxu0 %v20274_v28  ;;  %v20366_v28 = vld [vmem:[%s28262_s12 + $0xbe4] ss:$16 sps:$4 sm:$0xff]   ;;  %v20369_v5 = vld [vmem:[%s28262_s12 + $0xbec] ss:$16 sps:$4 sm:$0xff]  }
 0xc91   :  { %14287 = vmatprep.mubr.bf16.mxu0 %v11623_v11  ;;  %14543 = vmatpush1.bf16.msra.mxu1 %v20277_v22  ;;  %v20364_v22 = vld [vmem:[%s28262_s12 + $0xbe0] ss:$16 sps:$4 sm:$0xff]  }
 0xc92   :  { %14574 = vmatprep.mubr.bf16.mxu1 %v11623_v11  ;;  %14257 = vmatprep.subr.bf16.mxu0 %v20282_v6  ;;  %v20367_v6 = vld [vmem:[%s28262_s12 + $0xbe8] ss:$16 sps:$4 sm:$0xff]   ;;  %v20372_v11 = vld [vmem:[%s28262_s12 + $0xc04] ss:$16 sps:$4 sm:$0xff]  }
 0xc93   :  { %14544 = vmatprep.subr.bf16.mxu1 %v20285_v18  ;;  %v20375_v18 = vld [vmem:[%s28262_s12 + $0xc0c] ss:$16 sps:$4 sm:$0xff]  }
 0xc94   :  { %14258 = vmatpush1.bf16.msra.mxu0 %v20280_v26  ;;  %v20370_v26 = vld [vmem:[%s28262_s12 + $0xc00] ss:$16 sps:$4 sm:$0xff]  }
 0xc95   :  { %14545 = vmatpush1.bf16.msra.mxu1 %v20283_v46  ;;  %14259 = vmatprep.subr.bf16.mxu0 %v20288_v55  ;;  %v11622_v46 = vpack.c.bf16 %v27068_v23, %v27068_v23  ;;  %v20373_v55 = vld [vmem:[%s28262_s12 + $0xc08] ss:$16 sps:$4 sm:$0xff]   ;;  %v20376_v23 = vld [vmem:[%s28262_s12 + $0xc20] ss:$16 sps:$4 sm:$0xff]  }
 0xc96   :  { %14546 = vmatprep.subr.bf16.mxu1 %v20291_v27  ;;  %v20378_v27 = vld [vmem:[%s28262_s12 + $0xc24] ss:$16 sps:$4 sm:$0xff]  }
 0xc98   :  { %14260 = vmatpush1.bf16.msra.mxu0 %v20286_v1  ;;  %v20381_v1 = vld [vmem:[%s28262_s12 + $0xc2c] ss:$16 sps:$4 sm:$0xff]  }
 0xc99   :  { %14547 = vmatpush1.bf16.msra.mxu1 %v20289_v42  ;;  %14261 = vmatprep.subr.bf16.mxu0 %v20294_v39  ;;  %v20379_v42 = vld [vmem:[%s28262_s12 + $0xc28] ss:$16 sps:$4 sm:$0xff]   ;;  %v20384_v39 = vld [vmem:[%s28262_s12 + $0xc44] ss:$16 sps:$4 sm:$0xff]  }
 0xc9a   :  { %14548 = vmatprep.subr.bf16.mxu1 %v20297_v32  ;;  %v20387_v32 = vld [vmem:[%s28262_s12 + $0xc4c] ss:$16 sps:$4 sm:$0xff]  }
 0xc9c   :  { %14262 = vmatpush1.bf16.msra.mxu0 %v20292_v33  ;;  %v28652_v33 = vmov 0  }
 0xc9d   :  { %14549 = vmatpush1.bf16.msra.mxu1 %v20295_v13  ;;  %14263 = vmatprep.subr.bf16.mxu0 %v20300_v57  ;;  %v20382_v13 = vld [vmem:[%s28262_s12 + $0xc40] ss:$16 sps:$4 sm:$0xff]   ;;  %v20385_v57 = vld [vmem:[%s28262_s12 + $0xc48] ss:$16 sps:$4 sm:$0xff]  }
 0xc9e   :  { %14550 = vmatprep.subr.bf16.mxu1 %v20303_v44  ;;  %v20390_v44 = vld [vmem:[%s28262_s12 + $0xc64] ss:$16 sps:$4 sm:$0xff]  }
 0xca0   :  { %14264 = vmatpush1.bf16.msra.mxu0 %v20298_v24  ;;  %v20393_v24 = vld [vmem:[%s28262_s12 + $0xc6c] ss:$16 sps:$4 sm:$0xff]  }
 0xca1   :  { %14551 = vmatpush1.bf16.msra.mxu1 %v20301_v30  ;;  %14265 = vmatprep.subr.bf16.mxu0 %v20306_v36  ;;  %v11499_v30 = vrot.slane %v27040_v40, 4  ;;  %v20388_v36 = vld [vmem:[%s28262_s12 + $0xc60] ss:$16 sps:$4 sm:$0xff]  }
 0xca2   :  { %14552 = vmatprep.subr.bf16.mxu1 %v20309_v63  ;;  %v16020_v63 = vrot.slane %v27023_v7, 5  ;;  %v20396_v7 = vld [vmem:[%s28264_s14] sm:$0xff]  }
 0xca4   :  { %14266 = vmatpush1.bf16.msra.mxu0 %v20304_v61  ;;  %v20391_v61 = vld [vmem:[%s28262_s12 + $0xc68] ss:$16 sps:$4 sm:$0xff]   ;;  %v11611_v40 = vsel %vm185_vm7, %v11499_v30, %v16020_v63 }
 0xca5   :  { %14553 = vmatpush1.bf16.msra.mxu1 %v20307_v14  ;;  %14267 = vmatprep.subr.bf16.mxu0 %v20312_v34  ;;  %v20394_v14 = vld [vmem:[%s28264_s14 + $0x40] sm:$0xff]  }
 0xca6   :  { %14554 = vmatprep.subr.bf16.mxu1 %v20315_v2  ;;  %v20395_v34 = vld [vmem:[%s28264_s14 + $0xc0] sm:$0xff]   ;;  %v11624_v2 = vpack.c.bf16 %v11611_v40, %v11611_v40 }
 0xca7   :  { %v16423_v40 = vld [vmem:[%s28265_s15] ss:$0 sm:$0xff] }
 0xca8   :  { %14268 = vmatpush1.bf16.msra.mxu0 %v20310_v60  ;;  %v20397_v60 = vld [vmem:[%s28264_s14 + $0x80] sm:$0xff]  }
 0xca9   :  { %14555 = vmatpush1.bf16.msra.mxu1 %v20313_v19  ;;  %14269 = vmatprep.subr.bf16.mxu0 %v20318_v49  ;;  %v20398_v19 = vld [vmem:[%s28264_s14 + $0x48] sm:$0xff]  }
 0xcaa   :  { %14556 = vmatprep.subr.bf16.mxu1 %v20321_v54  ;;  %v20399_v49 = vld [vmem:[%s28264_s14 + $0xc8] sm:$0xff]  }
 0xcab   :  { %v20400_v54 = vld [vmem:[%s28264_s14 + $0x8] sm:$0xff]  }
 0xcac   :  { %14270 = vmatpush1.bf16.msra.mxu0 %v20316_v47  ;;  %v20401_v47 = vld [vmem:[%s28264_s14 + $0x88] sm:$0xff]  }
 0xcad   :  { %14557 = vmatpush1.bf16.msra.mxu1 %v20319_v56  ;;  %14271 = vmatprep.subr.bf16.mxu0 %v20324_v16  ;;  %v20402_v56 = vld [vmem:[%s28264_s14 + $0x50] sm:$0xff]  }
 0xcae   :  { %14558 = vmatprep.subr.bf16.mxu1 %v20327_v48  ;;  %v20403_v16 = vld [vmem:[%s28264_s14 + $0xd0] sm:$0xff]  }
 0xcaf   :  { %v20404_v48 = vld [vmem:[%s28264_s14 + $0x10] sm:$0xff]  }
 0xcb0   :  { %14272 = vmatpush1.bf16.msra.mxu0 %v20322_v15  ;;  %v20405_v15 = vld [vmem:[%s28264_s14 + $0x90] sm:$0xff]  }
 0xcb1   :  { %14559 = vmatpush1.bf16.msra.mxu1 %v20325_v51  ;;  %14273 = vmatprep.subr.bf16.mxu0 %v20330_v58  ;;  %v20406_v51 = vld [vmem:[%s28264_s14 + $0x58] sm:$0xff]  }
 0xcb2   :  { %14560 = vmatprep.subr.bf16.mxu1 %v20333_v43  ;;  %v20407_v58 = vld [vmem:[%s28264_s14 + $0xd8] sm:$0xff]  }
 0xcb3   :  { %v20408_v43 = vld [vmem:[%s28264_s14 + $0x18] sm:$0xff]  }
 0xcb4   :  { %14274 = vmatpush1.bf16.msra.mxu0 %v20328_v31  ;;  %v20409_v31 = vld [vmem:[%s28264_s14 + $0x98] sm:$0xff]  }
 0xcb5   :  { %14561 = vmatpush1.bf16.msra.mxu1 %v20331_v10  ;;  %14275 = vmatprep.subr.bf16.mxu0 %v20336_v35  ;;  %v20410_v10 = vld [vmem:[%s28264_s14 + $0x60] sm:$0xff]  }
 0xcb6   :  { %14562 = vmatprep.subr.bf16.mxu1 %v20339_v37  ;;  %v20411_v35 = vld [vmem:[%s28264_s14 + $0xe0] sm:$0xff]  }
 0xcb7   :  { %v20412_v37 = vld [vmem:[%s28264_s14 + $0x20] sm:$0xff]  }
 0xcb8   :  { %14276 = vmatpush1.bf16.msra.mxu0 %v20334_v29  ;;  %v20413_v29 = vld [vmem:[%s28264_s14 + $0xa0] sm:$0xff]  }
 0xcb9   :  { %14563 = vmatpush1.bf16.msra.mxu1 %v20337_v45  ;;  %14277 = vmatprep.subr.bf16.mxu0 %v20342_v53  ;;  %v20414_v45 = vld [vmem:[%s28264_s14 + $0x68] sm:$0xff]  }
 0xcba   :  { %14564 = vmatprep.subr.bf16.mxu1 %v20345_v20  ;;  %v20415_v53 = vld [vmem:[%s28264_s14 + $0xe8] sm:$0xff]  }
 0xcbb   :  { %v20416_v20 = vld [vmem:[%s28264_s14 + $0x28] sm:$0xff]  }
 0xcbc   :  { %14278 = vmatpush1.bf16.msra.mxu0 %v20340_v4  ;;  %v20417_v4 = vld [vmem:[%s28264_s14 + $0xa8] sm:$0xff]  }
 0xcbd   :  { %14565 = vmatpush1.bf16.msra.mxu1 %v20343_v52  ;;  %14279 = vmatprep.subr.bf16.mxu0 %v20348_v8  ;;  %v20418_v52 = vld [vmem:[%s28264_s14 + $0x70] sm:$0xff]  }
 0xcbe   :  { %14566 = vmatprep.subr.bf16.mxu1 %v20351_v50  ;;  %v20419_v8 = vld [vmem:[%s28264_s14 + $0xf0] sm:$0xff]  }
 0xcbf   :  { %v20420_v50 = vld [vmem:[%s28264_s14 + $0x30] sm:$0xff]  }
 0xcc0   :  { %14280 = vmatpush1.bf16.msra.mxu0 %v20346_v9  ;;  %v20421_v9 = vld [vmem:[%s28264_s14 + $0xb0] sm:$0xff]  }
 0xcc1   :  { %14567 = vmatpush1.bf16.msra.mxu1 %v20349_v41  ;;  %14281 = vmatprep.subr.bf16.mxu0 %v20354_v3  ;;  %v20422_v41 = vld [vmem:[%s28264_s14 + $0x78] sm:$0xff]  }
 0xcc2   :  { %14568 = vmatprep.subr.bf16.mxu1 %v20357_v38  ;;  %v20423_v3 = vld [vmem:[%s28264_s14 + $0xf8] sm:$0xff]  }
 0xcc3   :  { %v20424_v38 = vld [vmem:[%s28264_s14 + $0x38] sm:$0xff]  }
 0xcc4   :  { %14282 = vmatpush1.bf16.msra.mxu0 %v20352_v0  ;;  %v20425_v0 = vld [vmem:[%s28264_s14 + $0xb8] sm:$0xff]  }
 0xcc5   :  { %14569 = vmatpush1.bf16.msra.mxu1 %v20355_v62  ;;  %14283 = vmatprep.subr.bf16.mxu0 %v20360_v21  ;;  %v12025_v62 = vld [vmem:[%s28263_s13] sm:$0xf] }
 0xcc6   :  { %14570 = vmatprep.subr.bf16.mxu1 %v20363_v17  ;;  %v28653_v21 = vld [vmem:[#allocation5_spill] sm:$0xff] }
 0xcc7   :  { %v12037_v17 = vsub.s32 2, %v28653_v21 }
 0xcc8   :  { %14284 = vmatpush1.bf16.msra.mxu0 %v20358_v12  ;;  %v12033_v12 = vsub.s32 1, %v28653_v21 }
 0xcc9   :  { %14571 = vmatpush1.bf16.msra.mxu1 %v20361_v59  ;;  %14285 = vmatprep.subr.bf16.mxu0 %v20366_v28  ;;  %v12041_v59 = vsub.s32 3, %v28653_v21  ;;  %v12030_v28 = vrot.slane %v12025_v62, %v28639_v25 }
 0xcca   :  { %14572 = vmatprep.subr.bf16.mxu1 %v20369_v5  ;;  %v12038_v5 = vrot.slane %v12025_v62, %v12037_v17 }
 0xccc   :  { %14286 = vmatpush1.bf16.msra.mxu0 %v20364_v22  ;;  %v12034_v22 = vrot.slane %v12025_v62, %v12033_v12 }
 0xccd   :  { %14573 = vmatpush1.bf16.msra.mxu1 %v20367_v6  ;;  %14296 = vmatprep.subr.bf16.mxu0 %v20372_v11  ;;  %v12042_v6 = vrot.slane %v12025_v62, %v12041_v59 }
 0xcce   :  { %14583 = vmatprep.subr.bf16.mxu1 %v20375_v18 }
 0xccf   :  { %14288 = vmatmul.mubr.bf16.vlgmr.msra.gmra.mrb[132].mxu0 %v11622_v46 }
 0xcd0   :  { %14575 = vmatmul.mubr.bf16.vlgmr.msra.gmra.mrb[76].mxu1 %v11622_v46  ;;  %14297 = vmatpush1.bf16.msra.mxu0 %v20370_v26 }
 0xcd1   :  { %14584 = vmatpush1.bf16.msra.mxu1 %v20373_v55  ;;  %14298 = vmatprep.subr.bf16.mxu0 %v20378_v27 }
 0xcd2   :  { %14585 = vmatprep.subr.bf16.mxu1 %v20381_v1  ;;  %14328 = vmatprep.mubr.bf16.mxu0 %v28652_v33 }
 0xcd3   :  { %14615 = vmatprep.mubr.bf16.mxu1 %v28652_v33 }
 0xcd4   :  { %14299 = vmatpush1.bf16.msra.mxu0 %v20376_v23 }
 0xcd5   :  { %14586 = vmatpush1.bf16.msra.mxu1 %v20379_v42  ;;  %14300 = vmatprep.subr.bf16.mxu0 %v20384_v39 }
 0xcd6   :  { %14587 = vmatprep.subr.bf16.mxu1 %v20387_v32 }
 0xcd8   :  { %14301 = vmatpush1.bf16.msra.mxu0 %v20382_v13 }
 0xcd9   :  { %14588 = vmatpush1.bf16.msra.mxu1 %v20385_v57  ;;  %14302 = vmatprep.subr.bf16.mxu0 %v20390_v44 }
 0xcda   :  { %14589 = vmatprep.subr.bf16.mxu1 %v20393_v24 }
 0xcdc   :  { %14303 = vmatpush1.bf16.msra.mxu0 %v20388_v36 }
 0xcdd   :  { %14590 = vmatpush1.bf16.msra.mxu1 %v20391_v61  ;;  %17232 = vmatprep.subr.bf16.mxu0 %v20394_v14 }
 0xcde   :  { %17254 = vmatprep.subr.bf16.mxu1 %v20395_v34 }
 0xcdf   :  { %16421 = vmatmul.mubr.msk.bf16.vlgmr.msra.gmra.mrb[132].mxu0 %vm825_vm9, %v11624_v2 }
 0xce0   :  { %16422 = vmatmul.mubr.msk.bf16.vlgmr.msra.gmra.mrb[76].mxu1 %vm825_vm9, %v11624_v2  ;;  %17233 = vmatpush3.bf16.msra.mxu0 %v20396_v7 }
 0xce1   :  { %17255 = vmatpush3.bf16.msra.mxu1 %v20397_v60  ;;  %17234 = vmatprep.subr.bf16.mxu0 %v20398_v19 }
 0xce2   :  { %17256 = vmatprep.subr.bf16.mxu1 %v20399_v49 }
 0xce4   :  { %17235 = vmatpush3.bf16.msra.mxu0 %v20400_v54 }
 0xce5   :  { %17257 = vmatpush3.bf16.msra.mxu1 %v20401_v47  ;;  %17236 = vmatprep.subr.bf16.mxu0 %v20402_v56 }
 0xce6   :  { %17258 = vmatprep.subr.bf16.mxu1 %v20403_v16 }
 0xce8   :  { %17237 = vmatpush3.bf16.msra.mxu0 %v20404_v48 }
 0xce9   :  { %17259 = vmatpush3.bf16.msra.mxu1 %v20405_v15  ;;  %17238 = vmatprep.subr.bf16.mxu0 %v20406_v51 }
 0xcea   :  { %17260 = vmatprep.subr.bf16.mxu1 %v20407_v58 }
 0xcec   :  { %17239 = vmatpush3.bf16.msra.mxu0 %v20408_v43 }
 0xced   :  { %17261 = vmatpush3.bf16.msra.mxu1 %v20409_v31  ;;  %17240 = vmatprep.subr.bf16.mxu0 %v20410_v10 }
 0xcee   :  { %17262 = vmatprep.subr.bf16.mxu1 %v20411_v35 }
 0xcf0   :  { %17241 = vmatpush3.bf16.msra.mxu0 %v20412_v37 }
 0xcf1   :  { %17263 = vmatpush3.bf16.msra.mxu1 %v20413_v29  ;;  %17242 = vmatprep.subr.bf16.mxu0 %v20414_v45 }
 0xcf2   :  { %17264 = vmatprep.subr.bf16.mxu1 %v20415_v53 }
 0xcf4   :  { %17243 = vmatpush3.bf16.msra.mxu0 %v20416_v20 }
 0xcf5   :  { %17265 = vmatpush3.bf16.msra.mxu1 %v20417_v4  ;;  %17244 = vmatprep.subr.bf16.mxu0 %v20418_v52 }
 0xcf6   :  { %17266 = vmatprep.subr.bf16.mxu1 %v20419_v8 }
 0xcf8   :  { %17245 = vmatpush3.bf16.msra.mxu0 %v20420_v50 }
 0xcf9   :  { %17267 = vmatpush3.bf16.msra.mxu1 %v20421_v9  ;;  %17246 = vmatprep.subr.bf16.mxu0 %v20422_v41 }
 0xcfa   :  { %17268 = vmatprep.subr.bf16.mxu1 %v20423_v3 }
 0xcfc   :  { %17247 = vmatpush3.bf16.msra.mxu0 %v20424_v38 }
 0xcfd   :  { %17269 = vmatpush3.bf16.msra.mxu1 %v20425_v0 }
 0xdb2   :  { %v14330_v11 = vpop.f32.mrb[132].mxu0 }
 0xdb3   :  { %v17996_v18 = vadd.f32 %v14330_v11, %v12030_v28  ;;  %v14617_v26 = vpop.f32.mrb[76].mxu1  ;;  %v14332_v46 = vpop.f32.mrb[133].mxu0 }
 0xdb4   :  { %v17998_v55 = vadd.f32 %v14617_v26, %v12038_v5  ;;  %v17997_v27 = vadd.f32 %v14332_v46, %v12034_v22  ;;  %v14619_v1 = vpop.f32.mrb[77].mxu1  ;;  %v14334_v23 = vpop.f32.mrb[134].mxu0 }
 0xdb5   :  { %v14624_v42 = vmax.f32 %v17996_v18, 0.0  ;;  %v17999_v39 = vadd.f32 %v14619_v1, %v12042_v6  ;;  %v14621_v32 = vpop.f32.mrb[78].mxu1  ;;  %v14335_v33 = vpop.f32.mrb[135].mxu0 }
 0xdb6   :  { %v14626_v13 = vmax.f32 %v17998_v55, 0.0  ;;  %v14625_v57 = vmax.f32 %v17997_v27, 0.0  ;;  %v14622_v44 = vpop.f32.mrb[79].mxu1 }
 0xdb7   :  { %v14627_v24 = vmax.f32 %v17999_v39, 0.0  ;;  %v14628_v30 = vpack.c.bf16 %v14624_v42, %v14624_v42 }
 0xdb8   :  { %v14629_v25 = vpack.c.bf16 %v14625_v57, %v14625_v57  ;;  %v14630_v63 = vpack.c.bf16 %v14626_v13, %v14626_v13 }
 0xdb9   :  { %v14631_v36 = vpack.c.bf16 %v14627_v24, %v14627_v24 }
 0xdba   :  { %14927 = vmatprep.mubr.bf16.mxu0 %v14629_v25 }
 0xdbb   :  { %14967 = vmatprep.mubr.bf16.mxu1 %v14631_v36  ;;  %14928 = vmatmul.mubr.bf16.vlgmr.msra.gmra.mrb[136].mxu0 %v14628_v30 }
 0xdbc   :  { %14968 = vmatmul.mubr.bf16.vlgmr.msra.gmra.mrb[80].mxu1 %v14630_v63 }
 0xe8e   :  { %v17248_v61 = vpop.f32.mrb[136].mxu0 }
 0xe8f   :  { %v17270_v14 = vpop.f32.mrb[80].mxu1  ;;  %v17249_v34 = vpop.f32.mrb[137].mxu0 }
 0xe90   :  { %v17250_v7 = vadd.f32 %v17249_v34, %v17248_v61  ;;  %v17271_v2 = vpop.f32.mrb[81].mxu1  ;;  %v17251_v60 = vpop.f32.mrb[138].mxu0 }
 0xe91   :  { %v17272_v19 = vadd.f32 %v17271_v2, %v17270_v14  ;;  %v17273_v49 = vpop.f32.mrb[82].mxu1  ;;  %v17252_v54 = vpop.f32.mrb[139].mxu0 }
 0xe92   :  { %v14930_v47 = vadd.f32 %v17250_v7, %v16423_v40  ;;  %v17274_v56 = vpop.f32.mrb[83].mxu1 }
 0xe94   :  { %v14970_v16 = vadd.f32 %v17272_v19, %v14930_v47 }
 0xe96   :  { %14975 = vst [vmem:[#allocation2] sm:$0x3] %v14970_v16 }
 0xe97   :  { %20441 = shalt.err (!%p20438_p4)
}
 0xe98   :  { %s20442_s6 = scalar_lea.hbm %s28266_s16, 32 }
 0xe99   :  { %p20443_p5 = scmp.ne.s32.totalorder %s28266_s16, %s20442_s6  ;;  %p20446_p6 = scmp.lt.u32.totalorder %s20442_s6, %s28266_s16 }
 0xe9b   :  { %p20448_p7 = pnand %p20446_p6, %p20443_p5 }
 0xe9d   :  { %20451 = shalt.err (!%p20448_p7)
}
 0xe9e   :  { %14985 = dma.vmem_to_hbm [thread:$0]  %s14983_s7, 32, %s28266_s16, [#allocation3]  }
 0xe9f   :  { %20452 = dma.done.wait [#allocation3], 32  }
 0xea0   :  { %20453 = vsyncadd [#allocation3], 4294967264 }
 0xea1   :  { %14989 = vsyncpa [#allocation3], 1 }

</bundles_post_ra>
